<compile_context>
chip_gen: v5e
topology: v5e:2x2
jax: 0.10.0
libtpu: 0.0.40
codegen_flags: <defaults>
</compile_context>

<pallas_src>
import jax
import jax.numpy as jnp
from jax.experimental import pallas as pl
from jax.experimental.pallas import tpu as pltpu


INPUT_DIMS = 20    # look_back in Trading_Environment_Basic
N_ACTIONS = 3      # env.action_space.n == spaces.Discrete(3)
HIDDEN = 512
PAD_OUT = 128      # lane-dense padded output width (>= N_ACTIONS, multiple of 128)
BATCH = 256        # vectorized-env style batch so the weight DMA is amortized
MAX_BLOCK_B = 1024 # batch-tile cap; multiple of 256 for the v6e/v7x MXU


def _round_up(x, m):
    return ((x + m - 1) // m) * m


def actor_kernel(x_ref,
                 w1_ref, b1_ref,
                 w2_ref, b2_ref,
                 w3_ref, b3_ref,
                 w4_ref, b4_ref,
                 out_ref):
    # Activations enter the MXU in bf16; accumulation, bias add, ReLU and
    # softmax are all f32 (v5e has no bf16 VPU/EUP path).
    x = x_ref[...]

    h = jnp.dot(x, w1_ref[...], preferred_element_type=jnp.float32) + b1_ref[...]
    h = jnp.maximum(h, 0.0).astype(jnp.bfloat16)

    h = jnp.dot(h, w2_ref[...], preferred_element_type=jnp.float32) + b2_ref[...]
    h = jnp.maximum(h, 0.0).astype(jnp.bfloat16)

    h = jnp.dot(h, w3_ref[...], preferred_element_type=jnp.float32) + b3_ref[...]
    h = jnp.maximum(h, 0.0).astype(jnp.bfloat16)

    # fc4 logits over the padded 128-wide output; pad lanes carry a -1e30 bias
    # (and exactly-zero weight columns) so they contribute ~0 to the softmax.
    logits = jnp.dot(h, w4_ref[...], preferred_element_type=jnp.float32) + b4_ref[...]

    # Numerically stable softmax (dim=-1), exact division so rows sum to 1.
    m = jnp.max(logits, axis=-1, keepdims=True)
    e = jnp.exp(logits - m)
    s = jnp.sum(e, axis=-1, keepdims=True)
    out_ref[...] = e / s


def actor_forward(x, kernel_params, n_actions, *, max_block_b=MAX_BLOCK_B):
    """x: [B, input_dims] (any float dtype). kernel_params: bf16 weights
    (fc4 padded to PAD_OUT), f32 biases. Returns f32 probs [B, n_actions]."""
    (w1, b1, w2, b2, w3, b3, w4, b4) = kernel_params
    B, in_dims = x.shape
    hidden = w1.shape[1]
    pad_out = w4.shape[1]

    # Whole batch as one grid step when it fits; otherwise 1024-row tiles
    # (multiple of 256 for the v6e/v7x MXU). Rows must be a multiple of 8.
    b8 = _round_up(B, 8)
    tb = b8 if b8 <= max_block_b else max_block_b
    b_pad = _round_up(B, tb)
    num_blocks = b_pad // tb
    grid = (num_blocks,)

    # bf16 x on the wrapper side: halves the x HBM bytes of this mem-bound
    # kernel and removes the in-kernel cast.
    x = x.astype(jnp.bfloat16)
    if b_pad != B:
        x = jnp.pad(x, ((0, b_pad - B), (0, 0)))

    batch_map = lambda i: (i, 0)
    const_map = lambda i: (0, 0)   # weights/biases: VMEM-resident, fetched once

    in_specs = [
        pl.BlockSpec((tb, in_dims), batch_map),
        pl.BlockSpec((in_dims, hidden), const_map),
        pl.BlockSpec((1, hidden), const_map),
        pl.BlockSpec((hidden, hidden), const_map),
        pl.BlockSpec((1, hidden), const_map),
        pl.BlockSpec((hidden, hidden), const_map),
        pl.BlockSpec((1, hidden), const_map),
        pl.BlockSpec((hidden, pad_out), const_map),
        pl.BlockSpec((1, pad_out), const_map),
    ]
    out_specs = pl.BlockSpec((tb, pad_out), batch_map)

    # Megacore sharding only when each block is a full >=1024-row tile;
    # otherwise a single TC avoids duplicating the weight DMA (v7x).
    dims_sem = ("parallel",) if num_blocks > 1 else ("arbitrary",)

    flops = 2 * b_pad * (in_dims * hidden + 2 * hidden * hidden + hidden * pad_out)
    transcendentals = b_pad * pad_out                      # exp
    bytes_accessed = int(
        sum(int(w.size) * w.dtype.itemsize for w in (w1, w2, w3, w4))
        + sum(int(b.size) * 4 for b in (b1, b2, b3, b4))
        + int(x.size) * 2 + b_pad * pad_out * 4)

    probs_padded = pl.pallas_call(
        actor_kernel,
        out_shape=jax.ShapeDtypeStruct((b_pad, pad_out), jnp.float32),
        grid=grid,
        in_specs=in_specs,
        out_specs=out_specs,
        compiler_params=pltpu.CompilerParams(dimension_semantics=dims_sem),
        cost_estimate=pl.CostEstimate(
            flops=flops,
            transcendentals=transcendentals,
            bytes_accessed=bytes_accessed),
    )(x, w1, b1, w2, b2, w3, b3, w4, b4)

    return probs_padded[:B, :n_actions]


def init_params(key, input_dims=INPUT_DIMS, hidden=HIDDEN, n_actions=N_ACTIONS):
    """f32 params mimicking PyTorch nn.Linear default U(-1/sqrt(fan_in), 1/sqrt(fan_in))."""
    dims = [(input_dims, hidden), (hidden, hidden), (hidden, hidden), (hidden, n_actions)]
    params = []
    for fan_in, fan_out in dims:
        key, kw, kb = jax.random.split(key, 3)
        bound = float(fan_in) ** -0.5
        w = jax.random.uniform(kw, (fan_in, fan_out), jnp.float32, -bound, bound)
        b = jax.random.uniform(kb, (1, fan_out), jnp.float32, -bound, bound)
        params += [w, b]
    return tuple(params)


def prepare_kernel_params(params, pad_out=PAD_OUT):
    """Cast weights to bf16, keep biases f32, pad fc4 to a lane-dense width.
    Invariant: pad columns of w4p are exactly 0 and pad bias is exactly -1e30
    (f32) so pad logits are exactly -1e30."""
    w1, b1, w2, b2, w3, b3, w4, b4 = params
    n_actions = w4.shape[1]
    w4p = jnp.zeros((w4.shape[0], pad_out), jnp.float32).at[:, :n_actions].set(w4)
    b4p = jnp.full((1, pad_out), -1e30, jnp.float32).at[:, :n_actions].set(b4)
    return (w1.astype(jnp.bfloat16), b1,
            w2.astype(jnp.bfloat16), b2,
            w3.astype(jnp.bfloat16), b3,
            w4p.astype(jnp.bfloat16), b4p)


def reference_forward(x, kernel_params, n_actions):
    """Plain-JAX reference replicating the bf16 compute path of the kernel."""
    w1, b1, w2, b2, w3, b3, w4, b4 = kernel_params
    h = x.astype(jnp.bfloat16)
    h = jnp.maximum(jnp.dot(h, w1, preferred_element_type=jnp.float32) + b1, 0.0)
    h = jnp.maximum(jnp.dot(h.astype(jnp.bfloat16), w2,
                            preferred_element_type=jnp.float32) + b2, 0.0)
    h = jnp.maximum(jnp.dot(h.astype(jnp.bfloat16), w3,
                            preferred_element_type=jnp.float32) + b3, 0.0)
    logits = jnp.dot(h.astype(jnp.bfloat16), w4,
                     preferred_element_type=jnp.float32) + b4
    return jax.nn.softmax(logits, axis=-1)[:, :n_actions]


if __name__ == "__main__":
    key = jax.random.PRNGKey(0)
    key, kx = jax.random.split(key)
    x = jax.random.normal(kx, (BATCH, INPUT_DIMS), jnp.float32)

    params = init_params(key)
    kparams = prepare_kernel_params(params)

    probs = actor_forward(x, kparams, N_ACTIONS)
    probs = jax.block_until_ready(probs)

    # sanity: shape and softmax rows sum to ~1 (exact division now)
    assert probs.shape == (BATCH, N_ACTIONS)
    assert bool(jnp.all(jnp.abs(jnp.sum(probs, axis=-1) - 1.0) < 1e-3))

    # reference check (same bf16 weight path, exact softmax)
    ref = reference_forward(x, kparams, N_ACTIONS)
    assert bool(jnp.all(jnp.abs(probs - ref) < 2e-3))

    print("KERNEL_OK")
</pallas_src>

<mosaic_0001>
module attributes {stable_mosaic.version = 11 : i64} {
  func.func @actor_kernel(%arg0: i32, %arg1: memref<256x20xbf16, #tpu.memory_space<vmem>>, %arg2: memref<20x512xbf16, #tpu.memory_space<vmem>>, %arg3: memref<1x512xf32, #tpu.memory_space<vmem>>, %arg4: memref<512x512xbf16, #tpu.memory_space<vmem>>, %arg5: memref<1x512xf32, #tpu.memory_space<vmem>>, %arg6: memref<512x512xbf16, #tpu.memory_space<vmem>>, %arg7: memref<1x512xf32, #tpu.memory_space<vmem>>, %arg8: memref<512x128xbf16, #tpu.memory_space<vmem>>, %arg9: memref<1x128xf32, #tpu.memory_space<vmem>>, %arg10: memref<256x128xf32, #tpu.memory_space<vmem>>) attributes {dimension_semantics = [#tpu.dimension_semantics<arbitrary>], iteration_bounds = array<i64: 1>, scalar_prefetch = 0 : i64, scratch_operands = 0 : i64, tpu.core_type = #tpu.core_type<tc>, window_params = [{transform_indices = @transform_0, window_bounds = array<i64: 256, 20>}, {pipeline_mode = #tpu.pipeline_mode<synchronous>, transform_indices = @transform_1, window_bounds = array<i64: 20, 512>}, {pipeline_mode = #tpu.pipeline_mode<synchronous>, transform_indices = @transform_2, window_bounds = array<i64: 1, 512>}, {pipeline_mode = #tpu.pipeline_mode<synchronous>, transform_indices = @transform_3, window_bounds = array<i64: 512, 512>}, {pipeline_mode = #tpu.pipeline_mode<synchronous>, transform_indices = @transform_4, window_bounds = array<i64: 1, 512>}, {pipeline_mode = #tpu.pipeline_mode<synchronous>, transform_indices = @transform_5, window_bounds = array<i64: 512, 512>}, {pipeline_mode = #tpu.pipeline_mode<synchronous>, transform_indices = @transform_6, window_bounds = array<i64: 1, 512>}, {pipeline_mode = #tpu.pipeline_mode<synchronous>, transform_indices = @transform_7, window_bounds = array<i64: 512, 128>}, {pipeline_mode = #tpu.pipeline_mode<synchronous>, transform_indices = @transform_8, window_bounds = array<i64: 1, 128>}, {transform_indices = @transform_9, window_bounds = array<i64: 256, 128>}]} {
    %c0 = arith.constant 0 : index
    %c0_0 = arith.constant 0 : index
    %0 = vector.load %arg1[%c0, %c0_0] : memref<256x20xbf16, #tpu.memory_space<vmem>>, vector<256x20xbf16>
    %c0_1 = arith.constant 0 : index
    %c0_2 = arith.constant 0 : index
    %1 = vector.load %arg2[%c0_1, %c0_2] : memref<20x512xbf16, #tpu.memory_space<vmem>>, vector<20x512xbf16>
    %cst = arith.constant dense<0.000000e+00> : vector<256x512xf32>
    %2 = tpu.matmul %0, %1, %cst {dimension_numbers = #tpu.dot_dimension_numbers<[1], [0], [0], [1], [0, 0, 1, 1], [], []>} : vector<256x20xbf16>, vector<20x512xbf16>, vector<256x512xf32> -> vector<256x512xf32>
    %c0_3 = arith.constant 0 : index
    %c0_4 = arith.constant 0 : index
    %3 = vector.load %arg3[%c0_3, %c0_4] : memref<1x512xf32, #tpu.memory_space<vmem>>, vector<1x512xf32>
    %4 = vector.broadcast %3 : vector<1x512xf32> to vector<256x512xf32>
    %5 = arith.addf %2, %4 : vector<256x512xf32>
    %cst_5 = arith.constant 0.000000e+00 : f32
    %6 = vector.broadcast %cst_5 : f32 to vector<256x512xf32>
    %7 = arith.maximumf %5, %6 : vector<256x512xf32>
    %8 = arith.truncf %7 : vector<256x512xf32> to vector<256x512xbf16>
    %c0_6 = arith.constant 0 : index
    %c0_7 = arith.constant 0 : index
    %9 = vector.load %arg4[%c0_6, %c0_7] : memref<512x512xbf16, #tpu.memory_space<vmem>>, vector<512x512xbf16>
    %cst_8 = arith.constant dense<0.000000e+00> : vector<256x512xf32>
    %10 = tpu.matmul %8, %9, %cst_8 {dimension_numbers = #tpu.dot_dimension_numbers<[1], [0], [0], [1], [0, 0, 1, 1], [], []>} : vector<256x512xbf16>, vector<512x512xbf16>, vector<256x512xf32> -> vector<256x512xf32>
    %c0_9 = arith.constant 0 : index
    %c0_10 = arith.constant 0 : index
    %11 = vector.load %arg5[%c0_9, %c0_10] : memref<1x512xf32, #tpu.memory_space<vmem>>, vector<1x512xf32>
    %12 = vector.broadcast %11 : vector<1x512xf32> to vector<256x512xf32>
    %13 = arith.addf %10, %12 : vector<256x512xf32>
    %cst_11 = arith.constant 0.000000e+00 : f32
    %14 = vector.broadcast %cst_11 : f32 to vector<256x512xf32>
    %15 = arith.maximumf %13, %14 : vector<256x512xf32>
    %16 = arith.truncf %15 : vector<256x512xf32> to vector<256x512xbf16>
    %c0_12 = arith.constant 0 : index
    %c0_13 = arith.constant 0 : index
    %17 = vector.load %arg6[%c0_12, %c0_13] : memref<512x512xbf16, #tpu.memory_space<vmem>>, vector<512x512xbf16>
    %cst_14 = arith.constant dense<0.000000e+00> : vector<256x512xf32>
    %18 = tpu.matmul %16, %17, %cst_14 {dimension_numbers = #tpu.dot_dimension_numbers<[1], [0], [0], [1], [0, 0, 1, 1], [], []>} : vector<256x512xbf16>, vector<512x512xbf16>, vector<256x512xf32> -> vector<256x512xf32>
    %c0_15 = arith.constant 0 : index
    %c0_16 = arith.constant 0 : index
    %19 = vector.load %arg7[%c0_15, %c0_16] : memref<1x512xf32, #tpu.memory_space<vmem>>, vector<1x512xf32>
    %20 = vector.broadcast %19 : vector<1x512xf32> to vector<256x512xf32>
    %21 = arith.addf %18, %20 : vector<256x512xf32>
    %cst_17 = arith.constant 0.000000e+00 : f32
    %22 = vector.broadcast %cst_17 : f32 to vector<256x512xf32>
    %23 = arith.maximumf %21, %22 : vector<256x512xf32>
    %24 = arith.truncf %23 : vector<256x512xf32> to vector<256x512xbf16>
    %c0_18 = arith.constant 0 : index
    %c0_19 = arith.constant 0 : index
    %25 = vector.load %arg8[%c0_18, %c0_19] : memref<512x128xbf16, #tpu.memory_space<vmem>>, vector<512x128xbf16>
    %cst_20 = arith.constant dense<0.000000e+00> : vector<256x128xf32>
    %26 = tpu.matmul %24, %25, %cst_20 {dimension_numbers = #tpu.dot_dimension_numbers<[1], [0], [0], [1], [0, 0, 1, 1], [], []>} : vector<256x512xbf16>, vector<512x128xbf16>, vector<256x128xf32> -> vector<256x128xf32>
    %c0_21 = arith.constant 0 : index
    %c0_22 = arith.constant 0 : index
    %27 = vector.load %arg9[%c0_21, %c0_22] : memref<1x128xf32, #tpu.memory_space<vmem>>, vector<1x128xf32>
    %28 = vector.broadcast %27 : vector<1x128xf32> to vector<256x128xf32>
    %29 = arith.addf %26, %28 : vector<256x128xf32>
    %cst_23 = arith.constant dense<0xFF800000> : vector<256xf32>
    %30 = vector.multi_reduction <maximumf>, %29, %cst_23 [1] : vector<256x128xf32> to vector<256xf32>
    %31 = vector.shape_cast %30 : vector<256xf32> to vector<256x1xf32>
    %32 = vector.broadcast %31 : vector<256x1xf32> to vector<256x128xf32>
    %33 = arith.subf %29, %32 : vector<256x128xf32>
    %34 = math.exp %33 : vector<256x128xf32>
    %cst_24 = arith.constant dense<0.000000e+00> : vector<256xf32>
    %35 = vector.multi_reduction <add>, %34, %cst_24 [1] : vector<256x128xf32> to vector<256xf32>
    %36 = vector.shape_cast %35 : vector<256xf32> to vector<256x1xf32>
    %37 = vector.broadcast %36 : vector<256x1xf32> to vector<256x128xf32>
    %38 = arith.divf %34, %37 : vector<256x128xf32>
    %c0_25 = arith.constant 0 : index
    %c0_26 = arith.constant 0 : index
    %39 = vector.load %arg10[%c0_25, %c0_26] : memref<256x128xf32, #tpu.memory_space<vmem>>, vector<256x128xf32>
    tpu.vector_store %arg10[%c0_25, %c0_26], %38 {strides = array<i32>} : memref<256x128xf32, #tpu.memory_space<vmem>>, vector<256x128xf32>,
    return
  }
  func.func @transform_0(%arg0: i32) -> (i32, i32) {
    %c0_i32 = arith.constant 0 : i32
    %c0_i32_0 = arith.constant 0 : i32
    return %arg0, %c0_i32 : i32, i32
  }
  func.func @transform_1(%arg0: i32) -> (i32, i32) {
    %c0_i32 = arith.constant 0 : i32
    %c0_i32_0 = arith.constant 0 : i32
    %c0_i32_1 = arith.constant 0 : i32
    return %c0_i32, %c0_i32_0 : i32, i32
  }
  func.func @transform_2(%arg0: i32) -> (i32, i32) {
    %c0_i32 = arith.constant 0 : i32
    %c0_i32_0 = arith.constant 0 : i32
    %c0_i32_1 = arith.constant 0 : i32
    return %c0_i32, %c0_i32_0 : i32, i32
  }
  func.func @transform_3(%arg0: i32) -> (i32, i32) {
    %c0_i32 = arith.constant 0 : i32
    %c0_i32_0 = arith.constant 0 : i32
    %c0_i32_1 = arith.constant 0 : i32
    return %c0_i32, %c0_i32_0 : i32, i32
  }
  func.func @transform_4(%arg0: i32) -> (i32, i32) {
    %c0_i32 = arith.constant 0 : i32
    %c0_i32_0 = arith.constant 0 : i32
    %c0_i32_1 = arith.constant 0 : i32
    return %c0_i32, %c0_i32_0 : i32, i32
  }
  func.func @transform_5(%arg0: i32) -> (i32, i32) {
    %c0_i32 = arith.constant 0 : i32
    %c0_i32_0 = arith.constant 0 : i32
    %c0_i32_1 = arith.constant 0 : i32
    return %c0_i32, %c0_i32_0 : i32, i32
  }
  func.func @transform_6(%arg0: i32) -> (i32, i32) {
    %c0_i32 = arith.constant 0 : i32
    %c0_i32_0 = arith.constant 0 : i32
    %c0_i32_1 = arith.constant 0 : i32
    return %c0_i32, %c0_i32_0 : i32, i32
  }
  func.func @transform_7(%arg0: i32) -> (i32, i32) {
    %c0_i32 = arith.constant 0 : i32
    %c0_i32_0 = arith.constant 0 : i32
    %c0_i32_1 = arith.constant 0 : i32
    return %c0_i32, %c0_i32_0 : i32, i32
  }
  func.func @transform_8(%arg0: i32) -> (i32, i32) {
    %c0_i32 = arith.constant 0 : i32
    %c0_i32_0 = arith.constant 0 : i32
    %c0_i32_1 = arith.constant 0 : i32
    return %c0_i32, %c0_i32_0 : i32, i32
  }
  func.func @transform_9(%arg0: i32) -> (i32, i32) {
    %c0_i32 = arith.constant 0 : i32
    %c0_i32_0 = arith.constant 0 : i32
    return %arg0, %c0_i32 : i32, i32
  }
}

</mosaic_0001>

<bundles_post_ra>
// kernel: tpu_custom_call.1
= control target key start
LH: loop header
LB: loop body
LE: loop exit
PB: predicated region body
PF: predicated region fallthrough
CT: control target
= control target key end

     0   :  { %14 = vsyncpa [#allocation3], 0  ;;  %s10780_s0 = inlined_call_operand.vmem [shape: bf16[256,20], index: 0, kind: input, shape index: {}]   ;;  %s10781_s1 = inlined_call_operand.vmem [shape: bf16[20,512], index: 1, kind: input, shape index: {}]   ;;  %s10782_s2 = inlined_call_operand.vmem [shape: f32[1,512], index: 2, kind: input, shape index: {}]   ;;  %s10783_s3 = inlined_call_operand.hbm [shape: bf16[512,512], index: 3, kind: input, shape index: {}]   ;;  %s10784_s4 = inlined_call_operand.vmem [shape: f32[1,512], index: 4, kind: input, shape index: {}]   ;;  %s10785_s5 = inlined_call_operand.hbm [shape: bf16[512,512], index: 5, kind: input, shape index: {}]   ;;  %s10786_s6 = inlined_call_operand.vmem [shape: f32[1,512], index: 6, kind: input, shape index: {}]   ;;  %s10787_s7 = inlined_call_operand.hbm [shape: bf16[512,128], index: 7, kind: input, shape index: {}]   ;;  %s10788_s8 = inlined_call_operand.vmem [shape: f32[1,128], index: 8, kind: input, shape index: {}]   ;;  %s10789_s9 = inlined_call_operand.hbm [shape: f32[256,128], index: 9, kind: output, shape index: {}]  }
   0x1   :  { %15 = vsyncpa [#allocation6], 0 }
   0x2   :  { %16 = vsyncpa [#allocation4], 0  ;;  %s42_s11 = sshll.u32 %s10785_s5, 4  ;;  %s8856_s12 = smov [#allocation5]   ;;  %s43_s11 = int_to_ptr.hbm [resolvable:$true] %s42_s11 }
   0x3   :  { %s44_s13 = sshll.u32 %s8856_s12, 4  ;;  %s27_s16 = sshll.u32 %s10783_s3, 4  ;;  %s45_s13 = int_to_ptr.vmem [resolvable:$true] %s44_s13  ;;  %s28_s16 = int_to_ptr.hbm [resolvable:$true] %s27_s16 }
   0x4   :  { %s8857_s17 = smov 256   ;;  %s8858_s18 = smov 16  }
   0x5   :  { %50 = dma.hbm_to_vmem [thread:$0]  %s43_s11, 16384, %s45_s13, [#allocation6], %s8857_s17, %s8857_s17, %s8858_s18  }
   0x6   :  { %s8859_s19 = smov [#allocation2]   ;;  %s57_s23 = sshll.u32 %s10787_s7, 4  ;;  %s58_s23 = int_to_ptr.hbm [resolvable:$true] %s57_s23 }
   0x7   :  { %s29_s20 = sshll.u32 %s8859_s19, 4  ;;  %s8860_s5 = smov [#allocation7]   ;;  %s30_s20 = int_to_ptr.vmem [resolvable:$true] %s29_s20 }
   0x8   :  { %35 = dma.hbm_to_vmem [thread:$0]  %s28_s16, 16384, %s30_s20, [#allocation3], %s8857_s17, %s8857_s17, %s8858_s18  }
   0x9   :  { %s59_s24 = sshll.u32 %s8860_s5, 4  ;;  %s8861_s25 = smov 64   ;;  %s60_s24 = int_to_ptr.vmem [resolvable:$true] %s59_s24 }
   0xa   :  { %s8862_s26 = smov 4  }
   0xb   :  { %65 = dma.hbm_to_vmem [thread:$0]  %s58_s23, 4096, %s60_s24, [#allocation6], %s8861_s25, %s8861_s25, %s8862_s26  }
   0xc   :  { %8850 = dma.done.wait [#allocation3], 16384  }
   0xd   :  { %8851 = vsyncadd [#allocation3], 4294950912 }
   0xe   :  { %8852 = dma.done.wait [#allocation6], 20480  }
   0xf   :  { %8853 = vsyncadd [#allocation6], 4294946816  ;;  %v117_v0 = vld [vmem:[%s10781_s1 + $0x20] sm:$0x33]  ;;  %vm288_vm0 = vcmask 1041408   ;;  %vm239_vm1 = vcmask 162816  }
  0x10   :  { %v118_v1 = vld [vmem:[%s10781_s1 + $0x28] sm:$0x33]  ;;  %v223_v2 = vunpack.c.l.b16 %v117_v0  ;;  %v224_v3 = vunpack.c.h.b16 %v117_v0  ;;  %v7075_v6 = vld [vmem:[%s10781_s1] sm:$0xf]  ;;  %v8323_v7 = vld [vmem:[%s10781_s1 + $0xc] sm:$0xf0] }
  0x11   :  { %v225_v4 = vunpack.c.l.b16 %v118_v1  ;;  %v226_v5 = vunpack.c.h.b16 %v118_v1  ;;  %v8321_v8 = vld [vmem:[%s10781_s1 + $0x4] sm:$0xf]  ;;  %v7077_v9 = vld [vmem:[%s10781_s1 + $0x10] sm:$0xf0]  ;;  %v7083_v10 = vld [vmem:[%s10781_s1 + $0x8] sm:$0xf]  ;;  %v7076_v26 = vor.u32 %v8323_v7, %v7075_v6 }
  0x12   :  { %v231_v11 = vpack.c.b16 %v223_v2, %v223_v2  ;;  %v232_v12 = vpack.c.b16 %v224_v3, %v224_v3  ;;  %v8324_v15 = vld [vmem:[%s10781_s1 + $0x14] sm:$0xf0]  ;;  %v8322_v16 = vld [vmem:[%s10781_s1 + $0xc] sm:$0xf]  ;;  %v7085_v17 = vld [vmem:[%s10781_s1 + $0x18] sm:$0xf0]  ;;  %v7080_v27 = vor.u32 %v8321_v8, %v7077_v9 }
  0x13   :  { %v233_v13 = vpack.c.b16 %v225_v4, %v225_v4  ;;  %v234_v14 = vpack.c.b16 %v226_v5, %v226_v5  ;;  %v7523_v18 = vld [vmem:[#allocation2 + $0x2e0] sm:$0xf]  ;;  %v8419_v19 = vld [vmem:[#allocation2 + $0x2ec] sm:$0xf0]  ;;  %v7084_v28 = vor.u32 %v8324_v15, %v7083_v10  ;;  %v7088_v29 = vor.u32 %v8322_v16, %v7085_v17  ;;  %v8306_v51 = vld [vmem:[%s10780_s0 + $0x8] sm:$0xff]  ;;  %s6995_s17 = sshll.u32 %s10789_s9, 4  ;;  %s6996_s17 = int_to_ptr.hbm [resolvable:$true] %s6995_s17 }
  0x14   :  { %v7267_v20 = vld [vmem:[#allocation2 + $0xe0] sm:$0xf]  ;;  %v290_v21 = vsel %vm288_vm0, %v231_v11, 0  ;;  %v293_v22 = vsel %vm288_vm0, %v232_v12, 0  ;;  %v8355_v25 = vld [vmem:[#allocation2 + $0xec] sm:$0xf0]  ;;  %v7524_v31 = vor.u32 %v8419_v19, %v7523_v18 }
  0x15   :  { %v296_v23 = vsel %vm288_vm0, %v233_v13, 0  ;;  %v299_v24 = vsel %vm288_vm0, %v234_v14, 0  ;;  %307 = vmatpush.bf16.msra.mxu0 %v290_v21  ;;  %396 = vmatpush.bf16.msra.mxu1 %v293_v22  ;;  %v7651_v30 = vld [vmem:[#allocation2 + $0x3e0] sm:$0xf]  ;;  %v7268_v32 = vor.u32 %v8355_v25, %v7267_v20  ;;  %v8451_v33 = vld [vmem:[#allocation2 + $0x3ec] sm:$0xf0] }
  0x16   :  { %485 = vmatpush.bf16.msra.mxu2 %v296_v23  ;;  %574 = vmatpush.bf16.msra.mxu3 %v299_v24  ;;  %v7395_v34 = vld [vmem:[#allocation2 + $0x1e0] sm:$0xf]  ;;  %v8387_v35 = vld [vmem:[#allocation2 + $0x1ec] sm:$0xf0]  ;;  %v7652_v37 = vor.u32 %v8451_v33, %v7651_v30  ;;  %v8308_v1 = vld [vmem:[%s10780_s0 + $0x18] sm:$0xff]  ;;  %s8864_s18 = smov 128  }
  0x17   :  { %v8305_v36 = vld [vmem:[%s10780_s0] sm:$0xff]  ;;  %v7396_v38 = vor.u32 %v8387_v35, %v7395_v34  ;;  %v8415_v40 = vld [vmem:[#allocation2 + $0x2cc] sm:$0xf0]  ;;  %v8310_v15 = vld [vmem:[%s10780_s0 + $0x28] sm:$0xff] }
  0x18   :  { %v7507_v39 = vld [vmem:[#allocation2 + $0x2c0] sm:$0xf]  ;;  %v8351_v43 = vld [vmem:[#allocation2 + $0xcc] sm:$0xf0] }
  0x19   :  { %308 = vmatpush.bf16.msra.mxu0 %v7076_v26  ;;  %397 = vmatpush.bf16.msra.mxu1 %v7080_v27  ;;  %v7251_v41 = vld [vmem:[#allocation2 + $0xc0] sm:$0xf]  ;;  %v7508_v42 = vor.u32 %v8415_v40, %v7507_v39  ;;  %v8447_v45 = vld [vmem:[#allocation2 + $0x3cc] sm:$0xf0] }
  0x1a   :  { %486 = vmatpush.bf16.msra.mxu2 %v7084_v28  ;;  %575 = vmatpush.bf16.msra.mxu3 %v7088_v29  ;;  %v7635_v44 = vld [vmem:[#allocation2 + $0x3c0] sm:$0xf]  ;;  %v7252_v46 = vor.u32 %v8351_v43, %v7251_v41  ;;  %v8383_v49 = vld [vmem:[#allocation2 + $0x1cc] sm:$0xf0]  ;;  %v8312_v29 = vld [vmem:[%s10780_s0 + $0x38] sm:$0xff] }
  0x1b   :  { %v7636_v47 = vor.u32 %v8447_v45, %v7635_v44  ;;  %v7379_v48 = vld [vmem:[#allocation2 + $0x1c0] sm:$0xf]  ;;  %v8307_v52 = vld [vmem:[%s10780_s0 + $0x10] sm:$0xff] }
  0x1c   :  { %7089 = vmatmul.msk.bf16.vlgmr.msra.gmra.mxu0 %vm239_vm1, %v8305_v36  ;;  %7105 = vmatmul.msk.bf16.vlgmr.msra.gmra.mxu1 %vm239_vm1, %v8305_v36  ;;  %v7380_v50 = vor.u32 %v8383_v49, %v7379_v48  ;;  %v7491_v53 = vld [vmem:[#allocation2 + $0x2a0] sm:$0xf]  ;;  %v8411_v54 = vld [vmem:[#allocation2 + $0x2ac] sm:$0xf0] }
  0x1d   :  { %1627 = vmatpush.bf16.msrb.mxu0 %v7268_v32  ;;  %7121 = vmatmul.msk.bf16.vlgmr.msra.gmra.mxu2 %vm239_vm1, %v8305_v36  ;;  %v7235_v55 = vld [vmem:[#allocation2 + $0xa0] sm:$0xf]  ;;  %v7492_v56 = vor.u32 %v8411_v54, %v7491_v53  ;;  %v8347_v57 = vld [vmem:[#allocation2 + $0xac] sm:$0xf0] }
  0x1e   :  { %1805 = vmatpush.bf16.msrb.mxu2 %v7524_v31  ;;  %7137 = vmatmul.msk.bf16.vlgmr.msra.gmra.mxu3 %vm239_vm1, %v8305_v36  ;;  %v7619_v58 = vld [vmem:[#allocation2 + $0x3a0] sm:$0xf]  ;;  %v8443_v59 = vld [vmem:[#allocation2 + $0x3ac] sm:$0xf0]  ;;  %v7236_v60 = vor.u32 %v8347_v57, %v7235_v55 }
  0x1f   :  { %1894 = vmatpush.bf16.msrb.mxu3 %v7652_v37  ;;  %1716 = vmatpush.bf16.msrb.mxu1 %v7396_v38  ;;  %v7620_v61 = vor.u32 %v8443_v59, %v7619_v58  ;;  %v7363_v62 = vld [vmem:[#allocation2 + $0x1a0] sm:$0xf]  ;;  %v8379_v63 = vld [vmem:[#allocation2 + $0x1ac] sm:$0xf0] }
  0x20   :  { %v7364_v0 = vor.u32 %v8379_v63, %v7363_v62  ;;  %v8309_v2 = vld [vmem:[%s10780_s0 + $0x20] sm:$0xff]  ;;  %v8407_v4 = vld [vmem:[#allocation2 + $0x28c] sm:$0xf0] }
  0x21   :  { %1628 = vmatpush.bf16.msrb.mxu0 %v7252_v46  ;;  %v7475_v3 = vld [vmem:[#allocation2 + $0x280] sm:$0xf]  ;;  %v8343_v7 = vld [vmem:[#allocation2 + $0x8c] sm:$0xf0] }
  0x22   :  { %1806 = vmatpush.bf16.msrb.mxu2 %v7508_v42  ;;  %v7219_v5 = vld [vmem:[#allocation2 + $0x80] sm:$0xf]  ;;  %v7476_v6 = vor.u32 %v8407_v4, %v7475_v3  ;;  %v8439_v9 = vld [vmem:[#allocation2 + $0x38c] sm:$0xf0]  ;;  %v8314_v4 = vld [vmem:[%s10780_s0 + $0x48] sm:$0xff] }
  0x23   :  { %1895 = vmatpush.bf16.msrb.mxu3 %v7636_v47  ;;  %1717 = vmatpush.bf16.msrb.mxu1 %v7380_v50  ;;  %v7603_v8 = vld [vmem:[#allocation2 + $0x380] sm:$0xf]  ;;  %v7220_v10 = vor.u32 %v8343_v7, %v7219_v5  ;;  %v8375_v13 = vld [vmem:[#allocation2 + $0x18c] sm:$0xf0] }
  0x24   :  { %v7604_v11 = vor.u32 %v8439_v9, %v7603_v8  ;;  %v7347_v12 = vld [vmem:[#allocation2 + $0x180] sm:$0xf]  ;;  %v8311_v16 = vld [vmem:[%s10780_s0 + $0x30] sm:$0xff] }
  0x25   :  { %1629 = vmatpush.bf16.msrb.mxu0 %v7236_v60  ;;  %v7348_v14 = vor.u32 %v8375_v13, %v7347_v12  ;;  %v7459_v17 = vld [vmem:[#allocation2 + $0x260] sm:$0xf]  ;;  %v8403_v18 = vld [vmem:[#allocation2 + $0x26c] sm:$0xf0] }
  0x26   :  { %1807 = vmatpush.bf16.msrb.mxu2 %v7492_v56  ;;  %v7203_v19 = vld [vmem:[#allocation2 + $0x60] sm:$0xf]  ;;  %v7460_v20 = vor.u32 %v8403_v18, %v7459_v17  ;;  %v8339_v21 = vld [vmem:[#allocation2 + $0x6c] sm:$0xf0] }
  0x27   :  { %1896 = vmatpush.bf16.msrb.mxu3 %v7620_v61  ;;  %1718 = vmatpush.bf16.msrb.mxu1 %v7364_v0  ;;  %v7587_v22 = vld [vmem:[#allocation2 + $0x360] sm:$0xf]  ;;  %v8435_v23 = vld [vmem:[#allocation2 + $0x36c] sm:$0xf0]  ;;  %v7204_v24 = vor.u32 %v8339_v21, %v7203_v19 }
  0x28   :  { %v7588_v25 = vor.u32 %v8435_v23, %v7587_v22  ;;  %v7331_v26 = vld [vmem:[#allocation2 + $0x160] sm:$0xf]  ;;  %v8371_v27 = vld [vmem:[#allocation2 + $0x16c] sm:$0xf0] }
  0x29   :  { %1630 = vmatpush.bf16.msrb.mxu0 %v7220_v10  ;;  %v7332_v28 = vor.u32 %v8371_v27, %v7331_v26  ;;  %v119_v30 = vld [vmem:[%s10782_s2] sm:$0xf]  ;;  %v8399_v37 = vld [vmem:[#allocation2 + $0x24c] sm:$0xf0]  ;;  %s8865_s2 = smov 8  }
  0x2a   :  { %1808 = vmatpush.bf16.msrb.mxu2 %v7476_v6  ;;  %v8313_v31 = vld [vmem:[%s10780_s0 + $0x40] sm:$0xff]  ;;  %v9021_v34 = vperm.slane %v119_v30, 0  ;;  %v9023_v35 = vperm.slane %v119_v30, 1  ;;  %v8335_v40 = vld [vmem:[#allocation2 + $0x4c] sm:$0xf0]  ;;  %v9035_v55 = vperm.slane %v119_v30, 3 }
  0x2b   :  { %1897 = vmatpush.bf16.msrb.mxu3 %v7604_v11  ;;  %1719 = vmatpush.bf16.msrb.mxu1 %v7348_v14  ;;  %v7443_v36 = vld [vmem:[#allocation2 + $0x240] sm:$0xf]  ;;  %v8431_v42 = vld [vmem:[#allocation2 + $0x34c] sm:$0xf0] }
  0x2c   :  { %7090 = vmatmul.msk.bf16.gmra.mxu0 %vm239_vm1, %v8306_v51  ;;  %7106 = vmatmul.msk.bf16.gmra.mxu1 %vm239_vm1, %v8306_v51  ;;  %v7187_v38 = vld [vmem:[#allocation2 + $0x40] sm:$0xf]  ;;  %v7444_v39 = vor.u32 %v8399_v37, %v7443_v36  ;;  %v8367_v57 = vld [vmem:[#allocation2 + $0x14c] sm:$0xf0] }
  0x2d   :  { %7122 = vmatmul.msk.bf16.gmra.mxu2 %vm239_vm1, %v8306_v51  ;;  %1631 = vmatpush.bf16.msrb.mxu0 %v7204_v24  ;;  %v7571_v41 = vld [vmem:[#allocation2 + $0x340] sm:$0xf]  ;;  %v7188_v44 = vor.u32 %v8335_v40, %v7187_v38 }
  0x2e   :  { %7138 = vmatmul.msk.bf16.gmra.mxu3 %vm239_vm1, %v8306_v51  ;;  %1809 = vmatpush.bf16.msrb.mxu2 %v7460_v20  ;;  %v7572_v45 = vor.u32 %v8431_v42, %v7571_v41  ;;  %v9031_v51 = vperm.slane %v119_v30, 2  ;;  %v7315_v56 = vld [vmem:[#allocation2 + $0x140] sm:$0xf] }
  0x2f   :  { %1898 = vmatpush.bf16.msrb.mxu3 %v7588_v25  ;;  %1720 = vmatpush.bf16.msrb.mxu1 %v7332_v28  ;;  %v7316_v61 = vor.u32 %v8367_v57, %v7315_v56 }
  0x31   :  { %1632 = vmatpush.bf16.msrb.mxu0 %v7188_v44 }
  0x32   :  { %1810 = vmatpush.bf16.msrb.mxu2 %v7444_v39 }
  0x33   :  { %1899 = vmatpush.bf16.msrb.mxu3 %v7572_v45  ;;  %1721 = vmatpush.bf16.msrb.mxu1 %v7316_v61 }
  0x3c   :  { %7091 = vmatmul.msk.bf16.gmra.mxu0 %vm239_vm1, %v8307_v52  ;;  %7107 = vmatmul.msk.bf16.gmra.mxu1 %vm239_vm1, %v8307_v52 }
  0x3d   :  { %7123 = vmatmul.msk.bf16.gmra.mxu2 %vm239_vm1, %v8307_v52 }
  0x3e   :  { %7139 = vmatmul.msk.bf16.gmra.mxu3 %vm239_vm1, %v8307_v52 }
  0x4c   :  { %7092 = vmatmul.msk.bf16.gmra.mxu0 %vm239_vm1, %v8308_v1  ;;  %7108 = vmatmul.msk.bf16.gmra.mxu1 %vm239_vm1, %v8308_v1 }
  0x4d   :  { %7124 = vmatmul.msk.bf16.gmra.mxu2 %vm239_vm1, %v8308_v1 }
  0x4e   :  { %7140 = vmatmul.msk.bf16.gmra.mxu3 %vm239_vm1, %v8308_v1 }
  0x5c   :  { %7093 = vmatmul.msk.bf16.gmra.mxu0 %vm239_vm1, %v8309_v2  ;;  %7109 = vmatmul.msk.bf16.gmra.mxu1 %vm239_vm1, %v8309_v2 }
  0x5d   :  { %7125 = vmatmul.msk.bf16.gmra.mxu2 %vm239_vm1, %v8309_v2 }
  0x5e   :  { %7141 = vmatmul.msk.bf16.gmra.mxu3 %vm239_vm1, %v8309_v2 }
  0x6c   :  { %7094 = vmatmul.msk.bf16.gmra.mxu0 %vm239_vm1, %v8310_v15  ;;  %7110 = vmatmul.msk.bf16.gmra.mxu1 %vm239_vm1, %v8310_v15 }
  0x6d   :  { %7126 = vmatmul.msk.bf16.gmra.mxu2 %vm239_vm1, %v8310_v15 }
  0x6e   :  { %7142 = vmatmul.msk.bf16.gmra.mxu3 %vm239_vm1, %v8310_v15 }
  0x7c   :  { %7095 = vmatmul.msk.bf16.gmra.mxu0 %vm239_vm1, %v8311_v16  ;;  %7111 = vmatmul.msk.bf16.gmra.mxu1 %vm239_vm1, %v8311_v16 }
  0x7d   :  { %7127 = vmatmul.msk.bf16.gmra.mxu2 %vm239_vm1, %v8311_v16 }
  0x7e   :  { %7143 = vmatmul.msk.bf16.gmra.mxu3 %vm239_vm1, %v8311_v16 }
  0x8c   :  { %7096 = vmatmul.msk.bf16.gmra.mxu0 %vm239_vm1, %v8312_v29  ;;  %7112 = vmatmul.msk.bf16.gmra.mxu1 %vm239_vm1, %v8312_v29 }
  0x8d   :  { %7128 = vmatmul.msk.bf16.gmra.mxu2 %vm239_vm1, %v8312_v29 }
  0x8e   :  { %7144 = vmatmul.msk.bf16.gmra.mxu3 %vm239_vm1, %v8312_v29 }
  0x99   :  { %v310_v32 = vpop.f32.mrf.mxu0  ;;  %v399_v33 = vpop.f32.mrf.mxu1 }
  0x9a   :  { %v311_v43 = vadd.f32 %v310_v32, %v9021_v34  ;;  %v400_v46 = vadd.f32 %v399_v33, %v9023_v35  ;;  %v8315_v33 = vld [vmem:[%s10780_s0 + $0x50] sm:$0xff] }
  0x9c   :  { %7097 = vmatmul.msk.bf16.gmra.mxu0 %vm239_vm1, %v8313_v31  ;;  %7113 = vmatmul.msk.bf16.gmra.mxu1 %vm239_vm1, %v8313_v31  ;;  %v657_v54 = vmax.f32 %v311_v43, 0.0  ;;  %v658_v58 = vmax.f32 %v400_v46, 0.0  ;;  %v7427_v46 = vld [vmem:[#allocation2 + $0x220] sm:$0xf] }
  0x9d   :  { %7129 = vmatmul.msk.bf16.gmra.mxu2 %vm239_vm1, %v8313_v31 }
  0x9e   :  { %7145 = vmatmul.msk.bf16.gmra.mxu3 %vm239_vm1, %v8313_v31 }
  0xa0   :  { %v488_v47 = vpop.f32.mrf.mxu2 }
  0xa1   :  { %v577_v48 = vpop.f32.mrf.mxu3  ;;  %v312_v49 = vpop.f32.mrf.mxu0  ;;  %v489_v0 = vadd.f32 %v488_v47, %v9031_v51  ;;  %v8395_v47 = vld [vmem:[#allocation2 + $0x22c] sm:$0xf0] }
  0xa2   :  { %v401_v50 = vpop.f32.mrf.mxu1  ;;  %v313_v52 = vadd.f32 %v312_v49, %v9021_v34  ;;  %v578_v1 = vadd.f32 %v577_v48, %v9035_v55  ;;  %v7171_v48 = vld [vmem:[#allocation2 + $0x20] sm:$0xf]  ;;  %v7428_v49 = vor.u32 %v8395_v47, %v7427_v46 }
  0xa3   :  { %v402_v53 = vadd.f32 %v401_v50, %v9023_v35  ;;  %v659_v9 = vmax.f32 %v489_v0, 0.0  ;;  %v8331_v50 = vld [vmem:[#allocation2 + $0x2c] sm:$0xf0] }
  0xa4   :  { %v661_v59 = vmax.f32 %v313_v52, 0.0  ;;  %v660_v10 = vmax.f32 %v578_v1, 0.0  ;;  %v7555_v52 = vld [vmem:[#allocation2 + $0x320] sm:$0xf]  ;;  %v7172_v56 = vor.u32 %v8331_v50, %v7171_v48  ;;  %1811 = vmatpush.bf16.msrb.mxu2 %v7428_v49 }
  0xa5   :  { %v662_v60 = vmax.f32 %v402_v53, 0.0  ;;  %v8427_v53 = vld [vmem:[#allocation2 + $0x32c] sm:$0xf0] }
  0xa6   :  { %v9037_v62 = vpack.c.bf16 %v661_v59, %v657_v54  ;;  %v7556_v57 = vor.u32 %v8427_v53, %v7555_v52  ;;  %1633 = vmatpush.bf16.msrb.mxu0 %v7172_v56 }
  0xa7   :  { %v9039_v63 = vpack.c.bf16 %v662_v60, %v658_v58 }
  0xa8   :  { %v490_v2 = vpop.f32.mrf.mxu2  ;;  %1900 = vmatpush.bf16.msrb.mxu3 %v7556_v57 }
  0xa9   :  { %v579_v3 = vpop.f32.mrf.mxu3  ;;  %v491_v5 = vadd.f32 %v490_v2, %v9031_v51  ;;  %v315_v7 = vpop.f32.mrf.mxu0 }
  0xaa   :  { %v580_v6 = vadd.f32 %v579_v3, %v9035_v55  ;;  %v404_v8 = vpop.f32.mrf.mxu1  ;;  %v316_v15 = vadd.f32 %v315_v7, %v9021_v34 }
  0xab   :  { %v663_v11 = vmax.f32 %v491_v5, 0.0  ;;  %v405_v16 = vadd.f32 %v404_v8, %v9023_v35  ;;  %v8363_v5 = vld [vmem:[#allocation2 + $0x12c] sm:$0xf0] }
  0xac   :  { %v664_v12 = vmax.f32 %v580_v6, 0.0  ;;  %7098 = vmatmul.msk.bf16.gmra.mxu0 %vm239_vm1, %v8314_v4  ;;  %7114 = vmatmul.msk.bf16.gmra.mxu1 %vm239_vm1, %v8314_v4  ;;  %v665_v23 = vmax.f32 %v316_v15, 0.0 }
  0xad   :  { %v9050_v13 = vpack.c.bf16 %v663_v11, %v659_v9  ;;  %7130 = vmatmul.msk.bf16.gmra.mxu2 %vm239_vm1, %v8314_v4  ;;  %v666_v24 = vmax.f32 %v405_v16, 0.0 }
  0xae   :  { %v9052_v14 = vpack.c.bf16 %v664_v12, %v660_v10  ;;  %7146 = vmatmul.msk.bf16.gmra.mxu3 %vm239_vm1, %v8314_v4  ;;  %v7299_v4 = vld [vmem:[#allocation2 + $0x120] sm:$0xf] }
  0xaf   :  { %v7300_v9 = vor.u32 %v8363_v5, %v7299_v4  ;;  %v7411_v4 = vld [vmem:[#allocation2 + $0x200] sm:$0xf]  ;;  %v8391_v5 = vld [vmem:[#allocation2 + $0x20c] sm:$0xf0] }
  0xb0   :  { %v493_v17 = vpop.f32.mrf.mxu2 }
  0xb1   :  { %v582_v18 = vpop.f32.mrf.mxu3  ;;  %v317_v19 = vpop.f32.mrf.mxu0  ;;  %v494_v29 = vadd.f32 %v493_v17, %v9031_v51  ;;  %1722 = vmatpush.bf16.msrb.mxu1 %v7300_v9  ;;  %v7539_v9 = vld [vmem:[#allocation2 + $0x300] sm:$0xf] }
  0xb2   :  { %v406_v20 = vpop.f32.mrf.mxu1  ;;  %v318_v21 = vadd.f32 %v317_v19, %v9021_v34  ;;  %v583_v30 = vadd.f32 %v582_v18, %v9035_v55  ;;  %v8316_v18 = vld [vmem:[%s10780_s0 + $0x58] sm:$0xff] }
  0xb3   :  { %v407_v22 = vadd.f32 %v406_v20, %v9023_v35  ;;  %v667_v40 = vmax.f32 %v494_v29, 0.0 }
  0xb4   :  { %v669_v25 = vmax.f32 %v318_v21, 0.0  ;;  %v668_v41 = vmax.f32 %v583_v30, 0.0 }
  0xb5   :  { %v670_v26 = vmax.f32 %v407_v22, 0.0 }
  0xb6   :  { %v9060_v27 = vpack.c.bf16 %v669_v25, %v665_v23 }
  0xb7   :  { %v9062_v28 = vpack.c.bf16 %v670_v26, %v666_v24 }
  0xb8   :  { %v495_v31 = vpop.f32.mrf.mxu2 }
  0xb9   :  { %v584_v32 = vpop.f32.mrf.mxu3  ;;  %v496_v36 = vadd.f32 %v495_v31, %v9031_v51  ;;  %v320_v38 = vpop.f32.mrf.mxu0 }
  0xba   :  { %v585_v37 = vadd.f32 %v584_v32, %v9035_v55  ;;  %v409_v39 = vpop.f32.mrf.mxu1  ;;  %v321_v54 = vadd.f32 %v320_v38, %v9021_v34 }
  0xbb   :  { %v671_v42 = vmax.f32 %v496_v36, 0.0  ;;  %v410_v58 = vadd.f32 %v409_v39, %v9023_v35 }
  0xbc   :  { %v672_v43 = vmax.f32 %v585_v37, 0.0  ;;  %7099 = vmatmul.msk.bf16.gmra.mxu0 %vm239_vm1, %v8315_v33  ;;  %7115 = vmatmul.msk.bf16.gmra.mxu1 %vm239_vm1, %v8315_v33  ;;  %v673_v3 = vmax.f32 %v321_v54, 0.0  ;;  %v8317_v54 = vld [vmem:[%s10780_s0 + $0x60] sm:$0xff] }
  0xbd   :  { %v9073_v44 = vpack.c.bf16 %v671_v42, %v667_v40  ;;  %7131 = vmatmul.msk.bf16.gmra.mxu2 %vm239_vm1, %v8315_v33  ;;  %v674_v6 = vmax.f32 %v410_v58, 0.0 }
  0xbe   :  { %v9075_v45 = vpack.c.bf16 %v672_v43, %v668_v41  ;;  %7147 = vmatmul.msk.bf16.gmra.mxu3 %vm239_vm1, %v8315_v33 }
  0xc0   :  { %v498_v59 = vpop.f32.mrf.mxu2 }
  0xc1   :  { %v587_v60 = vpop.f32.mrf.mxu3  ;;  %v322_v61 = vpop.f32.mrf.mxu0  ;;  %v499_v12 = vadd.f32 %v498_v59, %v9031_v51 }
  0xc2   :  { %v411_v0 = vpop.f32.mrf.mxu1  ;;  %v323_v1 = vadd.f32 %v322_v61, %v9021_v34  ;;  %v588_v15 = vadd.f32 %v587_v60, %v9035_v55 }
  0xc3   :  { %v412_v2 = vadd.f32 %v411_v0, %v9023_v35  ;;  %v675_v23 = vmax.f32 %v499_v12, 0.0  ;;  %v8423_v12 = vld [vmem:[#allocation2 + $0x30c] sm:$0xf0] }
  0xc4   :  { %v677_v7 = vmax.f32 %v323_v1, 0.0  ;;  %v676_v24 = vmax.f32 %v588_v15, 0.0 }
  0xc5   :  { %v678_v8 = vmax.f32 %v412_v2, 0.0 }
  0xc6   :  { %v9083_v10 = vpack.c.bf16 %v677_v7, %v673_v3  ;;  %v7412_v7 = vor.u32 %v8391_v5, %v7411_v4 }
  0xc7   :  { %v9085_v11 = vpack.c.bf16 %v678_v8, %v674_v6  ;;  %v7155_v6 = vld [vmem:[#allocation2] sm:$0xf]  ;;  %v8327_v8 = vld [vmem:[#allocation2 + $0xc] sm:$0xf0] }
  0xc8   :  { %v500_v16 = vpop.f32.mrf.mxu2  ;;  %1812 = vmatpush.bf16.msrb.mxu2 %v7412_v7 }
  0xc9   :  { %v589_v17 = vpop.f32.mrf.mxu3  ;;  %v501_v19 = vadd.f32 %v500_v16, %v9031_v51  ;;  %v325_v21 = vpop.f32.mrf.mxu0  ;;  %v7156_v16 = vor.u32 %v8327_v8, %v7155_v6 }
  0xca   :  { %v590_v20 = vadd.f32 %v589_v17, %v9035_v55  ;;  %v414_v22 = vpop.f32.mrf.mxu1  ;;  %v326_v31 = vadd.f32 %v325_v21, %v9021_v34  ;;  %v7540_v17 = vor.u32 %v8423_v12, %v7539_v9 }
  0xcb   :  { %v679_v25 = vmax.f32 %v501_v19, 0.0  ;;  %v415_v32 = vadd.f32 %v414_v22, %v9023_v35  ;;  %1634 = vmatpush.bf16.msrb.mxu0 %v7156_v16 }
  0xcc   :  { %v680_v26 = vmax.f32 %v590_v20, 0.0  ;;  %7100 = vmatmul.msk.bf16.gmra.mxu0 %vm239_vm1, %v8316_v18  ;;  %7116 = vmatmul.msk.bf16.gmra.mxu1 %vm239_vm1, %v8316_v18  ;;  %v681_v41 = vmax.f32 %v326_v31, 0.0  ;;  %v8359_v31 = vld [vmem:[#allocation2 + $0x10c] sm:$0xf0] }
  0xcd   :  { %v9096_v29 = vpack.c.bf16 %v679_v25, %v675_v23  ;;  %7132 = vmatmul.msk.bf16.gmra.mxu2 %vm239_vm1, %v8316_v18  ;;  %v682_v42 = vmax.f32 %v415_v32, 0.0  ;;  %1901 = vmatpush.bf16.msrb.mxu3 %v7540_v17 }
  0xce   :  { %v9098_v30 = vpack.c.bf16 %v680_v26, %v676_v24  ;;  %7148 = vmatmul.msk.bf16.gmra.mxu3 %vm239_vm1, %v8316_v18  ;;  %v7283_v26 = vld [vmem:[#allocation2 + $0x100] sm:$0xf] }
  0xd0   :  { %10905 = vst [vmem:[#allocation12_spill] sm:$0xff] %v9098_v30  ;;  %v503_v33 = vpop.f32.mrf.mxu2 }
  0xd1   :  { %v592_v36 = vpop.f32.mrf.mxu3  ;;  %v327_v37 = vpop.f32.mrf.mxu0  ;;  %v504_v49 = vadd.f32 %v503_v33, %v9031_v51 }
  0xd2   :  { %v416_v38 = vpop.f32.mrf.mxu1  ;;  %v328_v39 = vadd.f32 %v327_v37, %v9021_v34  ;;  %v593_v50 = vadd.f32 %v592_v36, %v9035_v55  ;;  %v7284_v37 = vor.u32 %v8359_v31, %v7283_v26 }
  0xd3   :  { %v417_v40 = vadd.f32 %v416_v38, %v9023_v35  ;;  %v683_v60 = vmax.f32 %v504_v49, 0.0 }
  0xd4   :  { %v685_v43 = vmax.f32 %v328_v39, 0.0  ;;  %v684_v61 = vmax.f32 %v593_v50, 0.0  ;;  %1723 = vmatpush.bf16.msrb.mxu1 %v7284_v37 }
  0xd5   :  { %v686_v46 = vmax.f32 %v417_v40, 0.0 }
  0xd6   :  { %v9106_v47 = vpack.c.bf16 %v685_v43, %v681_v41 }
  0xd7   :  { %v9108_v48 = vpack.c.bf16 %v686_v46, %v682_v42  ;;  %v8318_v46 = vld [vmem:[%s10780_s0 + $0x68] sm:$0xff] }
  0xd8   :  { %10906 = vst [vmem:[#allocation13_spill] sm:$0xff] %v9106_v47  ;;  %v505_v52 = vpop.f32.mrf.mxu2 }
  0xd9   :  { %10907 = vst [vmem:[#allocation14_spill] sm:$0xff] %v9108_v48  ;;  %v594_v53 = vpop.f32.mrf.mxu3  ;;  %v506_v56 = vadd.f32 %v505_v52, %v9031_v51  ;;  %v330_v58 = vpop.f32.mrf.mxu0 }
  0xda   :  { %v595_v57 = vadd.f32 %v594_v53, %v9035_v55  ;;  %v419_v59 = vpop.f32.mrf.mxu1  ;;  %v331_v15 = vadd.f32 %v330_v58, %v9021_v34 }
  0xdb   :  { %v687_v0 = vmax.f32 %v506_v56, 0.0  ;;  %v420_v18 = vadd.f32 %v419_v59, %v9023_v35 }
  0xdc   :  { %v688_v1 = vmax.f32 %v595_v57, 0.0  ;;  %7101 = vmatmul.msk.bf16.gmra.mxu0 %vm239_vm1, %v8317_v54  ;;  %7117 = vmatmul.msk.bf16.gmra.mxu1 %vm239_vm1, %v8317_v54  ;;  %v689_v25 = vmax.f32 %v331_v15, 0.0 }
  0xdd   :  { %v9119_v2 = vpack.c.bf16 %v687_v0, %v683_v60  ;;  %7133 = vmatmul.msk.bf16.gmra.mxu2 %vm239_vm1, %v8317_v54  ;;  %v690_v32 = vmax.f32 %v420_v18, 0.0 }
  0xde   :  { %v9121_v3 = vpack.c.bf16 %v688_v1, %v684_v61  ;;  %7149 = vmatmul.msk.bf16.gmra.mxu3 %vm239_vm1, %v8317_v54 }
  0xdf   :  { %10908 = vst [vmem:[#allocation15_spill] sm:$0xff] %v9119_v2 }
  0xe0   :  { %10909 = vst [vmem:[#allocation16_spill] sm:$0xff] %v9121_v3  ;;  %v508_v19 = vpop.f32.mrf.mxu2 }
  0xe1   :  { %v597_v20 = vpop.f32.mrf.mxu3  ;;  %v332_v21 = vpop.f32.mrf.mxu0  ;;  %v509_v40 = vadd.f32 %v508_v19, %v9031_v51 }
  0xe2   :  { %v421_v22 = vpop.f32.mrf.mxu1  ;;  %v333_v23 = vadd.f32 %v332_v21, %v9021_v34  ;;  %v598_v41 = vadd.f32 %v597_v20, %v9035_v55 }
  0xe3   :  { %v422_v24 = vadd.f32 %v421_v22, %v9023_v35  ;;  %v691_v54 = vmax.f32 %v509_v40, 0.0 }
  0xe4   :  { %v693_v33 = vmax.f32 %v333_v23, 0.0  ;;  %v692_v56 = vmax.f32 %v598_v41, 0.0  ;;  %v8319_v23 = vld [vmem:[%s10780_s0 + $0x70] sm:$0xff] }
  0xe5   :  { %v694_v36 = vmax.f32 %v422_v24, 0.0 }
  0xe6   :  { %v9129_v38 = vpack.c.bf16 %v693_v33, %v689_v25 }
  0xe7   :  { %v9131_v39 = vpack.c.bf16 %v694_v36, %v690_v32 }
  0xe8   :  { %10910 = vst [vmem:[#allocation17_spill] sm:$0xff] %v9129_v38  ;;  %v510_v42 = vpop.f32.mrf.mxu2 }
  0xe9   :  { %10911 = vst [vmem:[#allocation18_spill] sm:$0xff] %v9131_v39  ;;  %v599_v43 = vpop.f32.mrf.mxu3  ;;  %v511_v49 = vadd.f32 %v510_v42, %v9031_v51  ;;  %v335_v52 = vpop.f32.mrf.mxu0  ;;  %v8417_v42 = vld [vmem:[#allocation2 + $0x2e4] sm:$0xf] }
  0xea   :  { %v600_v50 = vadd.f32 %v599_v43, %v9035_v55  ;;  %v424_v53 = vpop.f32.mrf.mxu1  ;;  %v336_v61 = vadd.f32 %v335_v52, %v9021_v34  ;;  %v7525_v43 = vld [vmem:[#allocation2 + $0x2f0] sm:$0xf0]  ;;  %v8449_v52 = vld [vmem:[#allocation2 + $0x3e4] sm:$0xf] }
  0xeb   :  { %v695_v57 = vmax.f32 %v511_v49, 0.0  ;;  %v425_v0 = vadd.f32 %v424_v53, %v9023_v35  ;;  %v7528_v49 = vor.u32 %v8417_v42, %v7525_v43  ;;  %v7653_v53 = vld [vmem:[#allocation2 + $0x3f0] sm:$0xf0] }
  0xec   :  { %v696_v58 = vmax.f32 %v600_v50, 0.0  ;;  %7102 = vmatmul.msk.bf16.gmra.mxu0 %vm239_vm1, %v8318_v46  ;;  %7118 = vmatmul.msk.bf16.gmra.mxu1 %vm239_vm1, %v8318_v46  ;;  %v697_v9 = vmax.f32 %v336_v61, 0.0  ;;  %v7269_v50 = vld [vmem:[#allocation2 + $0xf0] sm:$0xf0] }
  0xed   :  { %v9142_v59 = vpack.c.bf16 %v695_v57, %v691_v54  ;;  %7134 = vmatmul.msk.bf16.gmra.mxu2 %vm239_vm1, %v8318_v46  ;;  %v698_v12 = vmax.f32 %v425_v0, 0.0  ;;  %v7656_v57 = vor.u32 %v8449_v52, %v7653_v53 }
  0xee   :  { %v9144_v60 = vpack.c.bf16 %v696_v58, %v692_v56  ;;  %7150 = vmatmul.msk.bf16.gmra.mxu3 %vm239_vm1, %v8318_v46  ;;  %v8353_v46 = vld [vmem:[#allocation2 + $0xe4] sm:$0xf]  ;;  %2161 = vmatpush.bf16.msra.mxu2 %v7528_v49 }
  0xef   :  { %10912 = vst [vmem:[#allocation19_spill] sm:$0xff] %v9142_v59  ;;  %v7272_v56 = vor.u32 %v8353_v46, %v7269_v50  ;;  %2250 = vmatpush.bf16.msra.mxu3 %v7656_v57 }
  0xf0   :  { %10913 = vst [vmem:[#allocation20_spill] sm:$0xff] %v9144_v60  ;;  %v513_v1 = vpop.f32.mrf.mxu2 }
  0xf1   :  { %v602_v4 = vpop.f32.mrf.mxu3  ;;  %v337_v5 = vpop.f32.mrf.mxu0  ;;  %v514_v19 = vadd.f32 %v513_v1, %v9031_v51  ;;  %1983 = vmatpush.bf16.msra.mxu0 %v7272_v56 }
  0xf2   :  { %v426_v6 = vpop.f32.mrf.mxu1  ;;  %v338_v7 = vadd.f32 %v337_v5, %v9021_v34  ;;  %v603_v20 = vadd.f32 %v602_v4, %v9035_v55 }
  0xf3   :  { %v427_v8 = vadd.f32 %v426_v6, %v9023_v35  ;;  %v699_v32 = vmax.f32 %v514_v19, 0.0 }
  0xf4   :  { %v701_v15 = vmax.f32 %v338_v7, 0.0  ;;  %v700_v33 = vmax.f32 %v603_v20, 0.0 }
  0xf5   :  { %v702_v16 = vmax.f32 %v427_v8, 0.0  ;;  %v8385_v8 = vld [vmem:[#allocation2 + $0x1e4] sm:$0xf] }
  0xf6   :  { %v9152_v17 = vpack.c.bf16 %v701_v15, %v697_v9  ;;  %v7397_v9 = vld [vmem:[#allocation2 + $0x1f0] sm:$0xf0] }
  0xf7   :  { %v9154_v18 = vpack.c.bf16 %v702_v16, %v698_v12  ;;  %v7400_v19 = vor.u32 %v8385_v8, %v7397_v9 }
  0xf8   :  { %10914 = vst [vmem:[#allocation21_spill] sm:$0xff] %v9152_v17  ;;  %v515_v21 = vpop.f32.mrf.mxu2 }
  0xf9   :  { %10915 = vst [vmem:[#allocation22_spill] sm:$0xff] %v9154_v18  ;;  %v604_v22 = vpop.f32.mrf.mxu3  ;;  %v516_v24 = vadd.f32 %v515_v21, %v9031_v51  ;;  %v340_v26 = vpop.f32.mrf.mxu0  ;;  %2072 = vmatpush.bf16.msra.mxu1 %v7400_v19 }
  0xfa   :  { %v605_v25 = vadd.f32 %v604_v22, %v9035_v55  ;;  %v429_v31 = vpop.f32.mrf.mxu1  ;;  %v341_v54 = vadd.f32 %v340_v26, %v9021_v34  ;;  %v8320_v26 = vld [vmem:[%s10780_s0 + $0x78] sm:$0xff] }
  0xfb   :  { %v703_v36 = vmax.f32 %v516_v24, 0.0  ;;  %v430_v58 = vadd.f32 %v429_v31, %v9023_v35 }
  0xfc   :  { %v704_v37 = vmax.f32 %v605_v25, 0.0  ;;  %7103 = vmatmul.msk.bf16.gmra.mxu0 %vm239_vm1, %v8319_v23  ;;  %7119 = vmatmul.msk.bf16.gmra.mxu1 %vm239_vm1, %v8319_v23  ;;  %v705_v7 = vmax.f32 %v341_v54, 0.0 }
  0xfd   :  { %v9165_v40 = vpack.c.bf16 %v703_v36, %v699_v32  ;;  %7135 = vmatmul.msk.bf16.gmra.mxu2 %vm239_vm1, %v8319_v23  ;;  %v706_v12 = vmax.f32 %v430_v58, 0.0 }
  0xfe   :  { %v9167_v41 = vpack.c.bf16 %v704_v37, %v700_v33  ;;  %7151 = vmatmul.msk.bf16.gmra.mxu3 %vm239_vm1, %v8319_v23 }
  0xff   :  { %10916 = vst [vmem:[#allocation23_spill] sm:$0xff] %v9165_v40 }
 0x100   :  { %10917 = vst [vmem:[#allocation24_spill] sm:$0xff] %v9167_v41  ;;  %v518_v61 = vpop.f32.mrf.mxu2 }
 0x101   :  { %v607_v0 = vpop.f32.mrf.mxu3  ;;  %v342_v1 = vpop.f32.mrf.mxu0  ;;  %v519_v22 = vadd.f32 %v518_v61, %v9031_v51 }
 0x102   :  { %v431_v4 = vpop.f32.mrf.mxu1  ;;  %v343_v5 = vadd.f32 %v342_v1, %v9021_v34  ;;  %v608_v23 = vadd.f32 %v607_v0, %v9035_v55 }
 0x103   :  { %v432_v6 = vadd.f32 %v431_v4, %v9023_v35  ;;  %v707_v37 = vmax.f32 %v519_v22, 0.0 }
 0x104   :  { %v709_v15 = vmax.f32 %v343_v5, 0.0  ;;  %v708_v42 = vmax.f32 %v608_v23, 0.0 }
 0x105   :  { %v710_v16 = vmax.f32 %v432_v6, 0.0 }
 0x106   :  { %v9175_v20 = vpack.c.bf16 %v709_v15, %v705_v7 }
 0x107   :  { %v9177_v21 = vpack.c.bf16 %v710_v16, %v706_v12 }
 0x108   :  { %10918 = vst [vmem:[#allocation25_spill] sm:$0xff] %v9175_v20  ;;  %v520_v24 = vpop.f32.mrf.mxu2 }
 0x109   :  { %10919 = vst [vmem:[#allocation26_spill] sm:$0xff] %v9177_v21  ;;  %v609_v25 = vpop.f32.mrf.mxu3  ;;  %v521_v31 = vadd.f32 %v520_v24, %v9031_v51  ;;  %v345_v33 = vpop.f32.mrf.mxu0 }
 0x10a   :  { %v610_v32 = vadd.f32 %v609_v25, %v9035_v55  ;;  %v434_v36 = vpop.f32.mrf.mxu1  ;;  %v346_v52 = vadd.f32 %v345_v33, %v9021_v34 }
 0x10b   :  { %v711_v43 = vmax.f32 %v521_v31, 0.0  ;;  %v435_v53 = vadd.f32 %v434_v36, %v9023_v35 }
 0x10c   :  { %v712_v46 = vmax.f32 %v610_v32, 0.0  ;;  %7104 = vmatmul.msk.bf16.gmra.mxu0 %vm239_vm1, %v8320_v26  ;;  %7120 = vmatmul.msk.bf16.gmra.mxu1 %vm239_vm1, %v8320_v26  ;;  %v713_v1 = vmax.f32 %v346_v52, 0.0  ;;  %v7253_v52 = vld [vmem:[#allocation2 + $0xd0] sm:$0xf0] }
 0x10d   :  { %v9188_v49 = vpack.c.bf16 %v711_v43, %v707_v37  ;;  %7136 = vmatmul.msk.bf16.gmra.mxu2 %vm239_vm1, %v8320_v26  ;;  %v714_v4 = vmax.f32 %v435_v53, 0.0  ;;  %v8413_v37 = vld [vmem:[#allocation2 + $0x2c4] sm:$0xf] }
 0x10e   :  { %v9190_v50 = vpack.c.bf16 %v712_v46, %v708_v42  ;;  %7152 = vmatmul.msk.bf16.gmra.mxu3 %vm239_vm1, %v8320_v26  ;;  %v7509_v42 = vld [vmem:[#allocation2 + $0x2d0] sm:$0xf0]  ;;  %v8349_v43 = vld [vmem:[#allocation2 + $0xc4] sm:$0xf] }
 0x10f   :  { %10920 = vst [vmem:[#allocation27_spill] sm:$0xff] %v9188_v49  ;;  %v7512_v46 = vor.u32 %v8413_v37, %v7509_v42  ;;  %v8445_v53 = vld [vmem:[#allocation2 + $0x3c4] sm:$0xf] }
 0x110   :  { %10921 = vst [vmem:[#allocation28_spill] sm:$0xff] %v9190_v50  ;;  %v523_v54 = vpop.f32.mrf.mxu2 }
 0x111   :  { %v612_v56 = vpop.f32.mrf.mxu3  ;;  %v347_v57 = vpop.f32.mrf.mxu0  ;;  %v524_v9 = vadd.f32 %v523_v54, %v9031_v51  ;;  %v7637_v54 = vld [vmem:[#allocation2 + $0x3d0] sm:$0xf0]  ;;  %2162 = vmatpush.bf16.msra.mxu2 %v7512_v46 }
 0x112   :  { %v436_v58 = vpop.f32.mrf.mxu1  ;;  %v348_v61 = vadd.f32 %v347_v57, %v9021_v34  ;;  %v613_v12 = vadd.f32 %v612_v56, %v9035_v55  ;;  %v7256_v57 = vor.u32 %v8349_v43, %v7253_v52 }
 0x113   :  { %v437_v0 = vadd.f32 %v436_v58, %v9023_v35  ;;  %v715_v25 = vmax.f32 %v524_v9, 0.0  ;;  %v7640_v58 = vor.u32 %v8445_v53, %v7637_v54 }
 0x114   :  { %v717_v5 = vmax.f32 %v348_v61, 0.0  ;;  %v716_v26 = vmax.f32 %v613_v12, 0.0  ;;  %1984 = vmatpush.bf16.msra.mxu0 %v7256_v57 }
 0x115   :  { %v718_v6 = vmax.f32 %v437_v0, 0.0  ;;  %2251 = vmatpush.bf16.msra.mxu3 %v7640_v58 }
 0x116   :  { %v9198_v7 = vpack.c.bf16 %v717_v5, %v713_v1 }
 0x117   :  { %v9200_v8 = vpack.c.bf16 %v718_v6, %v714_v4 }
 0x118   :  { %v525_v15 = vpop.f32.mrf.mxu2 }
 0x119   :  { %10922 = vst [vmem:[#allocation29_spill] sm:$0xff] %v9200_v8  ;;  %v614_v16 = vpop.f32.mrf.mxu3  ;;  %v526_v19 = vadd.f32 %v525_v15, %v9031_v51  ;;  %v350_v23 = vpop.f32.mrf.mxu0  ;;  %v8381_v15 = vld [vmem:[#allocation2 + $0x1c4] sm:$0xf] }
 0x11a   :  { %v615_v22 = vadd.f32 %v614_v16, %v9035_v55  ;;  %v439_v24 = vpop.f32.mrf.mxu1  ;;  %v351_v56 = vadd.f32 %v350_v23, %v9021_v34  ;;  %v7381_v16 = vld [vmem:[#allocation2 + $0x1d0] sm:$0xf0] }
 0x11b   :  { %v719_v31 = vmax.f32 %v526_v19, 0.0  ;;  %v440_v61 = vadd.f32 %v439_v24, %v9023_v35 }
 0x11c   :  { %v720_v32 = vmax.f32 %v615_v22, 0.0  ;;  %1635 = vmatmul.bf16.vlgmr.msrb.gmra.mxu0 %v9037_v62  ;;  %1724 = vmatmul.bf16.vlgmr.msrb.gmra.mxu1 %v9039_v63  ;;  %v721_v12 = vmax.f32 %v351_v56, 0.0 }
 0x11d   :  { %v9208_v33 = vpack.c.bf16 %v719_v31, %v715_v25  ;;  %1813 = vmatmul.bf16.vlgmr.msrb.gmra.mxu2 %v9050_v13  ;;  %v722_v19 = vmax.f32 %v440_v61, 0.0  ;;  %v7384_v25 = vor.u32 %v8381_v15, %v7381_v16 }
 0x11e   :  { %v9210_v36 = vpack.c.bf16 %v720_v32, %v716_v26  ;;  %1902 = vmatmul.bf16.vlgmr.msrb.gmra.mxu3 %v9052_v14 }
 0x11f   :  { %10923 = vst [vmem:[#allocation30_spill] sm:$0xff] %v9208_v33  ;;  %2073 = vmatpush.bf16.msra.mxu1 %v7384_v25 }
 0x120   :  { %10924 = vst [vmem:[#allocation31_spill] sm:$0xff] %v9210_v36  ;;  %v528_v0 = vpop.f32.mrf.mxu2 }
 0x121   :  { %v617_v1 = vpop.f32.mrf.mxu3  ;;  %v352_v4 = vpop.f32.mrf.mxu0  ;;  %v529_v31 = vadd.f32 %v528_v0, %v9031_v51 }
 0x122   :  { %v441_v5 = vpop.f32.mrf.mxu1  ;;  %v353_v6 = vadd.f32 %v352_v4, %v9021_v34  ;;  %v618_v32 = vadd.f32 %v617_v1, %v9035_v55 }
 0x123   :  { %v442_v9 = vadd.f32 %v441_v5, %v9023_v35  ;;  %v723_v54 = vmax.f32 %v529_v31, 0.0 }
 0x124   :  { %v725_v22 = vmax.f32 %v353_v6, 0.0  ;;  %v724_v56 = vmax.f32 %v618_v32, 0.0 }
 0x125   :  { %v726_v23 = vmax.f32 %v442_v9, 0.0 }
 0x126   :  { %v9218_v26 = vpack.c.bf16 %v725_v22, %v721_v12 }
 0x127   :  { %v9220_v24 = vpack.c.bf16 %v726_v23, %v722_v19 }
 0x128   :  { %10925 = vst [vmem:[#allocation32_spill] sm:$0xff] %v9218_v26  ;;  %v530_v37 = vpop.f32.mrf.mxu2 }
 0x129   :  { %10926 = vst [vmem:[#allocation33_spill] sm:$0xff] %v9220_v24  ;;  %v619_v42 = vpop.f32.mrf.mxu3  ;;  %v531_v43 = vadd.f32 %v530_v37, %v9031_v51  ;;  %v355_v52 = vpop.f32.mrf.mxu0 }
 0x12a   :  { %v620_v46 = vadd.f32 %v619_v42, %v9035_v55  ;;  %v444_v53 = vpop.f32.mrf.mxu1  ;;  %v356_v1 = vadd.f32 %v355_v52, %v9021_v34 }
 0x12b   :  { %v727_v57 = vmax.f32 %v531_v43, 0.0  ;;  %v445_v4 = vadd.f32 %v444_v53, %v9023_v35 }
 0x12c   :  { %v728_v58 = vmax.f32 %v620_v46, 0.0  ;;  %1640 = vmatmul.bf16.gmra.mxu0 %v9060_v27  ;;  %1729 = vmatmul.bf16.gmra.mxu1 %v9062_v28  ;;  %v729_v19 = vmax.f32 %v356_v1, 0.0 }
 0x12d   :  { %v9228_v61 = vpack.c.bf16 %v727_v57, %v723_v54  ;;  %1818 = vmatmul.bf16.gmra.mxu2 %v9073_v44  ;;  %v730_v22 = vmax.f32 %v445_v4, 0.0 }
 0x12e   :  { %v9230_v0 = vpack.c.bf16 %v728_v58, %v724_v56  ;;  %1907 = vmatmul.bf16.gmra.mxu3 %v9075_v45 }
 0x12f   :  { %10927 = vst [vmem:[#allocation34_spill] sm:$0xff] %v9228_v61 }
 0x130   :  { %10928 = vst [vmem:[#allocation35_spill] sm:$0xff] %v9230_v0  ;;  %v533_v5 = vpop.f32.mrf.mxu2 }
 0x131   :  { %v622_v6 = vpop.f32.mrf.mxu3  ;;  %v357_v9 = vpop.f32.mrf.mxu0  ;;  %v534_v37 = vadd.f32 %v533_v5, %v9031_v51 }
 0x132   :  { %v446_v12 = vpop.f32.mrf.mxu1  ;;  %v358_v15 = vadd.f32 %v357_v9, %v9021_v34  ;;  %v623_v42 = vadd.f32 %v622_v6, %v9035_v55  ;;  %v8409_v6 = vld [vmem:[#allocation2 + $0x2a4] sm:$0xf] }
 0x133   :  { %v447_v16 = vadd.f32 %v446_v12, %v9023_v35  ;;  %v731_v57 = vmax.f32 %v534_v37, 0.0  ;;  %v7493_v12 = vld [vmem:[#allocation2 + $0x2b0] sm:$0xf0] }
 0x134   :  { %v733_v23 = vmax.f32 %v358_v15, 0.0  ;;  %v732_v58 = vmax.f32 %v623_v42, 0.0  ;;  %v8345_v15 = vld [vmem:[#allocation2 + $0xa4] sm:$0xf] }
 0x135   :  { %v734_v25 = vmax.f32 %v447_v16, 0.0  ;;  %v7496_v16 = vor.u32 %v8409_v6, %v7493_v12  ;;  %v8377_v6 = vld [vmem:[#allocation2 + $0x1a4] sm:$0xf]  ;;  %v7365_v12 = vld [vmem:[#allocation2 + $0x1b0] sm:$0xf0] }
 0x136   :  { %v9238_v31 = vpack.c.bf16 %v733_v23, %v729_v19  ;;  %v7237_v19 = vld [vmem:[#allocation2 + $0xb0] sm:$0xf0] }
 0x137   :  { %v9240_v32 = vpack.c.bf16 %v734_v25, %v730_v22  ;;  %v8441_v22 = vld [vmem:[#allocation2 + $0x3a4] sm:$0xf]  ;;  %v7621_v23 = vld [vmem:[#allocation2 + $0x3b0] sm:$0xf0]  ;;  %v7240_v37 = vor.u32 %v8345_v15, %v7237_v19  ;;  %2163 = vmatpush.bf16.msra.mxu2 %v7496_v16  ;;  %v7368_v19 = vor.u32 %v8377_v6, %v7365_v12 }
 0x138   :  { %v535_v43 = vpop.f32.mrf.mxu2  ;;  %v7624_v42 = vor.u32 %v8441_v22, %v7621_v23 }
 0x139   :  { %v624_v46 = vpop.f32.mrf.mxu3  ;;  %v536_v52 = vadd.f32 %v535_v43, %v9031_v51  ;;  %v360_v54 = vpop.f32.mrf.mxu0  ;;  %1985 = vmatpush.bf16.msra.mxu0 %v7240_v37  ;;  %2074 = vmatpush.bf16.msra.mxu1 %v7368_v19 }
 0x13a   :  { %v625_v53 = vadd.f32 %v624_v46, %v9035_v55  ;;  %v449_v56 = vpop.f32.mrf.mxu1  ;;  %v361_v25 = vadd.f32 %v360_v54, %v9021_v34  ;;  %2252 = vmatpush.bf16.msra.mxu3 %v7624_v42 }
 0x13b   :  { %v735_v1 = vmax.f32 %v536_v52, 0.0  ;;  %v450_v43 = vadd.f32 %v449_v56, %v9023_v35 }
 0x13c   :  { %v736_v4 = vmax.f32 %v625_v53, 0.0  ;;  %1645 = vmatmul.bf16.gmra.mxu0 %v9083_v10  ;;  %1734 = vmatmul.bf16.gmra.mxu1 %v9085_v11 }
 0x13d   :  { %v9248_v9 = vpack.c.bf16 %v735_v1, %v731_v57  ;;  %1823 = vmatmul.bf16.gmra.mxu2 %v9096_v29 }
 0x13e   :  { %v9250_v5 = vpack.c.bf16 %v736_v4, %v732_v58  ;;  %1912 = vmatmul.bf16.gmra.mxu3 %v9098_v30  ;;  %v737_v4 = vmax.f32 %v361_v25, 0.0  ;;  %v738_v30 = vmax.f32 %v450_v43, 0.0 }
 0x140   :  { %v538_v46 = vpop.f32.mrf.mxu2 }
 0x141   :  { %v627_v52 = vpop.f32.mrf.mxu3  ;;  %v362_v53 = vpop.f32.mrf.mxu0  ;;  %v539_v16 = vadd.f32 %v538_v46, %v9031_v51 }
 0x142   :  { %v451_v57 = vpop.f32.mrf.mxu1  ;;  %v363_v58 = vadd.f32 %v362_v53, %v9021_v34  ;;  %v628_v23 = vadd.f32 %v627_v52, %v9035_v55 }
 0x143   :  { %v452_v1 = vadd.f32 %v451_v57, %v9023_v35 }
 0x144   :  { %v741_v54 = vmax.f32 %v363_v58, 0.0  ;;  %v739_v58 = vmax.f32 %v539_v16, 0.0 }
 0x145   :  { %v742_v15 = vmax.f32 %v452_v1, 0.0  ;;  %v740_v1 = vmax.f32 %v628_v23, 0.0 }
 0x146   :  { %v9258_v22 = vpack.c.bf16 %v741_v54, %v737_v4 }
 0x147   :  { %v9260_v56 = vpack.c.bf16 %v742_v15, %v738_v30 }
 0x148   :  { %v540_v37 = vpop.f32.mrf.mxu2 }
 0x149   :  { %v629_v42 = vpop.f32.mrf.mxu3  ;;  %v541_v53 = vadd.f32 %v540_v37, %v9031_v51  ;;  %v365_v57 = vpop.f32.mrf.mxu0 }
 0x14a   :  { %v630_v25 = vadd.f32 %v629_v42, %v9035_v55  ;;  %v454_v43 = vpop.f32.mrf.mxu1  ;;  %v366_v52 = vadd.f32 %v365_v57, %v9021_v34 }
 0x14b   :  { %v743_v6 = vmax.f32 %v541_v53, 0.0  ;;  %v455_v12 = vadd.f32 %v454_v43, %v9023_v35 }
 0x14c   :  { %v744_v4 = vmax.f32 %v630_v25, 0.0  ;;  %1650 = vmatmul.bf16.gmra.mxu0 %v9106_v47  ;;  %1739 = vmatmul.bf16.gmra.mxu1 %v9108_v48  ;;  %v745_v42 = vmax.f32 %v366_v52, 0.0 }
 0x14d   :  { %v9268_v30 = vpack.c.bf16 %v743_v6, %v739_v58  ;;  %1828 = vmatmul.bf16.gmra.mxu2 %v9119_v2  ;;  %v746_v53 = vmax.f32 %v455_v12, 0.0 }
 0x14e   :  { %v9270_v46 = vpack.c.bf16 %v744_v4, %v740_v1  ;;  %1917 = vmatmul.bf16.gmra.mxu3 %v9121_v3 }
 0x150   :  { %v543_v54 = vpop.f32.mrf.mxu2 }
 0x151   :  { %v632_v15 = vpop.f32.mrf.mxu3  ;;  %v367_v19 = vpop.f32.mrf.mxu0  ;;  %v544_v57 = vadd.f32 %v543_v54, %v9031_v51 }
 0x152   :  { %v456_v16 = vpop.f32.mrf.mxu1  ;;  %v368_v23 = vadd.f32 %v367_v19, %v9021_v34  ;;  %v633_v43 = vadd.f32 %v632_v15, %v9035_v55  ;;  %v8405_v15 = vld [vmem:[#allocation2 + $0x284] sm:$0xf] }
 0x153   :  { %v457_v37 = vadd.f32 %v456_v16, %v9023_v35  ;;  %v747_v52 = vmax.f32 %v544_v57, 0.0  ;;  %v8437_v57 = vld [vmem:[#allocation2 + $0x384] sm:$0xf] }
 0x154   :  { %v749_v25 = vmax.f32 %v368_v23, 0.0  ;;  %v748_v12 = vmax.f32 %v633_v43, 0.0 }
 0x155   :  { %v750_v58 = vmax.f32 %v457_v37, 0.0 }
 0x156   :  { %v9278_v1 = vpack.c.bf16 %v749_v25, %v745_v42 }
 0x157   :  { %v9280_v6 = vpack.c.bf16 %v750_v58, %v746_v53  ;;  %v8341_v53 = vld [vmem:[#allocation2 + $0x84] sm:$0xf]  ;;  %v7221_v58 = vld [vmem:[#allocation2 + $0x90] sm:$0xf0] }
 0x158   :  { %v545_v4 = vpop.f32.mrf.mxu2 }
 0x159   :  { %v634_v3 = vpop.f32.mrf.mxu3  ;;  %v546_v2 = vadd.f32 %v545_v4, %v9031_v51  ;;  %v370_v48 = vpop.f32.mrf.mxu0  ;;  %v7224_v4 = vor.u32 %v8341_v53, %v7221_v58 }
 0x15a   :  { %v635_v19 = vadd.f32 %v634_v3, %v9035_v55  ;;  %v459_v16 = vpop.f32.mrf.mxu1  ;;  %v7477_v3 = vld [vmem:[#allocation2 + $0x290] sm:$0xf0]  ;;  %v371_v43 = vadd.f32 %v370_v48, %v9021_v34 }
 0x15b   :  { %v751_v23 = vmax.f32 %v546_v2, 0.0  ;;  %v7480_v25 = vor.u32 %v8405_v15, %v7477_v3  ;;  %v7605_v2 = vld [vmem:[#allocation2 + $0x390] sm:$0xf0]  ;;  %1986 = vmatpush.bf16.msra.mxu0 %v7224_v4 }
 0x15c   :  { %v752_v37 = vmax.f32 %v635_v19, 0.0  ;;  %1655 = vmatmul.bf16.gmra.mxu0 %v9129_v38  ;;  %1744 = vmatmul.bf16.gmra.mxu1 %v9131_v39  ;;  %v7608_v19 = vor.u32 %v8437_v57, %v7605_v2  ;;  %v753_v3 = vmax.f32 %v371_v43, 0.0  ;;  %v8373_v39 = vld [vmem:[#allocation2 + $0x184] sm:$0xf]  ;;  %v7349_v38 = vld [vmem:[#allocation2 + $0x190] sm:$0xf0] }
 0x15d   :  { %v9288_v42 = vpack.c.bf16 %v751_v23, %v747_v52  ;;  %1833 = vmatmul.bf16.gmra.mxu2 %v9142_v59  ;;  %v460_v52 = vadd.f32 %v459_v16, %v9023_v35  ;;  %v7352_v58 = vor.u32 %v8373_v39, %v7349_v38 }
 0x15e   :  { %v9290_v54 = vpack.c.bf16 %v752_v37, %v748_v12  ;;  %1922 = vmatmul.bf16.gmra.mxu3 %v9144_v60  ;;  %2164 = vmatpush.bf16.msra.mxu2 %v7480_v25 }
 0x15f   :  { %2253 = vmatpush.bf16.msra.mxu3 %v7608_v19  ;;  %v754_v47 = vmax.f32 %v460_v52, 0.0  ;;  %2075 = vmatpush.bf16.msra.mxu1 %v7352_v58 }
 0x160   :  { %v548_v23 = vpop.f32.mrf.mxu2 }
 0x161   :  { %v637_v12 = vpop.f32.mrf.mxu3  ;;  %v372_v37 = vpop.f32.mrf.mxu0  ;;  %v549_v25 = vadd.f32 %v548_v23, %v9031_v51 }
 0x162   :  { %v461_v59 = vpop.f32.mrf.mxu1  ;;  %v373_v60 = vadd.f32 %v372_v37, %v9021_v34  ;;  %v638_v2 = vadd.f32 %v637_v12, %v9035_v55 }
 0x163   :  { %v462_v15 = vadd.f32 %v461_v59, %v9023_v35 }
 0x164   :  { %v757_v48 = vmax.f32 %v373_v60, 0.0  ;;  %v755_v60 = vmax.f32 %v549_v25, 0.0 }
 0x165   :  { %v758_v53 = vmax.f32 %v462_v15, 0.0  ;;  %v756_v15 = vmax.f32 %v638_v2, 0.0 }
 0x166   :  { %v9298_v57 = vpack.c.bf16 %v757_v48, %v753_v3 }
 0x167   :  { %v9300_v16 = vpack.c.bf16 %v758_v53, %v754_v47 }
 0x168   :  { %v550_v4 = vpop.f32.mrf.mxu2 }
 0x169   :  { %v639_v19 = vpop.f32.mrf.mxu3  ;;  %v551_v59 = vadd.f32 %v550_v4, %v9031_v51  ;;  %v375_v37 = vpop.f32.mrf.mxu0 }
 0x16a   :  { %v640_v43 = vadd.f32 %v639_v19, %v9035_v55  ;;  %v464_v52 = vpop.f32.mrf.mxu1  ;;  %v376_v12 = vadd.f32 %v375_v37, %v9021_v34 }
 0x16b   :  { %v759_v38 = vmax.f32 %v551_v59, 0.0  ;;  %v465_v3 = vadd.f32 %v464_v52, %v9023_v35 }
 0x16c   :  { %v760_v39 = vmax.f32 %v640_v43, 0.0  ;;  %1660 = vmatmul.bf16.gmra.mxu0 %v9152_v17  ;;  %1749 = vmatmul.bf16.gmra.mxu1 %v9154_v18  ;;  %v761_v19 = vmax.f32 %v376_v12, 0.0 }
 0x16d   :  { %v9308_v47 = vpack.c.bf16 %v759_v38, %v755_v60  ;;  %1838 = vmatmul.bf16.gmra.mxu2 %v9165_v40  ;;  %v762_v59 = vmax.f32 %v465_v3, 0.0 }
 0x16e   :  { %v9310_v23 = vpack.c.bf16 %v760_v39, %v756_v15  ;;  %1927 = vmatmul.bf16.gmra.mxu3 %v9167_v41 }
 0x170   :  { %v553_v48 = vpop.f32.mrf.mxu2 }
 0x171   :  { %v642_v53 = vpop.f32.mrf.mxu3  ;;  %v377_v58 = vpop.f32.mrf.mxu0  ;;  %v554_v37 = vadd.f32 %v553_v48, %v9031_v51 }
 0x172   :  { %v466_v25 = vpop.f32.mrf.mxu1  ;;  %v378_v2 = vadd.f32 %v377_v58, %v9021_v34  ;;  %v643_v52 = vadd.f32 %v642_v53, %v9035_v55  ;;  %v8401_v53 = vld [vmem:[#allocation2 + $0x264] sm:$0xf] }
 0x173   :  { %v467_v4 = vadd.f32 %v466_v25, %v9023_v35  ;;  %v763_v12 = vmax.f32 %v554_v37, 0.0  ;;  %v8433_v37 = vld [vmem:[#allocation2 + $0x364] sm:$0xf] }
 0x174   :  { %v765_v43 = vmax.f32 %v378_v2, 0.0  ;;  %v764_v3 = vmax.f32 %v643_v52, 0.0 }
 0x175   :  { %v766_v60 = vmax.f32 %v467_v4, 0.0 }
 0x176   :  { %v9318_v15 = vpack.c.bf16 %v765_v43, %v761_v19 }
 0x177   :  { %v9320_v38 = vpack.c.bf16 %v766_v60, %v762_v59  ;;  %v8337_v59 = vld [vmem:[#allocation2 + $0x64] sm:$0xf]  ;;  %v7205_v60 = vld [vmem:[#allocation2 + $0x70] sm:$0xf0] }
 0x178   :  { %v555_v39 = vpop.f32.mrf.mxu2  ;;  %v7208_v52 = vor.u32 %v8337_v59, %v7205_v60  ;;  %v8369_v60 = vld [vmem:[#allocation2 + $0x164] sm:$0xf] }
 0x179   :  { %v644_v41 = vpop.f32.mrf.mxu3  ;;  %v556_v40 = vadd.f32 %v555_v39, %v9031_v51  ;;  %v380_v18 = vpop.f32.mrf.mxu0 }
 0x17a   :  { %v645_v58 = vadd.f32 %v644_v41, %v9035_v55  ;;  %v469_v25 = vpop.f32.mrf.mxu1  ;;  %v7461_v41 = vld [vmem:[#allocation2 + $0x270] sm:$0xf0]  ;;  %1987 = vmatpush.bf16.msra.mxu0 %v7208_v52 }
 0x17b   :  { %v767_v2 = vmax.f32 %v556_v40, 0.0  ;;  %v7464_v43 = vor.u32 %v8401_v53, %v7461_v41  ;;  %v7589_v40 = vld [vmem:[#allocation2 + $0x370] sm:$0xf0] }
 0x17c   :  { %v768_v4 = vmax.f32 %v645_v58, 0.0  ;;  %1665 = vmatmul.bf16.gmra.mxu0 %v9175_v20  ;;  %1754 = vmatmul.bf16.gmra.mxu1 %v9177_v21  ;;  %v7592_v39 = vor.u32 %v8433_v37, %v7589_v40  ;;  %v381_v58 = vadd.f32 %v380_v18, %v9021_v34  ;;  %v7333_v37 = vld [vmem:[#allocation2 + $0x170] sm:$0xf0] }
 0x17d   :  { %v9328_v19 = vpack.c.bf16 %v767_v2, %v763_v12  ;;  %1843 = vmatmul.bf16.gmra.mxu2 %v9188_v49  ;;  %v470_v12 = vadd.f32 %v469_v25, %v9023_v35  ;;  %v7336_v40 = vor.u32 %v8369_v60, %v7333_v37 }
 0x17e   :  { %v9330_v48 = vpack.c.bf16 %v768_v4, %v764_v3  ;;  %1932 = vmatmul.bf16.gmra.mxu3 %v9190_v50  ;;  %2165 = vmatpush.bf16.msra.mxu2 %v7464_v43  ;;  %v769_v41 = vmax.f32 %v381_v58, 0.0 }
 0x17f   :  { %2254 = vmatpush.bf16.msra.mxu3 %v7592_v39  ;;  %v770_v21 = vmax.f32 %v470_v12, 0.0  ;;  %2076 = vmatpush.bf16.msra.mxu1 %v7336_v40 }
 0x180   :  { %v558_v2 = vpop.f32.mrf.mxu2 }
 0x181   :  { %v647_v3 = vpop.f32.mrf.mxu3  ;;  %v382_v4 = vpop.f32.mrf.mxu0  ;;  %v559_v43 = vadd.f32 %v558_v2, %v9031_v51 }
 0x182   :  { %v471_v49 = vpop.f32.mrf.mxu1  ;;  %v383_v50 = vadd.f32 %v382_v4, %v9021_v34  ;;  %v648_v52 = vadd.f32 %v647_v3, %v9035_v55 }
 0x183   :  { %v472_v53 = vadd.f32 %v471_v49, %v9023_v35  ;;  %v771_v4 = vmax.f32 %v559_v43, 0.0 }
 0x184   :  { %v773_v20 = vmax.f32 %v383_v50, 0.0 }
 0x185   :  { %v774_v59 = vmax.f32 %v472_v53, 0.0  ;;  %v772_v53 = vmax.f32 %v648_v52, 0.0 }
 0x186   :  { %v9338_v18 = vpack.c.bf16 %v773_v20, %v769_v41 }
 0x187   :  { %v9340_v25 = vpack.c.bf16 %v774_v59, %v770_v21 }
 0x188   :  { %v560_v39 = vpop.f32.mrf.mxu2 }
 0x189   :  { %v649_v17 = vpop.f32.mrf.mxu3  ;;  %v561_v49 = vadd.f32 %v560_v39, %v9031_v51  ;;  %v385_v50 = vpop.f32.mrf.mxu0  ;;  %v9361_v39 = vld [vmem:[%s10784_s4] sm:$0xf] }
 0x18a   :  { %v650_v58 = vadd.f32 %v649_v17, %v9035_v55  ;;  %v474_v12 = vpop.f32.mrf.mxu1  ;;  %v386_v17 = vadd.f32 %v385_v50, %v9021_v34  ;;  %10929 = vst [vmem:[#allocation36_spill] sm:$0xff] %v9361_v39 }
 0x18b   :  { %v775_v20 = vmax.f32 %v561_v49, 0.0  ;;  %v475_v3 = vadd.f32 %v474_v12, %v9023_v35 }
 0x18c   :  { %v776_v41 = vmax.f32 %v650_v58, 0.0  ;;  %1670 = vmatmul.bf16.gmra.mxu0 %v9198_v7  ;;  %1759 = vmatmul.bf16.gmra.mxu1 %v9200_v8  ;;  %v777_v49 = vmax.f32 %v386_v17, 0.0 }
 0x18d   :  { %v9348_v21 = vpack.c.bf16 %v775_v20, %v771_v4  ;;  %1848 = vmatmul.bf16.gmra.mxu2 %v9208_v33  ;;  %v778_v58 = vmax.f32 %v475_v3, 0.0  ;;  %v9368_v20 = vperm.slane %v9361_v39, 0 }
 0x18e   :  { %v9350_v2 = vpack.c.bf16 %v776_v41, %v772_v53  ;;  %1937 = vmatmul.bf16.gmra.mxu3 %v9210_v36 }
 0x190   :  { %v563_v59 = vpop.f32.mrf.mxu2 }
 0x191   :  { %v652_v60 = vpop.f32.mrf.mxu3  ;;  %v387_v37 = vpop.f32.mrf.mxu0 }
 0x192   :  { %v476_v40 = vpop.f32.mrf.mxu1  ;;  %v388_v43 = vadd.f32 %v387_v37, %v9021_v34  ;;  %v564_v34 = vadd.f32 %v563_v59, %v9031_v51 }
 0x193   :  { %v477_v52 = vadd.f32 %v476_v40, %v9023_v35  ;;  %v653_v35 = vadd.f32 %v652_v60, %v9035_v55 }
 0x194   :  { %v781_v4 = vmax.f32 %v388_v43, 0.0 }
 0x195   :  { %v782_v53 = vmax.f32 %v477_v52, 0.0 }
 0x196   :  { %v9363_v50 = vpack.c.bf16 %v781_v4, %v777_v49  ;;  %v779_v49 = vmax.f32 %v564_v34, 0.0 }
 0x197   :  { %v9365_v12 = vpack.c.bf16 %v782_v53, %v778_v58  ;;  %v780_v58 = vmax.f32 %v653_v35, 0.0 }
 0x198   :  { %v565_v41 = vpop.f32.mrf.mxu2 }
 0x199   :  { %v654_v37 = vpop.f32.mrf.mxu3  ;;  %v566_v40 = vadd.f32 %v565_v41, %v9031_v51  ;;  %v1636_v3 = vpop.f32.mrf.mxu0  ;;  %v8397_v51 = vld [vmem:[#allocation2 + $0x244] sm:$0xf] }
 0x19a   :  { %v655_v17 = vadd.f32 %v654_v37, %v9035_v55  ;;  %v1725_v43 = vpop.f32.mrf.mxu1  ;;  %v1637_v52 = vadd.f32 %v1636_v3, %v9368_v20  ;;  %v7445_v55 = vld [vmem:[#allocation2 + $0x250] sm:$0xf0]  ;;  %v8333_v41 = vld [vmem:[#allocation2 + $0x44] sm:$0xf] }
 0x19b   :  { %v783_v4 = vmax.f32 %v566_v40, 0.0  ;;  %v7448_v37 = vor.u32 %v8397_v51, %v7445_v55  ;;  %v7189_v40 = vld [vmem:[#allocation2 + $0x50] sm:$0xf0] }
 0x19c   :  { %v784_v53 = vmax.f32 %v655_v17, 0.0  ;;  %v1726_v39 = vadd.f32 %v1725_v43, %v1637_v52  ;;  %1675 = vmatmul.bf16.gmra.mxu0 %v9218_v26  ;;  %1764 = vmatmul.bf16.gmra.mxu1 %v9220_v24  ;;  %v8429_v17 = vld [vmem:[#allocation2 + $0x344] sm:$0xf]  ;;  %v7573_v3 = vld [vmem:[#allocation2 + $0x350] sm:$0xf0] }
 0x19d   :  { %v9377_v59 = vpack.c.bf16 %v783_v4, %v779_v49  ;;  %1853 = vmatmul.bf16.gmra.mxu2 %v9228_v61  ;;  %v7192_v49 = vor.u32 %v8333_v41, %v7189_v40  ;;  %v7576_v4 = vor.u32 %v8429_v17, %v7573_v3  ;;  %v8365_v61 = vld [vmem:[#allocation2 + $0x144] sm:$0xf]  ;;  %v7317_v26 = vld [vmem:[#allocation2 + $0x150] sm:$0xf0] }
 0x19e   :  { %v9379_v60 = vpack.c.bf16 %v784_v53, %v780_v58  ;;  %1942 = vmatmul.bf16.gmra.mxu3 %v9230_v0  ;;  %2166 = vmatpush.bf16.msra.mxu2 %v7448_v37  ;;  %v7320_v36 = vor.u32 %v8365_v61, %v7317_v26 }
 0x19f   :  { %1988 = vmatpush.bf16.msra.mxu0 %v7192_v49  ;;  %2255 = vmatpush.bf16.msra.mxu3 %v7576_v4 }
 0x1a0   :  { %v1814_v34 = vpop.f32.mrf.mxu2  ;;  %2077 = vmatpush.bf16.msra.mxu1 %v7320_v36 }
 0x1a1   :  { %v1903_v35 = vpop.f32.mrf.mxu3  ;;  %v1815_v43 = vadd.f32 %v1814_v34, %v1726_v39  ;;  %v1638_v52 = vpop.f32.mrf.mxu0 }
 0x1a2   :  { %v1727_v24 = vpop.f32.mrf.mxu1  ;;  %v1639_v58 = vadd.f32 %v1638_v52, %v9368_v20 }
 0x1a3   :  { %v1904_v53 = vadd.f32 %v1903_v35, %v1815_v43 }
 0x1a4   :  { %v1728_v0 = vadd.f32 %v1727_v24, %v1639_v58 }
 0x1a5   :  { %v3051_v35 = vmax.f32 %v1904_v53, 0.0 }
 0x1a8   :  { %v1816_v33 = vpop.f32.mrf.mxu2 }
 0x1a9   :  { %v1905_v51 = vpop.f32.mrf.mxu3  ;;  %v1817_v55 = vadd.f32 %v1816_v33, %v1728_v0  ;;  %v1641_v8 = vpop.f32.mrf.mxu0 }
 0x1aa   :  { %v1730_v39 = vpop.f32.mrf.mxu1  ;;  %v1642_v34 = vadd.f32 %v1641_v8, %v9368_v20 }
 0x1ab   :  { %v1906_v41 = vadd.f32 %v1905_v51, %v1817_v55 }
 0x1ac   :  { %v1731_v40 = vadd.f32 %v1730_v39, %v1642_v34  ;;  %1680 = vmatmul.bf16.gmra.mxu0 %v9238_v31  ;;  %1769 = vmatmul.bf16.gmra.mxu1 %v9240_v32 }
 0x1ad   :  { %v3055_v37 = vmax.f32 %v1906_v41, 0.0  ;;  %1858 = vmatmul.bf16.gmra.mxu2 %v9248_v9 }
 0x1ae   :  { %1947 = vmatmul.bf16.gmra.mxu3 %v9250_v5 }
 0x1af   :  { %v9389_v26 = vpack.c.bf16 %v3055_v37, %v3051_v35  ;;  %v7429_v35 = vld [vmem:[#allocation2 + $0x230] sm:$0xf0]  ;;  %v8329_v37 = vld [vmem:[#allocation2 + $0x24] sm:$0xf] }
 0x1b0   :  { %v1819_v36 = vpop.f32.mrf.mxu2 }
 0x1b1   :  { %10930 = vst [vmem:[#allocation37_spill] sm:$0xff] %v9389_v26  ;;  %v1908_v33 = vpop.f32.mrf.mxu3  ;;  %v1820_v24 = vadd.f32 %v1819_v36, %v1731_v40  ;;  %v1643_v61 = vpop.f32.mrf.mxu0  ;;  %v8393_v40 = vld [vmem:[#allocation2 + $0x224] sm:$0xf] }
 0x1b2   :  { %v1732_v0 = vpop.f32.mrf.mxu1  ;;  %v1644_v8 = vadd.f32 %v1643_v61, %v9368_v20  ;;  %v7173_v61 = vld [vmem:[#allocation2 + $0x30] sm:$0xf0] }
 0x1b3   :  { %v1909_v17 = vadd.f32 %v1908_v33, %v1820_v24  ;;  %v7432_v24 = vor.u32 %v8393_v40, %v7429_v35 }
 0x1b4   :  { %v1733_v3 = vadd.f32 %v1732_v0, %v1644_v8  ;;  %v8425_v0 = vld [vmem:[#allocation2 + $0x324] sm:$0xf]  ;;  %v7557_v8 = vld [vmem:[#allocation2 + $0x330] sm:$0xf0] }
 0x1b5   :  { %v3059_v39 = vmax.f32 %v1909_v17, 0.0  ;;  %v7176_v17 = vor.u32 %v8329_v37, %v7173_v61  ;;  %2167 = vmatpush.bf16.msra.mxu2 %v7432_v24 }
 0x1b7   :  { %1989 = vmatpush.bf16.msra.mxu0 %v7176_v17 }
 0x1b8   :  { %v1821_v43 = vpop.f32.mrf.mxu2 }
 0x1b9   :  { %v1910_v52 = vpop.f32.mrf.mxu3  ;;  %v1822_v49 = vadd.f32 %v1821_v43, %v1733_v3  ;;  %v1646_v4 = vpop.f32.mrf.mxu0 }
 0x1ba   :  { %v1735_v58 = vpop.f32.mrf.mxu1  ;;  %v1647_v53 = vadd.f32 %v1646_v4, %v9368_v20 }
 0x1bb   :  { %v1911_v51 = vadd.f32 %v1910_v52, %v1822_v49  ;;  %v7560_v49 = vor.u32 %v8425_v0, %v7557_v8 }
 0x1bc   :  { %v1736_v55 = vadd.f32 %v1735_v58, %v1647_v53  ;;  %1685 = vmatmul.bf16.gmra.mxu0 %v9258_v22  ;;  %1774 = vmatmul.bf16.gmra.mxu1 %v9260_v56 }
 0x1bd   :  { %v3063_v34 = vmax.f32 %v1911_v51, 0.0  ;;  %1863 = vmatmul.bf16.gmra.mxu2 %v9268_v30  ;;  %2256 = vmatpush.bf16.msra.mxu3 %v7560_v49  ;;  %v8361_v51 = vld [vmem:[#allocation2 + $0x124] sm:$0xf] }
 0x1be   :  { %1952 = vmatmul.bf16.gmra.mxu3 %v9270_v46 }
 0x1bf   :  { %v9397_v41 = vpack.c.bf16 %v3063_v34, %v3059_v39  ;;  %v7301_v39 = vld [vmem:[#allocation2 + $0x130] sm:$0xf0] }
 0x1c0   :  { %v1824_v36 = vpop.f32.mrf.mxu2  ;;  %v7304_v34 = vor.u32 %v8361_v51, %v7301_v39 }
 0x1c1   :  { %10931 = vst [vmem:[#allocation38_spill] sm:$0xff] %v9397_v41  ;;  %v1913_v33 = vpop.f32.mrf.mxu3  ;;  %v1825_v3 = vadd.f32 %v1824_v36, %v1736_v55  ;;  %v1648_v43 = vpop.f32.mrf.mxu0 }
 0x1c2   :  { %v1737_v52 = vpop.f32.mrf.mxu1  ;;  %v1649_v4 = vadd.f32 %v1648_v43, %v9368_v20  ;;  %2078 = vmatpush.bf16.msra.mxu1 %v7304_v34 }
 0x1c3   :  { %v1914_v58 = vadd.f32 %v1913_v33, %v1825_v3 }
 0x1c4   :  { %v1738_v53 = vadd.f32 %v1737_v52, %v1649_v4 }
 0x1c5   :  { %v3067_v33 = vmax.f32 %v1914_v58, 0.0 }
 0x1c8   :  { %v1826_v41 = vpop.f32.mrf.mxu2 }
 0x1c9   :  { %v1915_v40 = vpop.f32.mrf.mxu3  ;;  %v1827_v35 = vadd.f32 %v1826_v41, %v1738_v53  ;;  %v1651_v26 = vpop.f32.mrf.mxu0 }
 0x1ca   :  { %v1740_v55 = vpop.f32.mrf.mxu1  ;;  %v1652_v36 = vadd.f32 %v1651_v26, %v9368_v20 }
 0x1cb   :  { %v1916_v37 = vadd.f32 %v1915_v40, %v1827_v35 }
 0x1cc   :  { %v1741_v61 = vadd.f32 %v1740_v55, %v1652_v36  ;;  %1690 = vmatmul.bf16.gmra.mxu0 %v9278_v1  ;;  %1779 = vmatmul.bf16.gmra.mxu1 %v9280_v6 }
 0x1cd   :  { %v3071_v24 = vmax.f32 %v1916_v37, 0.0  ;;  %1868 = vmatmul.bf16.gmra.mxu2 %v9288_v42 }
 0x1ce   :  { %1957 = vmatmul.bf16.gmra.mxu3 %v9290_v54 }
 0x1cf   :  { %v9405_v0 = vpack.c.bf16 %v3071_v24, %v3067_v33  ;;  %v7413_v33 = vld [vmem:[#allocation2 + $0x210] sm:$0xf0]  ;;  %v8325_v24 = vld [vmem:[#allocation2 + $0x4] sm:$0xf] }
 0x1d0   :  { %v1829_v8 = vpop.f32.mrf.mxu2 }
 0x1d1   :  { %10932 = vst [vmem:[#allocation39_spill] sm:$0xff] %v9405_v0  ;;  %v1918_v41 = vpop.f32.mrf.mxu3  ;;  %v1830_v3 = vadd.f32 %v1829_v8, %v1741_v61  ;;  %v1653_v43 = vpop.f32.mrf.mxu0  ;;  %v8389_v61 = vld [vmem:[#allocation2 + $0x204] sm:$0xf] }
 0x1d2   :  { %v1742_v52 = vpop.f32.mrf.mxu1  ;;  %v1654_v26 = vadd.f32 %v1653_v43, %v9368_v20  ;;  %v7157_v43 = vld [vmem:[#allocation2 + $0x10] sm:$0xf0] }
 0x1d3   :  { %v1919_v17 = vadd.f32 %v1918_v41, %v1830_v3  ;;  %v7416_v3 = vor.u32 %v8389_v61, %v7413_v33 }
 0x1d4   :  { %v1743_v49 = vadd.f32 %v1742_v52, %v1654_v26  ;;  %v8421_v52 = vld [vmem:[#allocation2 + $0x304] sm:$0xf]  ;;  %v7541_v26 = vld [vmem:[#allocation2 + $0x310] sm:$0xf0] }
 0x1d5   :  { %v3075_v55 = vmax.f32 %v1919_v17, 0.0  ;;  %v7160_v17 = vor.u32 %v8325_v24, %v7157_v43  ;;  %2168 = vmatpush.bf16.msra.mxu2 %v7416_v3 }
 0x1d7   :  { %1990 = vmatpush.bf16.msra.mxu0 %v7160_v17 }
 0x1d8   :  { %v1831_v4 = vpop.f32.mrf.mxu2 }
 0x1d9   :  { %v1920_v53 = vpop.f32.mrf.mxu3  ;;  %v1832_v51 = vadd.f32 %v1831_v4, %v1743_v49  ;;  %v1656_v58 = vpop.f32.mrf.mxu0 }
 0x1da   :  { %v1745_v39 = vpop.f32.mrf.mxu1  ;;  %v1657_v34 = vadd.f32 %v1656_v58, %v9368_v20 }
 0x1db   :  { %v1921_v40 = vadd.f32 %v1920_v53, %v1832_v51  ;;  %v7544_v51 = vor.u32 %v8421_v52, %v7541_v26 }
 0x1dc   :  { %v1746_v35 = vadd.f32 %v1745_v39, %v1657_v34  ;;  %1695 = vmatmul.bf16.gmra.mxu0 %v9298_v57  ;;  %1784 = vmatmul.bf16.gmra.mxu1 %v9300_v16 }
 0x1dd   :  { %v3079_v36 = vmax.f32 %v1921_v40, 0.0  ;;  %1873 = vmatmul.bf16.gmra.mxu2 %v9308_v47  ;;  %2257 = vmatpush.bf16.msra.mxu3 %v7544_v51  ;;  %v8357_v40 = vld [vmem:[#allocation2 + $0x104] sm:$0xf] }
 0x1de   :  { %1962 = vmatmul.bf16.gmra.mxu3 %v9310_v23 }
 0x1df   :  { %v9413_v37 = vpack.c.bf16 %v3079_v36, %v3075_v55  ;;  %v7285_v55 = vld [vmem:[#allocation2 + $0x110] sm:$0xf0] }
 0x1e0   :  { %v1834_v8 = vpop.f32.mrf.mxu2  ;;  %v7288_v36 = vor.u32 %v8357_v40, %v7285_v55 }
 0x1e1   :  { %10933 = vst [vmem:[#allocation40_spill] sm:$0xff] %v9413_v37  ;;  %v1923_v41 = vpop.f32.mrf.mxu3  ;;  %v1835_v49 = vadd.f32 %v1834_v8, %v1746_v35  ;;  %v1658_v4 = vpop.f32.mrf.mxu0 }
 0x1e2   :  { %v1747_v53 = vpop.f32.mrf.mxu1  ;;  %v1659_v58 = vadd.f32 %v1658_v4, %v9368_v20  ;;  %2079 = vmatpush.bf16.msra.mxu1 %v7288_v36 }
 0x1e3   :  { %v1924_v39 = vadd.f32 %v1923_v41, %v1835_v49 }
 0x1e4   :  { %v1748_v34 = vadd.f32 %v1747_v53, %v1659_v58 }
 0x1e5   :  { %v3083_v41 = vmax.f32 %v1924_v39, 0.0 }
 0x1e8   :  { %v1836_v37 = vpop.f32.mrf.mxu2 }
 0x1e9   :  { %v1925_v61 = vpop.f32.mrf.mxu3  ;;  %v1837_v33 = vadd.f32 %v1836_v37, %v1748_v34  ;;  %v1661_v0 = vpop.f32.mrf.mxu0 }
 0x1ea   :  { %v1750_v35 = vpop.f32.mrf.mxu1  ;;  %v1662_v8 = vadd.f32 %v1661_v0, %v9368_v20 }
 0x1eb   :  { %v1926_v24 = vadd.f32 %v1925_v61, %v1837_v33 }
 0x1ec   :  { %v1751_v43 = vadd.f32 %v1750_v35, %v1662_v8  ;;  %1700 = vmatmul.bf16.gmra.mxu0 %v9318_v15  ;;  %1789 = vmatmul.bf16.gmra.mxu1 %v9320_v38 }
 0x1ed   :  { %v3087_v3 = vmax.f32 %v1926_v24, 0.0  ;;  %1878 = vmatmul.bf16.gmra.mxu2 %v9328_v19 }
 0x1ee   :  { %1967 = vmatmul.bf16.gmra.mxu3 %v9330_v48 }
 0x1ef   :  { %v9421_v52 = vpack.c.bf16 %v3087_v3, %v3083_v41  ;;  %v8420_v41 = vld [vmem:[#allocation2 + $0x2f4] sm:$0xf0]  ;;  %v7275_v3 = vld [vmem:[#allocation2 + $0xe8] sm:$0xf] }
 0x1f0   :  { %v1839_v26 = vpop.f32.mrf.mxu2 }
 0x1f1   :  { %10934 = vst [vmem:[#allocation41_spill] sm:$0xff] %v9421_v52  ;;  %v1928_v37 = vpop.f32.mrf.mxu3  ;;  %v1840_v49 = vadd.f32 %v1839_v26, %v1751_v43  ;;  %v1663_v4 = vpop.f32.mrf.mxu0  ;;  %v7531_v43 = vld [vmem:[#allocation2 + $0x2e8] sm:$0xf] }
 0x1f2   :  { %v1752_v53 = vpop.f32.mrf.mxu1  ;;  %v1664_v0 = vadd.f32 %v1663_v4, %v9368_v20  ;;  %v8356_v4 = vld [vmem:[#allocation2 + $0xf4] sm:$0xf0] }
 0x1f3   :  { %v1929_v17 = vadd.f32 %v1928_v37, %v1840_v49  ;;  %v7532_v49 = vor.u32 %v8420_v41, %v7531_v43 }
 0x1f4   :  { %v1753_v51 = vadd.f32 %v1752_v53, %v1664_v0  ;;  %v7659_v53 = vld [vmem:[#allocation2 + $0x3e8] sm:$0xf]  ;;  %v8452_v0 = vld [vmem:[#allocation2 + $0x3f4] sm:$0xf0] }
 0x1f5   :  { %v3091_v35 = vmax.f32 %v1929_v17, 0.0  ;;  %v7276_v17 = vor.u32 %v8356_v4, %v7275_v3  ;;  %2517 = vmatpush.bf16.msrb.mxu2 %v7532_v49 }
 0x1f7   :  { %2339 = vmatpush.bf16.msrb.mxu0 %v7276_v17 }
 0x1f8   :  { %v1841_v58 = vpop.f32.mrf.mxu2 }
 0x1f9   :  { %v1930_v34 = vpop.f32.mrf.mxu3  ;;  %v1842_v40 = vadd.f32 %v1841_v58, %v1753_v51  ;;  %v1666_v39 = vpop.f32.mrf.mxu0 }
 0x1fa   :  { %v1755_v55 = vpop.f32.mrf.mxu1  ;;  %v1667_v36 = vadd.f32 %v1666_v39, %v9368_v20 }
 0x1fb   :  { %v1931_v61 = vadd.f32 %v1930_v34, %v1842_v40  ;;  %v7660_v40 = vor.u32 %v8452_v0, %v7659_v53 }
 0x1fc   :  { %v1756_v33 = vadd.f32 %v1755_v55, %v1667_v36  ;;  %1705 = vmatmul.bf16.gmra.mxu0 %v9338_v18  ;;  %1794 = vmatmul.bf16.gmra.mxu1 %v9340_v25 }
 0x1fd   :  { %v3095_v8 = vmax.f32 %v1931_v61, 0.0  ;;  %1883 = vmatmul.bf16.gmra.mxu2 %v9348_v21  ;;  %2606 = vmatpush.bf16.msrb.mxu3 %v7660_v40  ;;  %v7403_v61 = vld [vmem:[#allocation2 + $0x1e8] sm:$0xf] }
 0x1fe   :  { %1972 = vmatmul.bf16.gmra.mxu3 %v9350_v2 }
 0x1ff   :  { %v9429_v24 = vpack.c.bf16 %v3095_v8, %v3091_v35  ;;  %v8388_v35 = vld [vmem:[#allocation2 + $0x1f4] sm:$0xf0] }
 0x200   :  { %v1844_v26 = vpop.f32.mrf.mxu2  ;;  %v7404_v8 = vor.u32 %v8388_v35, %v7403_v61 }
 0x201   :  { %10935 = vst [vmem:[#allocation42_spill] sm:$0xff] %v9429_v24  ;;  %v1933_v37 = vpop.f32.mrf.mxu3  ;;  %v1845_v51 = vadd.f32 %v1844_v26, %v1756_v33  ;;  %v1668_v58 = vpop.f32.mrf.mxu0 }
 0x202   :  { %v1757_v34 = vpop.f32.mrf.mxu1  ;;  %v1669_v39 = vadd.f32 %v1668_v58, %v9368_v20  ;;  %2428 = vmatpush.bf16.msrb.mxu1 %v7404_v8 }
 0x203   :  { %v1934_v55 = vadd.f32 %v1933_v37, %v1845_v51 }
 0x204   :  { %v1758_v36 = vadd.f32 %v1757_v34, %v1669_v39 }
 0x205   :  { %v3099_v37 = vmax.f32 %v1934_v55, 0.0 }
 0x208   :  { %v1846_v24 = vpop.f32.mrf.mxu2 }
 0x209   :  { %v1935_v43 = vpop.f32.mrf.mxu3  ;;  %v1847_v41 = vadd.f32 %v1846_v24, %v1758_v36  ;;  %v1671_v52 = vpop.f32.mrf.mxu0 }
 0x20a   :  { %v1760_v33 = vpop.f32.mrf.mxu1  ;;  %v1672_v26 = vadd.f32 %v1671_v52, %v9368_v20 }
 0x20b   :  { %v1936_v3 = vadd.f32 %v1935_v43, %v1847_v41 }
 0x20c   :  { %v1761_v4 = vadd.f32 %v1760_v33, %v1672_v26  ;;  %1710 = vmatmul.bf16.gmra.mxu0 %v9363_v50  ;;  %1799 = vmatmul.bf16.gmra.mxu1 %v9365_v12 }
 0x20d   :  { %v3103_v49 = vmax.f32 %v1936_v3, 0.0  ;;  %1888 = vmatmul.bf16.gmra.mxu2 %v9377_v59 }
 0x20e   :  { %1977 = vmatmul.bf16.gmra.mxu3 %v9379_v60 }
 0x20f   :  { %v9437_v53 = vpack.c.bf16 %v3103_v49, %v3099_v37  ;;  %v8416_v37 = vld [vmem:[#allocation2 + $0x2d4] sm:$0xf0]  ;;  %v7259_v49 = vld [vmem:[#allocation2 + $0xc8] sm:$0xf] }
 0x210   :  { %v1849_v0 = vpop.f32.mrf.mxu2 }
 0x211   :  { %10936 = vst [vmem:[#allocation43_spill] sm:$0xff] %v9437_v53  ;;  %v1938_v24 = vpop.f32.mrf.mxu3  ;;  %v1850_v51 = vadd.f32 %v1849_v0, %v1761_v4  ;;  %v1673_v58 = vpop.f32.mrf.mxu0  ;;  %v7515_v4 = vld [vmem:[#allocation2 + $0x2c8] sm:$0xf] }
 0x212   :  { %v1762_v34 = vpop.f32.mrf.mxu1  ;;  %v1674_v52 = vadd.f32 %v1673_v58, %v9368_v20  ;;  %v8352_v58 = vld [vmem:[#allocation2 + $0xd4] sm:$0xf0] }
 0x213   :  { %v1939_v17 = vadd.f32 %v1938_v24, %v1850_v51  ;;  %v7516_v51 = vor.u32 %v8416_v37, %v7515_v4 }
 0x214   :  { %v1763_v40 = vadd.f32 %v1762_v34, %v1674_v52  ;;  %v7643_v34 = vld [vmem:[#allocation2 + $0x3c8] sm:$0xf]  ;;  %v8448_v52 = vld [vmem:[#allocation2 + $0x3d4] sm:$0xf0] }
 0x215   :  { %v3107_v33 = vmax.f32 %v1939_v17, 0.0  ;;  %v7260_v17 = vor.u32 %v8352_v58, %v7259_v49  ;;  %2518 = vmatpush.bf16.msrb.mxu2 %v7516_v51 }
 0x217   :  { %2340 = vmatpush.bf16.msrb.mxu0 %v7260_v17 }
 0x218   :  { %v1851_v39 = vpop.f32.mrf.mxu2 }
 0x219   :  { %v1940_v36 = vpop.f32.mrf.mxu3  ;;  %v1852_v61 = vadd.f32 %v1851_v39, %v1763_v40  ;;  %v1676_v55 = vpop.f32.mrf.mxu0 }
 0x21a   :  { %v1765_v35 = vpop.f32.mrf.mxu1  ;;  %v1677_v8 = vadd.f32 %v1676_v55, %v9368_v20 }
 0x21b   :  { %v1941_v43 = vadd.f32 %v1940_v36, %v1852_v61  ;;  %v7644_v61 = vor.u32 %v8448_v52, %v7643_v34 }
 0x21c   :  { %v1766_v41 = vadd.f32 %v1765_v35, %v1677_v8  ;;  %1991 = vmatmul.bf16.vlgmr.msra.gmra.mxu0 %v9037_v62  ;;  %2080 = vmatmul.bf16.vlgmr.msra.gmra.mxu1 %v9039_v63 }
 0x21d   :  { %v3111_v26 = vmax.f32 %v1941_v43, 0.0  ;;  %2169 = vmatmul.bf16.vlgmr.msra.gmra.mxu2 %v9050_v13  ;;  %2607 = vmatpush.bf16.msrb.mxu3 %v7644_v61  ;;  %v7387_v43 = vld [vmem:[#allocation2 + $0x1c8] sm:$0xf] }
 0x21e   :  { %2258 = vmatmul.bf16.vlgmr.msra.gmra.mxu3 %v9052_v14 }
 0x21f   :  { %v9445_v3 = vpack.c.bf16 %v3111_v26, %v3107_v33  ;;  %v8384_v33 = vld [vmem:[#allocation2 + $0x1d4] sm:$0xf0] }
 0x220   :  { %v1854_v0 = vpop.f32.mrf.mxu2  ;;  %v7388_v26 = vor.u32 %v8384_v33, %v7387_v43 }
 0x221   :  { %10937 = vst [vmem:[#allocation44_spill] sm:$0xff] %v9445_v3  ;;  %v1943_v24 = vpop.f32.mrf.mxu3  ;;  %v1855_v40 = vadd.f32 %v1854_v0, %v1766_v41  ;;  %v1678_v39 = vpop.f32.mrf.mxu0 }
 0x222   :  { %v1767_v36 = vpop.f32.mrf.mxu1  ;;  %v1679_v55 = vadd.f32 %v1678_v39, %v9368_v20  ;;  %2429 = vmatpush.bf16.msrb.mxu1 %v7388_v26 }
 0x223   :  { %v1944_v35 = vadd.f32 %v1943_v24, %v1855_v40 }
 0x224   :  { %v1768_v8 = vadd.f32 %v1767_v36, %v1679_v55 }
 0x225   :  { %v3115_v24 = vmax.f32 %v1944_v35, 0.0 }
 0x228   :  { %v1856_v3 = vpop.f32.mrf.mxu2 }
 0x229   :  { %v1945_v4 = vpop.f32.mrf.mxu3  ;;  %v1857_v37 = vadd.f32 %v1856_v3, %v1768_v8  ;;  %v1681_v53 = vpop.f32.mrf.mxu0 }
 0x22a   :  { %v1770_v41 = vpop.f32.mrf.mxu1  ;;  %v1682_v0 = vadd.f32 %v1681_v53, %v9368_v20 }
 0x22b   :  { %v1946_v49 = vadd.f32 %v1945_v4, %v1857_v37 }
 0x22c   :  { %v1771_v58 = vadd.f32 %v1770_v41, %v1682_v0  ;;  %1996 = vmatmul.bf16.gmra.mxu0 %v9060_v27  ;;  %2085 = vmatmul.bf16.gmra.mxu1 %v9062_v28 }
 0x22d   :  { %v3119_v51 = vmax.f32 %v1946_v49, 0.0  ;;  %2174 = vmatmul.bf16.gmra.mxu2 %v9073_v44  ;;  %v10939_v49 = vld [vmem:[#allocation12_spill] sm:$0xff] }
 0x22e   :  { %2263 = vmatmul.bf16.gmra.mxu3 %v9075_v45 }
 0x22f   :  { %v9453_v34 = vpack.c.bf16 %v3119_v51, %v3115_v24  ;;  %v7499_v24 = vld [vmem:[#allocation2 + $0x2a8] sm:$0xf]  ;;  %v8412_v51 = vld [vmem:[#allocation2 + $0x2b4] sm:$0xf0] }
 0x230   :  { %v1859_v52 = vpop.f32.mrf.mxu2 }
 0x231   :  { %10938 = vst [vmem:[#allocation45_spill] sm:$0xff] %v9453_v34  ;;  %v1948_v3 = vpop.f32.mrf.mxu3  ;;  %v1860_v40 = vadd.f32 %v1859_v52, %v1771_v58  ;;  %v1683_v39 = vpop.f32.mrf.mxu0  ;;  %v7243_v52 = vld [vmem:[#allocation2 + $0xa8] sm:$0xf] }
 0x232   :  { %v1772_v36 = vpop.f32.mrf.mxu1  ;;  %v1684_v53 = vadd.f32 %v1683_v39, %v9368_v20  ;;  %v7500_v39 = vor.u32 %v8412_v51, %v7499_v24 }
 0x233   :  { %v1949_v17 = vadd.f32 %v1948_v3, %v1860_v40 }
 0x234   :  { %v1773_v61 = vadd.f32 %v1772_v36, %v1684_v53  ;;  %v8348_v36 = vld [vmem:[#allocation2 + $0xb4] sm:$0xf0]  ;;  %v7627_v53 = vld [vmem:[#allocation2 + $0x3a8] sm:$0xf]  ;;  %2519 = vmatpush.bf16.msrb.mxu2 %v7500_v39  ;;  %v10942_v39 = vld [vmem:[#allocation14_spill] sm:$0xff] }
 0x235   :  { %v3123_v41 = vmax.f32 %v1949_v17, 0.0  ;;  %v7244_v17 = vor.u32 %v8348_v36, %v7243_v52 }
 0x237   :  { %2341 = vmatpush.bf16.msrb.mxu0 %v7244_v17 }
 0x238   :  { %v1861_v55 = vpop.f32.mrf.mxu2 }
 0x239   :  { %v1950_v8 = vpop.f32.mrf.mxu3  ;;  %v1862_v43 = vadd.f32 %v1861_v55, %v1773_v61  ;;  %v1686_v35 = vpop.f32.mrf.mxu0  ;;  %v8444_v61 = vld [vmem:[#allocation2 + $0x3b4] sm:$0xf0] }
 0x23a   :  { %v1775_v33 = vpop.f32.mrf.mxu1  ;;  %v1687_v26 = vadd.f32 %v1686_v35, %v9368_v20  ;;  %v7628_v35 = vor.u32 %v8444_v61, %v7627_v53  ;;  %v10941_v53 = vld [vmem:[#allocation13_spill] sm:$0xff] }
 0x23b   :  { %v1951_v4 = vadd.f32 %v1950_v8, %v1862_v43 }
 0x23c   :  { %v1776_v37 = vadd.f32 %v1775_v33, %v1687_v26  ;;  %2001 = vmatmul.bf16.gmra.mxu0 %v9083_v10  ;;  %2090 = vmatmul.bf16.gmra.mxu1 %v9085_v11 }
 0x23d   :  { %v3127_v0 = vmax.f32 %v1951_v4, 0.0  ;;  %2179 = vmatmul.bf16.gmra.mxu2 %v9096_v29  ;;  %2608 = vmatpush.bf16.msrb.mxu3 %v7628_v35 }
 0x23e   :  { %2268 = vmatmul.bf16.gmra.mxu3 %v10939_v49 }
 0x23f   :  { %v9461_v58 = vpack.c.bf16 %v3127_v0, %v3123_v41  ;;  %v7371_v41 = vld [vmem:[#allocation2 + $0x1a8] sm:$0xf]  ;;  %v8380_v0 = vld [vmem:[#allocation2 + $0x1b4] sm:$0xf0] }
 0x240   :  { %v1864_v3 = vpop.f32.mrf.mxu2 }
 0x241   :  { %10940 = vst [vmem:[#allocation46_spill] sm:$0xff] %v9461_v58  ;;  %v1953_v40 = vpop.f32.mrf.mxu3  ;;  %v1865_v55 = vadd.f32 %v1864_v3, %v1776_v37  ;;  %v1688_v8 = vpop.f32.mrf.mxu0  ;;  %v7372_v58 = vor.u32 %v8380_v0, %v7371_v41 }
 0x242   :  { %v1777_v43 = vpop.f32.mrf.mxu1  ;;  %v1689_v33 = vadd.f32 %v1688_v8, %v9368_v20  ;;  %v10944_v8 = vld [vmem:[#allocation16_spill] sm:$0xff] }
 0x243   :  { %v1954_v26 = vadd.f32 %v1953_v40, %v1865_v55  ;;  %2430 = vmatpush.bf16.msrb.mxu1 %v7372_v58  ;;  %v10943_v55 = vld [vmem:[#allocation15_spill] sm:$0xff] }
 0x244   :  { %v1778_v4 = vadd.f32 %v1777_v43, %v1689_v33 }
 0x245   :  { %v3131_v40 = vmax.f32 %v1954_v26, 0.0 }
 0x248   :  { %v1866_v34 = vpop.f32.mrf.mxu2 }
 0x249   :  { %v1955_v24 = vpop.f32.mrf.mxu3  ;;  %v1867_v51 = vadd.f32 %v1866_v34, %v1778_v4  ;;  %v1691_v49 = vpop.f32.mrf.mxu0 }
 0x24a   :  { %v1780_v37 = vpop.f32.mrf.mxu1  ;;  %v1692_v3 = vadd.f32 %v1691_v49, %v9368_v20 }
 0x24b   :  { %v1956_v52 = vadd.f32 %v1955_v24, %v1867_v51 }
 0x24c   :  { %v1781_v36 = vadd.f32 %v1780_v37, %v1692_v3  ;;  %2006 = vmatmul.bf16.gmra.mxu0 %v10941_v53  ;;  %2095 = vmatmul.bf16.gmra.mxu1 %v10942_v39 }
 0x24d   :  { %v3135_v61 = vmax.f32 %v1956_v52, 0.0  ;;  %2184 = vmatmul.bf16.gmra.mxu2 %v10943_v55 }
 0x24e   :  { %2273 = vmatmul.bf16.gmra.mxu3 %v10944_v8 }
 0x24f   :  { %v9469_v43 = vpack.c.bf16 %v3135_v61, %v3131_v40  ;;  %v10946_v40 = vld [vmem:[#allocation17_spill] sm:$0xff]  ;;  %v10947_v61 = vld [vmem:[#allocation18_spill] sm:$0xff] }
 0x250   :  { %v1869_v58 = vpop.f32.mrf.mxu2 }
 0x251   :  { %10945 = vst [vmem:[#allocation47_spill] sm:$0xff] %v9469_v43  ;;  %v1958_v34 = vpop.f32.mrf.mxu3  ;;  %v1870_v17 = vadd.f32 %v1869_v58, %v1781_v36  ;;  %v1693_v35 = vpop.f32.mrf.mxu0  ;;  %v10948_v43 = vld [vmem:[#allocation19_spill] sm:$0xff] }
 0x252   :  { %v1782_v33 = vpop.f32.mrf.mxu1  ;;  %v1694_v49 = vadd.f32 %v1693_v35, %v9368_v20  ;;  %v10949_v35 = vld [vmem:[#allocation20_spill] sm:$0xff] }
 0x253   :  { %v1959_v4 = vadd.f32 %v1958_v34, %v1870_v17  ;;  %v7483_v17 = vld [vmem:[#allocation2 + $0x288] sm:$0xf] }
 0x254   :  { %v1783_v41 = vadd.f32 %v1782_v33, %v1694_v49  ;;  %v8408_v33 = vld [vmem:[#allocation2 + $0x294] sm:$0xf0]  ;;  %v7227_v49 = vld [vmem:[#allocation2 + $0x88] sm:$0xf] }
 0x255   :  { %v3139_v36 = vmax.f32 %v1959_v4, 0.0 }
 0x258   :  { %v1871_v0 = vpop.f32.mrf.mxu2 }
 0x259   :  { %v1960_v24 = vpop.f32.mrf.mxu3  ;;  %v1872_v51 = vadd.f32 %v1871_v0, %v1783_v41  ;;  %v1696_v26 = vpop.f32.mrf.mxu0 }
 0x25a   :  { %v1785_v37 = vpop.f32.mrf.mxu1  ;;  %v1697_v3 = vadd.f32 %v1696_v26, %v9368_v20  ;;  %v7484_v26 = vor.u32 %v8408_v33, %v7483_v17 }
 0x25b   :  { %v1961_v52 = vadd.f32 %v1960_v24, %v1872_v51  ;;  %v8344_v24 = vld [vmem:[#allocation2 + $0x94] sm:$0xf0]  ;;  %v7611_v51 = vld [vmem:[#allocation2 + $0x388] sm:$0xf] }
 0x25c   :  { %v1786_v8 = vadd.f32 %v1785_v37, %v1697_v3  ;;  %2011 = vmatmul.bf16.gmra.mxu0 %v10946_v40  ;;  %2100 = vmatmul.bf16.gmra.mxu1 %v10947_v61  ;;  %v8440_v37 = vld [vmem:[#allocation2 + $0x394] sm:$0xf0]  ;;  %v7228_v4 = vor.u32 %v8344_v24, %v7227_v49 }
 0x25d   :  { %v3143_v58 = vmax.f32 %v1961_v52, 0.0  ;;  %2189 = vmatmul.bf16.gmra.mxu2 %v10948_v43  ;;  %v7612_v52 = vor.u32 %v8440_v37, %v7611_v51  ;;  %v10951_v51 = vld [vmem:[#allocation21_spill] sm:$0xff] }
 0x25e   :  { %2278 = vmatmul.bf16.gmra.mxu3 %v10949_v35  ;;  %2520 = vmatpush.bf16.msrb.mxu2 %v7484_v26 }
 0x25f   :  { %v9477_v34 = vpack.c.bf16 %v3143_v58, %v3139_v36  ;;  %2342 = vmatpush.bf16.msrb.mxu0 %v7228_v4  ;;  %2609 = vmatpush.bf16.msrb.mxu3 %v7612_v52  ;;  %v7355_v58 = vld [vmem:[#allocation2 + $0x188] sm:$0xf] }
 0x260   :  { %v1874_v41 = vpop.f32.mrf.mxu2 }
 0x261   :  { %10950 = vst [vmem:[#allocation48_spill] sm:$0xff] %v9477_v34  ;;  %v1963_v0 = vpop.f32.mrf.mxu3  ;;  %v1875_v3 = vadd.f32 %v1874_v41, %v1786_v8  ;;  %v1698_v40 = vpop.f32.mrf.mxu0  ;;  %v8376_v34 = vld [vmem:[#allocation2 + $0x194] sm:$0xf0] }
 0x262   :  { %v1787_v61 = vpop.f32.mrf.mxu1  ;;  %v1699_v43 = vadd.f32 %v1698_v40, %v9368_v20  ;;  %v7356_v55 = vor.u32 %v8376_v34, %v7355_v58  ;;  %v10952_v40 = vld [vmem:[#allocation22_spill] sm:$0xff] }
 0x263   :  { %v1964_v35 = vadd.f32 %v1963_v0, %v1875_v3 }
 0x264   :  { %v1788_v36 = vadd.f32 %v1787_v61, %v1699_v43  ;;  %2431 = vmatpush.bf16.msrb.mxu1 %v7356_v55  ;;  %v10953_v43 = vld [vmem:[#allocation23_spill] sm:$0xff]  ;;  %v10954_v61 = vld [vmem:[#allocation24_spill] sm:$0xff] }
 0x265   :  { %v3147_v0 = vmax.f32 %v1964_v35, 0.0 }
 0x268   :  { %v1876_v39 = vpop.f32.mrf.mxu2 }
 0x269   :  { %v1965_v17 = vpop.f32.mrf.mxu3  ;;  %v1877_v33 = vadd.f32 %v1876_v39, %v1788_v36  ;;  %v1701_v53 = vpop.f32.mrf.mxu0 }
 0x26a   :  { %v1790_v8 = vpop.f32.mrf.mxu1  ;;  %v1702_v41 = vadd.f32 %v1701_v53, %v9368_v20 }
 0x26b   :  { %v1966_v49 = vadd.f32 %v1965_v17, %v1877_v33 }
 0x26c   :  { %v1791_v24 = vadd.f32 %v1790_v8, %v1702_v41  ;;  %2016 = vmatmul.bf16.gmra.mxu0 %v10951_v51  ;;  %2105 = vmatmul.bf16.gmra.mxu1 %v10952_v40 }
 0x26d   :  { %v3151_v26 = vmax.f32 %v1966_v49, 0.0  ;;  %2194 = vmatmul.bf16.gmra.mxu2 %v10953_v43 }
 0x26e   :  { %2283 = vmatmul.bf16.gmra.mxu3 %v10954_v61 }
 0x26f   :  { %v9485_v34 = vpack.c.bf16 %v3151_v26, %v3147_v0  ;;  %v10956_v0 = vld [vmem:[#allocation25_spill] sm:$0xff]  ;;  %v10957_v26 = vld [vmem:[#allocation26_spill] sm:$0xff] }
 0x270   :  { %v1879_v55 = vpop.f32.mrf.mxu2 }
 0x271   :  { %10955 = vst [vmem:[#allocation49_spill] sm:$0xff] %v9485_v34  ;;  %v1968_v39 = vpop.f32.mrf.mxu3  ;;  %v1880_v37 = vadd.f32 %v1879_v55, %v1791_v24  ;;  %v1703_v3 = vpop.f32.mrf.mxu0  ;;  %v10958_v34 = vld [vmem:[#allocation27_spill] sm:$0xff] }
 0x272   :  { %v1792_v4 = vpop.f32.mrf.mxu1  ;;  %v1704_v53 = vadd.f32 %v1703_v3, %v9368_v20  ;;  %v10959_v3 = vld [vmem:[#allocation28_spill] sm:$0xff] }
 0x273   :  { %v1969_v52 = vadd.f32 %v1968_v39, %v1880_v37  ;;  %v7467_v37 = vld [vmem:[#allocation2 + $0x268] sm:$0xf] }
 0x274   :  { %v1793_v36 = vadd.f32 %v1792_v4, %v1704_v53  ;;  %v8404_v4 = vld [vmem:[#allocation2 + $0x274] sm:$0xf0]  ;;  %v7211_v53 = vld [vmem:[#allocation2 + $0x68] sm:$0xf] }
 0x275   :  { %v3155_v24 = vmax.f32 %v1969_v52, 0.0 }
 0x278   :  { %v1881_v58 = vpop.f32.mrf.mxu2 }
 0x279   :  { %v1970_v17 = vpop.f32.mrf.mxu3  ;;  %v1882_v33 = vadd.f32 %v1881_v58, %v1793_v36  ;;  %v1706_v35 = vpop.f32.mrf.mxu0 }
 0x27a   :  { %v1795_v8 = vpop.f32.mrf.mxu1  ;;  %v1707_v41 = vadd.f32 %v1706_v35, %v9368_v20  ;;  %v7468_v35 = vor.u32 %v8404_v4, %v7467_v37 }
 0x27b   :  { %v1971_v49 = vadd.f32 %v1970_v17, %v1882_v33  ;;  %v8340_v17 = vld [vmem:[#allocation2 + $0x74] sm:$0xf0]  ;;  %v7595_v33 = vld [vmem:[#allocation2 + $0x368] sm:$0xf] }
 0x27c   :  { %v1796_v61 = vadd.f32 %v1795_v8, %v1707_v41  ;;  %2021 = vmatmul.bf16.gmra.mxu0 %v10956_v0  ;;  %2110 = vmatmul.bf16.gmra.mxu1 %v10957_v26  ;;  %v8436_v8 = vld [vmem:[#allocation2 + $0x374] sm:$0xf0]  ;;  %v7212_v52 = vor.u32 %v8340_v17, %v7211_v53 }
 0x27d   :  { %v3159_v55 = vmax.f32 %v1971_v49, 0.0  ;;  %2199 = vmatmul.bf16.gmra.mxu2 %v10958_v34  ;;  %v7596_v49 = vor.u32 %v8436_v8, %v7595_v33 }
 0x27e   :  { %2288 = vmatmul.bf16.gmra.mxu3 %v10959_v3  ;;  %2521 = vmatpush.bf16.msrb.mxu2 %v7468_v35 }
 0x27f   :  { %v9493_v39 = vpack.c.bf16 %v3159_v55, %v3155_v24  ;;  %2343 = vmatpush.bf16.msrb.mxu0 %v7212_v52  ;;  %2610 = vmatpush.bf16.msrb.mxu3 %v7596_v49  ;;  %v7339_v55 = vld [vmem:[#allocation2 + $0x168] sm:$0xf] }
 0x280   :  { %v1884_v36 = vpop.f32.mrf.mxu2 }
 0x281   :  { %10960 = vst [vmem:[#allocation50_spill] sm:$0xff] %v9493_v39  ;;  %v1973_v58 = vpop.f32.mrf.mxu3  ;;  %v1885_v41 = vadd.f32 %v1884_v36, %v1796_v61  ;;  %v1708_v0 = vpop.f32.mrf.mxu0  ;;  %v8372_v39 = vld [vmem:[#allocation2 + $0x174] sm:$0xf0] }
 0x282   :  { %v1797_v26 = vpop.f32.mrf.mxu1  ;;  %v1709_v34 = vadd.f32 %v1708_v0, %v9368_v20  ;;  %v7340_v43 = vor.u32 %v8372_v39, %v7339_v55  ;;  %v10961_v0 = vld [vmem:[#allocation29_spill] sm:$0xff] }
 0x283   :  { %v1974_v3 = vadd.f32 %v1973_v58, %v1885_v41 }
 0x284   :  { %v1798_v24 = vadd.f32 %v1797_v26, %v1709_v34  ;;  %2432 = vmatpush.bf16.msrb.mxu1 %v7340_v43  ;;  %v10962_v34 = vld [vmem:[#allocation30_spill] sm:$0xff]  ;;  %v10963_v26 = vld [vmem:[#allocation31_spill] sm:$0xff] }
 0x285   :  { %v3163_v58 = vmax.f32 %v1974_v3, 0.0 }
 0x288   :  { %v1886_v40 = vpop.f32.mrf.mxu2 }
 0x289   :  { %v1975_v37 = vpop.f32.mrf.mxu3  ;;  %v1887_v4 = vadd.f32 %v1886_v40, %v1798_v24  ;;  %v1711_v51 = vpop.f32.mrf.mxu0  ;;  %v10965_v24 = vld [vmem:[#allocation36_spill] sm:$0xff] }
 0x28a   :  { %v1800_v61 = vpop.f32.mrf.mxu1  ;;  %v1712_v36 = vadd.f32 %v1711_v51, %v9368_v20  ;;  %v9505_v55 = vperm.slane %v10965_v24, 1 }
 0x28b   :  { %v1976_v53 = vadd.f32 %v1975_v37, %v1887_v4 }
 0x28c   :  { %v1801_v17 = vadd.f32 %v1800_v61, %v1712_v36  ;;  %2026 = vmatmul.bf16.gmra.mxu0 %v9198_v7  ;;  %2115 = vmatmul.bf16.gmra.mxu1 %v10961_v0 }
 0x28d   :  { %v3167_v35 = vmax.f32 %v1976_v53, 0.0  ;;  %2204 = vmatmul.bf16.gmra.mxu2 %v10962_v34 }
 0x28e   :  { %2293 = vmatmul.bf16.gmra.mxu3 %v10963_v26 }
 0x28f   :  { %v9501_v39 = vpack.c.bf16 %v3167_v35, %v3163_v58 }
 0x290   :  { %v1889_v43 = vpop.f32.mrf.mxu2 }
 0x291   :  { %10964 = vst [vmem:[#allocation51_spill] sm:$0xff] %v9501_v39  ;;  %v1978_v40 = vpop.f32.mrf.mxu3  ;;  %v1890_v33 = vadd.f32 %v1889_v43, %v1801_v17  ;;  %v1713_v8 = vpop.f32.mrf.mxu0  ;;  %v10966_v39 = vld [vmem:[#allocation32_spill] sm:$0xff]  ;;  %v10967_v17 = vld [vmem:[#allocation33_spill] sm:$0xff] }
 0x292   :  { %v1802_v41 = vpop.f32.mrf.mxu1  ;;  %v1714_v51 = vadd.f32 %v1713_v8, %v9368_v20 }
 0x293   :  { %v1979_v52 = vadd.f32 %v1978_v40, %v1890_v33  ;;  %v10968_v40 = vld [vmem:[#allocation34_spill] sm:$0xff]  ;;  %v10969_v33 = vld [vmem:[#allocation35_spill] sm:$0xff] }
 0x294   :  { %v1803_v49 = vadd.f32 %v1802_v41, %v1714_v51  ;;  %v7451_v41 = vld [vmem:[#allocation2 + $0x248] sm:$0xf]  ;;  %v8400_v51 = vld [vmem:[#allocation2 + $0x254] sm:$0xf0] }
 0x295   :  { %v3171_v43 = vmax.f32 %v1979_v52, 0.0 }
 0x298   :  { %v1891_v3 = vpop.f32.mrf.mxu2 }
 0x299   :  { %v1980_v37 = vpop.f32.mrf.mxu3  ;;  %v1892_v4 = vadd.f32 %v1891_v3, %v1803_v49  ;;  %v1992_v61 = vpop.f32.mrf.mxu0  ;;  %v7195_v49 = vld [vmem:[#allocation2 + $0x48] sm:$0xf] }
 0x29a   :  { %v2081_v36 = vpop.f32.mrf.mxu1  ;;  %v1993_v53 = vadd.f32 %v1992_v61, %v9505_v55  ;;  %v7452_v61 = vor.u32 %v8400_v51, %v7451_v41 }
 0x29b   :  { %v1981_v58 = vadd.f32 %v1980_v37, %v1892_v4  ;;  %v8336_v37 = vld [vmem:[#allocation2 + $0x54] sm:$0xf0]  ;;  %v7579_v4 = vld [vmem:[#allocation2 + $0x348] sm:$0xf] }
 0x29c   :  { %v2082_v35 = vadd.f32 %v2081_v36, %v1993_v53  ;;  %2031 = vmatmul.bf16.gmra.mxu0 %v10966_v39  ;;  %2120 = vmatmul.bf16.gmra.mxu1 %v10967_v17  ;;  %v8432_v36 = vld [vmem:[#allocation2 + $0x354] sm:$0xf0]  ;;  %v7196_v52 = vor.u32 %v8336_v37, %v7195_v49 }
 0x29d   :  { %v3175_v20 = vmax.f32 %v1981_v58, 0.0  ;;  %2209 = vmatmul.bf16.gmra.mxu2 %v10968_v40  ;;  %v7580_v58 = vor.u32 %v8432_v36, %v7579_v4 }
 0x29e   :  { %2298 = vmatmul.bf16.gmra.mxu3 %v10969_v33  ;;  %2522 = vmatpush.bf16.msrb.mxu2 %v7452_v61 }
 0x29f   :  { %v9512_v8 = vpack.c.bf16 %v3175_v20, %v3171_v43  ;;  %2344 = vmatpush.bf16.msrb.mxu0 %v7196_v52  ;;  %2611 = vmatpush.bf16.msrb.mxu3 %v7580_v58  ;;  %v7323_v20 = vld [vmem:[#allocation2 + $0x148] sm:$0xf] }
 0x2a0   :  { %v2170_v24 = vpop.f32.mrf.mxu2 }
 0x2a1   :  { %10970 = vst [vmem:[#allocation36_spill] sm:$0xff] %v9512_v8  ;;  %v2259_v3 = vpop.f32.mrf.mxu3  ;;  %v2171_v53 = vadd.f32 %v2170_v24, %v2082_v35  ;;  %v1994_v39 = vpop.f32.mrf.mxu0  ;;  %v8368_v8 = vld [vmem:[#allocation2 + $0x154] sm:$0xf0] }
 0x2a2   :  { %v2083_v17 = vpop.f32.mrf.mxu1  ;;  %v1995_v40 = vadd.f32 %v1994_v39, %v9505_v55  ;;  %v7324_v26 = vor.u32 %v8368_v8, %v7323_v20 }
 0x2a3   :  { %v2260_v33 = vadd.f32 %v2259_v3, %v2171_v53 }
 0x2a4   :  { %v2084_v43 = vadd.f32 %v2083_v17, %v1995_v40  ;;  %2433 = vmatpush.bf16.msrb.mxu1 %v7324_v26 }
 0x2a5   :  { %v3052_v39 = vmax.f32 %v2260_v33, 0.0 }
 0x2a8   :  { %v2172_v34 = vpop.f32.mrf.mxu2 }
 0x2a9   :  { %v2261_v41 = vpop.f32.mrf.mxu3  ;;  %v2173_v51 = vadd.f32 %v2172_v34, %v2084_v43  ;;  %v1997_v0 = vpop.f32.mrf.mxu0 }
 0x2aa   :  { %v2086_v35 = vpop.f32.mrf.mxu1  ;;  %v1998_v24 = vadd.f32 %v1997_v0, %v9505_v55 }
 0x2ab   :  { %v2262_v49 = vadd.f32 %v2261_v41, %v2173_v51 }
 0x2ac   :  { %v2087_v37 = vadd.f32 %v2086_v35, %v1998_v24  ;;  %2036 = vmatmul.bf16.gmra.mxu0 %v9238_v31  ;;  %2125 = vmatmul.bf16.gmra.mxu1 %v9240_v32 }
 0x2ad   :  { %v3056_v3 = vmax.f32 %v2262_v49, 0.0  ;;  %2214 = vmatmul.bf16.gmra.mxu2 %v9248_v9 }
 0x2ae   :  { %2303 = vmatmul.bf16.gmra.mxu3 %v9250_v5 }
 0x2af   :  { %v9520_v17 = vpack.c.bf16 %v3056_v3, %v3052_v39  ;;  %v8396_v39 = vld [vmem:[#allocation2 + $0x234] sm:$0xf0]  ;;  %v7179_v3 = vld [vmem:[#allocation2 + $0x28] sm:$0xf] }
 0x2b0   :  { %v2175_v26 = vpop.f32.mrf.mxu2 }
 0x2b1   :  { %10971 = vst [vmem:[#allocation52_spill] sm:$0xff] %v9520_v17  ;;  %v2264_v34 = vpop.f32.mrf.mxu3  ;;  %v2176_v40 = vadd.f32 %v2175_v26, %v2087_v37  ;;  %v1999_v8 = vpop.f32.mrf.mxu0  ;;  %v7435_v37 = vld [vmem:[#allocation2 + $0x228] sm:$0xf] }
 0x2b2   :  { %v2088_v61 = vpop.f32.mrf.mxu1  ;;  %v2000_v0 = vadd.f32 %v1999_v8, %v9505_v55  ;;  %v8332_v8 = vld [vmem:[#allocation2 + $0x34] sm:$0xf0] }
 0x2b3   :  { %v2265_v4 = vadd.f32 %v2264_v34, %v2176_v40  ;;  %v7436_v40 = vor.u32 %v8396_v39, %v7435_v37 }
 0x2b4   :  { %v2089_v36 = vadd.f32 %v2088_v61, %v2000_v0  ;;  %v7563_v61 = vld [vmem:[#allocation2 + $0x328] sm:$0xf]  ;;  %v8428_v0 = vld [vmem:[#allocation2 + $0x334] sm:$0xf0] }
 0x2b5   :  { %v3060_v35 = vmax.f32 %v2265_v4, 0.0  ;;  %v7180_v4 = vor.u32 %v8332_v8, %v7179_v3  ;;  %2523 = vmatpush.bf16.msrb.mxu2 %v7436_v40 }
 0x2b7   :  { %2345 = vmatpush.bf16.msrb.mxu0 %v7180_v4 }
 0x2b8   :  { %v2177_v53 = vpop.f32.mrf.mxu2 }
 0x2b9   :  { %v2266_v52 = vpop.f32.mrf.mxu3  ;;  %v2178_v58 = vadd.f32 %v2177_v53, %v2089_v36  ;;  %v2002_v33 = vpop.f32.mrf.mxu0 }
 0x2ba   :  { %v2091_v43 = vpop.f32.mrf.mxu1  ;;  %v2003_v20 = vadd.f32 %v2002_v33, %v9505_v55 }
 0x2bb   :  { %v2267_v41 = vadd.f32 %v2266_v52, %v2178_v58  ;;  %v7564_v58 = vor.u32 %v8428_v0, %v7563_v61 }
 0x2bc   :  { %v2092_v51 = vadd.f32 %v2091_v43, %v2003_v20  ;;  %2041 = vmatmul.bf16.gmra.mxu0 %v9258_v22  ;;  %2130 = vmatmul.bf16.gmra.mxu1 %v9260_v56 }
 0x2bd   :  { %v3064_v24 = vmax.f32 %v2267_v41, 0.0  ;;  %2219 = vmatmul.bf16.gmra.mxu2 %v9268_v30  ;;  %2612 = vmatpush.bf16.msrb.mxu3 %v7564_v58  ;;  %v7307_v41 = vld [vmem:[#allocation2 + $0x128] sm:$0xf] }
 0x2be   :  { %2308 = vmatmul.bf16.gmra.mxu3 %v9270_v46 }
 0x2bf   :  { %v9528_v49 = vpack.c.bf16 %v3064_v24, %v3060_v35  ;;  %v8364_v35 = vld [vmem:[#allocation2 + $0x134] sm:$0xf0] }
 0x2c0   :  { %v2180_v26 = vpop.f32.mrf.mxu2  ;;  %v7308_v24 = vor.u32 %v8364_v35, %v7307_v41 }
 0x2c1   :  { %10972 = vst [vmem:[#allocation53_spill] sm:$0xff] %v9528_v49  ;;  %v2269_v34 = vpop.f32.mrf.mxu3  ;;  %v2181_v36 = vadd.f32 %v2180_v26, %v2092_v51  ;;  %v2004_v53 = vpop.f32.mrf.mxu0 }
 0x2c2   :  { %v2093_v52 = vpop.f32.mrf.mxu1  ;;  %v2005_v33 = vadd.f32 %v2004_v53, %v9505_v55  ;;  %2434 = vmatpush.bf16.msrb.mxu1 %v7308_v24 }
 0x2c3   :  { %v2270_v43 = vadd.f32 %v2269_v34, %v2181_v36 }
 0x2c4   :  { %v2094_v20 = vadd.f32 %v2093_v52, %v2005_v33 }
 0x2c5   :  { %v3068_v34 = vmax.f32 %v2270_v43, 0.0 }
 0x2c8   :  { %v2182_v49 = vpop.f32.mrf.mxu2 }
 0x2c9   :  { %v2271_v37 = vpop.f32.mrf.mxu3  ;;  %v2183_v39 = vadd.f32 %v2182_v49, %v2094_v20  ;;  %v2007_v17 = vpop.f32.mrf.mxu0 }
 0x2ca   :  { %v2096_v51 = vpop.f32.mrf.mxu1  ;;  %v2008_v26 = vadd.f32 %v2007_v17, %v9505_v55 }
 0x2cb   :  { %v2272_v3 = vadd.f32 %v2271_v37, %v2183_v39 }
 0x2cc   :  { %v2097_v8 = vadd.f32 %v2096_v51, %v2008_v26  ;;  %2046 = vmatmul.bf16.gmra.mxu0 %v9278_v1  ;;  %2135 = vmatmul.bf16.gmra.mxu1 %v9280_v6 }
 0x2cd   :  { %v3072_v40 = vmax.f32 %v2272_v3, 0.0  ;;  %2224 = vmatmul.bf16.gmra.mxu2 %v9288_v42 }
 0x2ce   :  { %2313 = vmatmul.bf16.gmra.mxu3 %v9290_v54 }
 0x2cf   :  { %v9536_v61 = vpack.c.bf16 %v3072_v40, %v3068_v34  ;;  %v8392_v34 = vld [vmem:[#allocation2 + $0x214] sm:$0xf0]  ;;  %v7163_v40 = vld [vmem:[#allocation2 + $0x8] sm:$0xf] }
 0x2d0   :  { %v2185_v0 = vpop.f32.mrf.mxu2 }
 0x2d1   :  { %10973 = vst [vmem:[#allocation54_spill] sm:$0xff] %v9536_v61  ;;  %v2274_v49 = vpop.f32.mrf.mxu3  ;;  %v2186_v36 = vadd.f32 %v2185_v0, %v2097_v8  ;;  %v2009_v53 = vpop.f32.mrf.mxu0  ;;  %v7419_v8 = vld [vmem:[#allocation2 + $0x208] sm:$0xf] }
 0x2d2   :  { %v2098_v52 = vpop.f32.mrf.mxu1  ;;  %v2010_v17 = vadd.f32 %v2009_v53, %v9505_v55  ;;  %v8328_v53 = vld [vmem:[#allocation2 + $0x14] sm:$0xf0] }
 0x2d3   :  { %v2275_v4 = vadd.f32 %v2274_v49, %v2186_v36  ;;  %v7420_v36 = vor.u32 %v8392_v34, %v7419_v8 }
 0x2d4   :  { %v2099_v58 = vadd.f32 %v2098_v52, %v2010_v17  ;;  %v7547_v52 = vld [vmem:[#allocation2 + $0x308] sm:$0xf]  ;;  %v8424_v17 = vld [vmem:[#allocation2 + $0x314] sm:$0xf0] }
 0x2d5   :  { %v3076_v51 = vmax.f32 %v2275_v4, 0.0  ;;  %v7164_v4 = vor.u32 %v8328_v53, %v7163_v40  ;;  %2524 = vmatpush.bf16.msrb.mxu2 %v7420_v36 }
 0x2d7   :  { %2346 = vmatpush.bf16.msrb.mxu0 %v7164_v4 }
 0x2d8   :  { %v2187_v33 = vpop.f32.mrf.mxu2 }
 0x2d9   :  { %v2276_v20 = vpop.f32.mrf.mxu3  ;;  %v2188_v41 = vadd.f32 %v2187_v33, %v2099_v58  ;;  %v2012_v43 = vpop.f32.mrf.mxu0 }
 0x2da   :  { %v2101_v35 = vpop.f32.mrf.mxu1  ;;  %v2013_v24 = vadd.f32 %v2012_v43, %v9505_v55 }
 0x2db   :  { %v2277_v37 = vadd.f32 %v2276_v20, %v2188_v41  ;;  %v7548_v41 = vor.u32 %v8424_v17, %v7547_v52 }
 0x2dc   :  { %v2102_v39 = vadd.f32 %v2101_v35, %v2013_v24  ;;  %2051 = vmatmul.bf16.gmra.mxu0 %v9298_v57  ;;  %2140 = vmatmul.bf16.gmra.mxu1 %v9300_v16 }
 0x2dd   :  { %v3080_v26 = vmax.f32 %v2277_v37, 0.0  ;;  %2229 = vmatmul.bf16.gmra.mxu2 %v9308_v47  ;;  %2613 = vmatpush.bf16.msrb.mxu3 %v7548_v41  ;;  %v7291_v37 = vld [vmem:[#allocation2 + $0x108] sm:$0xf] }
 0x2de   :  { %2318 = vmatmul.bf16.gmra.mxu3 %v9310_v23 }
 0x2df   :  { %v9544_v3 = vpack.c.bf16 %v3080_v26, %v3076_v51  ;;  %v8360_v51 = vld [vmem:[#allocation2 + $0x114] sm:$0xf0] }
 0x2e0   :  { %v2190_v0 = vpop.f32.mrf.mxu2  ;;  %v7292_v26 = vor.u32 %v8360_v51, %v7291_v37 }
 0x2e1   :  { %10974 = vst [vmem:[#allocation55_spill] sm:$0xff] %v9544_v3  ;;  %v2279_v49 = vpop.f32.mrf.mxu3  ;;  %v2191_v58 = vadd.f32 %v2190_v0, %v2102_v39  ;;  %v2014_v33 = vpop.f32.mrf.mxu0 }
 0x2e2   :  { %v2103_v20 = vpop.f32.mrf.mxu1  ;;  %v2015_v43 = vadd.f32 %v2014_v33, %v9505_v55  ;;  %2435 = vmatpush.bf16.msrb.mxu1 %v7292_v26 }
 0x2e3   :  { %v2280_v35 = vadd.f32 %v2279_v49, %v2191_v58 }
 0x2e4   :  { %v2104_v24 = vadd.f32 %v2103_v20, %v2015_v43 }
 0x2e5   :  { %v3084_v49 = vmax.f32 %v2280_v35, 0.0 }
 0x2e8   :  { %v2192_v3 = vpop.f32.mrf.mxu2 }
 0x2e9   :  { %v2281_v8 = vpop.f32.mrf.mxu3  ;;  %v2193_v34 = vadd.f32 %v2192_v3, %v2104_v24  ;;  %v2017_v61 = vpop.f32.mrf.mxu0 }
 0x2ea   :  { %v2106_v39 = vpop.f32.mrf.mxu1  ;;  %v2018_v0 = vadd.f32 %v2017_v61, %v9505_v55 }
 0x2eb   :  { %v2282_v40 = vadd.f32 %v2281_v8, %v2193_v34 }
 0x2ec   :  { %v2107_v53 = vadd.f32 %v2106_v39, %v2018_v0  ;;  %2056 = vmatmul.bf16.gmra.mxu0 %v9318_v15  ;;  %2145 = vmatmul.bf16.gmra.mxu1 %v9320_v38 }
 0x2ed   :  { %v3088_v36 = vmax.f32 %v2282_v40, 0.0  ;;  %2234 = vmatmul.bf16.gmra.mxu2 %v9328_v19 }
 0x2ee   :  { %2323 = vmatmul.bf16.gmra.mxu3 %v9330_v48 }
 0x2ef   :  { %v9552_v52 = vpack.c.bf16 %v3088_v36, %v3084_v49  ;;  %v7533_v49 = vld [vmem:[#allocation2 + $0x2f8] sm:$0xf0]  ;;  %v8354_v36 = vld [vmem:[#allocation2 + $0xec] sm:$0xf] }
 0x2f0   :  { %v2195_v17 = vpop.f32.mrf.mxu2 }
 0x2f1   :  { %10975 = vst [vmem:[#allocation56_spill] sm:$0xff] %v9552_v52  ;;  %v2284_v3 = vpop.f32.mrf.mxu3  ;;  %v2196_v58 = vadd.f32 %v2195_v17, %v2107_v53  ;;  %v2019_v33 = vpop.f32.mrf.mxu0  ;;  %v8418_v53 = vld [vmem:[#allocation2 + $0x2ec] sm:$0xf] }
 0x2f2   :  { %v2108_v20 = vpop.f32.mrf.mxu1  ;;  %v2020_v61 = vadd.f32 %v2019_v33, %v9505_v55  ;;  %v7277_v33 = vld [vmem:[#allocation2 + $0xf8] sm:$0xf0] }
 0x2f3   :  { %v2285_v4 = vadd.f32 %v2284_v3, %v2196_v58  ;;  %v7536_v58 = vor.u32 %v8418_v53, %v7533_v49 }
 0x2f4   :  { %v2109_v41 = vadd.f32 %v2108_v20, %v2020_v61  ;;  %v8450_v20 = vld [vmem:[#allocation2 + $0x3ec] sm:$0xf]  ;;  %v7661_v61 = vld [vmem:[#allocation2 + $0x3f8] sm:$0xf0] }
 0x2f5   :  { %v3092_v39 = vmax.f32 %v2285_v4, 0.0  ;;  %v7280_v4 = vor.u32 %v8354_v36, %v7277_v33  ;;  %2873 = vmatpush.bf16.msra.mxu2 %v7536_v58 }
 0x2f7   :  { %2695 = vmatpush.bf16.msra.mxu0 %v7280_v4 }
 0x2f8   :  { %v2197_v43 = vpop.f32.mrf.mxu2 }
 0x2f9   :  { %v2286_v24 = vpop.f32.mrf.mxu3  ;;  %v2198_v37 = vadd.f32 %v2197_v43, %v2109_v41  ;;  %v2022_v35 = vpop.f32.mrf.mxu0 }
 0x2fa   :  { %v2111_v51 = vpop.f32.mrf.mxu1  ;;  %v2023_v26 = vadd.f32 %v2022_v35, %v9505_v55 }
 0x2fb   :  { %v2287_v8 = vadd.f32 %v2286_v24, %v2198_v37  ;;  %v7664_v37 = vor.u32 %v8450_v20, %v7661_v61 }
 0x2fc   :  { %v2112_v34 = vadd.f32 %v2111_v51, %v2023_v26  ;;  %2061 = vmatmul.bf16.gmra.mxu0 %v9338_v18  ;;  %2150 = vmatmul.bf16.gmra.mxu1 %v9340_v25 }
 0x2fd   :  { %v3096_v0 = vmax.f32 %v2287_v8, 0.0  ;;  %2239 = vmatmul.bf16.gmra.mxu2 %v9348_v21  ;;  %2962 = vmatpush.bf16.msra.mxu3 %v7664_v37  ;;  %v8386_v8 = vld [vmem:[#allocation2 + $0x1ec] sm:$0xf] }
 0x2fe   :  { %2328 = vmatmul.bf16.gmra.mxu3 %v9350_v2 }
 0x2ff   :  { %v9560_v40 = vpack.c.bf16 %v3096_v0, %v3092_v39  ;;  %v7405_v39 = vld [vmem:[#allocation2 + $0x1f8] sm:$0xf0] }
 0x300   :  { %v2200_v17 = vpop.f32.mrf.mxu2  ;;  %v7408_v0 = vor.u32 %v8386_v8, %v7405_v39 }
 0x301   :  { %10976 = vst [vmem:[#allocation57_spill] sm:$0xff] %v9560_v40  ;;  %v2289_v3 = vpop.f32.mrf.mxu3  ;;  %v2201_v41 = vadd.f32 %v2200_v17, %v2112_v34  ;;  %v2024_v43 = vpop.f32.mrf.mxu0 }
 0x302   :  { %v2113_v24 = vpop.f32.mrf.mxu1  ;;  %v2025_v35 = vadd.f32 %v2024_v43, %v9505_v55  ;;  %2784 = vmatpush.bf16.msra.mxu1 %v7408_v0 }
 0x303   :  { %v2290_v51 = vadd.f32 %v2289_v3, %v2201_v41 }
 0x304   :  { %v2114_v26 = vadd.f32 %v2113_v24, %v2025_v35 }
 0x305   :  { %v3100_v3 = vmax.f32 %v2290_v51, 0.0 }
 0x308   :  { %v2202_v40 = vpop.f32.mrf.mxu2 }
 0x309   :  { %v2291_v53 = vpop.f32.mrf.mxu3  ;;  %v2203_v49 = vadd.f32 %v2202_v40, %v2114_v26  ;;  %v2027_v52 = vpop.f32.mrf.mxu0 }
 0x30a   :  { %v2116_v34 = vpop.f32.mrf.mxu1  ;;  %v2028_v17 = vadd.f32 %v2027_v52, %v9505_v55 }
 0x30b   :  { %v2292_v36 = vadd.f32 %v2291_v53, %v2203_v49 }
 0x30c   :  { %v2117_v33 = vadd.f32 %v2116_v34, %v2028_v17  ;;  %2066 = vmatmul.bf16.gmra.mxu0 %v9363_v50  ;;  %2155 = vmatmul.bf16.gmra.mxu1 %v9365_v12 }
 0x30d   :  { %v3104_v58 = vmax.f32 %v2292_v36, 0.0  ;;  %2244 = vmatmul.bf16.gmra.mxu2 %v9377_v59 }
 0x30e   :  { %2333 = vmatmul.bf16.gmra.mxu3 %v9379_v60 }
 0x30f   :  { %v9568_v20 = vpack.c.bf16 %v3104_v58, %v3100_v3  ;;  %v7517_v3 = vld [vmem:[#allocation2 + $0x2d8] sm:$0xf0]  ;;  %v8350_v58 = vld [vmem:[#allocation2 + $0xcc] sm:$0xf] }
 0x310   :  { %v2205_v61 = vpop.f32.mrf.mxu2 }
 0x311   :  { %10977 = vst [vmem:[#allocation58_spill] sm:$0xff] %v9568_v20  ;;  %v2294_v40 = vpop.f32.mrf.mxu3  ;;  %v2206_v41 = vadd.f32 %v2205_v61, %v2117_v33  ;;  %v2029_v43 = vpop.f32.mrf.mxu0  ;;  %v8414_v33 = vld [vmem:[#allocation2 + $0x2cc] sm:$0xf] }
 0x312   :  { %v2118_v24 = vpop.f32.mrf.mxu1  ;;  %v2030_v52 = vadd.f32 %v2029_v43, %v9505_v55  ;;  %v7261_v43 = vld [vmem:[#allocation2 + $0xd8] sm:$0xf0] }
 0x313   :  { %v2295_v4 = vadd.f32 %v2294_v40, %v2206_v41  ;;  %v7520_v41 = vor.u32 %v8414_v33, %v7517_v3 }
 0x314   :  { %v2119_v37 = vadd.f32 %v2118_v24, %v2030_v52  ;;  %v8446_v24 = vld [vmem:[#allocation2 + $0x3cc] sm:$0xf]  ;;  %v7645_v52 = vld [vmem:[#allocation2 + $0x3d8] sm:$0xf0] }
 0x315   :  { %v3108_v34 = vmax.f32 %v2295_v4, 0.0  ;;  %v7264_v4 = vor.u32 %v8350_v58, %v7261_v43  ;;  %2874 = vmatpush.bf16.msra.mxu2 %v7520_v41 }
 0x317   :  { %2696 = vmatpush.bf16.msra.mxu0 %v7264_v4 }
 0x318   :  { %v2207_v35 = vpop.f32.mrf.mxu2 }
 0x319   :  { %v2296_v26 = vpop.f32.mrf.mxu3  ;;  %v2208_v8 = vadd.f32 %v2207_v35, %v2119_v37  ;;  %v2032_v51 = vpop.f32.mrf.mxu0 }
 0x31a   :  { %v2121_v39 = vpop.f32.mrf.mxu1  ;;  %v2033_v0 = vadd.f32 %v2032_v51, %v9505_v55 }
 0x31b   :  { %v2297_v53 = vadd.f32 %v2296_v26, %v2208_v8  ;;  %v7648_v8 = vor.u32 %v8446_v24, %v7645_v52 }
 0x31c   :  { %v2122_v49 = vadd.f32 %v2121_v39, %v2033_v0  ;;  %2347 = vmatmul.bf16.vlgmr.msrb.gmra.mxu0 %v9037_v62  ;;  %2436 = vmatmul.bf16.vlgmr.msrb.gmra.mxu1 %v9039_v63 }
 0x31d   :  { %v3112_v17 = vmax.f32 %v2297_v53, 0.0  ;;  %2525 = vmatmul.bf16.vlgmr.msrb.gmra.mxu2 %v9050_v13  ;;  %2963 = vmatpush.bf16.msra.mxu3 %v7648_v8  ;;  %v8382_v53 = vld [vmem:[#allocation2 + $0x1cc] sm:$0xf] }
 0x31e   :  { %2614 = vmatmul.bf16.vlgmr.msrb.gmra.mxu3 %v9052_v14 }
 0x31f   :  { %v9576_v36 = vpack.c.bf16 %v3112_v17, %v3108_v34  ;;  %v7389_v34 = vld [vmem:[#allocation2 + $0x1d8] sm:$0xf0] }
 0x320   :  { %v2210_v61 = vpop.f32.mrf.mxu2  ;;  %v7392_v17 = vor.u32 %v8382_v53, %v7389_v34 }
 0x321   :  { %10978 = vst [vmem:[#allocation59_spill] sm:$0xff] %v9576_v36  ;;  %v2299_v40 = vpop.f32.mrf.mxu3  ;;  %v2211_v37 = vadd.f32 %v2210_v61, %v2122_v49  ;;  %v2034_v35 = vpop.f32.mrf.mxu0 }
 0x322   :  { %v2123_v26 = vpop.f32.mrf.mxu1  ;;  %v2035_v51 = vadd.f32 %v2034_v35, %v9505_v55  ;;  %2785 = vmatpush.bf16.msra.mxu1 %v7392_v17 }
 0x323   :  { %v2300_v39 = vadd.f32 %v2299_v40, %v2211_v37 }
 0x324   :  { %v2124_v0 = vadd.f32 %v2123_v26, %v2035_v51 }
 0x325   :  { %v3116_v40 = vmax.f32 %v2300_v39, 0.0 }
 0x328   :  { %v2212_v36 = vpop.f32.mrf.mxu2 }
 0x329   :  { %v2301_v33 = vpop.f32.mrf.mxu3  ;;  %v2213_v3 = vadd.f32 %v2212_v36, %v2124_v0  ;;  %v2037_v20 = vpop.f32.mrf.mxu0 }
 0x32a   :  { %v2126_v49 = vpop.f32.mrf.mxu1  ;;  %v2038_v61 = vadd.f32 %v2037_v20, %v9505_v55 }
 0x32b   :  { %v2302_v58 = vadd.f32 %v2301_v33, %v2213_v3 }
 0x32c   :  { %v2127_v43 = vadd.f32 %v2126_v49, %v2038_v61  ;;  %2352 = vmatmul.bf16.gmra.mxu0 %v9060_v27  ;;  %2441 = vmatmul.bf16.gmra.mxu1 %v9062_v28 }
 0x32d   :  { %v3120_v41 = vmax.f32 %v2302_v58, 0.0  ;;  %2530 = vmatmul.bf16.gmra.mxu2 %v9073_v44  ;;  %v10980_v58 = vld [vmem:[#allocation12_spill] sm:$0xff] }
 0x32e   :  { %2619 = vmatmul.bf16.gmra.mxu3 %v9075_v45 }
 0x32f   :  { %v9584_v24 = vpack.c.bf16 %v3120_v41, %v3116_v40  ;;  %v8410_v40 = vld [vmem:[#allocation2 + $0x2ac] sm:$0xf]  ;;  %v7501_v41 = vld [vmem:[#allocation2 + $0x2b8] sm:$0xf0] }
 0x330   :  { %v2215_v52 = vpop.f32.mrf.mxu2 }
 0x331   :  { %10979 = vst [vmem:[#allocation60_spill] sm:$0xff] %v9584_v24  ;;  %v2304_v36 = vpop.f32.mrf.mxu3  ;;  %v2216_v37 = vadd.f32 %v2215_v52, %v2127_v43  ;;  %v2039_v35 = vpop.f32.mrf.mxu0  ;;  %v8346_v52 = vld [vmem:[#allocation2 + $0xac] sm:$0xf] }
 0x332   :  { %v2128_v26 = vpop.f32.mrf.mxu1  ;;  %v2040_v20 = vadd.f32 %v2039_v35, %v9505_v55  ;;  %v7504_v35 = vor.u32 %v8410_v40, %v7501_v41 }
 0x333   :  { %v2305_v4 = vadd.f32 %v2304_v36, %v2216_v37 }
 0x334   :  { %v2129_v8 = vadd.f32 %v2128_v26, %v2040_v20  ;;  %v7245_v26 = vld [vmem:[#allocation2 + $0xb8] sm:$0xf0]  ;;  %v8442_v20 = vld [vmem:[#allocation2 + $0x3ac] sm:$0xf]  ;;  %2875 = vmatpush.bf16.msra.mxu2 %v7504_v35  ;;  %v10983_v35 = vld [vmem:[#allocation14_spill] sm:$0xff] }
 0x335   :  { %v3124_v49 = vmax.f32 %v2305_v4, 0.0  ;;  %v7248_v4 = vor.u32 %v8346_v52, %v7245_v26 }
 0x337   :  { %2697 = vmatpush.bf16.msra.mxu0 %v7248_v4 }
 0x338   :  { %v2217_v51 = vpop.f32.mrf.mxu2 }
 0x339   :  { %v2306_v0 = vpop.f32.mrf.mxu3  ;;  %v2218_v53 = vadd.f32 %v2217_v51, %v2129_v8  ;;  %v2042_v39 = vpop.f32.mrf.mxu0  ;;  %v7629_v8 = vld [vmem:[#allocation2 + $0x3b8] sm:$0xf0] }
 0x33a   :  { %v2131_v34 = vpop.f32.mrf.mxu1  ;;  %v2043_v17 = vadd.f32 %v2042_v39, %v9505_v55  ;;  %v7632_v39 = vor.u32 %v8442_v20, %v7629_v8  ;;  %v10982_v20 = vld [vmem:[#allocation13_spill] sm:$0xff] }
 0x33b   :  { %v2307_v33 = vadd.f32 %v2306_v0, %v2218_v53 }
 0x33c   :  { %v2132_v3 = vadd.f32 %v2131_v34, %v2043_v17  ;;  %2357 = vmatmul.bf16.gmra.mxu0 %v9083_v10  ;;  %2446 = vmatmul.bf16.gmra.mxu1 %v9085_v11 }
 0x33d   :  { %v3128_v61 = vmax.f32 %v2307_v33, 0.0  ;;  %2535 = vmatmul.bf16.gmra.mxu2 %v9096_v29  ;;  %2964 = vmatpush.bf16.msra.mxu3 %v7632_v39 }
 0x33e   :  { %2624 = vmatmul.bf16.gmra.mxu3 %v10980_v58 }
 0x33f   :  { %v9592_v43 = vpack.c.bf16 %v3128_v61, %v3124_v49  ;;  %v8378_v49 = vld [vmem:[#allocation2 + $0x1ac] sm:$0xf]  ;;  %v7373_v61 = vld [vmem:[#allocation2 + $0x1b8] sm:$0xf0] }
 0x340   :  { %v2220_v36 = vpop.f32.mrf.mxu2 }
 0x341   :  { %10981 = vst [vmem:[#allocation61_spill] sm:$0xff] %v9592_v43  ;;  %v2309_v37 = vpop.f32.mrf.mxu3  ;;  %v2221_v51 = vadd.f32 %v2220_v36, %v2132_v3  ;;  %v2044_v0 = vpop.f32.mrf.mxu0  ;;  %v7376_v43 = vor.u32 %v8378_v49, %v7373_v61 }
 0x342   :  { %v2133_v53 = vpop.f32.mrf.mxu1  ;;  %v2045_v34 = vadd.f32 %v2044_v0, %v9505_v55  ;;  %v10985_v0 = vld [vmem:[#allocation16_spill] sm:$0xff] }
 0x343   :  { %v2310_v17 = vadd.f32 %v2309_v37, %v2221_v51  ;;  %2786 = vmatpush.bf16.msra.mxu1 %v7376_v43  ;;  %v10984_v51 = vld [vmem:[#allocation15_spill] sm:$0xff] }
 0x344   :  { %v2134_v33 = vadd.f32 %v2133_v53, %v2045_v34 }
 0x345   :  { %v3132_v37 = vmax.f32 %v2310_v17, 0.0 }
 0x348   :  { %v2222_v24 = vpop.f32.mrf.mxu2 }
 0x349   :  { %v2311_v40 = vpop.f32.mrf.mxu3  ;;  %v2223_v41 = vadd.f32 %v2222_v24, %v2134_v33  ;;  %v2047_v58 = vpop.f32.mrf.mxu0 }
 0x34a   :  { %v2136_v3 = vpop.f32.mrf.mxu1  ;;  %v2048_v36 = vadd.f32 %v2047_v58, %v9505_v55 }
 0x34b   :  { %v2312_v52 = vadd.f32 %v2311_v40, %v2223_v41 }
 0x34c   :  { %v2137_v26 = vadd.f32 %v2136_v3, %v2048_v36  ;;  %2362 = vmatmul.bf16.gmra.mxu0 %v10982_v20  ;;  %2451 = vmatmul.bf16.gmra.mxu1 %v10983_v35 }
 0x34d   :  { %v3136_v8 = vmax.f32 %v2312_v52, 0.0  ;;  %2540 = vmatmul.bf16.gmra.mxu2 %v10984_v51 }
 0x34e   :  { %2629 = vmatmul.bf16.gmra.mxu3 %v10985_v0 }
 0x34f   :  { %v9600_v53 = vpack.c.bf16 %v3136_v8, %v3132_v37  ;;  %v10987_v37 = vld [vmem:[#allocation17_spill] sm:$0xff]  ;;  %v10988_v8 = vld [vmem:[#allocation18_spill] sm:$0xff] }
 0x350   :  { %v2225_v43 = vpop.f32.mrf.mxu2 }
 0x351   :  { %10986 = vst [vmem:[#allocation62_spill] sm:$0xff] %v9600_v53  ;;  %v2314_v24 = vpop.f32.mrf.mxu3  ;;  %v2226_v4 = vadd.f32 %v2225_v43, %v2137_v26  ;;  %v2049_v39 = vpop.f32.mrf.mxu0  ;;  %v10989_v53 = vld [vmem:[#allocation19_spill] sm:$0xff] }
 0x352   :  { %v2138_v34 = vpop.f32.mrf.mxu1  ;;  %v2050_v58 = vadd.f32 %v2049_v39, %v9505_v55  ;;  %v10990_v39 = vld [vmem:[#allocation20_spill] sm:$0xff] }
 0x353   :  { %v2315_v33 = vadd.f32 %v2314_v24, %v2226_v4  ;;  %v8406_v4 = vld [vmem:[#allocation2 + $0x28c] sm:$0xf] }
 0x354   :  { %v2139_v49 = vadd.f32 %v2138_v34, %v2050_v58  ;;  %v7485_v34 = vld [vmem:[#allocation2 + $0x298] sm:$0xf0]  ;;  %v8342_v58 = vld [vmem:[#allocation2 + $0x8c] sm:$0xf] }
 0x355   :  { %v3140_v26 = vmax.f32 %v2315_v33, 0.0 }
 0x358   :  { %v2227_v61 = vpop.f32.mrf.mxu2 }
 0x359   :  { %v2316_v40 = vpop.f32.mrf.mxu3  ;;  %v2228_v41 = vadd.f32 %v2227_v61, %v2139_v49  ;;  %v2052_v17 = vpop.f32.mrf.mxu0 }
 0x35a   :  { %v2141_v3 = vpop.f32.mrf.mxu1  ;;  %v2053_v36 = vadd.f32 %v2052_v17, %v9505_v55  ;;  %v7488_v17 = vor.u32 %v8406_v4, %v7485_v34 }
 0x35b   :  { %v2317_v52 = vadd.f32 %v2316_v40, %v2228_v41  ;;  %v7229_v40 = vld [vmem:[#allocation2 + $0x98] sm:$0xf0]  ;;  %v8438_v41 = vld [vmem:[#allocation2 + $0x38c] sm:$0xf] }
 0x35c   :  { %v2142_v0 = vadd.f32 %v2141_v3, %v2053_v36  ;;  %2367 = vmatmul.bf16.gmra.mxu0 %v10987_v37  ;;  %2456 = vmatmul.bf16.gmra.mxu1 %v10988_v8  ;;  %v7613_v3 = vld [vmem:[#allocation2 + $0x398] sm:$0xf0]  ;;  %v7232_v33 = vor.u32 %v8342_v58, %v7229_v40 }
 0x35d   :  { %v3144_v43 = vmax.f32 %v2317_v52, 0.0  ;;  %2545 = vmatmul.bf16.gmra.mxu2 %v10989_v53  ;;  %v7616_v52 = vor.u32 %v8438_v41, %v7613_v3  ;;  %v10992_v41 = vld [vmem:[#allocation21_spill] sm:$0xff] }
 0x35e   :  { %2634 = vmatmul.bf16.gmra.mxu3 %v10990_v39  ;;  %2876 = vmatpush.bf16.msra.mxu2 %v7488_v17 }
 0x35f   :  { %v9608_v24 = vpack.c.bf16 %v3144_v43, %v3140_v26  ;;  %2698 = vmatpush.bf16.msra.mxu0 %v7232_v33  ;;  %2965 = vmatpush.bf16.msra.mxu3 %v7616_v52  ;;  %v8374_v43 = vld [vmem:[#allocation2 + $0x18c] sm:$0xf] }
 0x360   :  { %v2230_v49 = vpop.f32.mrf.mxu2 }
 0x361   :  { %10991 = vst [vmem:[#allocation63_spill] sm:$0xff] %v9608_v24  ;;  %v2319_v61 = vpop.f32.mrf.mxu3  ;;  %v2231_v36 = vadd.f32 %v2230_v49, %v2142_v0  ;;  %v2054_v37 = vpop.f32.mrf.mxu0  ;;  %v7357_v24 = vld [vmem:[#allocation2 + $0x198] sm:$0xf0] }
 0x362   :  { %v2143_v8 = vpop.f32.mrf.mxu1  ;;  %v2055_v53 = vadd.f32 %v2054_v37, %v9505_v55  ;;  %v7360_v51 = vor.u32 %v8374_v43, %v7357_v24  ;;  %v10993_v37 = vld [vmem:[#allocation22_spill] sm:$0xff] }
 0x363   :  { %v2320_v39 = vadd.f32 %v2319_v61, %v2231_v36 }
 0x364   :  { %v2144_v26 = vadd.f32 %v2143_v8, %v2055_v53  ;;  %2787 = vmatpush.bf16.msra.mxu1 %v7360_v51  ;;  %v10994_v53 = vld [vmem:[#allocation23_spill] sm:$0xff]  ;;  %v10995_v8 = vld [vmem:[#allocation24_spill] sm:$0xff] }
 0x365   :  { %v3148_v61 = vmax.f32 %v2320_v39, 0.0 }
 0x368   :  { %v2232_v35 = vpop.f32.mrf.mxu2 }
 0x369   :  { %v2321_v4 = vpop.f32.mrf.mxu3  ;;  %v2233_v34 = vadd.f32 %v2232_v35, %v2144_v26  ;;  %v2057_v20 = vpop.f32.mrf.mxu0 }
 0x36a   :  { %v2146_v0 = vpop.f32.mrf.mxu1  ;;  %v2058_v49 = vadd.f32 %v2057_v20, %v9505_v55 }
 0x36b   :  { %v2322_v58 = vadd.f32 %v2321_v4, %v2233_v34 }
 0x36c   :  { %v2147_v40 = vadd.f32 %v2146_v0, %v2058_v49  ;;  %2372 = vmatmul.bf16.gmra.mxu0 %v10992_v41  ;;  %2461 = vmatmul.bf16.gmra.mxu1 %v10993_v37 }
 0x36d   :  { %v3152_v17 = vmax.f32 %v2322_v58, 0.0  ;;  %2550 = vmatmul.bf16.gmra.mxu2 %v10994_v53 }
 0x36e   :  { %2639 = vmatmul.bf16.gmra.mxu3 %v10995_v8 }
 0x36f   :  { %v9616_v24 = vpack.c.bf16 %v3152_v17, %v3148_v61  ;;  %v10997_v61 = vld [vmem:[#allocation25_spill] sm:$0xff]  ;;  %v10998_v17 = vld [vmem:[#allocation26_spill] sm:$0xff] }
 0x370   :  { %v2235_v51 = vpop.f32.mrf.mxu2 }
 0x371   :  { %10996 = vst [vmem:[#allocation64_spill] sm:$0xff] %v9616_v24  ;;  %v2324_v35 = vpop.f32.mrf.mxu3  ;;  %v2236_v3 = vadd.f32 %v2235_v51, %v2147_v40  ;;  %v2059_v36 = vpop.f32.mrf.mxu0  ;;  %v10999_v24 = vld [vmem:[#allocation27_spill] sm:$0xff] }
 0x372   :  { %v2148_v33 = vpop.f32.mrf.mxu1  ;;  %v2060_v20 = vadd.f32 %v2059_v36, %v9505_v55  ;;  %v11000_v36 = vld [vmem:[#allocation28_spill] sm:$0xff] }
 0x373   :  { %v2325_v52 = vadd.f32 %v2324_v35, %v2236_v3  ;;  %v8402_v3 = vld [vmem:[#allocation2 + $0x26c] sm:$0xf] }
 0x374   :  { %v2149_v26 = vadd.f32 %v2148_v33, %v2060_v20  ;;  %v7469_v33 = vld [vmem:[#allocation2 + $0x278] sm:$0xf0]  ;;  %v8338_v20 = vld [vmem:[#allocation2 + $0x6c] sm:$0xf] }
 0x375   :  { %v3156_v40 = vmax.f32 %v2325_v52, 0.0 }
 0x378   :  { %v2237_v43 = vpop.f32.mrf.mxu2 }
 0x379   :  { %v2326_v4 = vpop.f32.mrf.mxu3  ;;  %v2238_v34 = vadd.f32 %v2237_v43, %v2149_v26  ;;  %v2062_v39 = vpop.f32.mrf.mxu0 }
 0x37a   :  { %v2151_v0 = vpop.f32.mrf.mxu1  ;;  %v2063_v49 = vadd.f32 %v2062_v39, %v9505_v55  ;;  %v7472_v39 = vor.u32 %v8402_v3, %v7469_v33 }
 0x37b   :  { %v2327_v58 = vadd.f32 %v2326_v4, %v2238_v34  ;;  %v7213_v4 = vld [vmem:[#allocation2 + $0x78] sm:$0xf0]  ;;  %v8434_v34 = vld [vmem:[#allocation2 + $0x36c] sm:$0xf] }
 0x37c   :  { %v2152_v8 = vadd.f32 %v2151_v0, %v2063_v49  ;;  %2377 = vmatmul.bf16.gmra.mxu0 %v10997_v61  ;;  %2466 = vmatmul.bf16.gmra.mxu1 %v10998_v17  ;;  %v7597_v0 = vld [vmem:[#allocation2 + $0x378] sm:$0xf0]  ;;  %v7216_v52 = vor.u32 %v8338_v20, %v7213_v4 }
 0x37d   :  { %v3160_v51 = vmax.f32 %v2327_v58, 0.0  ;;  %2555 = vmatmul.bf16.gmra.mxu2 %v10999_v24  ;;  %v7600_v58 = vor.u32 %v8434_v34, %v7597_v0 }
 0x37e   :  { %2644 = vmatmul.bf16.gmra.mxu3 %v11000_v36  ;;  %2877 = vmatpush.bf16.msra.mxu2 %v7472_v39 }
 0x37f   :  { %v9624_v35 = vpack.c.bf16 %v3160_v51, %v3156_v40  ;;  %2699 = vmatpush.bf16.msra.mxu0 %v7216_v52  ;;  %2966 = vmatpush.bf16.msra.mxu3 %v7600_v58  ;;  %v8370_v51 = vld [vmem:[#allocation2 + $0x16c] sm:$0xf] }
 0x380   :  { %v2240_v26 = vpop.f32.mrf.mxu2 }
 0x381   :  { %11001 = vst [vmem:[#allocation65_spill] sm:$0xff] %v9624_v35  ;;  %v2329_v43 = vpop.f32.mrf.mxu3  ;;  %v2241_v49 = vadd.f32 %v2240_v26, %v2152_v8  ;;  %v2064_v61 = vpop.f32.mrf.mxu0  ;;  %v7341_v35 = vld [vmem:[#allocation2 + $0x178] sm:$0xf0] }
 0x382   :  { %v2153_v17 = vpop.f32.mrf.mxu1  ;;  %v2065_v24 = vadd.f32 %v2064_v61, %v9505_v55  ;;  %v7344_v53 = vor.u32 %v8370_v51, %v7341_v35  ;;  %v11002_v61 = vld [vmem:[#allocation29_spill] sm:$0xff] }
 0x383   :  { %v2330_v36 = vadd.f32 %v2329_v43, %v2241_v49 }
 0x384   :  { %v2154_v40 = vadd.f32 %v2153_v17, %v2065_v24  ;;  %2788 = vmatpush.bf16.msra.mxu1 %v7344_v53  ;;  %v11003_v24 = vld [vmem:[#allocation30_spill] sm:$0xff]  ;;  %v11004_v17 = vld [vmem:[#allocation31_spill] sm:$0xff] }
 0x385   :  { %v3164_v43 = vmax.f32 %v2330_v36, 0.0  ;;  %v9638_v36 = vld [vmem:[%s10784_s4] sm:$0xf] }
 0x386   :  { %11006 = vst [vmem:[#allocation67_spill] sm:$0xff] %v9638_v36 }
 0x388   :  { %v2242_v37 = vpop.f32.mrf.mxu2 }
 0x389   :  { %v2331_v3 = vpop.f32.mrf.mxu3  ;;  %v2243_v33 = vadd.f32 %v2242_v37, %v2154_v40  ;;  %v2067_v41 = vpop.f32.mrf.mxu0  ;;  %v9641_v40 = vperm.slane %v9638_v36, 2 }
 0x38a   :  { %v2156_v8 = vpop.f32.mrf.mxu1  ;;  %v2068_v26 = vadd.f32 %v2067_v41, %v9505_v55 }
 0x38b   :  { %v2332_v20 = vadd.f32 %v2331_v3, %v2243_v33 }
 0x38c   :  { %v2157_v4 = vadd.f32 %v2156_v8, %v2068_v26  ;;  %2382 = vmatmul.bf16.gmra.mxu0 %v9198_v7  ;;  %2471 = vmatmul.bf16.gmra.mxu1 %v11002_v61 }
 0x38d   :  { %v3168_v39 = vmax.f32 %v2332_v20, 0.0  ;;  %2560 = vmatmul.bf16.gmra.mxu2 %v11003_v24 }
 0x38e   :  { %2649 = vmatmul.bf16.gmra.mxu3 %v11004_v17 }
 0x38f   :  { %v9632_v35 = vpack.c.bf16 %v3168_v39, %v3164_v43  ;;  %v11008_v39 = vld [vmem:[#allocation33_spill] sm:$0xff] }
 0x390   :  { %v2245_v53 = vpop.f32.mrf.mxu2 }
 0x391   :  { %11005 = vst [vmem:[#allocation66_spill] sm:$0xff] %v9632_v35  ;;  %v2334_v37 = vpop.f32.mrf.mxu3  ;;  %v2246_v34 = vadd.f32 %v2245_v53, %v2157_v4  ;;  %v2069_v0 = vpop.f32.mrf.mxu0 }
 0x392   :  { %v2158_v49 = vpop.f32.mrf.mxu1  ;;  %v2070_v41 = vadd.f32 %v2069_v0, %v9505_v55  ;;  %v11007_v55 = vld [vmem:[#allocation32_spill] sm:$0xff]  ;;  %v11010_v0 = vld [vmem:[#allocation35_spill] sm:$0xff] }
 0x393   :  { %v2335_v52 = vadd.f32 %v2334_v37, %v2246_v34  ;;  %v11009_v34 = vld [vmem:[#allocation34_spill] sm:$0xff] }
 0x394   :  { %v2159_v58 = vadd.f32 %v2158_v49, %v2070_v41  ;;  %v8398_v41 = vld [vmem:[#allocation2 + $0x24c] sm:$0xf] }
 0x395   :  { %v3172_v53 = vmax.f32 %v2335_v52, 0.0 }
 0x398   :  { %v2247_v51 = vpop.f32.mrf.mxu2 }
 0x399   :  { %v2336_v3 = vpop.f32.mrf.mxu3  ;;  %v2248_v33 = vadd.f32 %v2247_v51, %v2159_v58  ;;  %v2348_v8 = vpop.f32.mrf.mxu0  ;;  %v7453_v58 = vld [vmem:[#allocation2 + $0x258] sm:$0xf0]  ;;  %v8334_v51 = vld [vmem:[#allocation2 + $0x4c] sm:$0xf] }
 0x39a   :  { %v2437_v26 = vpop.f32.mrf.mxu1  ;;  %v2349_v20 = vadd.f32 %v2348_v8, %v9641_v40  ;;  %v7456_v8 = vor.u32 %v8398_v41, %v7453_v58 }
 0x39b   :  { %v2337_v4 = vadd.f32 %v2336_v3, %v2248_v33  ;;  %v7197_v3 = vld [vmem:[#allocation2 + $0x58] sm:$0xf0]  ;;  %v8430_v33 = vld [vmem:[#allocation2 + $0x34c] sm:$0xf] }
 0x39c   :  { %v2438_v43 = vadd.f32 %v2437_v26, %v2349_v20  ;;  %2387 = vmatmul.bf16.gmra.mxu0 %v11007_v55  ;;  %2476 = vmatmul.bf16.gmra.mxu1 %v11008_v39  ;;  %v7581_v26 = vld [vmem:[#allocation2 + $0x358] sm:$0xf0]  ;;  %v7200_v52 = vor.u32 %v8334_v51, %v7197_v3 }
 0x39d   :  { %v3176_v37 = vmax.f32 %v2337_v4, 0.0  ;;  %2565 = vmatmul.bf16.gmra.mxu2 %v11009_v34  ;;  %v7584_v4 = vor.u32 %v8430_v33, %v7581_v26 }
 0x39e   :  { %2654 = vmatmul.bf16.gmra.mxu3 %v11010_v0  ;;  %2878 = vmatpush.bf16.msra.mxu2 %v7456_v8 }
 0x39f   :  { %v9648_v49 = vpack.c.bf16 %v3176_v37, %v3172_v53  ;;  %2700 = vmatpush.bf16.msra.mxu0 %v7200_v52  ;;  %2967 = vmatpush.bf16.msra.mxu3 %v7584_v4  ;;  %v8366_v37 = vld [vmem:[#allocation2 + $0x14c] sm:$0xf] }
 0x3a0   :  { %v2526_v35 = vpop.f32.mrf.mxu2 }
 0x3a1   :  { %11011 = vst [vmem:[#allocation68_spill] sm:$0xff] %v9648_v49  ;;  %v2615_v36 = vpop.f32.mrf.mxu3  ;;  %v2527_v20 = vadd.f32 %v2526_v35, %v2438_v43  ;;  %v2350_v55 = vpop.f32.mrf.mxu0  ;;  %v7325_v49 = vld [vmem:[#allocation2 + $0x158] sm:$0xf0] }
 0x3a2   :  { %v2439_v39 = vpop.f32.mrf.mxu1  ;;  %v2351_v34 = vadd.f32 %v2350_v55, %v9641_v40  ;;  %v7328_v17 = vor.u32 %v8366_v37, %v7325_v49 }
 0x3a3   :  { %v2616_v0 = vadd.f32 %v2615_v36, %v2527_v20 }
 0x3a4   :  { %v2440_v53 = vadd.f32 %v2439_v39, %v2351_v34  ;;  %2789 = vmatpush.bf16.msra.mxu1 %v7328_v17 }
 0x3a5   :  { %v3053_v36 = vmax.f32 %v2616_v0, 0.0 }
 0x3a8   :  { %v2528_v24 = vpop.f32.mrf.mxu2 }
 0x3a9   :  { %v2617_v41 = vpop.f32.mrf.mxu3  ;;  %v2529_v58 = vadd.f32 %v2528_v24, %v2440_v53  ;;  %v2353_v61 = vpop.f32.mrf.mxu0 }
 0x3aa   :  { %v2442_v35 = vpop.f32.mrf.mxu1  ;;  %v2354_v43 = vadd.f32 %v2353_v61, %v9641_v40 }
 0x3ab   :  { %v2618_v51 = vadd.f32 %v2617_v41, %v2529_v58 }
 0x3ac   :  { %v2443_v3 = vadd.f32 %v2442_v35, %v2354_v43  ;;  %2392 = vmatmul.bf16.gmra.mxu0 %v9238_v31  ;;  %2481 = vmatmul.bf16.gmra.mxu1 %v9240_v32 }
 0x3ad   :  { %v3057_v55 = vmax.f32 %v2618_v51, 0.0  ;;  %2570 = vmatmul.bf16.gmra.mxu2 %v9248_v9 }
 0x3ae   :  { %2659 = vmatmul.bf16.gmra.mxu3 %v9250_v5 }
 0x3af   :  { %v9656_v39 = vpack.c.bf16 %v3057_v55, %v3053_v36  ;;  %v7437_v36 = vld [vmem:[#allocation2 + $0x238] sm:$0xf0]  ;;  %v8330_v55 = vld [vmem:[#allocation2 + $0x2c] sm:$0xf] }
 0x3b0   :  { %v2531_v17 = vpop.f32.mrf.mxu2 }
 0x3b1   :  { %11012 = vst [vmem:[#allocation69_spill] sm:$0xff] %v9656_v39  ;;  %v2620_v24 = vpop.f32.mrf.mxu3  ;;  %v2532_v34 = vadd.f32 %v2531_v17, %v2443_v3  ;;  %v2355_v49 = vpop.f32.mrf.mxu0  ;;  %v8394_v3 = vld [vmem:[#allocation2 + $0x22c] sm:$0xf] }
 0x3b2   :  { %v2444_v8 = vpop.f32.mrf.mxu1  ;;  %v2356_v61 = vadd.f32 %v2355_v49, %v9641_v40  ;;  %v7181_v49 = vld [vmem:[#allocation2 + $0x38] sm:$0xf0] }
 0x3b3   :  { %v2621_v33 = vadd.f32 %v2620_v24, %v2532_v34  ;;  %v7440_v34 = vor.u32 %v8394_v3, %v7437_v36 }
 0x3b4   :  { %v2445_v26 = vadd.f32 %v2444_v8, %v2356_v61  ;;  %v8426_v8 = vld [vmem:[#allocation2 + $0x32c] sm:$0xf]  ;;  %v7565_v61 = vld [vmem:[#allocation2 + $0x338] sm:$0xf0] }
 0x3b5   :  { %v3061_v35 = vmax.f32 %v2621_v33, 0.0  ;;  %v7184_v33 = vor.u32 %v8330_v55, %v7181_v49  ;;  %2879 = vmatpush.bf16.msra.mxu2 %v7440_v34 }
 0x3b7   :  { %2701 = vmatpush.bf16.msra.mxu0 %v7184_v33 }
 0x3b8   :  { %v2533_v20 = vpop.f32.mrf.mxu2 }
 0x3b9   :  { %v2622_v52 = vpop.f32.mrf.mxu3  ;;  %v2534_v4 = vadd.f32 %v2533_v20, %v2445_v26  ;;  %v2358_v0 = vpop.f32.mrf.mxu0 }
 0x3ba   :  { %v2447_v53 = vpop.f32.mrf.mxu1  ;;  %v2359_v37 = vadd.f32 %v2358_v0, %v9641_v40 }
 0x3bb   :  { %v2623_v41 = vadd.f32 %v2622_v52, %v2534_v4  ;;  %v7568_v4 = vor.u32 %v8426_v8, %v7565_v61 }
 0x3bc   :  { %v2448_v58 = vadd.f32 %v2447_v53, %v2359_v37  ;;  %2397 = vmatmul.bf16.gmra.mxu0 %v9258_v22  ;;  %2486 = vmatmul.bf16.gmra.mxu1 %v9260_v56 }
 0x3bd   :  { %v3065_v43 = vmax.f32 %v2623_v41, 0.0  ;;  %2575 = vmatmul.bf16.gmra.mxu2 %v9268_v30  ;;  %2968 = vmatpush.bf16.msra.mxu3 %v7568_v4  ;;  %v8362_v41 = vld [vmem:[#allocation2 + $0x12c] sm:$0xf] }
 0x3be   :  { %2664 = vmatmul.bf16.gmra.mxu3 %v9270_v46 }
 0x3bf   :  { %v9664_v51 = vpack.c.bf16 %v3065_v43, %v3061_v35  ;;  %v7309_v35 = vld [vmem:[#allocation2 + $0x138] sm:$0xf0] }
 0x3c0   :  { %v2536_v17 = vpop.f32.mrf.mxu2  ;;  %v7312_v43 = vor.u32 %v8362_v41, %v7309_v35 }
 0x3c1   :  { %11013 = vst [vmem:[#allocation70_spill] sm:$0xff] %v9664_v51  ;;  %v2625_v24 = vpop.f32.mrf.mxu3  ;;  %v2537_v26 = vadd.f32 %v2536_v17, %v2448_v58  ;;  %v2360_v20 = vpop.f32.mrf.mxu0 }
 0x3c2   :  { %v2449_v52 = vpop.f32.mrf.mxu1  ;;  %v2361_v0 = vadd.f32 %v2360_v20, %v9641_v40  ;;  %2790 = vmatpush.bf16.msra.mxu1 %v7312_v43 }
 0x3c3   :  { %v2626_v53 = vadd.f32 %v2625_v24, %v2537_v26 }
 0x3c4   :  { %v2450_v37 = vadd.f32 %v2449_v52, %v2361_v0 }
 0x3c5   :  { %v3069_v24 = vmax.f32 %v2626_v53, 0.0 }
 0x3c8   :  { %v2538_v51 = vpop.f32.mrf.mxu2 }
 0x3c9   :  { %v2627_v3 = vpop.f32.mrf.mxu3  ;;  %v2539_v36 = vadd.f32 %v2538_v51, %v2450_v37  ;;  %v2363_v39 = vpop.f32.mrf.mxu0 }
 0x3ca   :  { %v2452_v58 = vpop.f32.mrf.mxu1  ;;  %v2364_v17 = vadd.f32 %v2363_v39, %v9641_v40 }
 0x3cb   :  { %v2628_v55 = vadd.f32 %v2627_v3, %v2539_v36 }
 0x3cc   :  { %v2453_v49 = vadd.f32 %v2452_v58, %v2364_v17  ;;  %2402 = vmatmul.bf16.gmra.mxu0 %v9278_v1  ;;  %2491 = vmatmul.bf16.gmra.mxu1 %v9280_v6 }
 0x3cd   :  { %v3073_v34 = vmax.f32 %v2628_v55, 0.0  ;;  %2580 = vmatmul.bf16.gmra.mxu2 %v9288_v42 }
 0x3ce   :  { %2669 = vmatmul.bf16.gmra.mxu3 %v9290_v54 }
 0x3cf   :  { %v9672_v8 = vpack.c.bf16 %v3073_v34, %v3069_v24  ;;  %v7421_v24 = vld [vmem:[#allocation2 + $0x218] sm:$0xf0]  ;;  %v8326_v34 = vld [vmem:[#allocation2 + $0xc] sm:$0xf] }
 0x3d0   :  { %v2541_v61 = vpop.f32.mrf.mxu2 }
 0x3d1   :  { %11014 = vst [vmem:[#allocation71_spill] sm:$0xff] %v9672_v8  ;;  %v2630_v51 = vpop.f32.mrf.mxu3  ;;  %v2542_v26 = vadd.f32 %v2541_v61, %v2453_v49  ;;  %v2365_v20 = vpop.f32.mrf.mxu0  ;;  %v8390_v49 = vld [vmem:[#allocation2 + $0x20c] sm:$0xf] }
 0x3d2   :  { %v2454_v52 = vpop.f32.mrf.mxu1  ;;  %v2366_v39 = vadd.f32 %v2365_v20, %v9641_v40  ;;  %v7165_v20 = vld [vmem:[#allocation2 + $0x18] sm:$0xf0] }
 0x3d3   :  { %v2631_v33 = vadd.f32 %v2630_v51, %v2542_v26  ;;  %v7424_v26 = vor.u32 %v8390_v49, %v7421_v24 }
 0x3d4   :  { %v2455_v4 = vadd.f32 %v2454_v52, %v2366_v39  ;;  %v8422_v52 = vld [vmem:[#allocation2 + $0x30c] sm:$0xf]  ;;  %v7549_v39 = vld [vmem:[#allocation2 + $0x318] sm:$0xf0] }
 0x3d5   :  { %v3077_v58 = vmax.f32 %v2631_v33, 0.0  ;;  %v7168_v33 = vor.u32 %v8326_v34, %v7165_v20  ;;  %2880 = vmatpush.bf16.msra.mxu2 %v7424_v26 }
 0x3d7   :  { %2702 = vmatpush.bf16.msra.mxu0 %v7168_v33 }
 0x3d8   :  { %v2543_v0 = vpop.f32.mrf.mxu2 }
 0x3d9   :  { %v2632_v37 = vpop.f32.mrf.mxu3  ;;  %v2544_v41 = vadd.f32 %v2543_v0, %v2455_v4  ;;  %v2368_v53 = vpop.f32.mrf.mxu0 }
 0x3da   :  { %v2457_v35 = vpop.f32.mrf.mxu1  ;;  %v2369_v43 = vadd.f32 %v2368_v53, %v9641_v40 }
 0x3db   :  { %v2633_v3 = vadd.f32 %v2632_v37, %v2544_v41  ;;  %v7552_v41 = vor.u32 %v8422_v52, %v7549_v39 }
 0x3dc   :  { %v2458_v36 = vadd.f32 %v2457_v35, %v2369_v43  ;;  %2407 = vmatmul.bf16.gmra.mxu0 %v9298_v57  ;;  %2496 = vmatmul.bf16.gmra.mxu1 %v9300_v16 }
 0x3dd   :  { %v3081_v17 = vmax.f32 %v2633_v3, 0.0  ;;  %2585 = vmatmul.bf16.gmra.mxu2 %v9308_v47  ;;  %2969 = vmatpush.bf16.msra.mxu3 %v7552_v41  ;;  %v8358_v3 = vld [vmem:[#allocation2 + $0x10c] sm:$0xf] }
 0x3de   :  { %2674 = vmatmul.bf16.gmra.mxu3 %v9310_v23 }
 0x3df   :  { %v9680_v55 = vpack.c.bf16 %v3081_v17, %v3077_v58  ;;  %v7293_v58 = vld [vmem:[#allocation2 + $0x118] sm:$0xf0] }
 0x3e0   :  { %v2546_v61 = vpop.f32.mrf.mxu2  ;;  %v7296_v17 = vor.u32 %v8358_v3, %v7293_v58 }
 0x3e1   :  { %11015 = vst [vmem:[#allocation72_spill] sm:$0xff] %v9680_v55  ;;  %v2635_v51 = vpop.f32.mrf.mxu3  ;;  %v2547_v4 = vadd.f32 %v2546_v61, %v2458_v36  ;;  %v2370_v0 = vpop.f32.mrf.mxu0 }
 0x3e2   :  { %v2459_v37 = vpop.f32.mrf.mxu1  ;;  %v2371_v53 = vadd.f32 %v2370_v0, %v9641_v40  ;;  %2791 = vmatpush.bf16.msra.mxu1 %v7296_v17 }
 0x3e3   :  { %v2636_v35 = vadd.f32 %v2635_v51, %v2547_v4 }
 0x3e4   :  { %v2460_v43 = vadd.f32 %v2459_v37, %v2371_v53 }
 0x3e5   :  { %v3085_v51 = vmax.f32 %v2636_v35, 0.0 }
 0x3e8   :  { %v2548_v55 = vpop.f32.mrf.mxu2 }
 0x3e9   :  { %v2637_v49 = vpop.f32.mrf.mxu3  ;;  %v2549_v24 = vadd.f32 %v2548_v55, %v2460_v43  ;;  %v2373_v8 = vpop.f32.mrf.mxu0 }
 0x3ea   :  { %v2462_v36 = vpop.f32.mrf.mxu1  ;;  %v2374_v61 = vadd.f32 %v2373_v8, %v9641_v40 }
 0x3eb   :  { %v2638_v34 = vadd.f32 %v2637_v49, %v2549_v24 }
 0x3ec   :  { %v2463_v20 = vadd.f32 %v2462_v36, %v2374_v61  ;;  %2412 = vmatmul.bf16.gmra.mxu0 %v9318_v15  ;;  %2501 = vmatmul.bf16.gmra.mxu1 %v9320_v38 }
 0x3ed   :  { %v3089_v26 = vmax.f32 %v2638_v34, 0.0  ;;  %2590 = vmatmul.bf16.gmra.mxu2 %v9328_v19 }
 0x3ee   :  { %2679 = vmatmul.bf16.gmra.mxu3 %v9330_v48 }
 0x3ef   :  { %v9688_v52 = vpack.c.bf16 %v3089_v26, %v3085_v51  ;;  %v8547_v51 = vld [vmem:[#allocation5 + $0x2ec] sm:$0xf0]  ;;  %v7779_v26 = vld [vmem:[#allocation5 + $0xe0] sm:$0xf] }
 0x3f0   :  { %v2551_v39 = vpop.f32.mrf.mxu2 }
 0x3f1   :  { %11016 = vst [vmem:[#allocation73_spill] sm:$0xff] %v9688_v52  ;;  %v2640_v55 = vpop.f32.mrf.mxu3  ;;  %v2552_v4 = vadd.f32 %v2551_v39, %v2463_v20  ;;  %v2375_v0 = vpop.f32.mrf.mxu0  ;;  %v8035_v20 = vld [vmem:[#allocation5 + $0x2e0] sm:$0xf] }
 0x3f2   :  { %v2464_v37 = vpop.f32.mrf.mxu1  ;;  %v2376_v8 = vadd.f32 %v2375_v0, %v9641_v40  ;;  %v8483_v0 = vld [vmem:[#allocation5 + $0xec] sm:$0xf0] }
 0x3f3   :  { %v2641_v33 = vadd.f32 %v2640_v55, %v2552_v4  ;;  %v8036_v4 = vor.u32 %v8547_v51, %v8035_v20 }
 0x3f4   :  { %v2465_v41 = vadd.f32 %v2464_v37, %v2376_v8  ;;  %v8163_v37 = vld [vmem:[#allocation5 + $0x3e0] sm:$0xf]  ;;  %v8579_v8 = vld [vmem:[#allocation5 + $0x3ec] sm:$0xf0] }
 0x3f5   :  { %v3093_v36 = vmax.f32 %v2641_v33, 0.0  ;;  %v7780_v33 = vor.u32 %v8483_v0, %v7779_v26  ;;  %4199 = vmatpush.bf16.msrb.mxu2 %v8036_v4 }
 0x3f7   :  { %4021 = vmatpush.bf16.msrb.mxu0 %v7780_v33 }
 0x3f8   :  { %v2553_v53 = vpop.f32.mrf.mxu2 }
 0x3f9   :  { %v2642_v43 = vpop.f32.mrf.mxu3  ;;  %v2554_v3 = vadd.f32 %v2553_v53, %v2465_v41  ;;  %v2378_v35 = vpop.f32.mrf.mxu0 }
 0x3fa   :  { %v2467_v58 = vpop.f32.mrf.mxu1  ;;  %v2379_v17 = vadd.f32 %v2378_v35, %v9641_v40 }
 0x3fb   :  { %v2643_v49 = vadd.f32 %v2642_v43, %v2554_v3  ;;  %v8164_v3 = vor.u32 %v8579_v8, %v8163_v37 }
 0x3fc   :  { %v2468_v24 = vadd.f32 %v2467_v58, %v2379_v17  ;;  %2417 = vmatmul.bf16.gmra.mxu0 %v9338_v18  ;;  %2506 = vmatmul.bf16.gmra.mxu1 %v9340_v25 }
 0x3fd   :  { %v3097_v61 = vmax.f32 %v2643_v49, 0.0  ;;  %2595 = vmatmul.bf16.gmra.mxu2 %v9348_v21  ;;  %4288 = vmatpush.bf16.msrb.mxu3 %v8164_v3  ;;  %v7907_v49 = vld [vmem:[#allocation5 + $0x1e0] sm:$0xf] }
 0x3fe   :  { %2684 = vmatmul.bf16.gmra.mxu3 %v9350_v2 }
 0x3ff   :  { %v9696_v34 = vpack.c.bf16 %v3097_v61, %v3093_v36  ;;  %v8515_v36 = vld [vmem:[#allocation5 + $0x1ec] sm:$0xf0] }
 0x400   :  { %v2556_v39 = vpop.f32.mrf.mxu2  ;;  %v7908_v61 = vor.u32 %v8515_v36, %v7907_v49 }
 0x401   :  { %11017 = vst [vmem:[#allocation74_spill] sm:$0xff] %v9696_v34  ;;  %v2645_v55 = vpop.f32.mrf.mxu3  ;;  %v2557_v41 = vadd.f32 %v2556_v39, %v2468_v24  ;;  %v2380_v53 = vpop.f32.mrf.mxu0 }
 0x402   :  { %v2469_v43 = vpop.f32.mrf.mxu1  ;;  %v2381_v35 = vadd.f32 %v2380_v53, %v9641_v40  ;;  %4110 = vmatpush.bf16.msrb.mxu1 %v7908_v61 }
 0x403   :  { %v2646_v58 = vadd.f32 %v2645_v55, %v2557_v41 }
 0x404   :  { %v2470_v17 = vadd.f32 %v2469_v43, %v2381_v35 }
 0x405   :  { %v3101_v55 = vmax.f32 %v2646_v58, 0.0 }
 0x408   :  { %v2558_v34 = vpop.f32.mrf.mxu2 }
 0x409   :  { %v2647_v20 = vpop.f32.mrf.mxu3  ;;  %v2559_v51 = vadd.f32 %v2558_v34, %v2470_v17  ;;  %v2383_v52 = vpop.f32.mrf.mxu0 }
 0x40a   :  { %v2472_v24 = vpop.f32.mrf.mxu1  ;;  %v2384_v39 = vadd.f32 %v2383_v52, %v9641_v40 }
 0x40b   :  { %v2648_v26 = vadd.f32 %v2647_v20, %v2559_v51 }
 0x40c   :  { %v2473_v0 = vadd.f32 %v2472_v24, %v2384_v39  ;;  %2422 = vmatmul.bf16.gmra.mxu0 %v9363_v50  ;;  %2511 = vmatmul.bf16.gmra.mxu1 %v9365_v12 }
 0x40d   :  { %v3105_v4 = vmax.f32 %v2648_v26, 0.0  ;;  %2600 = vmatmul.bf16.gmra.mxu2 %v9377_v59 }
 0x40e   :  { %2689 = vmatmul.bf16.gmra.mxu3 %v9379_v60 }
 0x40f   :  { %v9704_v37 = vpack.c.bf16 %v3105_v4, %v3101_v55  ;;  %v8543_v55 = vld [vmem:[#allocation5 + $0x2cc] sm:$0xf0]  ;;  %v7763_v4 = vld [vmem:[#allocation5 + $0xc0] sm:$0xf] }
 0x410   :  { %v2561_v8 = vpop.f32.mrf.mxu2 }
 0x411   :  { %11018 = vst [vmem:[#allocation75_spill] sm:$0xff] %v9704_v37  ;;  %v2650_v34 = vpop.f32.mrf.mxu3  ;;  %v2562_v41 = vadd.f32 %v2561_v8, %v2473_v0  ;;  %v2385_v53 = vpop.f32.mrf.mxu0  ;;  %v8019_v0 = vld [vmem:[#allocation5 + $0x2c0] sm:$0xf] }
 0x412   :  { %v2474_v43 = vpop.f32.mrf.mxu1  ;;  %v2386_v52 = vadd.f32 %v2385_v53, %v9641_v40  ;;  %v8479_v53 = vld [vmem:[#allocation5 + $0xcc] sm:$0xf0] }
 0x413   :  { %v2651_v33 = vadd.f32 %v2650_v34, %v2562_v41  ;;  %v8020_v41 = vor.u32 %v8543_v55, %v8019_v0 }
 0x414   :  { %v2475_v3 = vadd.f32 %v2474_v43, %v2386_v52  ;;  %v8147_v43 = vld [vmem:[#allocation5 + $0x3c0] sm:$0xf]  ;;  %v8575_v52 = vld [vmem:[#allocation5 + $0x3cc] sm:$0xf0] }
 0x415   :  { %v3109_v24 = vmax.f32 %v2651_v33, 0.0  ;;  %v7764_v33 = vor.u32 %v8479_v53, %v7763_v4  ;;  %4200 = vmatpush.bf16.msrb.mxu2 %v8020_v41 }
 0x417   :  { %4022 = vmatpush.bf16.msrb.mxu0 %v7764_v33 }
 0x418   :  { %v2563_v35 = vpop.f32.mrf.mxu2 }
 0x419   :  { %v2652_v17 = vpop.f32.mrf.mxu3  ;;  %v2564_v49 = vadd.f32 %v2563_v35, %v2475_v3  ;;  %v2388_v58 = vpop.f32.mrf.mxu0  ;;  %v8148_v35 = vor.u32 %v8575_v52, %v8147_v43 }
 0x41a   :  { %v2477_v36 = vpop.f32.mrf.mxu1  ;;  %v2389_v61 = vadd.f32 %v2388_v58, %v9641_v40  ;;  %v8511_v58 = vld [vmem:[#allocation5 + $0x1cc] sm:$0xf0] }
 0x41b   :  { %v2653_v20 = vadd.f32 %v2652_v17, %v2564_v49  ;;  %4289 = vmatpush.bf16.msrb.mxu3 %v8148_v35  ;;  %v7891_v49 = vld [vmem:[#allocation5 + $0x1c0] sm:$0xf] }
 0x41c   :  { %v2478_v51 = vadd.f32 %v2477_v36, %v2389_v61  ;;  %2703 = vmatmul.bf16.vlgmr.msra.gmra.mxu0 %v9037_v62  ;;  %2792 = vmatmul.bf16.vlgmr.msra.gmra.mxu1 %v9039_v63  ;;  %v7892_v36 = vor.u32 %v8511_v58, %v7891_v49 }
 0x41d   :  { %v3113_v39 = vmax.f32 %v2653_v20, 0.0  ;;  %2881 = vmatmul.bf16.vlgmr.msra.gmra.mxu2 %v9050_v13 }
 0x41e   :  { %2970 = vmatmul.bf16.vlgmr.msra.gmra.mxu3 %v9052_v14  ;;  %4111 = vmatpush.bf16.msrb.mxu1 %v7892_v36 }
 0x41f   :  { %v9712_v26 = vpack.c.bf16 %v3113_v39, %v3109_v24 }
 0x420   :  { %v2566_v8 = vpop.f32.mrf.mxu2 }
 0x421   :  { %v2655_v34 = vpop.f32.mrf.mxu3  ;;  %v2567_v62 = vadd.f32 %v2566_v8, %v2478_v51  ;;  %v2390_v3 = vpop.f32.mrf.mxu0 }
 0x422   :  { %v2479_v63 = vpop.f32.mrf.mxu1  ;;  %v2391_v13 = vadd.f32 %v2390_v3, %v9641_v40 }
 0x423   :  { %v2656_v14 = vadd.f32 %v2655_v34, %v2567_v62 }
 0x424   :  { %v2480_v17 = vadd.f32 %v2479_v63, %v2391_v13 }
 0x425   :  { %v3117_v8 = vmax.f32 %v2656_v14, 0.0 }
 0x428   :  { %v2568_v61 = vpop.f32.mrf.mxu2 }
 0x429   :  { %v2657_v20 = vpop.f32.mrf.mxu3  ;;  %v2569_v24 = vadd.f32 %v2568_v61, %v2480_v17  ;;  %v2393_v39 = vpop.f32.mrf.mxu0  ;;  %v11020_v61 = vld [vmem:[#allocation12_spill] sm:$0xff] }
 0x42a   :  { %v2482_v51 = vpop.f32.mrf.mxu1  ;;  %v2394_v0 = vadd.f32 %v2393_v39, %v9641_v40  ;;  %v8539_v39 = vld [vmem:[#allocation5 + $0x2ac] sm:$0xf0] }
 0x42b   :  { %v2658_v55 = vadd.f32 %v2657_v20, %v2569_v24  ;;  %v8003_v24 = vld [vmem:[#allocation5 + $0x2a0] sm:$0xf] }
 0x42c   :  { %v2483_v4 = vadd.f32 %v2482_v51, %v2394_v0  ;;  %2708 = vmatmul.bf16.gmra.mxu0 %v9060_v27  ;;  %2797 = vmatmul.bf16.gmra.mxu1 %v9062_v28  ;;  %v7747_v51 = vld [vmem:[#allocation5 + $0xa0] sm:$0xf] }
 0x42d   :  { %v3121_v34 = vmax.f32 %v2658_v55, 0.0  ;;  %2886 = vmatmul.bf16.gmra.mxu2 %v9073_v44 }
 0x42e   :  { %2975 = vmatmul.bf16.gmra.mxu3 %v9075_v45 }
 0x42f   :  { %v9720_v41 = vpack.c.bf16 %v3121_v34, %v3117_v8  ;;  %v8475_v8 = vld [vmem:[#allocation5 + $0xac] sm:$0xf0]  ;;  %v8131_v34 = vld [vmem:[#allocation5 + $0x3a0] sm:$0xf] }
 0x430   :  { %v2571_v53 = vpop.f32.mrf.mxu2 }
 0x431   :  { %11019 = vst [vmem:[#allocation76_spill] sm:$0xff] %v9720_v41  ;;  %v2660_v43 = vpop.f32.mrf.mxu3  ;;  %v2572_v52 = vadd.f32 %v2571_v53, %v2483_v4  ;;  %v2395_v62 = vpop.f32.mrf.mxu0  ;;  %v8004_v4 = vor.u32 %v8539_v39, %v8003_v24  ;;  %v8571_v53 = vld [vmem:[#allocation5 + $0x3ac] sm:$0xf0] }
 0x432   :  { %v2484_v3 = vpop.f32.mrf.mxu1  ;;  %v2396_v63 = vadd.f32 %v2395_v62, %v9641_v40  ;;  %v8132_v62 = vor.u32 %v8571_v53, %v8131_v34 }
 0x433   :  { %v2661_v33 = vadd.f32 %v2660_v43, %v2572_v52  ;;  %v7748_v52 = vor.u32 %v8475_v8, %v7747_v51  ;;  %4201 = vmatpush.bf16.msrb.mxu2 %v8004_v4  ;;  %v11023_v51 = vld [vmem:[#allocation15_spill] sm:$0xff] }
 0x434   :  { %v2485_v35 = vadd.f32 %v2484_v3, %v2396_v63  ;;  %4290 = vmatpush.bf16.msrb.mxu3 %v8132_v62 }
 0x435   :  { %v3125_v58 = vmax.f32 %v2661_v33, 0.0  ;;  %4023 = vmatpush.bf16.msrb.mxu0 %v7748_v52  ;;  %v7875_v33 = vld [vmem:[#allocation5 + $0x1a0] sm:$0xf] }
 0x438   :  { %v2573_v27 = vpop.f32.mrf.mxu2 }
 0x439   :  { %v2662_v13 = vpop.f32.mrf.mxu3  ;;  %v2574_v28 = vadd.f32 %v2573_v27, %v2485_v35  ;;  %v2398_v14 = vpop.f32.mrf.mxu0  ;;  %v8507_v35 = vld [vmem:[#allocation5 + $0x1ac] sm:$0xf0] }
 0x43a   :  { %v2487_v17 = vpop.f32.mrf.mxu1  ;;  %v2399_v44 = vadd.f32 %v2398_v14, %v9641_v40  ;;  %v7876_v27 = vor.u32 %v8507_v35, %v7875_v33 }
 0x43b   :  { %v2663_v49 = vadd.f32 %v2662_v13, %v2574_v28 }
 0x43c   :  { %v2488_v45 = vadd.f32 %v2487_v17, %v2399_v44  ;;  %2713 = vmatmul.bf16.gmra.mxu0 %v9083_v10  ;;  %2802 = vmatmul.bf16.gmra.mxu1 %v9085_v11 }
 0x43d   :  { %v3129_v36 = vmax.f32 %v2663_v49, 0.0  ;;  %2891 = vmatmul.bf16.gmra.mxu2 %v9096_v29  ;;  %4112 = vmatpush.bf16.msrb.mxu1 %v7876_v27 }
 0x43e   :  { %2980 = vmatmul.bf16.gmra.mxu3 %v11020_v61  ;;  %v11022_v61 = vld [vmem:[#allocation14_spill] sm:$0xff] }
 0x43f   :  { %v9728_v20 = vpack.c.bf16 %v3129_v36, %v3125_v58  ;;  %v11021_v36 = vld [vmem:[#allocation13_spill] sm:$0xff] }
 0x440   :  { %v2576_v0 = vpop.f32.mrf.mxu2 }
 0x441   :  { %v2665_v55 = vpop.f32.mrf.mxu3  ;;  %v2577_v10 = vadd.f32 %v2576_v0, %v2488_v45  ;;  %v2400_v43 = vpop.f32.mrf.mxu0  ;;  %v11024_v0 = vld [vmem:[#allocation16_spill] sm:$0xff] }
 0x442   :  { %v2489_v11 = vpop.f32.mrf.mxu1  ;;  %v2401_v29 = vadd.f32 %v2400_v43, %v9641_v40 }
 0x443   :  { %v2666_v3 = vadd.f32 %v2665_v55, %v2577_v10 }
 0x444   :  { %v2490_v63 = vadd.f32 %v2489_v11, %v2401_v29 }
 0x445   :  { %v3133_v24 = vmax.f32 %v2666_v3, 0.0 }
 0x448   :  { %v2578_v13 = vpop.f32.mrf.mxu2 }
 0x449   :  { %v2667_v28 = vpop.f32.mrf.mxu3  ;;  %v2579_v14 = vadd.f32 %v2578_v13, %v2490_v63  ;;  %v2403_v17 = vpop.f32.mrf.mxu0 }
 0x44a   :  { %v2492_v44 = vpop.f32.mrf.mxu1  ;;  %v2404_v49 = vadd.f32 %v2403_v17, %v9641_v40 }
 0x44b   :  { %v2668_v45 = vadd.f32 %v2667_v28, %v2579_v14  ;;  %v11026_v28 = vld [vmem:[#allocation17_spill] sm:$0xff]  ;;  %v11027_v14 = vld [vmem:[#allocation18_spill] sm:$0xff] }
 0x44c   :  { %v2493_v58 = vadd.f32 %v2492_v44, %v2404_v49  ;;  %2718 = vmatmul.bf16.gmra.mxu0 %v11021_v36  ;;  %2807 = vmatmul.bf16.gmra.mxu1 %v11022_v61  ;;  %v11028_v49 = vld [vmem:[#allocation19_spill] sm:$0xff]  ;;  %v7987_v36 = vld [vmem:[#allocation5 + $0x280] sm:$0xf]  ;;  %v8535_v61 = vld [vmem:[#allocation5 + $0x28c] sm:$0xf0] }
 0x44d   :  { %v3137_v39 = vmax.f32 %v2668_v45, 0.0  ;;  %2896 = vmatmul.bf16.gmra.mxu2 %v11023_v51  ;;  %v11029_v45 = vld [vmem:[#allocation20_spill] sm:$0xff] }
 0x44e   :  { %2985 = vmatmul.bf16.gmra.mxu3 %v11024_v0  ;;  %v7988_v0 = vor.u32 %v8535_v61, %v7987_v36  ;;  %v11030_v36 = vld [vmem:[#allocation21_spill] sm:$0xff]  ;;  %v11031_v61 = vld [vmem:[#allocation22_spill] sm:$0xff] }
 0x44f   :  { %v9736_v55 = vpack.c.bf16 %v3137_v39, %v3133_v24  ;;  %v7731_v24 = vld [vmem:[#allocation5 + $0x80] sm:$0xf] }
 0x450   :  { %v2581_v4 = vpop.f32.mrf.mxu2  ;;  %4202 = vmatpush.bf16.msrb.mxu2 %v7988_v0  ;;  %v11033_v0 = vld [vmem:[#allocation24_spill] sm:$0xff] }
 0x451   :  { %11025 = vst [vmem:[#allocation12_spill] sm:$0xff] %v9736_v55  ;;  %v2670_v8 = vpop.f32.mrf.mxu3  ;;  %v2582_v34 = vadd.f32 %v2581_v4, %v2493_v58  ;;  %v2405_v53 = vpop.f32.mrf.mxu0  ;;  %v8471_v4 = vld [vmem:[#allocation5 + $0x8c] sm:$0xf0] }
 0x452   :  { %v2494_v10 = vpop.f32.mrf.mxu1  ;;  %v2406_v43 = vadd.f32 %v2405_v53, %v9641_v40 }
 0x453   :  { %v2671_v11 = vadd.f32 %v2670_v8, %v2582_v34  ;;  %v8115_v8 = vld [vmem:[#allocation5 + $0x380] sm:$0xf]  ;;  %v8567_v34 = vld [vmem:[#allocation5 + $0x38c] sm:$0xf0] }
 0x454   :  { %v2495_v52 = vadd.f32 %v2494_v10, %v2406_v43 }
 0x455   :  { %v3141_v17 = vmax.f32 %v2671_v11, 0.0  ;;  %v7732_v11 = vor.u32 %v8471_v4, %v7731_v24 }
 0x457   :  { %4024 = vmatpush.bf16.msrb.mxu0 %v7732_v11 }
 0x458   :  { %v2583_v62 = vpop.f32.mrf.mxu2 }
 0x459   :  { %v2672_v29 = vpop.f32.mrf.mxu3  ;;  %v2584_v63 = vadd.f32 %v2583_v62, %v2495_v52  ;;  %v2408_v3 = vpop.f32.mrf.mxu0  ;;  %v8116_v52 = vor.u32 %v8567_v34, %v8115_v8 }
 0x45a   :  { %v2497_v33 = vpop.f32.mrf.mxu1  ;;  %v2409_v35 = vadd.f32 %v2408_v3, %v9641_v40  ;;  %v7859_v3 = vld [vmem:[#allocation5 + $0x180] sm:$0xf] }
 0x45b   :  { %v2673_v27 = vadd.f32 %v2672_v29, %v2584_v63  ;;  %4291 = vmatpush.bf16.msrb.mxu3 %v8116_v52 }
 0x45c   :  { %v2498_v13 = vadd.f32 %v2497_v33, %v2409_v35  ;;  %2723 = vmatmul.bf16.gmra.mxu0 %v11026_v28  ;;  %2812 = vmatmul.bf16.gmra.mxu1 %v11027_v14  ;;  %v8503_v33 = vld [vmem:[#allocation5 + $0x18c] sm:$0xf0] }
 0x45d   :  { %v3145_v44 = vmax.f32 %v2673_v27, 0.0  ;;  %2901 = vmatmul.bf16.gmra.mxu2 %v11028_v49  ;;  %v7860_v35 = vor.u32 %v8503_v33, %v7859_v3 }
 0x45e   :  { %2990 = vmatmul.bf16.gmra.mxu3 %v11029_v45 }
 0x45f   :  { %v9744_v58 = vpack.c.bf16 %v3145_v44, %v3141_v17  ;;  %4113 = vmatpush.bf16.msrb.mxu1 %v7860_v35 }
 0x460   :  { %v2586_v39 = vpop.f32.mrf.mxu2 }
 0x461   :  { %v2675_v51 = vpop.f32.mrf.mxu3  ;;  %v2587_v53 = vadd.f32 %v2586_v39, %v2498_v13  ;;  %v2410_v10 = vpop.f32.mrf.mxu0 }
 0x462   :  { %v2499_v43 = vpop.f32.mrf.mxu1  ;;  %v2411_v62 = vadd.f32 %v2410_v10, %v9641_v40 }
 0x463   :  { %v2676_v29 = vadd.f32 %v2675_v51, %v2587_v53  ;;  %v11032_v51 = vld [vmem:[#allocation23_spill] sm:$0xff] }
 0x464   :  { %v2500_v63 = vadd.f32 %v2499_v43, %v2411_v62 }
 0x465   :  { %v3149_v24 = vmax.f32 %v2676_v29, 0.0 }
 0x468   :  { %v2588_v27 = vpop.f32.mrf.mxu2 }
 0x469   :  { %v2677_v28 = vpop.f32.mrf.mxu3  ;;  %v2589_v14 = vadd.f32 %v2588_v27, %v2500_v63  ;;  %v2413_v17 = vpop.f32.mrf.mxu0 }
 0x46a   :  { %v2502_v13 = vpop.f32.mrf.mxu1  ;;  %v2414_v44 = vadd.f32 %v2413_v17, %v9641_v40  ;;  %v11035_v17 = vld [vmem:[#allocation25_spill] sm:$0xff] }
 0x46b   :  { %v2678_v49 = vadd.f32 %v2677_v28, %v2589_v14 }
 0x46c   :  { %v2503_v45 = vadd.f32 %v2502_v13, %v2414_v44  ;;  %2728 = vmatmul.bf16.gmra.mxu0 %v11030_v36  ;;  %2817 = vmatmul.bf16.gmra.mxu1 %v11031_v61  ;;  %v11036_v13 = vld [vmem:[#allocation26_spill] sm:$0xff]  ;;  %v11038_v36 = vld [vmem:[#allocation28_spill] sm:$0xff] }
 0x46d   :  { %v3153_v39 = vmax.f32 %v2678_v49, 0.0  ;;  %2906 = vmatmul.bf16.gmra.mxu2 %v11032_v51  ;;  %v7715_v51 = vld [vmem:[#allocation5 + $0x60] sm:$0xf] }
 0x46e   :  { %2995 = vmatmul.bf16.gmra.mxu3 %v11033_v0 }
 0x46f   :  { %v9752_v4 = vpack.c.bf16 %v3153_v39, %v3149_v24  ;;  %v7971_v24 = vld [vmem:[#allocation5 + $0x260] sm:$0xf]  ;;  %v8531_v39 = vld [vmem:[#allocation5 + $0x26c] sm:$0xf0] }
 0x470   :  { %v2591_v8 = vpop.f32.mrf.mxu2 }
 0x471   :  { %11034 = vst [vmem:[#allocation13_spill] sm:$0xff] %v9752_v4  ;;  %v2680_v34 = vpop.f32.mrf.mxu3  ;;  %v2592_v53 = vadd.f32 %v2591_v8, %v2503_v45  ;;  %v2415_v10 = vpop.f32.mrf.mxu0  ;;  %v11037_v45 = vld [vmem:[#allocation27_spill] sm:$0xff] }
 0x472   :  { %v2504_v43 = vpop.f32.mrf.mxu1  ;;  %v2416_v11 = vadd.f32 %v2415_v10, %v9641_v40  ;;  %v8099_v10 = vld [vmem:[#allocation5 + $0x360] sm:$0xf] }
 0x473   :  { %v2681_v52 = vadd.f32 %v2680_v34, %v2592_v53  ;;  %v7972_v34 = vor.u32 %v8531_v39, %v7971_v24  ;;  %v8467_v53 = vld [vmem:[#allocation5 + $0x6c] sm:$0xf0] }
 0x474   :  { %v2505_v62 = vadd.f32 %v2504_v43, %v2416_v11  ;;  %v8563_v43 = vld [vmem:[#allocation5 + $0x36c] sm:$0xf0] }
 0x475   :  { %v3157_v44 = vmax.f32 %v2681_v52, 0.0  ;;  %v7716_v52 = vor.u32 %v8467_v53, %v7715_v51  ;;  %4203 = vmatpush.bf16.msrb.mxu2 %v7972_v34  ;;  %v11039_v51 = vld [vmem:[#allocation29_spill] sm:$0xff]  ;;  %v11040_v34 = vld [vmem:[#allocation30_spill] sm:$0xff]  ;;  %v11041_v53 = vld [vmem:[#allocation31_spill] sm:$0xff] }
 0x477   :  { %4025 = vmatpush.bf16.msrb.mxu0 %v7716_v52 }
 0x478   :  { %v2593_v63 = vpop.f32.mrf.mxu2 }
 0x479   :  { %v2682_v3 = vpop.f32.mrf.mxu3  ;;  %v2594_v33 = vadd.f32 %v2593_v63, %v2505_v62  ;;  %v2418_v29 = vpop.f32.mrf.mxu0 }
 0x47a   :  { %v2507_v35 = vpop.f32.mrf.mxu1  ;;  %v2419_v27 = vadd.f32 %v2418_v29, %v9641_v40 }
 0x47b   :  { %v2683_v28 = vadd.f32 %v2682_v3, %v2594_v33  ;;  %v8100_v3 = vor.u32 %v8563_v43, %v8099_v10 }
 0x47c   :  { %v2508_v14 = vadd.f32 %v2507_v35, %v2419_v27  ;;  %2733 = vmatmul.bf16.gmra.mxu0 %v11035_v17  ;;  %2822 = vmatmul.bf16.gmra.mxu1 %v11036_v13  ;;  %v7843_v27 = vld [vmem:[#allocation5 + $0x160] sm:$0xf] }
 0x47d   :  { %v3161_v49 = vmax.f32 %v2683_v28, 0.0  ;;  %2911 = vmatmul.bf16.gmra.mxu2 %v11037_v45  ;;  %4292 = vmatpush.bf16.msrb.mxu3 %v8100_v3  ;;  %v8499_v28 = vld [vmem:[#allocation5 + $0x16c] sm:$0xf0] }
 0x47e   :  { %3000 = vmatmul.bf16.gmra.mxu3 %v11038_v36  ;;  %v7844_v17 = vor.u32 %v8499_v28, %v7843_v27 }
 0x47f   :  { %v9760_v61 = vpack.c.bf16 %v3161_v49, %v3157_v44 }
 0x480   :  { %v2596_v0 = vpop.f32.mrf.mxu2  ;;  %4114 = vmatpush.bf16.msrb.mxu1 %v7844_v17 }
 0x481   :  { %v2685_v8 = vpop.f32.mrf.mxu3  ;;  %v2597_v11 = vadd.f32 %v2596_v0, %v2508_v14  ;;  %v2420_v62 = vpop.f32.mrf.mxu0 }
 0x482   :  { %v2509_v63 = vpop.f32.mrf.mxu1  ;;  %v2421_v33 = vadd.f32 %v2420_v62, %v9641_v40 }
 0x483   :  { %v2686_v29 = vadd.f32 %v2685_v8, %v2597_v11 }
 0x484   :  { %v2510_v35 = vadd.f32 %v2509_v63, %v2421_v33 }
 0x485   :  { %v3165_v0 = vmax.f32 %v2686_v29, 0.0 }
 0x488   :  { %v2598_v13 = vpop.f32.mrf.mxu2 }
 0x489   :  { %v2687_v44 = vpop.f32.mrf.mxu3  ;;  %v2599_v49 = vadd.f32 %v2598_v13, %v2510_v35  ;;  %v2423_v45 = vpop.f32.mrf.mxu0 }
 0x48a   :  { %v2512_v14 = vpop.f32.mrf.mxu1  ;;  %v2424_v36 = vadd.f32 %v2423_v45, %v9641_v40 }
 0x48b   :  { %v2688_v24 = vadd.f32 %v2687_v44, %v2599_v49 }
 0x48c   :  { %v2513_v39 = vadd.f32 %v2512_v14, %v2424_v36  ;;  %2738 = vmatmul.bf16.gmra.mxu0 %v9198_v7  ;;  %2827 = vmatmul.bf16.gmra.mxu1 %v11039_v51  ;;  %v11043_v7 = vld [vmem:[#allocation67_spill] sm:$0xff]  ;;  %v11044_v36 = vld [vmem:[#allocation32_spill] sm:$0xff]  ;;  %v11046_v51 = vld [vmem:[#allocation34_spill] sm:$0xff] }
 0x48d   :  { %v3169_v8 = vmax.f32 %v2688_v24, 0.0  ;;  %2916 = vmatmul.bf16.gmra.mxu2 %v11040_v34  ;;  %v9772_v27 = vperm.slane %v11043_v7, 3  ;;  %v11045_v24 = vld [vmem:[#allocation33_spill] sm:$0xff]  ;;  %v7955_v34 = vld [vmem:[#allocation5 + $0x240] sm:$0xf] }
 0x48e   :  { %3005 = vmatmul.bf16.gmra.mxu3 %v11041_v53  ;;  %v8527_v53 = vld [vmem:[#allocation5 + $0x24c] sm:$0xf0] }
 0x48f   :  { %v9768_v10 = vpack.c.bf16 %v3169_v8, %v3165_v0  ;;  %v11047_v0 = vld [vmem:[#allocation35_spill] sm:$0xff] }
 0x490   :  { %v2601_v43 = vpop.f32.mrf.mxu2 }
 0x491   :  { %11042 = vst [vmem:[#allocation14_spill] sm:$0xff] %v9768_v10  ;;  %v2690_v11 = vpop.f32.mrf.mxu3  ;;  %v2602_v62 = vadd.f32 %v2601_v43, %v2513_v39  ;;  %v2425_v63 = vpop.f32.mrf.mxu0  ;;  %v7699_v43 = vld [vmem:[#allocation5 + $0x40] sm:$0xf] }
 0x492   :  { %v2514_v52 = vpop.f32.mrf.mxu1  ;;  %v2426_v3 = vadd.f32 %v2425_v63, %v9641_v40  ;;  %v7956_v63 = vor.u32 %v8527_v53, %v7955_v34 }
 0x493   :  { %v2691_v33 = vadd.f32 %v2690_v11, %v2602_v62 }
 0x494   :  { %v2515_v35 = vadd.f32 %v2514_v52, %v2426_v3  ;;  %v8463_v52 = vld [vmem:[#allocation5 + $0x4c] sm:$0xf0]  ;;  %v8083_v3 = vld [vmem:[#allocation5 + $0x340] sm:$0xf]  ;;  %4204 = vmatpush.bf16.msrb.mxu2 %v7956_v63 }
 0x495   :  { %v3173_v39 = vmax.f32 %v2691_v33, 0.0  ;;  %v7700_v33 = vor.u32 %v8463_v52, %v7699_v43 }
 0x497   :  { %4026 = vmatpush.bf16.msrb.mxu0 %v7700_v33 }
 0x498   :  { %v2603_v29 = vpop.f32.mrf.mxu2 }
 0x499   :  { %v2692_v28 = vpop.f32.mrf.mxu3  ;;  %v2604_v17 = vadd.f32 %v2603_v29, %v2515_v35  ;;  %v2704_v13 = vpop.f32.mrf.mxu0  ;;  %v8559_v35 = vld [vmem:[#allocation5 + $0x34c] sm:$0xf0] }
 0x49a   :  { %v2793_v44 = vpop.f32.mrf.mxu1  ;;  %v2705_v49 = vadd.f32 %v2704_v13, %v9772_v27 }
 0x49b   :  { %v2693_v45 = vadd.f32 %v2692_v28, %v2604_v17  ;;  %v8084_v17 = vor.u32 %v8559_v35, %v8083_v3 }
 0x49c   :  { %v2794_v14 = vadd.f32 %v2793_v44, %v2705_v49  ;;  %2743 = vmatmul.bf16.gmra.mxu0 %v11044_v36  ;;  %2832 = vmatmul.bf16.gmra.mxu1 %v11045_v24  ;;  %v8495_v36 = vld [vmem:[#allocation5 + $0x14c] sm:$0xf0] }
 0x49d   :  { %v3177_v40 = vmax.f32 %v2693_v45, 0.0  ;;  %2921 = vmatmul.bf16.gmra.mxu2 %v11046_v51  ;;  %4293 = vmatpush.bf16.msrb.mxu3 %v8084_v17  ;;  %v7827_v45 = vld [vmem:[#allocation5 + $0x140] sm:$0xf] }
 0x49e   :  { %3010 = vmatmul.bf16.gmra.mxu3 %v11047_v0  ;;  %v7828_v24 = vor.u32 %v8495_v36, %v7827_v45 }
 0x49f   :  { %v9779_v8 = vpack.c.bf16 %v3177_v40, %v3173_v39 }
 0x4a0   :  { %v2882_v11 = vpop.f32.mrf.mxu2  ;;  %4115 = vmatpush.bf16.msrb.mxu1 %v7828_v24 }
 0x4a1   :  { %v2971_v62 = vpop.f32.mrf.mxu3  ;;  %v2883_v7 = vadd.f32 %v2882_v11, %v2794_v14  ;;  %v2706_v29 = vpop.f32.mrf.mxu0 }
 0x4a2   :  { %v2795_v28 = vpop.f32.mrf.mxu1  ;;  %v2707_v13 = vadd.f32 %v2706_v29, %v9772_v27 }
 0x4a3   :  { %v2972_v44 = vadd.f32 %v2971_v62, %v2883_v7 }
 0x4a4   :  { %v2796_v49 = vadd.f32 %v2795_v28, %v2707_v13 }
 0x4a5   :  { %v3054_v11 = vmax.f32 %v2972_v44, 0.0 }
 0x4a8   :  { %v2884_v39 = vpop.f32.mrf.mxu2 }
 0x4a9   :  { %v2973_v40 = vpop.f32.mrf.mxu3  ;;  %v2885_v51 = vadd.f32 %v2884_v39, %v2796_v49  ;;  %v2709_v0 = vpop.f32.mrf.mxu0 }
 0x4aa   :  { %v2798_v14 = vpop.f32.mrf.mxu1  ;;  %v2710_v34 = vadd.f32 %v2709_v0, %v9772_v27  ;;  %v7683_v0 = vld [vmem:[#allocation5 + $0x20] sm:$0xf] }
 0x4ab   :  { %v2974_v53 = vadd.f32 %v2973_v40, %v2885_v51  ;;  %v7939_v40 = vld [vmem:[#allocation5 + $0x220] sm:$0xf]  ;;  %v8523_v51 = vld [vmem:[#allocation5 + $0x22c] sm:$0xf0] }
 0x4ac   :  { %v2799_v43 = vadd.f32 %v2798_v14, %v2710_v34  ;;  %2748 = vmatmul.bf16.gmra.mxu0 %v9238_v31  ;;  %2837 = vmatmul.bf16.gmra.mxu1 %v9240_v32 }
 0x4ad   :  { %v3058_v62 = vmax.f32 %v2974_v53, 0.0  ;;  %2926 = vmatmul.bf16.gmra.mxu2 %v9248_v9  ;;  %v7940_v53 = vor.u32 %v8523_v51, %v7939_v40 }
 0x4ae   :  { %3015 = vmatmul.bf16.gmra.mxu3 %v9250_v5 }
 0x4af   :  { %v9787_v63 = vpack.c.bf16 %v3058_v62, %v3054_v11  ;;  %v8067_v11 = vld [vmem:[#allocation5 + $0x320] sm:$0xf]  ;;  %v8555_v62 = vld [vmem:[#allocation5 + $0x32c] sm:$0xf0]  ;;  %4205 = vmatpush.bf16.msrb.mxu2 %v7940_v53 }
 0x4b0   :  { %v2887_v52 = vpop.f32.mrf.mxu2 }
 0x4b1   :  { %11048 = vst [vmem:[#allocation15_spill] sm:$0xff] %v9787_v63  ;;  %v2976_v3 = vpop.f32.mrf.mxu3  ;;  %v2888_v35 = vadd.f32 %v2887_v52, %v2799_v43  ;;  %v2711_v7 = vpop.f32.mrf.mxu0  ;;  %v8459_v43 = vld [vmem:[#allocation5 + $0x2c] sm:$0xf0] }
 0x4b2   :  { %v2800_v29 = vpop.f32.mrf.mxu1  ;;  %v2712_v28 = vadd.f32 %v2711_v7, %v9772_v27 }
 0x4b3   :  { %v2977_v33 = vadd.f32 %v2976_v3, %v2888_v35  ;;  %v7684_v3 = vor.u32 %v8459_v43, %v7683_v0  ;;  %v8068_v35 = vor.u32 %v8555_v62, %v8067_v11 }
 0x4b4   :  { %v2801_v17 = vadd.f32 %v2800_v29, %v2712_v28  ;;  %v7811_v29 = vld [vmem:[#allocation5 + $0x120] sm:$0xf]  ;;  %v8491_v28 = vld [vmem:[#allocation5 + $0x12c] sm:$0xf0] }
 0x4b5   :  { %v3062_v36 = vmax.f32 %v2977_v33, 0.0  ;;  %4027 = vmatpush.bf16.msrb.mxu0 %v7684_v3  ;;  %4294 = vmatpush.bf16.msrb.mxu3 %v8068_v35  ;;  %v7812_v33 = vor.u32 %v8491_v28, %v7811_v29  ;;  %v7667_v29 = vld [vmem:[#allocation5] sm:$0xf] }
 0x4b7   :  { %4116 = vmatpush.bf16.msrb.mxu1 %v7812_v33 }
 0x4b8   :  { %v2889_v31 = vpop.f32.mrf.mxu2 }
 0x4b9   :  { %v2978_v13 = vpop.f32.mrf.mxu3  ;;  %v2890_v32 = vadd.f32 %v2889_v31, %v2801_v17  ;;  %v2714_v44 = vpop.f32.mrf.mxu0 }
 0x4ba   :  { %v2803_v49 = vpop.f32.mrf.mxu1  ;;  %v2715_v9 = vadd.f32 %v2714_v44, %v9772_v27 }
 0x4bb   :  { %v2979_v45 = vadd.f32 %v2978_v13, %v2890_v32 }
 0x4bc   :  { %v2804_v5 = vadd.f32 %v2803_v49, %v2715_v9  ;;  %2753 = vmatmul.bf16.gmra.mxu0 %v9258_v22  ;;  %2842 = vmatmul.bf16.gmra.mxu1 %v9260_v56 }
 0x4bd   :  { %v3066_v24 = vmax.f32 %v2979_v45, 0.0  ;;  %2931 = vmatmul.bf16.gmra.mxu2 %v9268_v30 }
 0x4be   :  { %3020 = vmatmul.bf16.gmra.mxu3 %v9270_v46 }
 0x4bf   :  { %v9795_v39 = vpack.c.bf16 %v3066_v24, %v3062_v36 }
 0x4c0   :  { %v2892_v14 = vpop.f32.mrf.mxu2 }
 0x4c1   :  { %v2981_v34 = vpop.f32.mrf.mxu3  ;;  %v2893_v22 = vadd.f32 %v2892_v14, %v2804_v5  ;;  %v2716_v52 = vpop.f32.mrf.mxu0 }
 0x4c2   :  { %v2805_v56 = vpop.f32.mrf.mxu1  ;;  %v2717_v30 = vadd.f32 %v2716_v52, %v9772_v27 }
 0x4c3   :  { %v2982_v46 = vadd.f32 %v2981_v34, %v2893_v22 }
 0x4c4   :  { %v2806_v7 = vadd.f32 %v2805_v56, %v2717_v30 }
 0x4c5   :  { %v3070_v5 = vmax.f32 %v2982_v46, 0.0  ;;  %v7923_v46 = vld [vmem:[#allocation5 + $0x200] sm:$0xf] }
 0x4c8   :  { %v2894_v17 = vpop.f32.mrf.mxu2 }
 0x4c9   :  { %v2983_v31 = vpop.f32.mrf.mxu3  ;;  %v2895_v13 = vadd.f32 %v2894_v17, %v2806_v7  ;;  %v2719_v32 = vpop.f32.mrf.mxu0  ;;  %v8519_v7 = vld [vmem:[#allocation5 + $0x20c] sm:$0xf0] }
 0x4ca   :  { %v2808_v44 = vpop.f32.mrf.mxu1  ;;  %v2720_v49 = vadd.f32 %v2719_v32, %v9772_v27  ;;  %v7924_v17 = vor.u32 %v8519_v7, %v7923_v46  ;;  %v8551_v32 = vld [vmem:[#allocation5 + $0x30c] sm:$0xf0] }
 0x4cb   :  { %v2984_v9 = vadd.f32 %v2983_v31, %v2895_v13  ;;  %v8455_v31 = vld [vmem:[#allocation5 + $0xc] sm:$0xf0]  ;;  %v8051_v13 = vld [vmem:[#allocation5 + $0x300] sm:$0xf] }
 0x4cc   :  { %v2809_v45 = vadd.f32 %v2808_v44, %v2720_v49  ;;  %2758 = vmatmul.bf16.gmra.mxu0 %v9278_v1  ;;  %2847 = vmatmul.bf16.gmra.mxu1 %v9280_v6  ;;  %v7668_v49 = vor.u32 %v8455_v31, %v7667_v29 }
 0x4cd   :  { %v3074_v36 = vmax.f32 %v2984_v9, 0.0  ;;  %2936 = vmatmul.bf16.gmra.mxu2 %v9288_v42  ;;  %v8052_v9 = vor.u32 %v8551_v32, %v8051_v13 }
 0x4ce   :  { %3025 = vmatmul.bf16.gmra.mxu3 %v9290_v54  ;;  %4206 = vmatpush.bf16.msrb.mxu2 %v7924_v17 }
 0x4cf   :  { %v9803_v24 = vpack.c.bf16 %v3074_v36, %v3070_v5  ;;  %4028 = vmatpush.bf16.msrb.mxu0 %v7668_v49  ;;  %4295 = vmatpush.bf16.msrb.mxu3 %v8052_v9  ;;  %v7795_v5 = vld [vmem:[#allocation5 + $0x100] sm:$0xf]  ;;  %v8487_v36 = vld [vmem:[#allocation5 + $0x10c] sm:$0xf0] }
 0x4d0   :  { %v2897_v40 = vpop.f32.mrf.mxu2 }
 0x4d1   :  { %v2986_v51 = vpop.f32.mrf.mxu3  ;;  %v2898_v0 = vadd.f32 %v2897_v40, %v2809_v45  ;;  %v2721_v14 = vpop.f32.mrf.mxu0  ;;  %v7796_v40 = vor.u32 %v8487_v36, %v7795_v5  ;;  %v8165_v5 = vld [vmem:[#allocation5 + $0x3f0] sm:$0xf0] }
 0x4d2   :  { %v2810_v34 = vpop.f32.mrf.mxu1  ;;  %v2722_v53 = vadd.f32 %v2721_v14, %v9772_v27 }
 0x4d3   :  { %v2987_v43 = vadd.f32 %v2986_v51, %v2898_v0  ;;  %4117 = vmatpush.bf16.msrb.mxu1 %v7796_v40 }
 0x4d4   :  { %v2811_v11 = vadd.f32 %v2810_v34, %v2722_v53 }
 0x4d5   :  { %v3078_v3 = vmax.f32 %v2987_v43, 0.0 }
 0x4d8   :  { %v2899_v1 = vpop.f32.mrf.mxu2 }
 0x4d9   :  { %v2988_v62 = vpop.f32.mrf.mxu3  ;;  %v2900_v6 = vadd.f32 %v2899_v1, %v2811_v11  ;;  %v2724_v22 = vpop.f32.mrf.mxu0 }
 0x4da   :  { %v2813_v52 = vpop.f32.mrf.mxu1  ;;  %v2725_v42 = vadd.f32 %v2724_v22, %v9772_v27 }
 0x4db   :  { %v2989_v56 = vadd.f32 %v2988_v62, %v2900_v6 }
 0x4dc   :  { %v2814_v54 = vadd.f32 %v2813_v52, %v2725_v42  ;;  %2763 = vmatmul.bf16.gmra.mxu0 %v9298_v57  ;;  %2852 = vmatmul.bf16.gmra.mxu1 %v9300_v16 }
 0x4dd   :  { %v3082_v35 = vmax.f32 %v2989_v56, 0.0  ;;  %2941 = vmatmul.bf16.gmra.mxu2 %v9308_v47 }
 0x4de   :  { %3030 = vmatmul.bf16.gmra.mxu3 %v9310_v23 }
 0x4df   :  { %v9811_v30 = vpack.c.bf16 %v3082_v35, %v3078_v3 }
 0x4e0   :  { %v2902_v28 = vpop.f32.mrf.mxu2 }
 0x4e1   :  { %v2991_v33 = vpop.f32.mrf.mxu3  ;;  %v2903_v57 = vadd.f32 %v2902_v28, %v2814_v54  ;;  %v2726_v44 = vpop.f32.mrf.mxu0 }
 0x4e2   :  { %v2815_v16 = vpop.f32.mrf.mxu1  ;;  %v2727_v47 = vadd.f32 %v2726_v44, %v9772_v27  ;;  %v8037_v44 = vld [vmem:[#allocation5 + $0x2f0] sm:$0xf0] }
 0x4e3   :  { %v2992_v23 = vadd.f32 %v2991_v33, %v2903_v57  ;;  %v8545_v57 = vld [vmem:[#allocation5 + $0x2e4] sm:$0xf] }
 0x4e4   :  { %v2816_v45 = vadd.f32 %v2815_v16, %v2727_v47  ;;  %v8481_v16 = vld [vmem:[#allocation5 + $0xe4] sm:$0xf]  ;;  %v8040_v47 = vor.u32 %v8545_v57, %v8037_v44  ;;  %v11050_v57 = vld [vmem:[#allocation37_spill] sm:$0xff] }
 0x4e5   :  { %v3086_v62 = vmax.f32 %v2992_v23, 0.0  ;;  %v7781_v23 = vld [vmem:[#allocation5 + $0xf0] sm:$0xf0]  ;;  %v11051_v44 = vld [vmem:[#allocation52_spill] sm:$0xff] }
 0x4e6   :  { %v7784_v40 = vor.u32 %v8481_v16, %v7781_v23  ;;  %4555 = vmatpush.bf16.msra.mxu2 %v8040_v47  ;;  %v8541_v23 = vld [vmem:[#allocation5 + $0x2c4] sm:$0xf] }
 0x4e8   :  { %v2904_v51 = vpop.f32.mrf.mxu2  ;;  %4377 = vmatpush.bf16.msra.mxu0 %v7784_v40  ;;  %v7765_v40 = vld [vmem:[#allocation5 + $0xd0] sm:$0xf0] }
 0x4e9   :  { %v2993_v0 = vpop.f32.mrf.mxu3  ;;  %v2905_v14 = vadd.f32 %v2904_v51, %v2816_v45  ;;  %v2729_v34 = vpop.f32.mrf.mxu0  ;;  %v8577_v45 = vld [vmem:[#allocation5 + $0x3e4] sm:$0xf] }
 0x4ea   :  { %v2818_v53 = vpop.f32.mrf.mxu1  ;;  %v2730_v43 = vadd.f32 %v2729_v34, %v9772_v27  ;;  %v8168_v51 = vor.u32 %v8577_v45, %v8165_v5  ;;  %v7909_v34 = vld [vmem:[#allocation5 + $0x1f0] sm:$0xf0]  ;;  %v8477_v5 = vld [vmem:[#allocation5 + $0xc4] sm:$0xf] }
 0x4eb   :  { %v2994_v11 = vadd.f32 %v2993_v0, %v2905_v14  ;;  %v8513_v14 = vld [vmem:[#allocation5 + $0x1e4] sm:$0xf]  ;;  %v8021_v45 = vld [vmem:[#allocation5 + $0x2d0] sm:$0xf0] }
 0x4ec   :  { %v2819_v1 = vadd.f32 %v2818_v53, %v2730_v43  ;;  %2768 = vmatmul.bf16.gmra.mxu0 %v9318_v15  ;;  %2857 = vmatmul.bf16.gmra.mxu1 %v9320_v38  ;;  %v7912_v53 = vor.u32 %v8513_v14, %v7909_v34  ;;  %v7768_v34 = vor.u32 %v8477_v5, %v7765_v40 }
 0x4ed   :  { %v3090_v6 = vmax.f32 %v2994_v11, 0.0  ;;  %2946 = vmatmul.bf16.gmra.mxu2 %v9328_v19  ;;  %4644 = vmatpush.bf16.msra.mxu3 %v8168_v51  ;;  %v8573_v51 = vld [vmem:[#allocation5 + $0x3c4] sm:$0xf] }
 0x4ee   :  { %3035 = vmatmul.bf16.gmra.mxu3 %v9330_v48  ;;  %4466 = vmatpush.bf16.msra.mxu1 %v7912_v53 }
 0x4ef   :  { %v9819_v22 = vpack.c.bf16 %v3090_v6, %v3086_v62  ;;  %4378 = vmatpush.bf16.msra.mxu0 %v7768_v34  ;;  %v11060_v34 = vld [vmem:[#allocation71_spill] sm:$0xff] }
 0x4f0   :  { %v2907_v52 = vpop.f32.mrf.mxu2 }
 0x4f1   :  { %v2996_v42 = vpop.f32.mrf.mxu3  ;;  %v2908_v56 = vadd.f32 %v2907_v52, %v2819_v1  ;;  %v2731_v54 = vpop.f32.mrf.mxu0 }
 0x4f2   :  { %v2820_v3 = vpop.f32.mrf.mxu1  ;;  %v2732_v35 = vadd.f32 %v2731_v54, %v9772_v27 }
 0x4f3   :  { %v2997_v46 = vadd.f32 %v2996_v42, %v2908_v56 }
 0x4f4   :  { %v2821_v7 = vadd.f32 %v2820_v3, %v2732_v35 }
 0x4f5   :  { %v3094_v31 = vmax.f32 %v2997_v46, 0.0 }
 0x4f8   :  { %v2909_v15 = vpop.f32.mrf.mxu2 }
 0x4f9   :  { %v2998_v29 = vpop.f32.mrf.mxu3  ;;  %v2910_v38 = vadd.f32 %v2909_v15, %v2821_v7  ;;  %v2734_v28 = vpop.f32.mrf.mxu0 }
 0x4fa   :  { %v2823_v33 = vpop.f32.mrf.mxu1  ;;  %v2735_v19 = vadd.f32 %v2734_v28, %v9772_v27 }
 0x4fb   :  { %v2999_v17 = vadd.f32 %v2998_v29, %v2910_v38 }
 0x4fc   :  { %v2824_v48 = vadd.f32 %v2823_v33, %v2735_v19  ;;  %2773 = vmatmul.bf16.gmra.mxu0 %v9338_v18  ;;  %2862 = vmatmul.bf16.gmra.mxu1 %v9340_v25 }
 0x4fd   :  { %v3098_v13 = vmax.f32 %v2999_v17, 0.0  ;;  %2951 = vmatmul.bf16.gmra.mxu2 %v9348_v21 }
 0x4fe   :  { %3040 = vmatmul.bf16.gmra.mxu3 %v9350_v2 }
 0x4ff   :  { %v9827_v32 = vpack.c.bf16 %v3098_v13, %v3094_v31 }
 0x500   :  { %v2912_v49 = vpop.f32.mrf.mxu2 }
 0x501   :  { %v3001_v9 = vpop.f32.mrf.mxu3  ;;  %v2913_v18 = vadd.f32 %v2912_v49, %v2824_v48  ;;  %v2736_v36 = vpop.f32.mrf.mxu0 }
 0x502   :  { %v2825_v25 = vpop.f32.mrf.mxu1  ;;  %v2737_v21 = vadd.f32 %v2736_v36, %v9772_v27 }
 0x503   :  { %v3002_v2 = vadd.f32 %v3001_v9, %v2913_v18  ;;  %v11052_v9 = vld [vmem:[#allocation69_spill] sm:$0xff] }
 0x504   :  { %v2826_v0 = vadd.f32 %v2825_v25, %v2737_v21  ;;  %v8024_v25 = vor.u32 %v8541_v23, %v8021_v45  ;;  %v8149_v21 = vld [vmem:[#allocation5 + $0x3d0] sm:$0xf0] }
 0x505   :  { %v3102_v54 = vmax.f32 %v3002_v2, 0.0  ;;  %v8152_v53 = vor.u32 %v8573_v51, %v8149_v21  ;;  %v11058_v21 = vld [vmem:[#allocation39_spill] sm:$0xff] }
 0x506   :  { %4556 = vmatpush.bf16.msra.mxu2 %v8024_v25 }
 0x507   :  { %4645 = vmatpush.bf16.msra.mxu3 %v8152_v53 }
 0x508   :  { %v2914_v43 = vpop.f32.mrf.mxu2 }
 0x509   :  { %v3003_v11 = vpop.f32.mrf.mxu3  ;;  %v2915_v1 = vadd.f32 %v2914_v43, %v2826_v0  ;;  %v2739_v62 = vpop.f32.mrf.mxu0 }
 0x50a   :  { %v2828_v6 = vpop.f32.mrf.mxu1  ;;  %v2740_v52 = vadd.f32 %v2739_v62, %v9772_v27  ;;  %v8509_v62 = vld [vmem:[#allocation5 + $0x1c4] sm:$0xf] }
 0x50b   :  { %v3004_v42 = vadd.f32 %v3003_v11, %v2915_v1 }
 0x50c   :  { %v2829_v56 = vadd.f32 %v2828_v6, %v2740_v52  ;;  %2778 = vmatmul.bf16.gmra.mxu0 %v9363_v50  ;;  %2867 = vmatmul.bf16.gmra.mxu1 %v9365_v12  ;;  %v7893_v6 = vld [vmem:[#allocation5 + $0x1d0] sm:$0xf0] }
 0x50d   :  { %v3106_v3 = vmax.f32 %v3004_v42, 0.0  ;;  %2956 = vmatmul.bf16.gmra.mxu2 %v9377_v59  ;;  %v7896_v52 = vor.u32 %v8509_v62, %v7893_v6 }
 0x50e   :  { %3045 = vmatmul.bf16.gmra.mxu3 %v9379_v60 }
 0x50f   :  { %v9835_v35 = vpack.c.bf16 %v3106_v3, %v3102_v54  ;;  %4467 = vmatpush.bf16.msra.mxu1 %v7896_v52 }
 0x510   :  { %v2917_v46 = vpop.f32.mrf.mxu2 }
 0x511   :  { %11049 = vst [vmem:[#allocation16_spill] sm:$0xff] %v9835_v35  ;;  %v3006_v7 = vpop.f32.mrf.mxu3  ;;  %v2918_v15 = vadd.f32 %v2917_v46, %v2829_v56  ;;  %v2741_v29 = vpop.f32.mrf.mxu0 }
 0x512   :  { %v2830_v38 = vpop.f32.mrf.mxu1  ;;  %v2742_v28 = vadd.f32 %v2741_v29, %v9772_v27 }
 0x513   :  { %v3007_v33 = vadd.f32 %v3006_v7, %v2918_v15 }
 0x514   :  { %v2831_v19 = vadd.f32 %v2830_v38, %v2742_v28  ;;  %v11054_v38 = vld [vmem:[#allocation38_spill] sm:$0xff]  ;;  %v11055_v28 = vld [vmem:[#allocation53_spill] sm:$0xff] }
 0x515   :  { %v3110_v16 = vmax.f32 %v3007_v33, 0.0 }
 0x518   :  { %v2919_v50 = vpop.f32.mrf.mxu2 }
 0x519   :  { %v3008_v17 = vpop.f32.mrf.mxu3  ;;  %v2920_v12 = vadd.f32 %v2919_v50, %v2831_v19  ;;  %v2744_v48 = vpop.f32.mrf.mxu0  ;;  %v11056_v50 = vld [vmem:[#allocation70_spill] sm:$0xff] }
 0x51a   :  { %v2833_v31 = vpop.f32.mrf.mxu1  ;;  %v2745_v59 = vadd.f32 %v2744_v48, %v9772_v27 }
 0x51b   :  { %v3009_v13 = vadd.f32 %v3008_v17, %v2920_v12 }
 0x51c   :  { %v2834_v60 = vadd.f32 %v2833_v31, %v2745_v59  ;;  %4029 = vmatmul.bf16.vlgmr.msrb.gmra.mxu0 %v11050_v57  ;;  %4118 = vmatmul.bf16.vlgmr.msrb.gmra.mxu1 %v11051_v44 }
 0x51d   :  { %v3114_v49 = vmax.f32 %v3009_v13, 0.0  ;;  %4207 = vmatmul.bf16.vlgmr.msrb.gmra.mxu2 %v11052_v9 }
 0x51e   :  { %4296 = vmatmul.bf16.vlgmr.msrb.gmra.mxu3 %v9787_v63 }
 0x51f   :  { %v9843_v47 = vpack.c.bf16 %v3114_v49, %v3110_v16 }
 0x520   :  { %v2922_v18 = vpop.f32.mrf.mxu2 }
 0x521   :  { %11053 = vst [vmem:[#allocation17_spill] sm:$0xff] %v9843_v47  ;;  %v3011_v36 = vpop.f32.mrf.mxu3  ;;  %v2923_v2 = vadd.f32 %v2922_v18, %v2834_v60  ;;  %v2746_v0 = vpop.f32.mrf.mxu0 }
 0x522   :  { %v2835_v14 = vpop.f32.mrf.mxu1  ;;  %v2747_v43 = vadd.f32 %v2746_v0, %v9772_v27 }
 0x523   :  { %v3012_v11 = vadd.f32 %v3011_v36, %v2923_v2  ;;  %v11059_v2 = vld [vmem:[#allocation54_spill] sm:$0xff] }
 0x524   :  { %v2836_v1 = vadd.f32 %v2835_v14, %v2747_v43  ;;  %v8537_v43 = vld [vmem:[#allocation5 + $0x2a4] sm:$0xf] }
 0x525   :  { %v3118_v33 = vmax.f32 %v3012_v11, 0.0  ;;  %v8005_v11 = vld [vmem:[#allocation5 + $0x2b0] sm:$0xf0] }
 0x526   :  { %v8008_v52 = vor.u32 %v8537_v43, %v8005_v11 }
 0x528   :  { %v2924_v42 = vpop.f32.mrf.mxu2  ;;  %4557 = vmatpush.bf16.msra.mxu2 %v8008_v52 }
 0x529   :  { %v3013_v56 = vpop.f32.mrf.mxu3  ;;  %v2925_v54 = vadd.f32 %v2924_v42, %v2836_v1  ;;  %v2749_v3 = vpop.f32.mrf.mxu0  ;;  %v8473_v1 = vld [vmem:[#allocation5 + $0xa4] sm:$0xf]  ;;  %v7749_v42 = vld [vmem:[#allocation5 + $0xb0] sm:$0xf0] }
 0x52a   :  { %v2838_v46 = vpop.f32.mrf.mxu1  ;;  %v2750_v7 = vadd.f32 %v2749_v3, %v9772_v27 }
 0x52b   :  { %v3014_v15 = vadd.f32 %v3013_v56, %v2925_v54  ;;  %v8569_v56 = vld [vmem:[#allocation5 + $0x3a4] sm:$0xf]  ;;  %v8133_v54 = vld [vmem:[#allocation5 + $0x3b0] sm:$0xf0] }
 0x52c   :  { %v2839_v29 = vadd.f32 %v2838_v46, %v2750_v7  ;;  %4034 = vmatmul.bf16.gmra.mxu0 %v11054_v38  ;;  %4123 = vmatmul.bf16.gmra.mxu1 %v11055_v28 }
 0x52d   :  { %v3122_v19 = vmax.f32 %v3014_v15, 0.0  ;;  %4212 = vmatmul.bf16.gmra.mxu2 %v11056_v50  ;;  %v7752_v15 = vor.u32 %v8473_v1, %v7749_v42 }
 0x52e   :  { %4301 = vmatmul.bf16.gmra.mxu3 %v9795_v39 }
 0x52f   :  { %v9851_v17 = vpack.c.bf16 %v3122_v19, %v3118_v33  ;;  %4379 = vmatpush.bf16.msra.mxu0 %v7752_v15 }
 0x530   :  { %v2927_v12 = vpop.f32.mrf.mxu2 }
 0x531   :  { %11057 = vst [vmem:[#allocation18_spill] sm:$0xff] %v9851_v17  ;;  %v3016_v48 = vpop.f32.mrf.mxu3  ;;  %v2928_v31 = vadd.f32 %v2927_v12, %v2839_v29  ;;  %v2751_v59 = vpop.f32.mrf.mxu0  ;;  %v8136_v29 = vor.u32 %v8569_v56, %v8133_v54 }
 0x532   :  { %v2840_v13 = vpop.f32.mrf.mxu1  ;;  %v2752_v60 = vadd.f32 %v2751_v59, %v9772_v27 }
 0x533   :  { %v3017_v16 = vadd.f32 %v3016_v48, %v2928_v31  ;;  %4646 = vmatpush.bf16.msra.mxu3 %v8136_v29  ;;  %v8505_v48 = vld [vmem:[#allocation5 + $0x1a4] sm:$0xf]  ;;  %v7877_v31 = vld [vmem:[#allocation5 + $0x1b0] sm:$0xf0] }
 0x534   :  { %v2841_v49 = vadd.f32 %v2840_v13, %v2752_v60  ;;  %v7880_v59 = vor.u32 %v8505_v48, %v7877_v31  ;;  %v11066_v48 = vld [vmem:[#allocation56_spill] sm:$0xff] }
 0x535   :  { %v3126_v0 = vmax.f32 %v3017_v16, 0.0 }
 0x536   :  { %4468 = vmatpush.bf16.msra.mxu1 %v7880_v59 }
 0x538   :  { %v2929_v23 = vpop.f32.mrf.mxu2 }
 0x539   :  { %v3018_v45 = vpop.f32.mrf.mxu3  ;;  %v2930_v5 = vadd.f32 %v2929_v23, %v2841_v49  ;;  %v2754_v18 = vpop.f32.mrf.mxu0 }
 0x53a   :  { %v2843_v36 = vpop.f32.mrf.mxu1  ;;  %v2755_v25 = vadd.f32 %v2754_v18, %v9772_v27 }
 0x53b   :  { %v3019_v40 = vadd.f32 %v3018_v45, %v2930_v5 }
 0x53c   :  { %v2844_v51 = vadd.f32 %v2843_v36, %v2755_v25  ;;  %4039 = vmatmul.bf16.gmra.mxu0 %v11058_v21  ;;  %4128 = vmatmul.bf16.gmra.mxu1 %v11059_v2  ;;  %v11061_v36 = vld [vmem:[#allocation40_spill] sm:$0xff]  ;;  %v11062_v25 = vld [vmem:[#allocation55_spill] sm:$0xff] }
 0x53d   :  { %v3130_v14 = vmax.f32 %v3019_v40, 0.0  ;;  %4217 = vmatmul.bf16.gmra.mxu2 %v11060_v34 }
 0x53e   :  { %4306 = vmatmul.bf16.gmra.mxu3 %v9803_v24 }
 0x53f   :  { %v9859_v53 = vpack.c.bf16 %v3130_v14, %v3126_v0  ;;  %v11063_v0 = vld [vmem:[#allocation72_spill] sm:$0xff] }
 0x540   :  { %v2932_v62 = vpop.f32.mrf.mxu2 }
 0x541   :  { %v3021_v6 = vpop.f32.mrf.mxu3  ;;  %v2933_v3 = vadd.f32 %v2932_v62, %v2844_v51  ;;  %v2756_v46 = vpop.f32.mrf.mxu0 }
 0x542   :  { %v2845_v7 = vpop.f32.mrf.mxu1  ;;  %v2757_v33 = vadd.f32 %v2756_v46, %v9772_v27 }
 0x543   :  { %v3022_v19 = vadd.f32 %v3021_v6, %v2933_v3 }
 0x544   :  { %v2846_v12 = vadd.f32 %v2845_v7, %v2757_v33 }
 0x545   :  { %v3134_v40 = vmax.f32 %v3022_v19, 0.0 }
 0x548   :  { %v2934_v13 = vpop.f32.mrf.mxu2 }
 0x549   :  { %v3023_v60 = vpop.f32.mrf.mxu3  ;;  %v2935_v16 = vadd.f32 %v2934_v13, %v2846_v12  ;;  %v2759_v49 = vpop.f32.mrf.mxu0  ;;  %v11065_v12 = vld [vmem:[#allocation41_spill] sm:$0xff] }
 0x54a   :  { %v2848_v23 = vpop.f32.mrf.mxu1  ;;  %v2760_v45 = vadd.f32 %v2759_v49, %v9772_v27  ;;  %v11067_v13 = vld [vmem:[#allocation73_spill] sm:$0xff]  ;;  %v7989_v49 = vld [vmem:[#allocation5 + $0x290] sm:$0xf0] }
 0x54b   :  { %v3024_v5 = vadd.f32 %v3023_v60, %v2935_v16  ;;  %v8533_v16 = vld [vmem:[#allocation5 + $0x284] sm:$0xf] }
 0x54c   :  { %v2849_v18 = vadd.f32 %v2848_v23, %v2760_v45  ;;  %4044 = vmatmul.bf16.gmra.mxu0 %v11061_v36  ;;  %4133 = vmatmul.bf16.gmra.mxu1 %v11062_v25  ;;  %v8469_v23 = vld [vmem:[#allocation5 + $0x84] sm:$0xf] }
 0x54d   :  { %v3138_v51 = vmax.f32 %v3024_v5, 0.0  ;;  %4222 = vmatmul.bf16.gmra.mxu2 %v11063_v0 }
 0x54e   :  { %4311 = vmatmul.bf16.gmra.mxu3 %v9811_v30 }
 0x54f   :  { %v9867_v14 = vpack.c.bf16 %v3138_v51, %v3134_v40  ;;  %v7733_v40 = vld [vmem:[#allocation5 + $0x90] sm:$0xf0]  ;;  %v8565_v51 = vld [vmem:[#allocation5 + $0x384] sm:$0xf] }
 0x550   :  { %v2937_v43 = vpop.f32.mrf.mxu2 }
 0x551   :  { %11064 = vst [vmem:[#allocation19_spill] sm:$0xff] %v9867_v14  ;;  %v3026_v11 = vpop.f32.mrf.mxu3  ;;  %v2938_v1 = vadd.f32 %v2937_v43, %v2849_v18  ;;  %v2761_v62 = vpop.f32.mrf.mxu0  ;;  %v7992_v18 = vor.u32 %v8533_v16, %v7989_v49  ;;  %v8117_v43 = vld [vmem:[#allocation5 + $0x390] sm:$0xf0] }
 0x552   :  { %v2850_v6 = vpop.f32.mrf.mxu1  ;;  %v2762_v52 = vadd.f32 %v2761_v62, %v9772_v27 }
 0x553   :  { %v3027_v42 = vadd.f32 %v3026_v11, %v2938_v1  ;;  %4558 = vmatpush.bf16.msra.mxu2 %v7992_v18 }
 0x554   :  { %v2851_v56 = vadd.f32 %v2850_v6, %v2762_v52  ;;  %v7736_v6 = vor.u32 %v8469_v23, %v7733_v40  ;;  %v8120_v52 = vor.u32 %v8565_v51, %v8117_v43  ;;  %v11068_v23 = vld [vmem:[#allocation42_spill] sm:$0xff] }
 0x555   :  { %v3142_v31 = vmax.f32 %v3027_v42, 0.0  ;;  %v11070_v40 = vld [vmem:[#allocation74_spill] sm:$0xff] }
 0x556   :  { %4380 = vmatpush.bf16.msra.mxu0 %v7736_v6  ;;  %4647 = vmatpush.bf16.msra.mxu3 %v8120_v52 }
 0x558   :  { %v2939_v54 = vpop.f32.mrf.mxu2 }
 0x559   :  { %v3028_v3 = vpop.f32.mrf.mxu3  ;;  %v2940_v46 = vadd.f32 %v2939_v54, %v2851_v56  ;;  %v2764_v7 = vpop.f32.mrf.mxu0 }
 0x55a   :  { %v2853_v15 = vpop.f32.mrf.mxu1  ;;  %v2765_v29 = vadd.f32 %v2764_v7, %v9772_v27 }
 0x55b   :  { %v3029_v33 = vadd.f32 %v3028_v3, %v2940_v46  ;;  %v8501_v3 = vld [vmem:[#allocation5 + $0x184] sm:$0xf]  ;;  %v7861_v46 = vld [vmem:[#allocation5 + $0x190] sm:$0xf0] }
 0x55c   :  { %v2854_v19 = vadd.f32 %v2853_v15, %v2765_v29  ;;  %4049 = vmatmul.bf16.gmra.mxu0 %v11065_v12  ;;  %4138 = vmatmul.bf16.gmra.mxu1 %v11066_v48  ;;  %v7864_v7 = vor.u32 %v8501_v3, %v7861_v46 }
 0x55d   :  { %v3146_v59 = vmax.f32 %v3029_v33, 0.0  ;;  %4227 = vmatmul.bf16.gmra.mxu2 %v11067_v13 }
 0x55e   :  { %4316 = vmatmul.bf16.gmra.mxu3 %v9819_v22  ;;  %4469 = vmatpush.bf16.msra.mxu1 %v7864_v7 }
 0x55f   :  { %v9875_v60 = vpack.c.bf16 %v3146_v59, %v3142_v31 }
 0x560   :  { %v2942_v45 = vpop.f32.mrf.mxu2 }
 0x561   :  { %v3031_v5 = vpop.f32.mrf.mxu3  ;;  %v2943_v11 = vadd.f32 %v2942_v45, %v2854_v19  ;;  %v2766_v1 = vpop.f32.mrf.mxu0  ;;  %v11069_v45 = vld [vmem:[#allocation57_spill] sm:$0xff] }
 0x562   :  { %v2855_v62 = vpop.f32.mrf.mxu1  ;;  %v2767_v42 = vadd.f32 %v2766_v1, %v9772_v27 }
 0x563   :  { %v3032_v56 = vadd.f32 %v3031_v5, %v2943_v11 }
 0x564   :  { %v2856_v54 = vadd.f32 %v2855_v62, %v2767_v42 }
 0x565   :  { %v3150_v5 = vmax.f32 %v3032_v56, 0.0 }
 0x568   :  { %v2944_v15 = vpop.f32.mrf.mxu2 }
 0x569   :  { %v3033_v29 = vpop.f32.mrf.mxu3  ;;  %v2945_v33 = vadd.f32 %v2944_v15, %v2856_v54  ;;  %v2769_v31 = vpop.f32.mrf.mxu0 }
 0x56a   :  { %v2858_v19 = vpop.f32.mrf.mxu1  ;;  %v2770_v59 = vadd.f32 %v2769_v31, %v9772_v27 }
 0x56b   :  { %v3034_v16 = vadd.f32 %v3033_v29, %v2945_v33 }
 0x56c   :  { %v2859_v49 = vadd.f32 %v2858_v19, %v2770_v59  ;;  %4054 = vmatmul.bf16.gmra.mxu0 %v11068_v23  ;;  %4143 = vmatmul.bf16.gmra.mxu1 %v11069_v45  ;;  %v11072_v19 = vld [vmem:[#allocation43_spill] sm:$0xff]  ;;  %v11073_v59 = vld [vmem:[#allocation58_spill] sm:$0xff] }
 0x56d   :  { %v3154_v18 = vmax.f32 %v3034_v16, 0.0  ;;  %4232 = vmatmul.bf16.gmra.mxu2 %v11070_v40 }
 0x56e   :  { %4321 = vmatmul.bf16.gmra.mxu3 %v9827_v32 }
 0x56f   :  { %v9883_v51 = vpack.c.bf16 %v3154_v18, %v3150_v5  ;;  %v8529_v18 = vld [vmem:[#allocation5 + $0x264] sm:$0xf] }
 0x570   :  { %v2947_v43 = vpop.f32.mrf.mxu2 }
 0x571   :  { %11071 = vst [vmem:[#allocation20_spill] sm:$0xff] %v9883_v51  ;;  %v3036_v11 = vpop.f32.mrf.mxu3  ;;  %v2948_v1 = vadd.f32 %v2947_v43, %v2859_v49  ;;  %v2771_v62 = vpop.f32.mrf.mxu0  ;;  %v7973_v43 = vld [vmem:[#allocation5 + $0x270] sm:$0xf0] }
 0x572   :  { %v2860_v6 = vpop.f32.mrf.mxu1  ;;  %v2772_v52 = vadd.f32 %v2771_v62, %v9772_v27 }
 0x573   :  { %v3037_v42 = vadd.f32 %v3036_v11, %v2948_v1  ;;  %v8465_v11 = vld [vmem:[#allocation5 + $0x64] sm:$0xf] }
 0x574   :  { %v2861_v54 = vadd.f32 %v2860_v6, %v2772_v52  ;;  %v7976_v6 = vor.u32 %v8529_v18, %v7973_v43  ;;  %v7717_v52 = vld [vmem:[#allocation5 + $0x70] sm:$0xf0] }
 0x575   :  { %v3158_v16 = vmax.f32 %v3037_v42, 0.0  ;;  %v7720_v42 = vor.u32 %v8465_v11, %v7717_v52 }
 0x576   :  { %4559 = vmatpush.bf16.msra.mxu2 %v7976_v6  ;;  %v11075_v6 = vld [vmem:[#allocation59_spill] sm:$0xff] }
 0x577   :  { %4381 = vmatpush.bf16.msra.mxu0 %v7720_v42 }
 0x578   :  { %v2949_v3 = vpop.f32.mrf.mxu2 }
 0x579   :  { %v3038_v46 = vpop.f32.mrf.mxu3  ;;  %v2950_v7 = vadd.f32 %v2949_v3, %v2861_v54  ;;  %v2774_v56 = vpop.f32.mrf.mxu0  ;;  %v8561_v54 = vld [vmem:[#allocation5 + $0x364] sm:$0xf]  ;;  %v8101_v3 = vld [vmem:[#allocation5 + $0x370] sm:$0xf0] }
 0x57a   :  { %v2863_v15 = vpop.f32.mrf.mxu1  ;;  %v2775_v29 = vadd.f32 %v2774_v56, %v9772_v27 }
 0x57b   :  { %v3039_v33 = vadd.f32 %v3038_v46, %v2950_v7 }
 0x57c   :  { %v2864_v31 = vadd.f32 %v2863_v15, %v2775_v29  ;;  %4059 = vmatmul.bf16.gmra.mxu0 %v11072_v19  ;;  %4148 = vmatmul.bf16.gmra.mxu1 %v11073_v59  ;;  %v8104_v15 = vor.u32 %v8561_v54, %v8101_v3  ;;  %v11074_v54 = vld [vmem:[#allocation44_spill] sm:$0xff] }
 0x57d   :  { %v3162_v49 = vmax.f32 %v3039_v33, 0.0  ;;  %4237 = vmatmul.bf16.gmra.mxu2 %v9704_v37 }
 0x57e   :  { %4326 = vmatmul.bf16.gmra.mxu3 %v9835_v35  ;;  %v7845_v35 = vld [vmem:[#allocation5 + $0x170] sm:$0xf0] }
 0x57f   :  { %v9891_v5 = vpack.c.bf16 %v3162_v49, %v3158_v16  ;;  %4648 = vmatpush.bf16.msra.mxu3 %v8104_v15  ;;  %v8497_v49 = vld [vmem:[#allocation5 + $0x164] sm:$0xf]  ;;  %v9905_v15 = vld [vmem:[%s10786_s6] sm:$0xf] }
 0x580   :  { %v2952_v1 = vpop.f32.mrf.mxu2  ;;  %v7848_v37 = vor.u32 %v8497_v49, %v7845_v35  ;;  %11077 = vst [vmem:[#allocation22_spill] sm:$0xff] %v9905_v15 }
 0x581   :  { %v3041_v62 = vpop.f32.mrf.mxu3  ;;  %v2953_v46 = vadd.f32 %v2952_v1, %v2864_v31  ;;  %v2776_v7 = vpop.f32.mrf.mxu0 }
 0x582   :  { %v2865_v56 = vpop.f32.mrf.mxu1  ;;  %v2777_v29 = vadd.f32 %v2776_v7, %v9772_v27  ;;  %4470 = vmatpush.bf16.msra.mxu1 %v7848_v37 }
 0x583   :  { %v3042_v33 = vadd.f32 %v3041_v62, %v2953_v46 }
 0x584   :  { %v2866_v16 = vadd.f32 %v2865_v56, %v2777_v29 }
 0x585   :  { %v3166_v62 = vmax.f32 %v3042_v33, 0.0  ;;  %v9908_v33 = vperm.slane %v9905_v15, 0 }
 0x588   :  { %v2954_v59 = vpop.f32.mrf.mxu2 }
 0x589   :  { %v3043_v18 = vpop.f32.mrf.mxu3  ;;  %v2955_v43 = vadd.f32 %v2954_v59, %v2866_v16  ;;  %v2779_v19 = vpop.f32.mrf.mxu0 }
 0x58a   :  { %v2868_v31 = vpop.f32.mrf.mxu1  ;;  %v2780_v1 = vadd.f32 %v2779_v19, %v9772_v27 }
 0x58b   :  { %v3044_v11 = vadd.f32 %v3043_v18, %v2955_v43 }
 0x58c   :  { %v2869_v52 = vadd.f32 %v2868_v31, %v2780_v1  ;;  %4064 = vmatmul.bf16.gmra.mxu0 %v11074_v54  ;;  %4153 = vmatmul.bf16.gmra.mxu1 %v11075_v6 }
 0x58d   :  { %v3170_v3 = vmax.f32 %v3044_v11, 0.0  ;;  %4242 = vmatmul.bf16.gmra.mxu2 %v9712_v26 }
 0x58e   :  { %4331 = vmatmul.bf16.gmra.mxu3 %v9843_v47 }
 0x58f   :  { %v9899_v35 = vpack.c.bf16 %v3170_v3, %v3166_v62  ;;  %v11079_v62 = vld [vmem:[#allocation60_spill] sm:$0xff] }
 0x590   :  { %v2957_v37 = vpop.f32.mrf.mxu2 }
 0x591   :  { %11076 = vst [vmem:[#allocation21_spill] sm:$0xff] %v9899_v35  ;;  %v3046_v59 = vpop.f32.mrf.mxu3  ;;  %v2958_v46 = vadd.f32 %v2957_v37, %v2869_v52  ;;  %v2781_v7 = vpop.f32.mrf.mxu0 }
 0x592   :  { %v2870_v56 = vpop.f32.mrf.mxu1  ;;  %v2782_v19 = vadd.f32 %v2781_v7, %v9772_v27  ;;  %v11078_v27 = vld [vmem:[#allocation45_spill] sm:$0xff] }
 0x593   :  { %v3047_v42 = vadd.f32 %v3046_v59, %v2958_v46  ;;  %v8525_v59 = vld [vmem:[#allocation5 + $0x244] sm:$0xf]  ;;  %v7957_v46 = vld [vmem:[#allocation5 + $0x250] sm:$0xf0] }
 0x594   :  { %v2871_v29 = vadd.f32 %v2870_v56, %v2782_v19  ;;  %v7960_v7 = vor.u32 %v8525_v59, %v7957_v46  ;;  %v8461_v56 = vld [vmem:[#allocation5 + $0x44] sm:$0xf]  ;;  %v7701_v19 = vld [vmem:[#allocation5 + $0x50] sm:$0xf0] }
 0x595   :  { %v3174_v3 = vmax.f32 %v3047_v42, 0.0  ;;  %v8493_v46 = vld [vmem:[#allocation5 + $0x144] sm:$0xf] }
 0x596   :  { %4560 = vmatpush.bf16.msra.mxu2 %v7960_v7 }
 0x598   :  { %v2959_v16 = vpop.f32.mrf.mxu2 }
 0x599   :  { %v3048_v49 = vpop.f32.mrf.mxu3  ;;  %v2960_v18 = vadd.f32 %v2959_v16, %v2871_v29  ;;  %v4030_v43 = vpop.f32.mrf.mxu0  ;;  %v8557_v29 = vld [vmem:[#allocation5 + $0x344] sm:$0xf] }
 0x59a   :  { %v4119_v31 = vpop.f32.mrf.mxu1  ;;  %v4031_v1 = vadd.f32 %v4030_v43, %v9908_v33 }
 0x59b   :  { %v3049_v11 = vadd.f32 %v3048_v49, %v2960_v18  ;;  %v7704_v49 = vor.u32 %v8461_v56, %v7701_v19  ;;  %v8085_v18 = vld [vmem:[#allocation5 + $0x350] sm:$0xf0] }
 0x59c   :  { %v4120_v52 = vadd.f32 %v4119_v31, %v4031_v1  ;;  %4069 = vmatmul.bf16.gmra.mxu0 %v11078_v27  ;;  %4158 = vmatmul.bf16.gmra.mxu1 %v11079_v62  ;;  %v8088_v1 = vor.u32 %v8557_v29, %v8085_v18  ;;  %v7829_v27 = vld [vmem:[#allocation5 + $0x150] sm:$0xf0] }
 0x59d   :  { %v3178_v37 = vmax.f32 %v3049_v11, 0.0  ;;  %4247 = vmatmul.bf16.gmra.mxu2 %v9720_v41  ;;  %4382 = vmatpush.bf16.msra.mxu0 %v7704_v49  ;;  %v7832_v15 = vor.u32 %v8493_v46, %v7829_v27  ;;  %v11080_v18 = vld [vmem:[#allocation46_spill] sm:$0xff]  ;;  %v11081_v49 = vld [vmem:[#allocation61_spill] sm:$0xff] }
 0x59e   :  { %4336 = vmatmul.bf16.gmra.mxu3 %v9851_v17 }
 0x59f   :  { %v9915_v16 = vpack.c.bf16 %v3178_v37, %v3174_v3  ;;  %4649 = vmatpush.bf16.msra.mxu3 %v8088_v1  ;;  %4471 = vmatpush.bf16.msra.mxu1 %v7832_v15 }
 0x5a0   :  { %v4208_v43 = vpop.f32.mrf.mxu2 }
 0x5a1   :  { %v4297_v31 = vpop.f32.mrf.mxu3  ;;  %v4209_v42 = vadd.f32 %v4208_v43, %v4120_v52  ;;  %v4032_v11 = vpop.f32.mrf.mxu0 }
 0x5a2   :  { %v4121_v62 = vpop.f32.mrf.mxu1  ;;  %v4033_v17 = vadd.f32 %v4032_v11, %v9908_v33 }
 0x5a3   :  { %v4298_v41 = vadd.f32 %v4297_v31, %v4209_v42 }
 0x5a4   :  { %v4122_v59 = vadd.f32 %v4121_v62, %v4033_v17 }
 0x5a5   :  { %v5445_v43 = vmax.f32 %v4298_v41, 0.0 }
 0x5a8   :  { %v4210_v3 = vpop.f32.mrf.mxu2 }
 0x5a9   :  { %v4299_v37 = vpop.f32.mrf.mxu3  ;;  %v4211_v56 = vadd.f32 %v4210_v3, %v4122_v59  ;;  %v4035_v19 = vpop.f32.mrf.mxu0 }
 0x5aa   :  { %v4124_v47 = vpop.f32.mrf.mxu1  ;;  %v4036_v7 = vadd.f32 %v4035_v19, %v9908_v33 }
 0x5ab   :  { %v4300_v52 = vadd.f32 %v4299_v37, %v4211_v56 }
 0x5ac   :  { %v4125_v29 = vadd.f32 %v4124_v47, %v4036_v7  ;;  %4074 = vmatmul.bf16.gmra.mxu0 %v11080_v18  ;;  %4163 = vmatmul.bf16.gmra.mxu1 %v11081_v49 }
 0x5ad   :  { %v5449_v31 = vmax.f32 %v4300_v52, 0.0  ;;  %4252 = vmatmul.bf16.gmra.mxu2 %v9728_v20 }
 0x5ae   :  { %4341 = vmatmul.bf16.gmra.mxu3 %v9859_v53 }
 0x5af   :  { %v9923_v17 = vpack.c.bf16 %v5449_v31, %v5445_v43  ;;  %v11083_v43 = vld [vmem:[#allocation47_spill] sm:$0xff]  ;;  %v11084_v31 = vld [vmem:[#allocation62_spill] sm:$0xff] }
 0x5b0   :  { %v4213_v15 = vpop.f32.mrf.mxu2 }
 0x5b1   :  { %11082 = vst [vmem:[#allocation23_spill] sm:$0xff] %v9923_v17  ;;  %v4302_v27 = vpop.f32.mrf.mxu3  ;;  %v4214_v62 = vadd.f32 %v4213_v15, %v4125_v29  ;;  %v4037_v1 = vpop.f32.mrf.mxu0 }
 0x5b2   :  { %v4126_v42 = vpop.f32.mrf.mxu1  ;;  %v4038_v11 = vadd.f32 %v4037_v1, %v9908_v33 }
 0x5b3   :  { %v4303_v47 = vadd.f32 %v4302_v27, %v4214_v62  ;;  %v8521_v27 = vld [vmem:[#allocation5 + $0x224] sm:$0xf]  ;;  %v7941_v62 = vld [vmem:[#allocation5 + $0x230] sm:$0xf0] }
 0x5b4   :  { %v4127_v59 = vadd.f32 %v4126_v42, %v4038_v11  ;;  %v7944_v1 = vor.u32 %v8521_v27, %v7941_v62  ;;  %v8457_v42 = vld [vmem:[#allocation5 + $0x24] sm:$0xf]  ;;  %v7685_v11 = vld [vmem:[#allocation5 + $0x30] sm:$0xf0] }
 0x5b5   :  { %v5453_v29 = vmax.f32 %v4303_v47, 0.0  ;;  %v8489_v62 = vld [vmem:[#allocation5 + $0x124] sm:$0xf] }
 0x5b6   :  { %4561 = vmatpush.bf16.msra.mxu2 %v7944_v1 }
 0x5b8   :  { %v4215_v46 = vpop.f32.mrf.mxu2 }
 0x5b9   :  { %v4304_v3 = vpop.f32.mrf.mxu3  ;;  %v4216_v37 = vadd.f32 %v4215_v46, %v4127_v59  ;;  %v4040_v41 = vpop.f32.mrf.mxu0  ;;  %v8553_v59 = vld [vmem:[#allocation5 + $0x324] sm:$0xf]  ;;  %v7688_v46 = vor.u32 %v8457_v42, %v7685_v11 }
 0x5ba   :  { %v4129_v56 = vpop.f32.mrf.mxu1  ;;  %v4041_v19 = vadd.f32 %v4040_v41, %v9908_v33  ;;  %v8069_v41 = vld [vmem:[#allocation5 + $0x330] sm:$0xf0] }
 0x5bb   :  { %v4305_v7 = vadd.f32 %v4304_v3, %v4216_v37  ;;  %4383 = vmatpush.bf16.msra.mxu0 %v7688_v46  ;;  %v11087_v46 = vld [vmem:[#allocation63_spill] sm:$0xff] }
 0x5bc   :  { %v4130_v52 = vadd.f32 %v4129_v56, %v4041_v19  ;;  %4079 = vmatmul.bf16.gmra.mxu0 %v11083_v43  ;;  %4168 = vmatmul.bf16.gmra.mxu1 %v11084_v31  ;;  %v8072_v19 = vor.u32 %v8553_v59, %v8069_v41  ;;  %v7813_v31 = vld [vmem:[#allocation5 + $0x130] sm:$0xf0]  ;;  %v11086_v41 = vld [vmem:[#allocation48_spill] sm:$0xff] }
 0x5bd   :  { %v5457_v15 = vmax.f32 %v4305_v7, 0.0  ;;  %4257 = vmatmul.bf16.gmra.mxu2 %v9736_v55  ;;  %v7816_v43 = vor.u32 %v8489_v62, %v7813_v31 }
 0x5be   :  { %4346 = vmatmul.bf16.gmra.mxu3 %v9867_v14 }
 0x5bf   :  { %v9931_v3 = vpack.c.bf16 %v5457_v15, %v5453_v29  ;;  %4650 = vmatpush.bf16.msra.mxu3 %v8072_v19  ;;  %4472 = vmatpush.bf16.msra.mxu1 %v7816_v43 }
 0x5c0   :  { %v4218_v37 = vpop.f32.mrf.mxu2 }
 0x5c1   :  { %11085 = vst [vmem:[#allocation24_spill] sm:$0xff] %v9931_v3  ;;  %v4307_v56 = vpop.f32.mrf.mxu3  ;;  %v4219_v47 = vadd.f32 %v4218_v37, %v4130_v52  ;;  %v4042_v7 = vpop.f32.mrf.mxu0 }
 0x5c2   :  { %v4131_v17 = vpop.f32.mrf.mxu1  ;;  %v4043_v14 = vadd.f32 %v4042_v7, %v9908_v33 }
 0x5c3   :  { %v4308_v55 = vadd.f32 %v4307_v56, %v4219_v47 }
 0x5c4   :  { %v4132_v27 = vadd.f32 %v4131_v17, %v4043_v14 }
 0x5c5   :  { %v5461_v37 = vmax.f32 %v4308_v55, 0.0 }
 0x5c8   :  { %v4220_v42 = vpop.f32.mrf.mxu2 }
 0x5c9   :  { %v4309_v11 = vpop.f32.mrf.mxu3  ;;  %v4221_v29 = vadd.f32 %v4220_v42, %v4132_v27  ;;  %v4045_v15 = vpop.f32.mrf.mxu0 }
 0x5ca   :  { %v4134_v3 = vpop.f32.mrf.mxu1  ;;  %v4046_v1 = vadd.f32 %v4045_v15, %v9908_v33 }
 0x5cb   :  { %v4310_v52 = vadd.f32 %v4309_v11, %v4221_v29 }
 0x5cc   :  { %v4135_v59 = vadd.f32 %v4134_v3, %v4046_v1  ;;  %4084 = vmatmul.bf16.gmra.mxu0 %v11086_v41  ;;  %4173 = vmatmul.bf16.gmra.mxu1 %v11087_v46 }
 0x5cd   :  { %v5465_v56 = vmax.f32 %v4310_v52, 0.0  ;;  %4262 = vmatmul.bf16.gmra.mxu2 %v9744_v58 }
 0x5ce   :  { %4351 = vmatmul.bf16.gmra.mxu3 %v9875_v60 }
 0x5cf   :  { %v9939_v14 = vpack.c.bf16 %v5465_v56, %v5461_v37  ;;  %v11089_v37 = vld [vmem:[#allocation49_spill] sm:$0xff]  ;;  %v11090_v56 = vld [vmem:[#allocation64_spill] sm:$0xff] }
 0x5d0   :  { %v4223_v17 = vpop.f32.mrf.mxu2 }
 0x5d1   :  { %11088 = vst [vmem:[#allocation25_spill] sm:$0xff] %v9939_v14  ;;  %v4312_v43 = vpop.f32.mrf.mxu3  ;;  %v4224_v31 = vadd.f32 %v4223_v17, %v4135_v59  ;;  %v4047_v19 = vpop.f32.mrf.mxu0 }
 0x5d2   :  { %v4136_v47 = vpop.f32.mrf.mxu1  ;;  %v4048_v7 = vadd.f32 %v4047_v19, %v9908_v33 }
 0x5d3   :  { %v4313_v3 = vadd.f32 %v4312_v43, %v4224_v31  ;;  %v8517_v43 = vld [vmem:[#allocation5 + $0x204] sm:$0xf]  ;;  %v7925_v31 = vld [vmem:[#allocation5 + $0x210] sm:$0xf0] }
 0x5d4   :  { %v4137_v27 = vadd.f32 %v4136_v47, %v4048_v7  ;;  %v7928_v19 = vor.u32 %v8517_v43, %v7925_v31  ;;  %v8453_v47 = vld [vmem:[#allocation5 + $0x4] sm:$0xf]  ;;  %v7669_v7 = vld [vmem:[#allocation5 + $0x10] sm:$0xf0] }
 0x5d5   :  { %v5469_v59 = vmax.f32 %v4313_v3, 0.0  ;;  %v8485_v31 = vld [vmem:[#allocation5 + $0x104] sm:$0xf] }
 0x5d6   :  { %4562 = vmatpush.bf16.msra.mxu2 %v7928_v19 }
 0x5d8   :  { %v4225_v62 = vpop.f32.mrf.mxu2 }
 0x5d9   :  { %v4314_v42 = vpop.f32.mrf.mxu3  ;;  %v4226_v11 = vadd.f32 %v4225_v62, %v4137_v27  ;;  %v4050_v55 = vpop.f32.mrf.mxu0  ;;  %v8549_v27 = vld [vmem:[#allocation5 + $0x304] sm:$0xf]  ;;  %v7672_v62 = vor.u32 %v8453_v47, %v7669_v7 }
 0x5da   :  { %v4139_v29 = vpop.f32.mrf.mxu1  ;;  %v4051_v15 = vadd.f32 %v4050_v55, %v9908_v33  ;;  %v8053_v55 = vld [vmem:[#allocation5 + $0x310] sm:$0xf0] }
 0x5db   :  { %v4315_v1 = vadd.f32 %v4314_v42, %v4226_v11  ;;  %4384 = vmatpush.bf16.msra.mxu0 %v7672_v62  ;;  %v11093_v62 = vld [vmem:[#allocation65_spill] sm:$0xff] }
 0x5dc   :  { %v4140_v52 = vadd.f32 %v4139_v29, %v4051_v15  ;;  %4089 = vmatmul.bf16.gmra.mxu0 %v11089_v37  ;;  %4178 = vmatmul.bf16.gmra.mxu1 %v11090_v56  ;;  %v8056_v15 = vor.u32 %v8549_v27, %v8053_v55  ;;  %v7797_v56 = vld [vmem:[#allocation5 + $0x110] sm:$0xf0] }
 0x5dd   :  { %v5473_v17 = vmax.f32 %v4315_v1, 0.0  ;;  %4267 = vmatmul.bf16.gmra.mxu2 %v9752_v4  ;;  %v7800_v37 = vor.u32 %v8485_v31, %v7797_v56  ;;  %v11092_v55 = vld [vmem:[#allocation50_spill] sm:$0xff] }
 0x5de   :  { %4356 = vmatmul.bf16.gmra.mxu3 %v9883_v51 }
 0x5df   :  { %v9947_v42 = vpack.c.bf16 %v5473_v17, %v5469_v59  ;;  %4651 = vmatpush.bf16.msra.mxu3 %v8056_v15  ;;  %4473 = vmatpush.bf16.msra.mxu1 %v7800_v37 }
 0x5e0   :  { %v4228_v11 = vpop.f32.mrf.mxu2 }
 0x5e1   :  { %11091 = vst [vmem:[#allocation26_spill] sm:$0xff] %v9947_v42  ;;  %v4317_v29 = vpop.f32.mrf.mxu3  ;;  %v4229_v3 = vadd.f32 %v4228_v11, %v4140_v52  ;;  %v4052_v1 = vpop.f32.mrf.mxu0 }
 0x5e2   :  { %v4141_v14 = vpop.f32.mrf.mxu1  ;;  %v4053_v51 = vadd.f32 %v4052_v1, %v9908_v33 }
 0x5e3   :  { %v4318_v4 = vadd.f32 %v4317_v29, %v4229_v3 }
 0x5e4   :  { %v4142_v43 = vadd.f32 %v4141_v14, %v4053_v51 }
 0x5e5   :  { %v5477_v11 = vmax.f32 %v4318_v4, 0.0 }
 0x5e8   :  { %v4230_v47 = vpop.f32.mrf.mxu2 }
 0x5e9   :  { %v4319_v7 = vpop.f32.mrf.mxu3  ;;  %v4231_v59 = vadd.f32 %v4230_v47, %v4142_v43  ;;  %v4055_v17 = vpop.f32.mrf.mxu0 }
 0x5ea   :  { %v4144_v42 = vpop.f32.mrf.mxu1  ;;  %v4056_v19 = vadd.f32 %v4055_v17, %v9908_v33 }
 0x5eb   :  { %v4320_v52 = vadd.f32 %v4319_v7, %v4231_v59 }
 0x5ec   :  { %v4145_v27 = vadd.f32 %v4144_v42, %v4056_v19  ;;  %4094 = vmatmul.bf16.gmra.mxu0 %v11092_v55  ;;  %4183 = vmatmul.bf16.gmra.mxu1 %v11093_v62 }
 0x5ed   :  { %v5481_v29 = vmax.f32 %v4320_v52, 0.0  ;;  %4272 = vmatmul.bf16.gmra.mxu2 %v9760_v61 }
 0x5ee   :  { %4361 = vmatmul.bf16.gmra.mxu3 %v9891_v5 }
 0x5ef   :  { %v9955_v51 = vpack.c.bf16 %v5481_v29, %v5477_v11  ;;  %v11095_v11 = vld [vmem:[#allocation51_spill] sm:$0xff]  ;;  %v11096_v29 = vld [vmem:[#allocation66_spill] sm:$0xff] }
 0x5f0   :  { %v4233_v14 = vpop.f32.mrf.mxu2 }
 0x5f1   :  { %11094 = vst [vmem:[#allocation27_spill] sm:$0xff] %v9955_v51  ;;  %v4322_v37 = vpop.f32.mrf.mxu3  ;;  %v4234_v56 = vadd.f32 %v4233_v14, %v4145_v27  ;;  %v4057_v15 = vpop.f32.mrf.mxu0 }
 0x5f2   :  { %v4146_v3 = vpop.f32.mrf.mxu1  ;;  %v4058_v1 = vadd.f32 %v4057_v15, %v9908_v33 }
 0x5f3   :  { %v4323_v42 = vadd.f32 %v4322_v37, %v4234_v56  ;;  %v8043_v37 = vld [vmem:[#allocation5 + $0x2e8] sm:$0xf]  ;;  %v8548_v56 = vld [vmem:[#allocation5 + $0x2f4] sm:$0xf0] }
 0x5f4   :  { %v4147_v43 = vadd.f32 %v4146_v3, %v4058_v1  ;;  %v8044_v15 = vor.u32 %v8548_v56, %v8043_v37  ;;  %v7787_v3 = vld [vmem:[#allocation5 + $0xe8] sm:$0xf]  ;;  %v8484_v1 = vld [vmem:[#allocation5 + $0xf4] sm:$0xf0] }
 0x5f5   :  { %v5485_v27 = vmax.f32 %v4323_v42, 0.0  ;;  %v7915_v56 = vld [vmem:[#allocation5 + $0x1e8] sm:$0xf] }
 0x5f6   :  { %4911 = vmatpush.bf16.msrb.mxu2 %v8044_v15 }
 0x5f8   :  { %v4235_v31 = vpop.f32.mrf.mxu2 }
 0x5f9   :  { %v4324_v47 = vpop.f32.mrf.mxu3  ;;  %v4236_v7 = vadd.f32 %v4235_v31, %v4147_v43  ;;  %v4060_v4 = vpop.f32.mrf.mxu0  ;;  %v8171_v43 = vld [vmem:[#allocation5 + $0x3e8] sm:$0xf]  ;;  %v7788_v31 = vor.u32 %v8484_v1, %v7787_v3 }
 0x5fa   :  { %v4149_v59 = vpop.f32.mrf.mxu1  ;;  %v4061_v17 = vadd.f32 %v4060_v4, %v9908_v33  ;;  %v8580_v4 = vld [vmem:[#allocation5 + $0x3f4] sm:$0xf0] }
 0x5fb   :  { %v4325_v19 = vadd.f32 %v4324_v47, %v4236_v7  ;;  %4733 = vmatpush.bf16.msrb.mxu0 %v7788_v31  ;;  %v11099_v31 = vld [vmem:[#allocation68_spill] sm:$0xff] }
 0x5fc   :  { %v4150_v52 = vadd.f32 %v4149_v59, %v4061_v17  ;;  %4099 = vmatmul.bf16.gmra.mxu0 %v11095_v11  ;;  %4188 = vmatmul.bf16.gmra.mxu1 %v11096_v29  ;;  %v8172_v17 = vor.u32 %v8580_v4, %v8171_v43  ;;  %v8516_v29 = vld [vmem:[#allocation5 + $0x1f4] sm:$0xf0]  ;;  %v11098_v4 = vld [vmem:[#allocation36_spill] sm:$0xff] }
 0x5fd   :  { %v5489_v14 = vmax.f32 %v4325_v19, 0.0  ;;  %4277 = vmatmul.bf16.gmra.mxu2 %v9768_v10  ;;  %v7916_v11 = vor.u32 %v8516_v29, %v7915_v56 }
 0x5fe   :  { %4366 = vmatmul.bf16.gmra.mxu3 %v9899_v35 }
 0x5ff   :  { %v9963_v47 = vpack.c.bf16 %v5489_v14, %v5485_v27  ;;  %5000 = vmatpush.bf16.msrb.mxu3 %v8172_v17  ;;  %4822 = vmatpush.bf16.msrb.mxu1 %v7916_v11 }
 0x600   :  { %v4238_v7 = vpop.f32.mrf.mxu2 }
 0x601   :  { %11097 = vst [vmem:[#allocation28_spill] sm:$0xff] %v9963_v47  ;;  %v4327_v59 = vpop.f32.mrf.mxu3  ;;  %v4239_v42 = vadd.f32 %v4238_v7, %v4150_v52  ;;  %v4062_v19 = vpop.f32.mrf.mxu0 }
 0x602   :  { %v4151_v51 = vpop.f32.mrf.mxu1  ;;  %v4063_v35 = vadd.f32 %v4062_v19, %v9908_v33 }
 0x603   :  { %v4328_v10 = vadd.f32 %v4327_v59, %v4239_v42 }
 0x604   :  { %v4152_v37 = vadd.f32 %v4151_v51, %v4063_v35 }
 0x605   :  { %v5493_v7 = vmax.f32 %v4328_v10, 0.0 }
 0x608   :  { %v4240_v3 = vpop.f32.mrf.mxu2 }
 0x609   :  { %v4329_v1 = vpop.f32.mrf.mxu3  ;;  %v4241_v27 = vadd.f32 %v4240_v3, %v4152_v37  ;;  %v4065_v14 = vpop.f32.mrf.mxu0 }
 0x60a   :  { %v4154_v47 = vpop.f32.mrf.mxu1  ;;  %v4066_v15 = vadd.f32 %v4065_v14, %v9908_v33 }
 0x60b   :  { %v4330_v52 = vadd.f32 %v4329_v1, %v4241_v27 }
 0x60c   :  { %v4155_v43 = vadd.f32 %v4154_v47, %v4066_v15  ;;  %4104 = vmatmul.bf16.gmra.mxu0 %v11098_v4  ;;  %4193 = vmatmul.bf16.gmra.mxu1 %v11099_v31 }
 0x60d   :  { %v5497_v59 = vmax.f32 %v4330_v52, 0.0  ;;  %4282 = vmatmul.bf16.gmra.mxu2 %v9779_v8 }
 0x60e   :  { %4371 = vmatmul.bf16.gmra.mxu3 %v9915_v16 }
 0x60f   :  { %v9971_v35 = vpack.c.bf16 %v5497_v59, %v5493_v7  ;;  %v8027_v59 = vld [vmem:[#allocation5 + $0x2c8] sm:$0xf] }
 0x610   :  { %v4243_v51 = vpop.f32.mrf.mxu2 }
 0x611   :  { %11100 = vst [vmem:[#allocation29_spill] sm:$0xff] %v9971_v35  ;;  %v4332_v11 = vpop.f32.mrf.mxu3  ;;  %v4244_v29 = vadd.f32 %v4243_v51, %v4155_v43  ;;  %v4067_v17 = vpop.f32.mrf.mxu0  ;;  %v8544_v51 = vld [vmem:[#allocation5 + $0x2d4] sm:$0xf0] }
 0x612   :  { %v4156_v42 = vpop.f32.mrf.mxu1  ;;  %v4068_v19 = vadd.f32 %v4067_v17, %v9908_v33  ;;  %v8480_v17 = vld [vmem:[#allocation5 + $0xd4] sm:$0xf0] }
 0x613   :  { %v4333_v47 = vadd.f32 %v4332_v11, %v4244_v29  ;;  %v8028_v11 = vor.u32 %v8544_v51, %v8027_v59  ;;  %v7771_v29 = vld [vmem:[#allocation5 + $0xc8] sm:$0xf] }
 0x614   :  { %v4157_v37 = vadd.f32 %v4156_v42, %v4068_v19  ;;  %v8155_v42 = vld [vmem:[#allocation5 + $0x3c8] sm:$0xf]  ;;  %v7772_v19 = vor.u32 %v8480_v17, %v7771_v29 }
 0x615   :  { %v5501_v43 = vmax.f32 %v4333_v47, 0.0  ;;  %4912 = vmatpush.bf16.msrb.mxu2 %v8028_v11  ;;  %v7899_v51 = vld [vmem:[#allocation5 + $0x1c8] sm:$0xf] }
 0x616   :  { %4734 = vmatpush.bf16.msrb.mxu0 %v7772_v19 }
 0x618   :  { %v4245_v56 = vpop.f32.mrf.mxu2 }
 0x619   :  { %v4334_v3 = vpop.f32.mrf.mxu3  ;;  %v4246_v1 = vadd.f32 %v4245_v56, %v4157_v37  ;;  %v4070_v10 = vpop.f32.mrf.mxu0  ;;  %v8576_v37 = vld [vmem:[#allocation5 + $0x3d4] sm:$0xf0] }
 0x61a   :  { %v4159_v27 = vpop.f32.mrf.mxu1  ;;  %v4071_v14 = vadd.f32 %v4070_v10, %v9908_v33  ;;  %v8156_v10 = vor.u32 %v8576_v37, %v8155_v42 }
 0x61b   :  { %v4335_v15 = vadd.f32 %v4334_v3, %v4246_v1 }
 0x61c   :  { %v4160_v52 = vadd.f32 %v4159_v27, %v4071_v14  ;;  %4385 = vmatmul.bf16.vlgmr.msra.gmra.mxu0 %v11050_v57  ;;  %4474 = vmatmul.bf16.vlgmr.msra.gmra.mxu1 %v11051_v44 }
 0x61d   :  { %v5505_v7 = vmax.f32 %v4335_v15, 0.0  ;;  %4563 = vmatmul.bf16.vlgmr.msra.gmra.mxu2 %v11052_v9  ;;  %5001 = vmatpush.bf16.msrb.mxu3 %v8156_v10 }
 0x61e   :  { %4652 = vmatmul.bf16.vlgmr.msra.gmra.mxu3 %v9787_v63  ;;  %v8512_v63 = vld [vmem:[#allocation5 + $0x1d4] sm:$0xf0] }
 0x61f   :  { %v9979_v56 = vpack.c.bf16 %v5505_v7, %v5501_v43  ;;  %v7900_v9 = vor.u32 %v8512_v63, %v7899_v51 }
 0x620   :  { %v4248_v3 = vpop.f32.mrf.mxu2 }
 0x621   :  { %11101 = vst [vmem:[#allocation30_spill] sm:$0xff] %v9979_v56  ;;  %v4337_v1 = vpop.f32.mrf.mxu3  ;;  %v4249_v47 = vadd.f32 %v4248_v3, %v4160_v52  ;;  %v4072_v27 = vpop.f32.mrf.mxu0  ;;  %4823 = vmatpush.bf16.msrb.mxu1 %v7900_v9 }
 0x622   :  { %v4161_v14 = vpop.f32.mrf.mxu1  ;;  %v4073_v15 = vadd.f32 %v4072_v27, %v9908_v33 }
 0x623   :  { %v4338_v35 = vadd.f32 %v4337_v1, %v4249_v47 }
 0x624   :  { %v4162_v59 = vadd.f32 %v4161_v14, %v4073_v15 }
 0x625   :  { %v5509_v19 = vmax.f32 %v4338_v35, 0.0 }
 0x628   :  { %v4250_v29 = vpop.f32.mrf.mxu2 }
 0x629   :  { %v4339_v17 = vpop.f32.mrf.mxu3  ;;  %v4251_v43 = vadd.f32 %v4250_v29, %v4162_v59  ;;  %v4075_v7 = vpop.f32.mrf.mxu0 }
 0x62a   :  { %v4164_v56 = vpop.f32.mrf.mxu1  ;;  %v4076_v11 = vadd.f32 %v4075_v7, %v9908_v33 }
 0x62b   :  { %v4340_v52 = vadd.f32 %v4339_v17, %v4251_v43 }
 0x62c   :  { %v4165_v42 = vadd.f32 %v4164_v56, %v4076_v11  ;;  %4390 = vmatmul.bf16.gmra.mxu0 %v11054_v38  ;;  %4479 = vmatmul.bf16.gmra.mxu1 %v11055_v28 }
 0x62d   :  { %v5513_v37 = vmax.f32 %v4340_v52, 0.0  ;;  %4568 = vmatmul.bf16.gmra.mxu2 %v11056_v50 }
 0x62e   :  { %4657 = vmatmul.bf16.gmra.mxu3 %v9795_v39 }
 0x62f   :  { %v9987_v63 = vpack.c.bf16 %v5513_v37, %v5509_v19  ;;  %v8540_v19 = vld [vmem:[#allocation5 + $0x2b4] sm:$0xf0] }
 0x630   :  { %v4253_v9 = vpop.f32.mrf.mxu2 }
 0x631   :  { %11102 = vst [vmem:[#allocation31_spill] sm:$0xff] %v9987_v63  ;;  %v4342_v3 = vpop.f32.mrf.mxu3  ;;  %v4254_v1 = vadd.f32 %v4253_v9, %v4165_v42  ;;  %v4077_v10 = vpop.f32.mrf.mxu0  ;;  %v8011_v42 = vld [vmem:[#allocation5 + $0x2a8] sm:$0xf] }
 0x632   :  { %v4166_v47 = vpop.f32.mrf.mxu1  ;;  %v4078_v27 = vadd.f32 %v4077_v10, %v9908_v33  ;;  %v8012_v37 = vor.u32 %v8540_v19, %v8011_v42  ;;  %v7755_v9 = vld [vmem:[#allocation5 + $0xa8] sm:$0xf]  ;;  %v8508_v19 = vld [vmem:[#allocation5 + $0x1b4] sm:$0xf0] }
 0x633   :  { %v4343_v56 = vadd.f32 %v4342_v3, %v4254_v1  ;;  %v8476_v3 = vld [vmem:[#allocation5 + $0xb4] sm:$0xf0]  ;;  %v8139_v1 = vld [vmem:[#allocation5 + $0x3a8] sm:$0xf] }
 0x634   :  { %v4167_v14 = vadd.f32 %v4166_v47, %v4078_v27  ;;  %v7756_v10 = vor.u32 %v8476_v3, %v7755_v9  ;;  %v8572_v47 = vld [vmem:[#allocation5 + $0x3b4] sm:$0xf0]  ;;  %4913 = vmatpush.bf16.msrb.mxu2 %v8012_v37  ;;  %v7883_v42 = vld [vmem:[#allocation5 + $0x1a8] sm:$0xf] }
 0x635   :  { %v5517_v11 = vmax.f32 %v4343_v56, 0.0  ;;  %v7884_v63 = vor.u32 %v8508_v19, %v7883_v42 }
 0x636   :  { %4735 = vmatpush.bf16.msrb.mxu0 %v7756_v10 }
 0x637   :  { %4824 = vmatpush.bf16.msrb.mxu1 %v7884_v63 }
 0x638   :  { %v4255_v15 = vpop.f32.mrf.mxu2 }
 0x639   :  { %v4344_v59 = vpop.f32.mrf.mxu3  ;;  %v4256_v51 = vadd.f32 %v4255_v15, %v4167_v14  ;;  %v4080_v35 = vpop.f32.mrf.mxu0 }
 0x63a   :  { %v4169_v29 = vpop.f32.mrf.mxu1  ;;  %v4081_v17 = vadd.f32 %v4080_v35, %v9908_v33 }
 0x63b   :  { %v4345_v43 = vadd.f32 %v4344_v59, %v4256_v51  ;;  %v8140_v59 = vor.u32 %v8572_v47, %v8139_v1 }
 0x63c   :  { %v4170_v7 = vadd.f32 %v4169_v29, %v4081_v17  ;;  %4395 = vmatmul.bf16.gmra.mxu0 %v11058_v21  ;;  %4484 = vmatmul.bf16.gmra.mxu1 %v11059_v2 }
 0x63d   :  { %v5521_v52 = vmax.f32 %v4345_v43, 0.0  ;;  %4573 = vmatmul.bf16.gmra.mxu2 %v11060_v34  ;;  %5002 = vmatpush.bf16.msrb.mxu3 %v8140_v59 }
 0x63e   :  { %4662 = vmatmul.bf16.gmra.mxu3 %v9803_v24 }
 0x63f   :  { %v9995_v27 = vpack.c.bf16 %v5521_v52, %v5517_v11 }
 0x640   :  { %v4258_v14 = vpop.f32.mrf.mxu2 }
 0x641   :  { %11103 = vst [vmem:[#allocation67_spill] sm:$0xff] %v9995_v27  ;;  %v4347_v15 = vpop.f32.mrf.mxu3  ;;  %v4259_v56 = vadd.f32 %v4258_v14, %v4170_v7  ;;  %v4082_v51 = vpop.f32.mrf.mxu0 }
 0x642   :  { %v4171_v35 = vpop.f32.mrf.mxu1  ;;  %v4083_v29 = vadd.f32 %v4082_v51, %v9908_v33 }
 0x643   :  { %v4348_v17 = vadd.f32 %v4347_v15, %v4259_v56 }
 0x644   :  { %v4172_v43 = vadd.f32 %v4171_v35, %v4083_v29 }
 0x645   :  { %v5525_v10 = vmax.f32 %v4348_v17, 0.0 }
 0x648   :  { %v4260_v9 = vpop.f32.mrf.mxu2 }
 0x649   :  { %v4349_v3 = vpop.f32.mrf.mxu3  ;;  %v4261_v11 = vadd.f32 %v4260_v9, %v4172_v43  ;;  %v4085_v52 = vpop.f32.mrf.mxu0 }
 0x64a   :  { %v4174_v27 = vpop.f32.mrf.mxu1  ;;  %v4086_v37 = vadd.f32 %v4085_v52, %v9908_v33 }
 0x64b   :  { %v4350_v7 = vadd.f32 %v4349_v3, %v4261_v11 }
 0x64c   :  { %v4175_v1 = vadd.f32 %v4174_v27, %v4086_v37  ;;  %4400 = vmatmul.bf16.gmra.mxu0 %v11061_v36  ;;  %4489 = vmatmul.bf16.gmra.mxu1 %v11062_v25 }
 0x64d   :  { %v5529_v47 = vmax.f32 %v4350_v7, 0.0  ;;  %4578 = vmatmul.bf16.gmra.mxu2 %v11063_v0 }
 0x64e   :  { %4667 = vmatmul.bf16.gmra.mxu3 %v9811_v30 }
 0x64f   :  { %v10003_v14 = vpack.c.bf16 %v5529_v47, %v5525_v10  ;;  %v8536_v10 = vld [vmem:[#allocation5 + $0x294] sm:$0xf0] }
 0x650   :  { %v4263_v63 = vpop.f32.mrf.mxu2 }
 0x651   :  { %11104 = vst [vmem:[#allocation32_spill] sm:$0xff] %v10003_v14  ;;  %v4352_v15 = vpop.f32.mrf.mxu3  ;;  %v4264_v59 = vadd.f32 %v4263_v63, %v4175_v1  ;;  %v4087_v56 = vpop.f32.mrf.mxu0  ;;  %v7995_v1 = vld [vmem:[#allocation5 + $0x288] sm:$0xf] }
 0x652   :  { %v4176_v51 = vpop.f32.mrf.mxu1  ;;  %v4088_v35 = vadd.f32 %v4087_v56, %v9908_v33  ;;  %v7996_v47 = vor.u32 %v8536_v10, %v7995_v1  ;;  %v7739_v63 = vld [vmem:[#allocation5 + $0x88] sm:$0xf]  ;;  %v8504_v10 = vld [vmem:[#allocation5 + $0x194] sm:$0xf0] }
 0x653   :  { %v4353_v27 = vadd.f32 %v4352_v15, %v4264_v59  ;;  %v8472_v15 = vld [vmem:[#allocation5 + $0x94] sm:$0xf0]  ;;  %v8123_v59 = vld [vmem:[#allocation5 + $0x388] sm:$0xf] }
 0x654   :  { %v4177_v29 = vadd.f32 %v4176_v51, %v4088_v35  ;;  %v7740_v56 = vor.u32 %v8472_v15, %v7739_v63  ;;  %v8568_v51 = vld [vmem:[#allocation5 + $0x394] sm:$0xf0]  ;;  %4914 = vmatpush.bf16.msrb.mxu2 %v7996_v47  ;;  %v7867_v1 = vld [vmem:[#allocation5 + $0x188] sm:$0xf] }
 0x655   :  { %v5533_v37 = vmax.f32 %v4353_v27, 0.0  ;;  %v7868_v14 = vor.u32 %v8504_v10, %v7867_v1 }
 0x656   :  { %4736 = vmatpush.bf16.msrb.mxu0 %v7740_v56 }
 0x657   :  { %4825 = vmatpush.bf16.msrb.mxu1 %v7868_v14 }
 0x658   :  { %v4265_v43 = vpop.f32.mrf.mxu2 }
 0x659   :  { %v4354_v42 = vpop.f32.mrf.mxu3  ;;  %v4266_v19 = vadd.f32 %v4265_v43, %v4177_v29  ;;  %v4090_v17 = vpop.f32.mrf.mxu0 }
 0x65a   :  { %v4179_v9 = vpop.f32.mrf.mxu1  ;;  %v4091_v3 = vadd.f32 %v4090_v17, %v9908_v33 }
 0x65b   :  { %v4355_v11 = vadd.f32 %v4354_v42, %v4266_v19  ;;  %v8124_v42 = vor.u32 %v8568_v51, %v8123_v59 }
 0x65c   :  { %v4180_v52 = vadd.f32 %v4179_v9, %v4091_v3  ;;  %4405 = vmatmul.bf16.gmra.mxu0 %v11065_v12  ;;  %4494 = vmatmul.bf16.gmra.mxu1 %v11066_v48 }
 0x65d   :  { %v5537_v7 = vmax.f32 %v4355_v11, 0.0  ;;  %4583 = vmatmul.bf16.gmra.mxu2 %v11067_v13  ;;  %5003 = vmatpush.bf16.msrb.mxu3 %v8124_v42 }
 0x65e   :  { %4672 = vmatmul.bf16.gmra.mxu3 %v9819_v22 }
 0x65f   :  { %v10011_v35 = vpack.c.bf16 %v5537_v7, %v5533_v37 }
 0x660   :  { %v4268_v29 = vpop.f32.mrf.mxu2 }
 0x661   :  { %11105 = vst [vmem:[#allocation33_spill] sm:$0xff] %v10011_v35  ;;  %v4357_v43 = vpop.f32.mrf.mxu3  ;;  %v4269_v27 = vadd.f32 %v4268_v29, %v4180_v52  ;;  %v4092_v19 = vpop.f32.mrf.mxu0 }
 0x662   :  { %v4181_v17 = vpop.f32.mrf.mxu1  ;;  %v4093_v9 = vadd.f32 %v4092_v19, %v9908_v33 }
 0x663   :  { %v4358_v3 = vadd.f32 %v4357_v43, %v4269_v27 }
 0x664   :  { %v4182_v11 = vadd.f32 %v4181_v17, %v4093_v9 }
 0x665   :  { %v5541_v56 = vmax.f32 %v4358_v3, 0.0 }
 0x668   :  { %v4270_v63 = vpop.f32.mrf.mxu2 }
 0x669   :  { %v4359_v15 = vpop.f32.mrf.mxu3  ;;  %v4271_v37 = vadd.f32 %v4270_v63, %v4182_v11  ;;  %v4095_v7 = vpop.f32.mrf.mxu0 }
 0x66a   :  { %v4184_v35 = vpop.f32.mrf.mxu1  ;;  %v4096_v47 = vadd.f32 %v4095_v7, %v9908_v33 }
 0x66b   :  { %v4360_v52 = vadd.f32 %v4359_v15, %v4271_v37 }
 0x66c   :  { %v4185_v59 = vadd.f32 %v4184_v35, %v4096_v47  ;;  %4410 = vmatmul.bf16.gmra.mxu0 %v11068_v23  ;;  %4499 = vmatmul.bf16.gmra.mxu1 %v11069_v45  ;;  %v11107_v47 = vld [vmem:[#allocation43_spill] sm:$0xff] }
 0x66d   :  { %v5545_v51 = vmax.f32 %v4360_v52, 0.0  ;;  %4588 = vmatmul.bf16.gmra.mxu2 %v11070_v40  ;;  %v11108_v52 = vld [vmem:[#allocation58_spill] sm:$0xff] }
 0x66e   :  { %4677 = vmatmul.bf16.gmra.mxu3 %v9827_v32 }
 0x66f   :  { %v10019_v29 = vpack.c.bf16 %v5545_v51, %v5541_v56  ;;  %v11109_v51 = vld [vmem:[#allocation75_spill] sm:$0xff] }
 0x670   :  { %v4273_v14 = vpop.f32.mrf.mxu2 }
 0x671   :  { %11106 = vst [vmem:[#allocation34_spill] sm:$0xff] %v10019_v29  ;;  %v4362_v43 = vpop.f32.mrf.mxu3  ;;  %v4274_v42 = vadd.f32 %v4273_v14, %v4185_v59  ;;  %v4097_v27 = vpop.f32.mrf.mxu0  ;;  %v11110_v14 = vld [vmem:[#allocation16_spill] sm:$0xff] }
 0x672   :  { %v4186_v19 = vpop.f32.mrf.mxu1  ;;  %v4098_v17 = vadd.f32 %v4097_v27, %v9908_v33 }
 0x673   :  { %v4363_v35 = vadd.f32 %v4362_v43, %v4274_v42  ;;  %v7979_v43 = vld [vmem:[#allocation5 + $0x268] sm:$0xf]  ;;  %v8532_v42 = vld [vmem:[#allocation5 + $0x274] sm:$0xf0] }
 0x674   :  { %v4187_v9 = vadd.f32 %v4186_v19, %v4098_v17  ;;  %v7980_v27 = vor.u32 %v8532_v42, %v7979_v43  ;;  %v7723_v19 = vld [vmem:[#allocation5 + $0x68] sm:$0xf]  ;;  %v8468_v17 = vld [vmem:[#allocation5 + $0x74] sm:$0xf0] }
 0x675   :  { %v5549_v59 = vmax.f32 %v4363_v35, 0.0  ;;  %v7851_v42 = vld [vmem:[#allocation5 + $0x168] sm:$0xf] }
 0x676   :  { %4915 = vmatpush.bf16.msrb.mxu2 %v7980_v27 }
 0x678   :  { %v4275_v11 = vpop.f32.mrf.mxu2 }
 0x679   :  { %v4364_v1 = vpop.f32.mrf.mxu3  ;;  %v4276_v10 = vadd.f32 %v4275_v11, %v4187_v9  ;;  %v4100_v3 = vpop.f32.mrf.mxu0  ;;  %v8107_v9 = vld [vmem:[#allocation5 + $0x368] sm:$0xf]  ;;  %v7724_v11 = vor.u32 %v8468_v17, %v7723_v19 }
 0x67a   :  { %v4189_v63 = vpop.f32.mrf.mxu1  ;;  %v4101_v15 = vadd.f32 %v4100_v3, %v9908_v33  ;;  %v8564_v3 = vld [vmem:[#allocation5 + $0x374] sm:$0xf0] }
 0x67b   :  { %v4365_v37 = vadd.f32 %v4364_v1, %v4276_v10  ;;  %4737 = vmatpush.bf16.msrb.mxu0 %v7724_v11 }
 0x67c   :  { %v4190_v7 = vadd.f32 %v4189_v63, %v4101_v15  ;;  %4415 = vmatmul.bf16.gmra.mxu0 %v11107_v47  ;;  %4504 = vmatmul.bf16.gmra.mxu1 %v11108_v52  ;;  %v8108_v15 = vor.u32 %v8564_v3, %v8107_v9  ;;  %v8500_v52 = vld [vmem:[#allocation5 + $0x174] sm:$0xf0] }
 0x67d   :  { %v5553_v56 = vmax.f32 %v4365_v37, 0.0  ;;  %4593 = vmatmul.bf16.gmra.mxu2 %v11109_v51  ;;  %v7852_v47 = vor.u32 %v8500_v52, %v7851_v42 }
 0x67e   :  { %4682 = vmatmul.bf16.gmra.mxu3 %v11110_v14 }
 0x67f   :  { %v10027_v1 = vpack.c.bf16 %v5553_v56, %v5549_v59  ;;  %5004 = vmatpush.bf16.msrb.mxu3 %v8108_v15  ;;  %4826 = vmatpush.bf16.msrb.mxu1 %v7852_v47 }
 0x680   :  { %v4278_v10 = vpop.f32.mrf.mxu2 }
 0x681   :  { %11111 = vst [vmem:[#allocation35_spill] sm:$0xff] %v10027_v1  ;;  %v4367_v63 = vpop.f32.mrf.mxu3  ;;  %v4279_v35 = vadd.f32 %v4278_v10, %v4190_v7  ;;  %v4102_v37 = vpop.f32.mrf.mxu0 }
 0x682   :  { %v4191_v29 = vpop.f32.mrf.mxu1  ;;  %v4103_v14 = vadd.f32 %v4102_v37, %v9908_v33 }
 0x683   :  { %v4368_v51 = vadd.f32 %v4367_v63, %v4279_v35 }
 0x684   :  { %v4192_v43 = vadd.f32 %v4191_v29, %v4103_v14  ;;  %v11112_v29 = vld [vmem:[#allocation17_spill] sm:$0xff] }
 0x685   :  { %v5557_v11 = vmax.f32 %v4368_v51, 0.0 }
 0x688   :  { %v4280_v19 = vpop.f32.mrf.mxu2 }
 0x689   :  { %v4369_v17 = vpop.f32.mrf.mxu3  ;;  %v4281_v59 = vadd.f32 %v4280_v19, %v4192_v43  ;;  %v4105_v56 = vpop.f32.mrf.mxu0  ;;  %v11114_v43 = vld [vmem:[#allocation22_spill] sm:$0xff] }
 0x68a   :  { %v4194_v1 = vpop.f32.mrf.mxu1  ;;  %v4106_v27 = vadd.f32 %v4105_v56, %v9908_v33  ;;  %v10039_v42 = vperm.slane %v11114_v43, 1  ;;  %v8464_v43 = vld [vmem:[#allocation5 + $0x54] sm:$0xf0] }
 0x68b   :  { %v4370_v7 = vadd.f32 %v4369_v17, %v4281_v59 }
 0x68c   :  { %v4195_v9 = vadd.f32 %v4194_v1, %v4106_v27  ;;  %4420 = vmatmul.bf16.gmra.mxu0 %v11074_v54  ;;  %4509 = vmatmul.bf16.gmra.mxu1 %v11075_v6 }
 0x68d   :  { %v5561_v3 = vmax.f32 %v4370_v7, 0.0  ;;  %4598 = vmatmul.bf16.gmra.mxu2 %v9712_v26 }
 0x68e   :  { %4687 = vmatmul.bf16.gmra.mxu3 %v11112_v29 }
 0x68f   :  { %v10035_v52 = vpack.c.bf16 %v5561_v3, %v5557_v11  ;;  %v11115_v3 = vld [vmem:[#allocation45_spill] sm:$0xff] }
 0x690   :  { %v4283_v47 = vpop.f32.mrf.mxu2 }
 0x691   :  { %11113 = vst [vmem:[#allocation37_spill] sm:$0xff] %v10035_v52  ;;  %v4372_v14 = vpop.f32.mrf.mxu3  ;;  %v4284_v10 = vadd.f32 %v4283_v47, %v4195_v9  ;;  %v4107_v63 = vpop.f32.mrf.mxu0  ;;  %v11116_v9 = vld [vmem:[#allocation60_spill] sm:$0xff] }
 0x692   :  { %v4196_v15 = vpop.f32.mrf.mxu1  ;;  %v4108_v35 = vadd.f32 %v4107_v63, %v9908_v33  ;;  %v7963_v63 = vld [vmem:[#allocation5 + $0x248] sm:$0xf] }
 0x693   :  { %v4373_v1 = vadd.f32 %v4372_v14, %v4284_v10  ;;  %v11117_v14 = vld [vmem:[#allocation76_spill] sm:$0xff]  ;;  %v11118_v10 = vld [vmem:[#allocation18_spill] sm:$0xff] }
 0x694   :  { %v4197_v37 = vadd.f32 %v4196_v15, %v4108_v35  ;;  %v8528_v15 = vld [vmem:[#allocation5 + $0x254] sm:$0xf0] }
 0x695   :  { %v5565_v47 = vmax.f32 %v4373_v1, 0.0  ;;  %v7964_v35 = vor.u32 %v8528_v15, %v7963_v63  ;;  %v7835_v15 = vld [vmem:[#allocation5 + $0x148] sm:$0xf] }
 0x697   :  { %4916 = vmatpush.bf16.msrb.mxu2 %v7964_v35 }
 0x698   :  { %v4285_v51 = vpop.f32.mrf.mxu2 }
 0x699   :  { %v4374_v19 = vpop.f32.mrf.mxu3  ;;  %v4286_v17 = vadd.f32 %v4285_v51, %v4197_v37  ;;  %v4386_v59 = vpop.f32.mrf.mxu0  ;;  %v7707_v37 = vld [vmem:[#allocation5 + $0x48] sm:$0xf] }
 0x69a   :  { %v4475_v56 = vpop.f32.mrf.mxu1  ;;  %v4387_v27 = vadd.f32 %v4386_v59, %v10039_v42  ;;  %v8091_v51 = vld [vmem:[#allocation5 + $0x348] sm:$0xf]  ;;  %v7708_v52 = vor.u32 %v8464_v43, %v7707_v37  ;;  %v8560_v59 = vld [vmem:[#allocation5 + $0x354] sm:$0xf0] }
 0x69b   :  { %v4375_v7 = vadd.f32 %v4374_v19, %v4286_v17 }
 0x69c   :  { %v4476_v11 = vadd.f32 %v4475_v56, %v4387_v27  ;;  %4425 = vmatmul.bf16.gmra.mxu0 %v11115_v3  ;;  %4514 = vmatmul.bf16.gmra.mxu1 %v11116_v9  ;;  %v8092_v27 = vor.u32 %v8560_v59, %v8091_v51  ;;  %v8496_v3 = vld [vmem:[#allocation5 + $0x154] sm:$0xf0] }
 0x69d   :  { %v5569_v33 = vmax.f32 %v4375_v7, 0.0  ;;  %4603 = vmatmul.bf16.gmra.mxu2 %v11117_v14  ;;  %4738 = vmatpush.bf16.msrb.mxu0 %v7708_v52  ;;  %v7836_v29 = vor.u32 %v8496_v3, %v7835_v15 }
 0x69e   :  { %4692 = vmatmul.bf16.gmra.mxu3 %v11118_v10 }
 0x69f   :  { %v10046_v19 = vpack.c.bf16 %v5569_v33, %v5565_v47  ;;  %5005 = vmatpush.bf16.msrb.mxu3 %v8092_v27  ;;  %4827 = vmatpush.bf16.msrb.mxu1 %v7836_v29 }
 0x6a0   :  { %v4564_v17 = vpop.f32.mrf.mxu2 }
 0x6a1   :  { %11119 = vst [vmem:[#allocation52_spill] sm:$0xff] %v10046_v19  ;;  %v4653_v56 = vpop.f32.mrf.mxu3  ;;  %v4565_v1 = vadd.f32 %v4564_v17, %v4476_v11  ;;  %v4388_v7 = vpop.f32.mrf.mxu0 }
 0x6a2   :  { %v4477_v9 = vpop.f32.mrf.mxu1  ;;  %v4389_v10 = vadd.f32 %v4388_v7, %v10039_v42 }
 0x6a3   :  { %v4654_v14 = vadd.f32 %v4653_v56, %v4565_v1 }
 0x6a4   :  { %v4478_v63 = vadd.f32 %v4477_v9, %v4389_v10 }
 0x6a5   :  { %v5446_v52 = vmax.f32 %v4654_v14, 0.0 }
 0x6a8   :  { %v4566_v37 = vpop.f32.mrf.mxu2 }
 0x6a9   :  { %v4655_v43 = vpop.f32.mrf.mxu3  ;;  %v4567_v47 = vadd.f32 %v4566_v37, %v4478_v63  ;;  %v4391_v33 = vpop.f32.mrf.mxu0 }
 0x6aa   :  { %v4480_v19 = vpop.f32.mrf.mxu1  ;;  %v4392_v35 = vadd.f32 %v4391_v33, %v10039_v42 }
 0x6ab   :  { %v4656_v11 = vadd.f32 %v4655_v43, %v4567_v47 }
 0x6ac   :  { %v4481_v51 = vadd.f32 %v4480_v19, %v4392_v35  ;;  %4430 = vmatmul.bf16.gmra.mxu0 %v11080_v18  ;;  %4519 = vmatmul.bf16.gmra.mxu1 %v11081_v49  ;;  %v11121_v35 = vld [vmem:[#allocation47_spill] sm:$0xff] }
 0x6ad   :  { %v5450_v59 = vmax.f32 %v4656_v11, 0.0  ;;  %4608 = vmatmul.bf16.gmra.mxu2 %v9728_v20  ;;  %v11122_v11 = vld [vmem:[#allocation62_spill] sm:$0xff] }
 0x6ae   :  { %4697 = vmatmul.bf16.gmra.mxu3 %v9859_v53 }
 0x6af   :  { %v10054_v3 = vpack.c.bf16 %v5450_v59, %v5446_v52  ;;  %v11123_v59 = vld [vmem:[#allocation12_spill] sm:$0xff] }
 0x6b0   :  { %v4569_v29 = vpop.f32.mrf.mxu2 }
 0x6b1   :  { %11120 = vst [vmem:[#allocation38_spill] sm:$0xff] %v10054_v3  ;;  %v4658_v9 = vpop.f32.mrf.mxu3  ;;  %v4570_v10 = vadd.f32 %v4569_v29, %v4481_v51  ;;  %v4393_v17 = vpop.f32.mrf.mxu0  ;;  %v11124_v29 = vld [vmem:[#allocation19_spill] sm:$0xff] }
 0x6b2   :  { %v4482_v56 = vpop.f32.mrf.mxu1  ;;  %v4394_v27 = vadd.f32 %v4393_v17, %v10039_v42 }
 0x6b3   :  { %v4659_v19 = vadd.f32 %v4658_v9, %v4570_v10  ;;  %v7947_v9 = vld [vmem:[#allocation5 + $0x228] sm:$0xf]  ;;  %v8524_v10 = vld [vmem:[#allocation5 + $0x234] sm:$0xf0] }
 0x6b4   :  { %v4483_v1 = vadd.f32 %v4482_v56, %v4394_v27  ;;  %v7948_v17 = vor.u32 %v8524_v10, %v7947_v9  ;;  %v7691_v56 = vld [vmem:[#allocation5 + $0x28] sm:$0xf]  ;;  %v8460_v27 = vld [vmem:[#allocation5 + $0x34] sm:$0xf0] }
 0x6b5   :  { %v5454_v51 = vmax.f32 %v4659_v19, 0.0  ;;  %v7819_v10 = vld [vmem:[#allocation5 + $0x128] sm:$0xf] }
 0x6b6   :  { %4917 = vmatpush.bf16.msrb.mxu2 %v7948_v17 }
 0x6b8   :  { %v4571_v7 = vpop.f32.mrf.mxu2 }
 0x6b9   :  { %v4660_v63 = vpop.f32.mrf.mxu3  ;;  %v4572_v15 = vadd.f32 %v4571_v7, %v4483_v1  ;;  %v4396_v14 = vpop.f32.mrf.mxu0  ;;  %v8075_v1 = vld [vmem:[#allocation5 + $0x328] sm:$0xf]  ;;  %v7692_v7 = vor.u32 %v8460_v27, %v7691_v56 }
 0x6ba   :  { %v4485_v37 = vpop.f32.mrf.mxu1  ;;  %v4397_v43 = vadd.f32 %v4396_v14, %v10039_v42  ;;  %v8556_v14 = vld [vmem:[#allocation5 + $0x334] sm:$0xf0] }
 0x6bb   :  { %v4661_v47 = vadd.f32 %v4660_v63, %v4572_v15  ;;  %4739 = vmatpush.bf16.msrb.mxu0 %v7692_v7 }
 0x6bc   :  { %v4486_v33 = vadd.f32 %v4485_v37, %v4397_v43  ;;  %4435 = vmatmul.bf16.gmra.mxu0 %v11121_v35  ;;  %4524 = vmatmul.bf16.gmra.mxu1 %v11122_v11  ;;  %v8076_v43 = vor.u32 %v8556_v14, %v8075_v1  ;;  %v8492_v11 = vld [vmem:[#allocation5 + $0x134] sm:$0xf0] }
 0x6bd   :  { %v5458_v52 = vmax.f32 %v4661_v47, 0.0  ;;  %4613 = vmatmul.bf16.gmra.mxu2 %v11123_v59  ;;  %v7820_v35 = vor.u32 %v8492_v11, %v7819_v10 }
 0x6be   :  { %4702 = vmatmul.bf16.gmra.mxu3 %v11124_v29 }
 0x6bf   :  { %v10062_v63 = vpack.c.bf16 %v5458_v52, %v5454_v51  ;;  %5006 = vmatpush.bf16.msrb.mxu3 %v8076_v43  ;;  %4828 = vmatpush.bf16.msrb.mxu1 %v7820_v35 }
 0x6c0   :  { %v4574_v15 = vpop.f32.mrf.mxu2 }
 0x6c1   :  { %11125 = vst [vmem:[#allocation53_spill] sm:$0xff] %v10062_v63  ;;  %v4663_v37 = vpop.f32.mrf.mxu3  ;;  %v4575_v19 = vadd.f32 %v4574_v15, %v4486_v33  ;;  %v4398_v47 = vpop.f32.mrf.mxu0 }
 0x6c2   :  { %v4487_v3 = vpop.f32.mrf.mxu1  ;;  %v4399_v29 = vadd.f32 %v4398_v47, %v10039_v42 }
 0x6c3   :  { %v4664_v59 = vadd.f32 %v4663_v37, %v4575_v19 }
 0x6c4   :  { %v4488_v9 = vadd.f32 %v4487_v3, %v4399_v29 }
 0x6c5   :  { %v5462_v7 = vmax.f32 %v4664_v59, 0.0 }
 0x6c8   :  { %v4576_v56 = vpop.f32.mrf.mxu2 }
 0x6c9   :  { %v4665_v27 = vpop.f32.mrf.mxu3  ;;  %v4577_v51 = vadd.f32 %v4576_v56, %v4488_v9  ;;  %v4401_v52 = vpop.f32.mrf.mxu0 }
 0x6ca   :  { %v4490_v63 = vpop.f32.mrf.mxu1  ;;  %v4402_v17 = vadd.f32 %v4401_v52, %v10039_v42 }
 0x6cb   :  { %v4666_v33 = vadd.f32 %v4665_v27, %v4577_v51 }
 0x6cc   :  { %v4491_v1 = vadd.f32 %v4490_v63, %v4402_v17  ;;  %4440 = vmatmul.bf16.gmra.mxu0 %v11086_v41  ;;  %4529 = vmatmul.bf16.gmra.mxu1 %v11087_v46  ;;  %v11127_v17 = vld [vmem:[#allocation49_spill] sm:$0xff] }
 0x6cd   :  { %v5466_v14 = vmax.f32 %v4666_v33, 0.0  ;;  %4618 = vmatmul.bf16.gmra.mxu2 %v9744_v58  ;;  %v11128_v33 = vld [vmem:[#allocation64_spill] sm:$0xff] }
 0x6ce   :  { %4707 = vmatmul.bf16.gmra.mxu3 %v9875_v60 }
 0x6cf   :  { %v10070_v3 = vpack.c.bf16 %v5466_v14, %v5462_v7  ;;  %v11129_v14 = vld [vmem:[#allocation13_spill] sm:$0xff] }
 0x6d0   :  { %v4579_v35 = vpop.f32.mrf.mxu2 }
 0x6d1   :  { %11126 = vst [vmem:[#allocation70_spill] sm:$0xff] %v10070_v3  ;;  %v4668_v11 = vpop.f32.mrf.mxu3  ;;  %v4580_v29 = vadd.f32 %v4579_v35, %v4491_v1  ;;  %v4403_v15 = vpop.f32.mrf.mxu0  ;;  %v11130_v35 = vld [vmem:[#allocation20_spill] sm:$0xff] }
 0x6d2   :  { %v4492_v37 = vpop.f32.mrf.mxu1  ;;  %v4404_v43 = vadd.f32 %v4403_v15, %v10039_v42 }
 0x6d3   :  { %v4669_v63 = vadd.f32 %v4668_v11, %v4580_v29  ;;  %v7931_v11 = vld [vmem:[#allocation5 + $0x208] sm:$0xf]  ;;  %v8520_v29 = vld [vmem:[#allocation5 + $0x214] sm:$0xf0] }
 0x6d4   :  { %v4493_v19 = vadd.f32 %v4492_v37, %v4404_v43  ;;  %v7932_v15 = vor.u32 %v8520_v29, %v7931_v11  ;;  %v7675_v37 = vld [vmem:[#allocation5 + $0x8] sm:$0xf]  ;;  %v8456_v43 = vld [vmem:[#allocation5 + $0x14] sm:$0xf0] }
 0x6d5   :  { %v5470_v1 = vmax.f32 %v4669_v63, 0.0  ;;  %v7803_v29 = vld [vmem:[#allocation5 + $0x108] sm:$0xf] }
 0x6d6   :  { %4918 = vmatpush.bf16.msrb.mxu2 %v7932_v15 }
 0x6d8   :  { %v4581_v47 = vpop.f32.mrf.mxu2 }
 0x6d9   :  { %v4670_v9 = vpop.f32.mrf.mxu3  ;;  %v4582_v10 = vadd.f32 %v4581_v47, %v4493_v19  ;;  %v4406_v59 = vpop.f32.mrf.mxu0  ;;  %v8059_v19 = vld [vmem:[#allocation5 + $0x308] sm:$0xf]  ;;  %v7676_v47 = vor.u32 %v8456_v43, %v7675_v37 }
 0x6da   :  { %v4495_v56 = vpop.f32.mrf.mxu1  ;;  %v4407_v27 = vadd.f32 %v4406_v59, %v10039_v42  ;;  %v8552_v59 = vld [vmem:[#allocation5 + $0x314] sm:$0xf0] }
 0x6db   :  { %v4671_v51 = vadd.f32 %v4670_v9, %v4582_v10  ;;  %4740 = vmatpush.bf16.msrb.mxu0 %v7676_v47 }
 0x6dc   :  { %v4496_v52 = vadd.f32 %v4495_v56, %v4407_v27  ;;  %4445 = vmatmul.bf16.gmra.mxu0 %v11127_v17  ;;  %4534 = vmatmul.bf16.gmra.mxu1 %v11128_v33  ;;  %v8060_v27 = vor.u32 %v8552_v59, %v8059_v19  ;;  %v8488_v33 = vld [vmem:[#allocation5 + $0x114] sm:$0xf0] }
 0x6dd   :  { %v5474_v7 = vmax.f32 %v4671_v51, 0.0  ;;  %4623 = vmatmul.bf16.gmra.mxu2 %v11129_v14  ;;  %v7804_v17 = vor.u32 %v8488_v33, %v7803_v29 }
 0x6de   :  { %4712 = vmatmul.bf16.gmra.mxu3 %v11130_v35 }
 0x6df   :  { %v10078_v9 = vpack.c.bf16 %v5474_v7, %v5470_v1  ;;  %5007 = vmatpush.bf16.msrb.mxu3 %v8060_v27  ;;  %4829 = vmatpush.bf16.msrb.mxu1 %v7804_v17 }
 0x6e0   :  { %v4584_v10 = vpop.f32.mrf.mxu2 }
 0x6e1   :  { %11131 = vst [vmem:[#allocation39_spill] sm:$0xff] %v10078_v9  ;;  %v4673_v56 = vpop.f32.mrf.mxu3  ;;  %v4585_v63 = vadd.f32 %v4584_v10, %v4496_v52  ;;  %v4408_v51 = vpop.f32.mrf.mxu0 }
 0x6e2   :  { %v4497_v3 = vpop.f32.mrf.mxu1  ;;  %v4409_v35 = vadd.f32 %v4408_v51, %v10039_v42 }
 0x6e3   :  { %v4674_v14 = vadd.f32 %v4673_v56, %v4585_v63 }
 0x6e4   :  { %v4498_v11 = vadd.f32 %v4497_v3, %v4409_v35 }
 0x6e5   :  { %v5478_v47 = vmax.f32 %v4674_v14, 0.0 }
 0x6e8   :  { %v4586_v37 = vpop.f32.mrf.mxu2 }
 0x6e9   :  { %v4675_v43 = vpop.f32.mrf.mxu3  ;;  %v4587_v1 = vadd.f32 %v4586_v37, %v4498_v11  ;;  %v4411_v7 = vpop.f32.mrf.mxu0 }
 0x6ea   :  { %v4500_v9 = vpop.f32.mrf.mxu1  ;;  %v4412_v15 = vadd.f32 %v4411_v7, %v10039_v42 }
 0x6eb   :  { %v4676_v52 = vadd.f32 %v4675_v43, %v4587_v1 }
 0x6ec   :  { %v4501_v19 = vadd.f32 %v4500_v9, %v4412_v15  ;;  %4450 = vmatmul.bf16.gmra.mxu0 %v11092_v55  ;;  %4539 = vmatmul.bf16.gmra.mxu1 %v11093_v62  ;;  %v11133_v15 = vld [vmem:[#allocation51_spill] sm:$0xff] }
 0x6ed   :  { %v5482_v59 = vmax.f32 %v4676_v52, 0.0  ;;  %4628 = vmatmul.bf16.gmra.mxu2 %v9760_v61  ;;  %v11134_v52 = vld [vmem:[#allocation66_spill] sm:$0xff] }
 0x6ee   :  { %4717 = vmatmul.bf16.gmra.mxu3 %v9891_v5 }
 0x6ef   :  { %v10086_v3 = vpack.c.bf16 %v5482_v59, %v5478_v47  ;;  %v11135_v59 = vld [vmem:[#allocation14_spill] sm:$0xff] }
 0x6f0   :  { %v4589_v17 = vpop.f32.mrf.mxu2 }
 0x6f1   :  { %11132 = vst [vmem:[#allocation54_spill] sm:$0xff] %v10086_v3  ;;  %v4678_v33 = vpop.f32.mrf.mxu3  ;;  %v4590_v35 = vadd.f32 %v4589_v17, %v4501_v19  ;;  %v4413_v10 = vpop.f32.mrf.mxu0  ;;  %v11136_v17 = vld [vmem:[#allocation21_spill] sm:$0xff] }
 0x6f2   :  { %v4502_v56 = vpop.f32.mrf.mxu1  ;;  %v4414_v27 = vadd.f32 %v4413_v10, %v10039_v42 }
 0x6f3   :  { %v4679_v9 = vadd.f32 %v4678_v33, %v4590_v35  ;;  %v8546_v33 = vld [vmem:[#allocation5 + $0x2ec] sm:$0xf]  ;;  %v8045_v35 = vld [vmem:[#allocation5 + $0x2f8] sm:$0xf0] }
 0x6f4   :  { %v4503_v63 = vadd.f32 %v4502_v56, %v4414_v27  ;;  %v8048_v10 = vor.u32 %v8546_v33, %v8045_v35  ;;  %v8482_v56 = vld [vmem:[#allocation5 + $0xec] sm:$0xf]  ;;  %v7789_v27 = vld [vmem:[#allocation5 + $0xf8] sm:$0xf0] }
 0x6f5   :  { %v5486_v19 = vmax.f32 %v4679_v9, 0.0  ;;  %v8514_v35 = vld [vmem:[#allocation5 + $0x1ec] sm:$0xf] }
 0x6f6   :  { %5267 = vmatpush.bf16.msra.mxu2 %v8048_v10 }
 0x6f8   :  { %v4591_v51 = vpop.f32.mrf.mxu2 }
 0x6f9   :  { %v4680_v11 = vpop.f32.mrf.mxu3  ;;  %v4592_v29 = vadd.f32 %v4591_v51, %v4503_v63  ;;  %v4416_v14 = vpop.f32.mrf.mxu0  ;;  %v8578_v63 = vld [vmem:[#allocation5 + $0x3ec] sm:$0xf]  ;;  %v7792_v51 = vor.u32 %v8482_v56, %v7789_v27 }
 0x6fa   :  { %v4505_v37 = vpop.f32.mrf.mxu1  ;;  %v4417_v43 = vadd.f32 %v4416_v14, %v10039_v42  ;;  %v8173_v14 = vld [vmem:[#allocation5 + $0x3f8] sm:$0xf0] }
 0x6fb   :  { %v4681_v1 = vadd.f32 %v4680_v11, %v4592_v29  ;;  %5089 = vmatpush.bf16.msra.mxu0 %v7792_v51 }
 0x6fc   :  { %v4506_v7 = vadd.f32 %v4505_v37, %v4417_v43  ;;  %4455 = vmatmul.bf16.gmra.mxu0 %v11133_v15  ;;  %4544 = vmatmul.bf16.gmra.mxu1 %v11134_v52  ;;  %v8176_v43 = vor.u32 %v8578_v63, %v8173_v14  ;;  %v7917_v52 = vld [vmem:[#allocation5 + $0x1f8] sm:$0xf0] }
 0x6fd   :  { %v5490_v47 = vmax.f32 %v4681_v1, 0.0  ;;  %4633 = vmatmul.bf16.gmra.mxu2 %v11135_v59  ;;  %v7920_v15 = vor.u32 %v8514_v35, %v7917_v52 }
 0x6fe   :  { %4722 = vmatmul.bf16.gmra.mxu3 %v11136_v17 }
 0x6ff   :  { %v10094_v11 = vpack.c.bf16 %v5490_v47, %v5486_v19  ;;  %5356 = vmatpush.bf16.msra.mxu3 %v8176_v43  ;;  %5178 = vmatpush.bf16.msra.mxu1 %v7920_v15 }
 0x700   :  { %v4594_v29 = vpop.f32.mrf.mxu2 }
 0x701   :  { %11137 = vst [vmem:[#allocation71_spill] sm:$0xff] %v10094_v11  ;;  %v4683_v37 = vpop.f32.mrf.mxu3  ;;  %v4595_v9 = vadd.f32 %v4594_v29, %v4506_v7  ;;  %v4418_v1 = vpop.f32.mrf.mxu0 }
 0x702   :  { %v4507_v3 = vpop.f32.mrf.mxu1  ;;  %v4419_v17 = vadd.f32 %v4418_v1, %v10039_v42 }
 0x703   :  { %v4684_v59 = vadd.f32 %v4683_v37, %v4595_v9 }
 0x704   :  { %v4508_v33 = vadd.f32 %v4507_v3, %v4419_v17 }
 0x705   :  { %v5494_v51 = vmax.f32 %v4684_v59, 0.0 }
 0x708   :  { %v4596_v56 = vpop.f32.mrf.mxu2 }
 0x709   :  { %v4685_v27 = vpop.f32.mrf.mxu3  ;;  %v4597_v19 = vadd.f32 %v4596_v56, %v4508_v33  ;;  %v4421_v47 = vpop.f32.mrf.mxu0 }
 0x70a   :  { %v4510_v11 = vpop.f32.mrf.mxu1  ;;  %v4422_v10 = vadd.f32 %v4421_v47, %v10039_v42 }
 0x70b   :  { %v4686_v7 = vadd.f32 %v4685_v27, %v4597_v19 }
 0x70c   :  { %v4511_v63 = vadd.f32 %v4510_v11, %v4422_v10  ;;  %4460 = vmatmul.bf16.gmra.mxu0 %v11098_v4  ;;  %4549 = vmatmul.bf16.gmra.mxu1 %v11099_v31 }
 0x70d   :  { %v5498_v14 = vmax.f32 %v4686_v7, 0.0  ;;  %4638 = vmatmul.bf16.gmra.mxu2 %v9779_v8 }
 0x70e   :  { %4727 = vmatmul.bf16.gmra.mxu3 %v9915_v16 }
 0x70f   :  { %v10102_v3 = vpack.c.bf16 %v5498_v14, %v5494_v51  ;;  %v11140_v51 = vld [vmem:[#allocation15_spill] sm:$0xff]  ;;  %v8542_v14 = vld [vmem:[#allocation5 + $0x2cc] sm:$0xf] }
 0x710   :  { %v4599_v15 = vpop.f32.mrf.mxu2 }
 0x711   :  { %11138 = vst [vmem:[#allocation40_spill] sm:$0xff] %v10102_v3  ;;  %v4688_v52 = vpop.f32.mrf.mxu3  ;;  %v4600_v17 = vadd.f32 %v4599_v15, %v4511_v63  ;;  %v4423_v29 = vpop.f32.mrf.mxu0  ;;  %v11139_v63 = vld [vmem:[#allocation69_spill] sm:$0xff]  ;;  %v8029_v15 = vld [vmem:[#allocation5 + $0x2d8] sm:$0xf0] }
 0x712   :  { %v4512_v37 = vpop.f32.mrf.mxu1  ;;  %v4424_v43 = vadd.f32 %v4423_v29, %v10039_v42  ;;  %v7773_v29 = vld [vmem:[#allocation5 + $0xd8] sm:$0xf0] }
 0x713   :  { %v4689_v11 = vadd.f32 %v4688_v52, %v4600_v17  ;;  %v8032_v52 = vor.u32 %v8542_v14, %v8029_v15  ;;  %v8478_v17 = vld [vmem:[#allocation5 + $0xcc] sm:$0xf] }
 0x714   :  { %v4513_v9 = vadd.f32 %v4512_v37, %v4424_v43  ;;  %v8574_v37 = vld [vmem:[#allocation5 + $0x3cc] sm:$0xf]  ;;  %v7776_v43 = vor.u32 %v8478_v17, %v7773_v29 }
 0x715   :  { %v5502_v10 = vmax.f32 %v4689_v11, 0.0  ;;  %5268 = vmatpush.bf16.msra.mxu2 %v8032_v52  ;;  %v8510_v15 = vld [vmem:[#allocation5 + $0x1cc] sm:$0xf] }
 0x716   :  { %5090 = vmatpush.bf16.msra.mxu0 %v7776_v43 }
 0x718   :  { %v4601_v1 = vpop.f32.mrf.mxu2 }
 0x719   :  { %v4690_v33 = vpop.f32.mrf.mxu3  ;;  %v4602_v35 = vadd.f32 %v4601_v1, %v4513_v9  ;;  %v4426_v59 = vpop.f32.mrf.mxu0  ;;  %v8157_v9 = vld [vmem:[#allocation5 + $0x3d8] sm:$0xf0] }
 0x71a   :  { %v4515_v56 = vpop.f32.mrf.mxu1  ;;  %v4427_v27 = vadd.f32 %v4426_v59, %v10039_v42  ;;  %v8160_v59 = vor.u32 %v8574_v37, %v8157_v9 }
 0x71b   :  { %v4691_v19 = vadd.f32 %v4690_v33, %v4602_v35 }
 0x71c   :  { %v4516_v47 = vadd.f32 %v4515_v56, %v4427_v27  ;;  %4741 = vmatmul.bf16.vlgmr.msrb.gmra.mxu0 %v11050_v57  ;;  %4830 = vmatmul.bf16.vlgmr.msrb.gmra.mxu1 %v11051_v44 }
 0x71d   :  { %v5506_v7 = vmax.f32 %v4691_v19, 0.0  ;;  %4919 = vmatmul.bf16.vlgmr.msrb.gmra.mxu2 %v11139_v63  ;;  %5357 = vmatpush.bf16.msra.mxu3 %v8160_v59 }
 0x71e   :  { %5008 = vmatmul.bf16.vlgmr.msrb.gmra.mxu3 %v11140_v51  ;;  %v7901_v51 = vld [vmem:[#allocation5 + $0x1d8] sm:$0xf0] }
 0x71f   :  { %v10110_v1 = vpack.c.bf16 %v5506_v7, %v5502_v10  ;;  %v7904_v63 = vor.u32 %v8510_v15, %v7901_v51 }
 0x720   :  { %v4604_v33 = vpop.f32.mrf.mxu2 }
 0x721   :  { %11141 = vst [vmem:[#allocation55_spill] sm:$0xff] %v10110_v1  ;;  %v4693_v35 = vpop.f32.mrf.mxu3  ;;  %v4605_v11 = vadd.f32 %v4604_v33, %v4516_v47  ;;  %v4428_v56 = vpop.f32.mrf.mxu0  ;;  %5179 = vmatpush.bf16.msra.mxu1 %v7904_v63 }
 0x722   :  { %v4517_v27 = vpop.f32.mrf.mxu1  ;;  %v4429_v19 = vadd.f32 %v4428_v56, %v10039_v42 }
 0x723   :  { %v4694_v3 = vadd.f32 %v4693_v35, %v4605_v11 }
 0x724   :  { %v4518_v14 = vadd.f32 %v4517_v27, %v4429_v19 }
 0x725   :  { %v5510_v43 = vmax.f32 %v4694_v3, 0.0 }
 0x728   :  { %v4606_v17 = vpop.f32.mrf.mxu2 }
 0x729   :  { %v4695_v29 = vpop.f32.mrf.mxu3  ;;  %v4607_v10 = vadd.f32 %v4606_v17, %v4518_v14  ;;  %v4431_v7 = vpop.f32.mrf.mxu0 }
 0x72a   :  { %v4520_v1 = vpop.f32.mrf.mxu1  ;;  %v4432_v52 = vadd.f32 %v4431_v7, %v10039_v42 }
 0x72b   :  { %v4696_v47 = vadd.f32 %v4695_v29, %v4607_v10 }
 0x72c   :  { %v4521_v37 = vadd.f32 %v4520_v1, %v4432_v52  ;;  %4746 = vmatmul.bf16.gmra.mxu0 %v11054_v38  ;;  %4835 = vmatmul.bf16.gmra.mxu1 %v11055_v28 }
 0x72d   :  { %v5514_v9 = vmax.f32 %v4696_v47, 0.0  ;;  %4924 = vmatmul.bf16.gmra.mxu2 %v11056_v50 }
 0x72e   :  { %5013 = vmatmul.bf16.gmra.mxu3 %v9795_v39 }
 0x72f   :  { %v10118_v51 = vpack.c.bf16 %v5514_v9, %v5510_v43  ;;  %v8013_v43 = vld [vmem:[#allocation5 + $0x2b8] sm:$0xf0] }
 0x730   :  { %v4609_v63 = vpop.f32.mrf.mxu2 }
 0x731   :  { %11142 = vst [vmem:[#allocation72_spill] sm:$0xff] %v10118_v51  ;;  %v4698_v33 = vpop.f32.mrf.mxu3  ;;  %v4610_v35 = vadd.f32 %v4609_v63, %v4521_v37  ;;  %v4433_v59 = vpop.f32.mrf.mxu0  ;;  %v8538_v37 = vld [vmem:[#allocation5 + $0x2ac] sm:$0xf] }
 0x732   :  { %v4522_v11 = vpop.f32.mrf.mxu1  ;;  %v4434_v56 = vadd.f32 %v4433_v59, %v10039_v42  ;;  %v8016_v9 = vor.u32 %v8538_v37, %v8013_v43  ;;  %v8474_v63 = vld [vmem:[#allocation5 + $0xac] sm:$0xf]  ;;  %v7885_v43 = vld [vmem:[#allocation5 + $0x1b8] sm:$0xf0] }
 0x733   :  { %v4699_v1 = vadd.f32 %v4698_v33, %v4610_v35  ;;  %v7757_v33 = vld [vmem:[#allocation5 + $0xb8] sm:$0xf0]  ;;  %v8570_v35 = vld [vmem:[#allocation5 + $0x3ac] sm:$0xf] }
 0x734   :  { %v4523_v27 = vadd.f32 %v4522_v11, %v4434_v56  ;;  %v7760_v59 = vor.u32 %v8474_v63, %v7757_v33  ;;  %v8141_v11 = vld [vmem:[#allocation5 + $0x3b8] sm:$0xf0]  ;;  %5269 = vmatpush.bf16.msra.mxu2 %v8016_v9  ;;  %v8506_v37 = vld [vmem:[#allocation5 + $0x1ac] sm:$0xf] }
 0x735   :  { %v5518_v52 = vmax.f32 %v4699_v1, 0.0  ;;  %v7888_v51 = vor.u32 %v8506_v37, %v7885_v43 }
 0x736   :  { %5091 = vmatpush.bf16.msra.mxu0 %v7760_v59 }
 0x737   :  { %5180 = vmatpush.bf16.msra.mxu1 %v7888_v51 }
 0x738   :  { %v4611_v19 = vpop.f32.mrf.mxu2 }
 0x739   :  { %v4700_v14 = vpop.f32.mrf.mxu3  ;;  %v4612_v15 = vadd.f32 %v4611_v19, %v4523_v27  ;;  %v4436_v3 = vpop.f32.mrf.mxu0 }
 0x73a   :  { %v4525_v17 = vpop.f32.mrf.mxu1  ;;  %v4437_v29 = vadd.f32 %v4436_v3, %v10039_v42 }
 0x73b   :  { %v4701_v10 = vadd.f32 %v4700_v14, %v4612_v15  ;;  %v8144_v14 = vor.u32 %v8570_v35, %v8141_v11 }
 0x73c   :  { %v4526_v7 = vadd.f32 %v4525_v17, %v4437_v29  ;;  %4751 = vmatmul.bf16.gmra.mxu0 %v11058_v21  ;;  %4840 = vmatmul.bf16.gmra.mxu1 %v11059_v2 }
 0x73d   :  { %v5522_v47 = vmax.f32 %v4701_v10, 0.0  ;;  %4929 = vmatmul.bf16.gmra.mxu2 %v11060_v34  ;;  %5358 = vmatpush.bf16.msra.mxu3 %v8144_v14 }
 0x73e   :  { %5018 = vmatmul.bf16.gmra.mxu3 %v9803_v24 }
 0x73f   :  { %v10126_v56 = vpack.c.bf16 %v5522_v47, %v5518_v52 }
 0x740   :  { %v4614_v27 = vpop.f32.mrf.mxu2 }
 0x741   :  { %11143 = vst [vmem:[#allocation41_spill] sm:$0xff] %v10126_v56  ;;  %v4703_v19 = vpop.f32.mrf.mxu3  ;;  %v4615_v1 = vadd.f32 %v4614_v27, %v4526_v7  ;;  %v4438_v15 = vpop.f32.mrf.mxu0 }
 0x742   :  { %v4527_v3 = vpop.f32.mrf.mxu1  ;;  %v4439_v17 = vadd.f32 %v4438_v15, %v10039_v42 }
 0x743   :  { %v4704_v29 = vadd.f32 %v4703_v19, %v4615_v1 }
 0x744   :  { %v4528_v10 = vadd.f32 %v4527_v3, %v4439_v17 }
 0x745   :  { %v5526_v59 = vmax.f32 %v4704_v29, 0.0 }
 0x748   :  { %v4616_v63 = vpop.f32.mrf.mxu2 }
 0x749   :  { %v4705_v33 = vpop.f32.mrf.mxu3  ;;  %v4617_v52 = vadd.f32 %v4616_v63, %v4528_v10  ;;  %v4441_v47 = vpop.f32.mrf.mxu0 }
 0x74a   :  { %v4530_v56 = vpop.f32.mrf.mxu1  ;;  %v4442_v9 = vadd.f32 %v4441_v47, %v10039_v42 }
 0x74b   :  { %v4706_v7 = vadd.f32 %v4705_v33, %v4617_v52 }
 0x74c   :  { %v4531_v35 = vadd.f32 %v4530_v56, %v4442_v9  ;;  %4756 = vmatmul.bf16.gmra.mxu0 %v11061_v36  ;;  %4845 = vmatmul.bf16.gmra.mxu1 %v11062_v25 }
 0x74d   :  { %v5530_v11 = vmax.f32 %v4706_v7, 0.0  ;;  %4934 = vmatmul.bf16.gmra.mxu2 %v11063_v0 }
 0x74e   :  { %5023 = vmatmul.bf16.gmra.mxu3 %v9811_v30 }
 0x74f   :  { %v10134_v27 = vpack.c.bf16 %v5530_v11, %v5526_v59  ;;  %v7997_v59 = vld [vmem:[#allocation5 + $0x298] sm:$0xf0] }
 0x750   :  { %v4619_v51 = vpop.f32.mrf.mxu2 }
 0x751   :  { %11144 = vst [vmem:[#allocation56_spill] sm:$0xff] %v10134_v27  ;;  %v4708_v19 = vpop.f32.mrf.mxu3  ;;  %v4620_v14 = vadd.f32 %v4619_v51, %v4531_v35  ;;  %v4443_v1 = vpop.f32.mrf.mxu0  ;;  %v8534_v35 = vld [vmem:[#allocation5 + $0x28c] sm:$0xf] }
 0x752   :  { %v4532_v15 = vpop.f32.mrf.mxu1  ;;  %v4444_v3 = vadd.f32 %v4443_v1, %v10039_v42  ;;  %v8000_v11 = vor.u32 %v8534_v35, %v7997_v59  ;;  %v8470_v51 = vld [vmem:[#allocation5 + $0x8c] sm:$0xf]  ;;  %v7869_v59 = vld [vmem:[#allocation5 + $0x198] sm:$0xf0] }
 0x753   :  { %v4709_v56 = vadd.f32 %v4708_v19, %v4620_v14  ;;  %v7741_v19 = vld [vmem:[#allocation5 + $0x98] sm:$0xf0]  ;;  %v8566_v14 = vld [vmem:[#allocation5 + $0x38c] sm:$0xf] }
 0x754   :  { %v4533_v17 = vadd.f32 %v4532_v15, %v4444_v3  ;;  %v7744_v1 = vor.u32 %v8470_v51, %v7741_v19  ;;  %v8125_v15 = vld [vmem:[#allocation5 + $0x398] sm:$0xf0]  ;;  %5270 = vmatpush.bf16.msra.mxu2 %v8000_v11  ;;  %v8502_v35 = vld [vmem:[#allocation5 + $0x18c] sm:$0xf] }
 0x755   :  { %v5534_v9 = vmax.f32 %v4709_v56, 0.0  ;;  %v7872_v27 = vor.u32 %v8502_v35, %v7869_v59 }
 0x756   :  { %5092 = vmatpush.bf16.msra.mxu0 %v7744_v1 }
 0x757   :  { %5181 = vmatpush.bf16.msra.mxu1 %v7872_v27 }
 0x758   :  { %v4621_v10 = vpop.f32.mrf.mxu2 }
 0x759   :  { %v4710_v37 = vpop.f32.mrf.mxu3  ;;  %v4622_v43 = vadd.f32 %v4621_v10, %v4533_v17  ;;  %v4446_v29 = vpop.f32.mrf.mxu0 }
 0x75a   :  { %v4535_v63 = vpop.f32.mrf.mxu1  ;;  %v4447_v33 = vadd.f32 %v4446_v29, %v10039_v42 }
 0x75b   :  { %v4711_v52 = vadd.f32 %v4710_v37, %v4622_v43  ;;  %v8128_v37 = vor.u32 %v8566_v14, %v8125_v15 }
 0x75c   :  { %v4536_v47 = vadd.f32 %v4535_v63, %v4447_v33  ;;  %4761 = vmatmul.bf16.gmra.mxu0 %v11065_v12  ;;  %4850 = vmatmul.bf16.gmra.mxu1 %v11066_v48 }
 0x75d   :  { %v5538_v7 = vmax.f32 %v4711_v52, 0.0  ;;  %4939 = vmatmul.bf16.gmra.mxu2 %v11067_v13  ;;  %5359 = vmatpush.bf16.msra.mxu3 %v8128_v37 }
 0x75e   :  { %5028 = vmatmul.bf16.gmra.mxu3 %v9819_v22 }
 0x75f   :  { %v10142_v3 = vpack.c.bf16 %v5538_v7, %v5534_v9 }
 0x760   :  { %v4624_v17 = vpop.f32.mrf.mxu2 }
 0x761   :  { %11145 = vst [vmem:[#allocation73_spill] sm:$0xff] %v10142_v3  ;;  %v4713_v10 = vpop.f32.mrf.mxu3  ;;  %v4625_v56 = vadd.f32 %v4624_v17, %v4536_v47  ;;  %v4448_v43 = vpop.f32.mrf.mxu0 }
 0x762   :  { %v4537_v29 = vpop.f32.mrf.mxu1  ;;  %v4449_v63 = vadd.f32 %v4448_v43, %v10039_v42 }
 0x763   :  { %v4714_v33 = vadd.f32 %v4713_v10, %v4625_v56 }
 0x764   :  { %v4538_v52 = vadd.f32 %v4537_v29, %v4449_v63 }
 0x765   :  { %v5542_v1 = vmax.f32 %v4714_v33, 0.0 }
 0x768   :  { %v4626_v51 = vpop.f32.mrf.mxu2 }
 0x769   :  { %v4715_v19 = vpop.f32.mrf.mxu3  ;;  %v4627_v9 = vadd.f32 %v4626_v51, %v4538_v52  ;;  %v4451_v7 = vpop.f32.mrf.mxu0 }
 0x76a   :  { %v4540_v3 = vpop.f32.mrf.mxu1  ;;  %v4452_v11 = vadd.f32 %v4451_v7, %v10039_v42 }
 0x76b   :  { %v4716_v47 = vadd.f32 %v4715_v19, %v4627_v9 }
 0x76c   :  { %v4541_v14 = vadd.f32 %v4540_v3, %v4452_v11  ;;  %4766 = vmatmul.bf16.gmra.mxu0 %v11068_v23  ;;  %4855 = vmatmul.bf16.gmra.mxu1 %v11069_v45  ;;  %v11147_v11 = vld [vmem:[#allocation43_spill] sm:$0xff] }
 0x76d   :  { %v5546_v15 = vmax.f32 %v4716_v47, 0.0  ;;  %4944 = vmatmul.bf16.gmra.mxu2 %v11070_v40  ;;  %v11148_v47 = vld [vmem:[#allocation58_spill] sm:$0xff] }
 0x76e   :  { %5033 = vmatmul.bf16.gmra.mxu3 %v9827_v32 }
 0x76f   :  { %v10150_v17 = vpack.c.bf16 %v5546_v15, %v5542_v1  ;;  %v11149_v15 = vld [vmem:[#allocation75_spill] sm:$0xff] }
 0x770   :  { %v4629_v27 = vpop.f32.mrf.mxu2 }
 0x771   :  { %11146 = vst [vmem:[#allocation42_spill] sm:$0xff] %v10150_v17  ;;  %v4718_v10 = vpop.f32.mrf.mxu3  ;;  %v4630_v37 = vadd.f32 %v4629_v27, %v4541_v14  ;;  %v4453_v56 = vpop.f32.mrf.mxu0  ;;  %v11150_v27 = vld [vmem:[#allocation16_spill] sm:$0xff] }
 0x772   :  { %v4542_v43 = vpop.f32.mrf.mxu1  ;;  %v4454_v29 = vadd.f32 %v4453_v56, %v10039_v42 }
 0x773   :  { %v4719_v3 = vadd.f32 %v4718_v10, %v4630_v37  ;;  %v8530_v10 = vld [vmem:[#allocation5 + $0x26c] sm:$0xf]  ;;  %v7981_v37 = vld [vmem:[#allocation5 + $0x278] sm:$0xf0] }
 0x774   :  { %v4543_v63 = vadd.f32 %v4542_v43, %v4454_v29  ;;  %v7984_v56 = vor.u32 %v8530_v10, %v7981_v37  ;;  %v8466_v43 = vld [vmem:[#allocation5 + $0x6c] sm:$0xf]  ;;  %v7725_v29 = vld [vmem:[#allocation5 + $0x78] sm:$0xf0] }
 0x775   :  { %v5550_v14 = vmax.f32 %v4719_v3, 0.0  ;;  %v8498_v37 = vld [vmem:[#allocation5 + $0x16c] sm:$0xf] }
 0x776   :  { %5271 = vmatpush.bf16.msra.mxu2 %v7984_v56 }
 0x778   :  { %v4631_v52 = vpop.f32.mrf.mxu2 }
 0x779   :  { %v4720_v35 = vpop.f32.mrf.mxu3  ;;  %v4632_v59 = vadd.f32 %v4631_v52, %v4543_v63  ;;  %v4456_v33 = vpop.f32.mrf.mxu0  ;;  %v8562_v63 = vld [vmem:[#allocation5 + $0x36c] sm:$0xf]  ;;  %v7728_v52 = vor.u32 %v8466_v43, %v7725_v29 }
 0x77a   :  { %v4545_v51 = vpop.f32.mrf.mxu1  ;;  %v4457_v19 = vadd.f32 %v4456_v33, %v10039_v42  ;;  %v8109_v33 = vld [vmem:[#allocation5 + $0x378] sm:$0xf0] }
 0x77b   :  { %v4721_v9 = vadd.f32 %v4720_v35, %v4632_v59  ;;  %5093 = vmatpush.bf16.msra.mxu0 %v7728_v52 }
 0x77c   :  { %v4546_v7 = vadd.f32 %v4545_v51, %v4457_v19  ;;  %4771 = vmatmul.bf16.gmra.mxu0 %v11147_v11  ;;  %4860 = vmatmul.bf16.gmra.mxu1 %v11148_v47  ;;  %v8112_v19 = vor.u32 %v8562_v63, %v8109_v33  ;;  %v7853_v47 = vld [vmem:[#allocation5 + $0x178] sm:$0xf0] }
 0x77d   :  { %v5554_v1 = vmax.f32 %v4721_v9, 0.0  ;;  %4949 = vmatmul.bf16.gmra.mxu2 %v11149_v15  ;;  %v7856_v11 = vor.u32 %v8498_v37, %v7853_v47 }
 0x77e   :  { %5038 = vmatmul.bf16.gmra.mxu3 %v11150_v27 }
 0x77f   :  { %v10158_v35 = vpack.c.bf16 %v5554_v1, %v5550_v14  ;;  %5360 = vmatpush.bf16.msra.mxu3 %v8112_v19  ;;  %5182 = vmatpush.bf16.msra.mxu1 %v7856_v11 }
 0x780   :  { %v4634_v59 = vpop.f32.mrf.mxu2 }
 0x781   :  { %11151 = vst [vmem:[#allocation57_spill] sm:$0xff] %v10158_v35  ;;  %v4723_v51 = vpop.f32.mrf.mxu3  ;;  %v4635_v3 = vadd.f32 %v4634_v59, %v4546_v7  ;;  %v4458_v9 = vpop.f32.mrf.mxu0 }
 0x782   :  { %v4547_v17 = vpop.f32.mrf.mxu1  ;;  %v4459_v27 = vadd.f32 %v4458_v9, %v10039_v42 }
 0x783   :  { %v4724_v15 = vadd.f32 %v4723_v51, %v4635_v3 }
 0x784   :  { %v4548_v10 = vadd.f32 %v4547_v17, %v4459_v27  ;;  %v11152_v17 = vld [vmem:[#allocation17_spill] sm:$0xff] }
 0x785   :  { %v5558_v52 = vmax.f32 %v4724_v15, 0.0  ;;  %v10172_v15 = vld [vmem:[%s10786_s6] sm:$0xf] }
 0x786   :  { %11154 = vst [vmem:[#allocation44_spill] sm:$0xff] %v10172_v15 }
 0x788   :  { %v4636_v43 = vpop.f32.mrf.mxu2 }
 0x789   :  { %v4725_v29 = vpop.f32.mrf.mxu3  ;;  %v4637_v14 = vadd.f32 %v4636_v43, %v4548_v10  ;;  %v4461_v1 = vpop.f32.mrf.mxu0  ;;  %v10175_v10 = vperm.slane %v10172_v15, 2 }
 0x78a   :  { %v4550_v35 = vpop.f32.mrf.mxu1  ;;  %v4462_v56 = vadd.f32 %v4461_v1, %v10039_v42 }
 0x78b   :  { %v4726_v7 = vadd.f32 %v4725_v29, %v4637_v14 }
 0x78c   :  { %v4551_v63 = vadd.f32 %v4550_v35, %v4462_v56  ;;  %4776 = vmatmul.bf16.gmra.mxu0 %v11074_v54  ;;  %4865 = vmatmul.bf16.gmra.mxu1 %v11075_v6 }
 0x78d   :  { %v5562_v33 = vmax.f32 %v4726_v7, 0.0  ;;  %4954 = vmatmul.bf16.gmra.mxu2 %v9712_v26 }
 0x78e   :  { %5043 = vmatmul.bf16.gmra.mxu3 %v11152_v17 }
 0x78f   :  { %v10166_v47 = vpack.c.bf16 %v5562_v33, %v5558_v52  ;;  %v11156_v52 = vld [vmem:[#allocation60_spill] sm:$0xff] }
 0x790   :  { %v4639_v11 = vpop.f32.mrf.mxu2 }
 0x791   :  { %11153 = vst [vmem:[#allocation74_spill] sm:$0xff] %v10166_v47  ;;  %v4728_v27 = vpop.f32.mrf.mxu3  ;;  %v4640_v59 = vadd.f32 %v4639_v11, %v4551_v63  ;;  %v4463_v51 = vpop.f32.mrf.mxu0  ;;  %v8558_v47 = vld [vmem:[#allocation5 + $0x34c] sm:$0xf] }
 0x792   :  { %v4552_v19 = vpop.f32.mrf.mxu1  ;;  %v4464_v3 = vadd.f32 %v4463_v51, %v10039_v42  ;;  %v11155_v42 = vld [vmem:[#allocation45_spill] sm:$0xff] }
 0x793   :  { %v4729_v35 = vadd.f32 %v4728_v27, %v4640_v59  ;;  %v11157_v27 = vld [vmem:[#allocation76_spill] sm:$0xff]  ;;  %v11158_v59 = vld [vmem:[#allocation18_spill] sm:$0xff]  ;;  %v8526_v51 = vld [vmem:[#allocation5 + $0x24c] sm:$0xf] }
 0x794   :  { %v4553_v9 = vadd.f32 %v4552_v19, %v4464_v3  ;;  %v7965_v19 = vld [vmem:[#allocation5 + $0x258] sm:$0xf0] }
 0x795   :  { %v5566_v33 = vmax.f32 %v4729_v35, 0.0  ;;  %v7968_v3 = vor.u32 %v8526_v51, %v7965_v19  ;;  %v8494_v19 = vld [vmem:[#allocation5 + $0x14c] sm:$0xf] }
 0x797   :  { %5272 = vmatpush.bf16.msra.mxu2 %v7968_v3 }
 0x798   :  { %v4641_v37 = vpop.f32.mrf.mxu2 }
 0x799   :  { %v4730_v43 = vpop.f32.mrf.mxu3  ;;  %v4642_v29 = vadd.f32 %v4641_v37, %v4553_v9  ;;  %v4742_v14 = vpop.f32.mrf.mxu0  ;;  %v8462_v9 = vld [vmem:[#allocation5 + $0x4c] sm:$0xf]  ;;  %v7709_v37 = vld [vmem:[#allocation5 + $0x58] sm:$0xf0] }
 0x79a   :  { %v4831_v1 = vpop.f32.mrf.mxu1  ;;  %v4743_v56 = vadd.f32 %v4742_v14, %v10175_v10  ;;  %v7712_v15 = vor.u32 %v8462_v9, %v7709_v37  ;;  %v8093_v14 = vld [vmem:[#allocation5 + $0x358] sm:$0xf0] }
 0x79b   :  { %v4731_v7 = vadd.f32 %v4730_v43, %v4642_v29 }
 0x79c   :  { %v4832_v63 = vadd.f32 %v4831_v1, %v4743_v56  ;;  %4781 = vmatmul.bf16.gmra.mxu0 %v11155_v42  ;;  %4870 = vmatmul.bf16.gmra.mxu1 %v11156_v52  ;;  %v8096_v56 = vor.u32 %v8558_v47, %v8093_v14  ;;  %v7837_v42 = vld [vmem:[#allocation5 + $0x158] sm:$0xf0] }
 0x79d   :  { %v5570_v11 = vmax.f32 %v4731_v7, 0.0  ;;  %4959 = vmatmul.bf16.gmra.mxu2 %v11157_v27  ;;  %5094 = vmatpush.bf16.msra.mxu0 %v7712_v15  ;;  %v7840_v17 = vor.u32 %v8494_v19, %v7837_v42 }
 0x79e   :  { %5048 = vmatmul.bf16.gmra.mxu3 %v11158_v59 }
 0x79f   :  { %v10182_v43 = vpack.c.bf16 %v5570_v11, %v5566_v33  ;;  %5361 = vmatpush.bf16.msra.mxu3 %v8096_v56  ;;  %5183 = vmatpush.bf16.msra.mxu1 %v7840_v17 }
 0x7a0   :  { %v4920_v29 = vpop.f32.mrf.mxu2 }
 0x7a1   :  { %11159 = vst [vmem:[#allocation59_spill] sm:$0xff] %v10182_v43  ;;  %v5009_v1 = vpop.f32.mrf.mxu3  ;;  %v4921_v35 = vadd.f32 %v4920_v29, %v4832_v63  ;;  %v4744_v7 = vpop.f32.mrf.mxu0 }
 0x7a2   :  { %v4833_v52 = vpop.f32.mrf.mxu1  ;;  %v4745_v59 = vadd.f32 %v4744_v7, %v10175_v10 }
 0x7a3   :  { %v5010_v27 = vadd.f32 %v5009_v1, %v4921_v35 }
 0x7a4   :  { %v4834_v51 = vadd.f32 %v4833_v52, %v4745_v59 }
 0x7a5   :  { %v5447_v15 = vmax.f32 %v5010_v27, 0.0 }
 0x7a8   :  { %v4922_v9 = vpop.f32.mrf.mxu2 }
 0x7a9   :  { %v5011_v37 = vpop.f32.mrf.mxu3  ;;  %v4923_v33 = vadd.f32 %v4922_v9, %v4834_v51  ;;  %v4747_v11 = vpop.f32.mrf.mxu0 }
 0x7aa   :  { %v4836_v43 = vpop.f32.mrf.mxu1  ;;  %v4748_v47 = vadd.f32 %v4747_v11, %v10175_v10 }
 0x7ab   :  { %v5012_v63 = vadd.f32 %v5011_v37, %v4923_v33 }
 0x7ac   :  { %v4837_v3 = vadd.f32 %v4836_v43, %v4748_v47  ;;  %4786 = vmatmul.bf16.gmra.mxu0 %v11080_v18  ;;  %4875 = vmatmul.bf16.gmra.mxu1 %v11081_v49  ;;  %v11161_v47 = vld [vmem:[#allocation47_spill] sm:$0xff] }
 0x7ad   :  { %v5451_v14 = vmax.f32 %v5012_v63, 0.0  ;;  %4964 = vmatmul.bf16.gmra.mxu2 %v9728_v20  ;;  %v11162_v63 = vld [vmem:[#allocation62_spill] sm:$0xff] }
 0x7ae   :  { %5053 = vmatmul.bf16.gmra.mxu3 %v9859_v53 }
 0x7af   :  { %v10190_v42 = vpack.c.bf16 %v5451_v14, %v5447_v15  ;;  %v11163_v14 = vld [vmem:[#allocation12_spill] sm:$0xff] }
 0x7b0   :  { %v4925_v17 = vpop.f32.mrf.mxu2 }
 0x7b1   :  { %11160 = vst [vmem:[#allocation46_spill] sm:$0xff] %v10190_v42  ;;  %v5014_v52 = vpop.f32.mrf.mxu3  ;;  %v4926_v59 = vadd.f32 %v4925_v17, %v4837_v3  ;;  %v4749_v29 = vpop.f32.mrf.mxu0  ;;  %v11164_v17 = vld [vmem:[#allocation19_spill] sm:$0xff] }
 0x7b2   :  { %v4838_v1 = vpop.f32.mrf.mxu1  ;;  %v4750_v56 = vadd.f32 %v4749_v29, %v10175_v10 }
 0x7b3   :  { %v5015_v43 = vadd.f32 %v5014_v52, %v4926_v59  ;;  %v8522_v52 = vld [vmem:[#allocation5 + $0x22c] sm:$0xf]  ;;  %v7949_v59 = vld [vmem:[#allocation5 + $0x238] sm:$0xf0] }
 0x7b4   :  { %v4839_v35 = vadd.f32 %v4838_v1, %v4750_v56  ;;  %v7952_v29 = vor.u32 %v8522_v52, %v7949_v59  ;;  %v8458_v1 = vld [vmem:[#allocation5 + $0x2c] sm:$0xf]  ;;  %v7693_v56 = vld [vmem:[#allocation5 + $0x38] sm:$0xf0] }
 0x7b5   :  { %v5455_v3 = vmax.f32 %v5015_v43, 0.0  ;;  %v8490_v59 = vld [vmem:[#allocation5 + $0x12c] sm:$0xf] }
 0x7b6   :  { %5273 = vmatpush.bf16.msra.mxu2 %v7952_v29 }
 0x7b8   :  { %v4927_v7 = vpop.f32.mrf.mxu2 }
 0x7b9   :  { %v5016_v51 = vpop.f32.mrf.mxu3  ;;  %v4928_v19 = vadd.f32 %v4927_v7, %v4839_v35  ;;  %v4752_v27 = vpop.f32.mrf.mxu0  ;;  %v8554_v35 = vld [vmem:[#allocation5 + $0x32c] sm:$0xf]  ;;  %v7696_v7 = vor.u32 %v8458_v1, %v7693_v56 }
 0x7ba   :  { %v4841_v9 = vpop.f32.mrf.mxu1  ;;  %v4753_v37 = vadd.f32 %v4752_v27, %v10175_v10  ;;  %v8077_v27 = vld [vmem:[#allocation5 + $0x338] sm:$0xf0] }
 0x7bb   :  { %v5017_v33 = vadd.f32 %v5016_v51, %v4928_v19  ;;  %5095 = vmatpush.bf16.msra.mxu0 %v7696_v7 }
 0x7bc   :  { %v4842_v11 = vadd.f32 %v4841_v9, %v4753_v37  ;;  %4791 = vmatmul.bf16.gmra.mxu0 %v11161_v47  ;;  %4880 = vmatmul.bf16.gmra.mxu1 %v11162_v63  ;;  %v8080_v37 = vor.u32 %v8554_v35, %v8077_v27  ;;  %v7821_v63 = vld [vmem:[#allocation5 + $0x138] sm:$0xf0] }
 0x7bd   :  { %v5459_v15 = vmax.f32 %v5017_v33, 0.0  ;;  %4969 = vmatmul.bf16.gmra.mxu2 %v11163_v14  ;;  %v7824_v47 = vor.u32 %v8490_v59, %v7821_v63 }
 0x7be   :  { %5058 = vmatmul.bf16.gmra.mxu3 %v11164_v17 }
 0x7bf   :  { %v10198_v51 = vpack.c.bf16 %v5459_v15, %v5455_v3  ;;  %5362 = vmatpush.bf16.msra.mxu3 %v8080_v37  ;;  %5184 = vmatpush.bf16.msra.mxu1 %v7824_v47 }
 0x7c0   :  { %v4930_v19 = vpop.f32.mrf.mxu2 }
 0x7c1   :  { %11165 = vst [vmem:[#allocation61_spill] sm:$0xff] %v10198_v51  ;;  %v5019_v9 = vpop.f32.mrf.mxu3  ;;  %v4931_v43 = vadd.f32 %v4930_v19, %v4842_v11  ;;  %v4754_v33 = vpop.f32.mrf.mxu0 }
 0x7c2   :  { %v4843_v42 = vpop.f32.mrf.mxu1  ;;  %v4755_v17 = vadd.f32 %v4754_v33, %v10175_v10 }
 0x7c3   :  { %v5020_v14 = vadd.f32 %v5019_v9, %v4931_v43 }
 0x7c4   :  { %v4844_v52 = vadd.f32 %v4843_v42, %v4755_v17 }
 0x7c5   :  { %v5463_v7 = vmax.f32 %v5020_v14, 0.0 }
 0x7c8   :  { %v4932_v1 = vpop.f32.mrf.mxu2 }
 0x7c9   :  { %v5021_v56 = vpop.f32.mrf.mxu3  ;;  %v4933_v3 = vadd.f32 %v4932_v1, %v4844_v52  ;;  %v4757_v15 = vpop.f32.mrf.mxu0 }
 0x7ca   :  { %v4846_v51 = vpop.f32.mrf.mxu1  ;;  %v4758_v29 = vadd.f32 %v4757_v15, %v10175_v10 }
 0x7cb   :  { %v5022_v11 = vadd.f32 %v5021_v56, %v4933_v3 }
 0x7cc   :  { %v4847_v35 = vadd.f32 %v4846_v51, %v4758_v29  ;;  %4796 = vmatmul.bf16.gmra.mxu0 %v11086_v41  ;;  %4885 = vmatmul.bf16.gmra.mxu1 %v11087_v46  ;;  %v11167_v29 = vld [vmem:[#allocation49_spill] sm:$0xff] }
 0x7cd   :  { %v5467_v27 = vmax.f32 %v5022_v11, 0.0  ;;  %4974 = vmatmul.bf16.gmra.mxu2 %v9744_v58  ;;  %v11168_v11 = vld [vmem:[#allocation64_spill] sm:$0xff] }
 0x7ce   :  { %5063 = vmatmul.bf16.gmra.mxu3 %v9875_v60 }
 0x7cf   :  { %v10206_v42 = vpack.c.bf16 %v5467_v27, %v5463_v7  ;;  %v11169_v27 = vld [vmem:[#allocation13_spill] sm:$0xff] }
 0x7d0   :  { %v4935_v47 = vpop.f32.mrf.mxu2 }
 0x7d1   :  { %11166 = vst [vmem:[#allocation48_spill] sm:$0xff] %v10206_v42  ;;  %v5024_v63 = vpop.f32.mrf.mxu3  ;;  %v4936_v17 = vadd.f32 %v4935_v47, %v4847_v35  ;;  %v4759_v19 = vpop.f32.mrf.mxu0  ;;  %v11170_v47 = vld [vmem:[#allocation20_spill] sm:$0xff] }
 0x7d2   :  { %v4848_v9 = vpop.f32.mrf.mxu1  ;;  %v4760_v37 = vadd.f32 %v4759_v19, %v10175_v10 }
 0x7d3   :  { %v5025_v51 = vadd.f32 %v5024_v63, %v4936_v17  ;;  %v8518_v63 = vld [vmem:[#allocation5 + $0x20c] sm:$0xf]  ;;  %v7933_v17 = vld [vmem:[#allocation5 + $0x218] sm:$0xf0] }
 0x7d4   :  { %v4849_v43 = vadd.f32 %v4848_v9, %v4760_v37  ;;  %v7936_v19 = vor.u32 %v8518_v63, %v7933_v17  ;;  %v8454_v9 = vld [vmem:[#allocation5 + $0xc] sm:$0xf]  ;;  %v7677_v37 = vld [vmem:[#allocation5 + $0x18] sm:$0xf0] }
 0x7d5   :  { %v5471_v35 = vmax.f32 %v5025_v51, 0.0  ;;  %v8486_v17 = vld [vmem:[#allocation5 + $0x10c] sm:$0xf] }
 0x7d6   :  { %5274 = vmatpush.bf16.msra.mxu2 %v7936_v19 }
 0x7d8   :  { %v4937_v33 = vpop.f32.mrf.mxu2 }
 0x7d9   :  { %v5026_v52 = vpop.f32.mrf.mxu3  ;;  %v4938_v59 = vadd.f32 %v4937_v33, %v4849_v43  ;;  %v4762_v14 = vpop.f32.mrf.mxu0  ;;  %v8550_v43 = vld [vmem:[#allocation5 + $0x30c] sm:$0xf]  ;;  %v7680_v33 = vor.u32 %v8454_v9, %v7677_v37 }
 0x7da   :  { %v4851_v1 = vpop.f32.mrf.mxu1  ;;  %v4763_v56 = vadd.f32 %v4762_v14, %v10175_v10  ;;  %v8061_v14 = vld [vmem:[#allocation5 + $0x318] sm:$0xf0] }
 0x7db   :  { %v5027_v3 = vadd.f32 %v5026_v52, %v4938_v59  ;;  %5096 = vmatpush.bf16.msra.mxu0 %v7680_v33 }
 0x7dc   :  { %v4852_v15 = vadd.f32 %v4851_v1, %v4763_v56  ;;  %4801 = vmatmul.bf16.gmra.mxu0 %v11167_v29  ;;  %4890 = vmatmul.bf16.gmra.mxu1 %v11168_v11  ;;  %v8064_v56 = vor.u32 %v8550_v43, %v8061_v14  ;;  %v7805_v11 = vld [vmem:[#allocation5 + $0x118] sm:$0xf0] }
 0x7dd   :  { %v5475_v7 = vmax.f32 %v5027_v3, 0.0  ;;  %4979 = vmatmul.bf16.gmra.mxu2 %v11169_v27  ;;  %v7808_v29 = vor.u32 %v8486_v17, %v7805_v11 }
 0x7de   :  { %5068 = vmatmul.bf16.gmra.mxu3 %v11170_v47 }
 0x7df   :  { %v10214_v52 = vpack.c.bf16 %v5475_v7, %v5471_v35  ;;  %5363 = vmatpush.bf16.msra.mxu3 %v8064_v56  ;;  %5185 = vmatpush.bf16.msra.mxu1 %v7808_v29 }
 0x7e0   :  { %v4940_v59 = vpop.f32.mrf.mxu2 }
 0x7e1   :  { %11171 = vst [vmem:[#allocation63_spill] sm:$0xff] %v10214_v52  ;;  %v5029_v1 = vpop.f32.mrf.mxu3  ;;  %v4941_v51 = vadd.f32 %v4940_v59, %v4852_v15  ;;  %v4764_v3 = vpop.f32.mrf.mxu0 }
 0x7e2   :  { %v4853_v42 = vpop.f32.mrf.mxu1  ;;  %v4765_v47 = vadd.f32 %v4764_v3, %v10175_v10 }
 0x7e3   :  { %v5030_v27 = vadd.f32 %v5029_v1, %v4941_v51 }
 0x7e4   :  { %v4854_v63 = vadd.f32 %v4853_v42, %v4765_v47 }
 0x7e5   :  { %v5479_v33 = vmax.f32 %v5030_v27, 0.0 }
 0x7e8   :  { %v4942_v9 = vpop.f32.mrf.mxu2 }
 0x7e9   :  { %v5031_v37 = vpop.f32.mrf.mxu3  ;;  %v4943_v35 = vadd.f32 %v4942_v9, %v4854_v63  ;;  %v4767_v7 = vpop.f32.mrf.mxu0 }
 0x7ea   :  { %v4856_v52 = vpop.f32.mrf.mxu1  ;;  %v4768_v19 = vadd.f32 %v4767_v7, %v10175_v10 }
 0x7eb   :  { %v5032_v15 = vadd.f32 %v5031_v37, %v4943_v35 }
 0x7ec   :  { %v4857_v43 = vadd.f32 %v4856_v52, %v4768_v19  ;;  %4806 = vmatmul.bf16.gmra.mxu0 %v11092_v55  ;;  %4895 = vmatmul.bf16.gmra.mxu1 %v11093_v62  ;;  %v11173_v19 = vld [vmem:[#allocation51_spill] sm:$0xff] }
 0x7ed   :  { %v5483_v14 = vmax.f32 %v5032_v15, 0.0  ;;  %4984 = vmatmul.bf16.gmra.mxu2 %v9760_v61  ;;  %v11174_v15 = vld [vmem:[#allocation66_spill] sm:$0xff] }
 0x7ee   :  { %5073 = vmatmul.bf16.gmra.mxu3 %v9891_v5 }
 0x7ef   :  { %v10222_v42 = vpack.c.bf16 %v5483_v14, %v5479_v33  ;;  %v11175_v14 = vld [vmem:[#allocation14_spill] sm:$0xff] }
 0x7f0   :  { %v4945_v29 = vpop.f32.mrf.mxu2 }
 0x7f1   :  { %11172 = vst [vmem:[#allocation50_spill] sm:$0xff] %v10222_v42  ;;  %v5034_v11 = vpop.f32.mrf.mxu3  ;;  %v4946_v47 = vadd.f32 %v4945_v29, %v4857_v43  ;;  %v4769_v59 = vpop.f32.mrf.mxu0  ;;  %v11176_v29 = vld [vmem:[#allocation21_spill] sm:$0xff] }
 0x7f2   :  { %v4858_v1 = vpop.f32.mrf.mxu1  ;;  %v4770_v56 = vadd.f32 %v4769_v59, %v10175_v10  ;;  %v8612_v59 = vld [vmem:[#allocation7 + $0xf8] sm:$0xff] }
 0x7f3   :  { %v5035_v52 = vadd.f32 %v5034_v11, %v4946_v47  ;;  %v8604_v11 = vld [vmem:[#allocation7 + $0xb8] sm:$0xff]  ;;  %6164 = vmatpush.bf16.msrb.mxu3 %v8612_v59 }
 0x7f4   :  { %v4859_v51 = vadd.f32 %v4858_v1, %v4770_v56  ;;  %v8588_v47 = vld [vmem:[#allocation7 + $0x38] sm:$0xff]  ;;  %6075 = vmatpush.bf16.msrb.mxu2 %v8604_v11 }
 0x7f5   :  { %v5487_v43 = vmax.f32 %v5035_v52, 0.0  ;;  %5897 = vmatpush.bf16.msrb.mxu0 %v8588_v47 }
 0x7f8   :  { %v4947_v3 = vpop.f32.mrf.mxu2 }
 0x7f9   :  { %v5036_v63 = vpop.f32.mrf.mxu3  ;;  %v4948_v17 = vadd.f32 %v4947_v3, %v4859_v51  ;;  %v4772_v27 = vpop.f32.mrf.mxu0 }
 0x7fa   :  { %v4861_v9 = vpop.f32.mrf.mxu1  ;;  %v4773_v37 = vadd.f32 %v4772_v27, %v10175_v10 }
 0x7fb   :  { %v5037_v35 = vadd.f32 %v5036_v63, %v4948_v17 }
 0x7fc   :  { %v4862_v7 = vadd.f32 %v4861_v9, %v4773_v37  ;;  %4811 = vmatmul.bf16.gmra.mxu0 %v11173_v19  ;;  %4900 = vmatmul.bf16.gmra.mxu1 %v11174_v15  ;;  %v8596_v37 = vld [vmem:[#allocation7 + $0x78] sm:$0xff] }
 0x7fd   :  { %v5491_v33 = vmax.f32 %v5037_v35, 0.0  ;;  %4989 = vmatmul.bf16.gmra.mxu2 %v11175_v14  ;;  %5986 = vmatpush.bf16.msrb.mxu1 %v8596_v37 }
 0x7fe   :  { %5078 = vmatmul.bf16.gmra.mxu3 %v11176_v29 }
 0x7ff   :  { %v10230_v1 = vpack.c.bf16 %v5491_v33, %v5487_v43 }
 0x800   :  { %v4950_v56 = vpop.f32.mrf.mxu2 }
 0x801   :  { %11177 = vst [vmem:[#allocation65_spill] sm:$0xff] %v10230_v1  ;;  %v5039_v51 = vpop.f32.mrf.mxu3  ;;  %v4951_v3 = vadd.f32 %v4950_v56, %v4862_v7  ;;  %v4774_v63 = vpop.f32.mrf.mxu0 }
 0x802   :  { %v4863_v17 = vpop.f32.mrf.mxu1  ;;  %v4775_v52 = vadd.f32 %v4774_v63, %v10175_v10 }
 0x803   :  { %v5040_v27 = vadd.f32 %v5039_v51, %v4951_v3 }
 0x804   :  { %v4864_v9 = vadd.f32 %v4863_v17, %v4775_v52 }
 0x805   :  { %v5495_v7 = vmax.f32 %v5040_v27, 0.0 }
 0x808   :  { %v4952_v35 = vpop.f32.mrf.mxu2 }
 0x809   :  { %v5041_v42 = vpop.f32.mrf.mxu3  ;;  %v4953_v29 = vadd.f32 %v4952_v35, %v4864_v9  ;;  %v4777_v14 = vpop.f32.mrf.mxu0 }
 0x80a   :  { %v4866_v11 = vpop.f32.mrf.mxu1  ;;  %v4778_v43 = vadd.f32 %v4777_v14, %v10175_v10 }
 0x80b   :  { %v5042_v33 = vadd.f32 %v5041_v42, %v4953_v29 }
 0x80c   :  { %v4867_v47 = vadd.f32 %v4866_v11, %v4778_v43  ;;  %4816 = vmatmul.bf16.gmra.mxu0 %v11098_v4  ;;  %4905 = vmatmul.bf16.gmra.mxu1 %v11099_v31 }
 0x80d   :  { %v5499_v59 = vmax.f32 %v5042_v33, 0.0  ;;  %4994 = vmatmul.bf16.gmra.mxu2 %v9779_v8 }
 0x80e   :  { %5083 = vmatmul.bf16.gmra.mxu3 %v9915_v16 }
 0x80f   :  { %v10238_v56 = vpack.c.bf16 %v5499_v59, %v5495_v7  ;;  %v11178_v59 = vld [vmem:[#allocation69_spill] sm:$0xff] }
 0x810   :  { %v4955_v51 = vpop.f32.mrf.mxu2 }
 0x811   :  { %v5044_v3 = vpop.f32.mrf.mxu3  ;;  %v4956_v63 = vadd.f32 %v4955_v51, %v4867_v47  ;;  %v4779_v17 = vpop.f32.mrf.mxu0  ;;  %v11179_v51 = vld [vmem:[#allocation15_spill] sm:$0xff] }
 0x812   :  { %v4868_v52 = vpop.f32.mrf.mxu1  ;;  %v4780_v42 = vadd.f32 %v4779_v17, %v10175_v10  ;;  %v8611_v17 = vld [vmem:[#allocation7 + $0xf0] sm:$0xff] }
 0x813   :  { %v5045_v14 = vadd.f32 %v5044_v3, %v4956_v63  ;;  %v8603_v3 = vld [vmem:[#allocation7 + $0xb0] sm:$0xff]  ;;  %6165 = vmatpush.bf16.msrb.mxu3 %v8611_v17 }
 0x814   :  { %v4869_v29 = vadd.f32 %v4868_v52, %v4780_v42  ;;  %v8587_v63 = vld [vmem:[#allocation7 + $0x30] sm:$0xff]  ;;  %6076 = vmatpush.bf16.msrb.mxu2 %v8603_v3 }
 0x815   :  { %v5503_v47 = vmax.f32 %v5045_v14, 0.0  ;;  %5898 = vmatpush.bf16.msrb.mxu0 %v8587_v63 }
 0x818   :  { %v4957_v9 = vpop.f32.mrf.mxu2 }
 0x819   :  { %v5046_v37 = vpop.f32.mrf.mxu3  ;;  %v4958_v35 = vadd.f32 %v4957_v9, %v4869_v29  ;;  %v4782_v27 = vpop.f32.mrf.mxu0 }
 0x81a   :  { %v4871_v11 = vpop.f32.mrf.mxu1  ;;  %v4783_v43 = vadd.f32 %v4782_v27, %v10175_v10  ;;  %v8595_v27 = vld [vmem:[#allocation7 + $0x70] sm:$0xff] }
 0x81b   :  { %v5047_v33 = vadd.f32 %v5046_v37, %v4958_v35  ;;  %5987 = vmatpush.bf16.msrb.mxu1 %v8595_v27 }
 0x81c   :  { %v4872_v1 = vadd.f32 %v4871_v11, %v4783_v43  ;;  %5097 = vmatmul.bf16.vlgmr.msra.gmra.mxu0 %v11050_v57  ;;  %5186 = vmatmul.bf16.vlgmr.msra.gmra.mxu1 %v11051_v44 }
 0x81d   :  { %v5507_v7 = vmax.f32 %v5047_v33, 0.0  ;;  %5275 = vmatmul.bf16.vlgmr.msra.gmra.mxu2 %v11178_v59 }
 0x81e   :  { %5364 = vmatmul.bf16.vlgmr.msra.gmra.mxu3 %v11179_v51 }
 0x81f   :  { %v10246_v52 = vpack.c.bf16 %v5507_v7, %v5503_v47 }
 0x820   :  { %v4960_v42 = vpop.f32.mrf.mxu2 }
 0x821   :  { %v5049_v29 = vpop.f32.mrf.mxu3  ;;  %v4961_v9 = vadd.f32 %v4960_v42, %v4872_v1  ;;  %v4784_v57 = vpop.f32.mrf.mxu0 }
 0x822   :  { %v4873_v37 = vpop.f32.mrf.mxu1  ;;  %v4785_v44 = vadd.f32 %v4784_v57, %v10175_v10 }
 0x823   :  { %v5050_v14 = vadd.f32 %v5049_v29, %v4961_v9 }
 0x824   :  { %v4874_v35 = vadd.f32 %v4873_v37, %v4785_v44 }
 0x825   :  { %v5511_v1 = vmax.f32 %v5050_v14, 0.0 }
 0x828   :  { %v4962_v11 = vpop.f32.mrf.mxu2 }
 0x829   :  { %v5051_v43 = vpop.f32.mrf.mxu3  ;;  %v4963_v33 = vadd.f32 %v4962_v11, %v4874_v35  ;;  %v4787_v59 = vpop.f32.mrf.mxu0 }
 0x82a   :  { %v4876_v51 = vpop.f32.mrf.mxu1  ;;  %v4788_v47 = vadd.f32 %v4787_v59, %v10175_v10 }
 0x82b   :  { %v5052_v7 = vadd.f32 %v5051_v43, %v4963_v33 }
 0x82c   :  { %v4877_v3 = vadd.f32 %v4876_v51, %v4788_v47  ;;  %5102 = vmatmul.bf16.gmra.mxu0 %v11054_v38  ;;  %5191 = vmatmul.bf16.gmra.mxu1 %v11055_v28  ;;  %v8602_v47 = vld [vmem:[#allocation7 + $0xa8] sm:$0xff] }
 0x82d   :  { %v5515_v63 = vmax.f32 %v5052_v7, 0.0  ;;  %5280 = vmatmul.bf16.gmra.mxu2 %v11056_v50  ;;  %v8586_v7 = vld [vmem:[#allocation7 + $0x28] sm:$0xff] }
 0x82e   :  { %5369 = vmatmul.bf16.gmra.mxu3 %v9795_v39  ;;  %6077 = vmatpush.bf16.msrb.mxu2 %v8602_v47 }
 0x82f   :  { %v10254_v17 = vpack.c.bf16 %v5515_v63, %v5511_v1  ;;  %5899 = vmatpush.bf16.msrb.mxu0 %v8586_v7 }
 0x830   :  { %v4965_v42 = vpop.f32.mrf.mxu2 }
 0x831   :  { %v5054_v29 = vpop.f32.mrf.mxu3  ;;  %v4966_v9 = vadd.f32 %v4965_v42, %v4877_v3  ;;  %v4789_v57 = vpop.f32.mrf.mxu0  ;;  %v8610_v3 = vld [vmem:[#allocation7 + $0xe8] sm:$0xff] }
 0x832   :  { %v4878_v37 = vpop.f32.mrf.mxu1  ;;  %v4790_v44 = vadd.f32 %v4789_v57, %v10175_v10  ;;  %6166 = vmatpush.bf16.msrb.mxu3 %v8610_v3 }
 0x833   :  { %v5055_v35 = vadd.f32 %v5054_v29, %v4966_v9 }
 0x834   :  { %v4879_v27 = vadd.f32 %v4878_v37, %v4790_v44 }
 0x835   :  { %v5519_v59 = vmax.f32 %v5055_v35, 0.0 }
 0x838   :  { %v4967_v38 = vpop.f32.mrf.mxu2 }
 0x839   :  { %v5056_v11 = vpop.f32.mrf.mxu3  ;;  %v4968_v28 = vadd.f32 %v4967_v38, %v4879_v27  ;;  %v4792_v14 = vpop.f32.mrf.mxu0 }
 0x83a   :  { %v4881_v43 = vpop.f32.mrf.mxu1  ;;  %v4793_v50 = vadd.f32 %v4792_v14, %v10175_v10 }
 0x83b   :  { %v5057_v33 = vadd.f32 %v5056_v11, %v4968_v28 }
 0x83c   :  { %v4882_v39 = vadd.f32 %v4881_v43, %v4793_v50  ;;  %5107 = vmatmul.bf16.gmra.mxu0 %v11058_v21  ;;  %5196 = vmatmul.bf16.gmra.mxu1 %v11059_v2 }
 0x83d   :  { %v5523_v51 = vmax.f32 %v5057_v33, 0.0  ;;  %5285 = vmatmul.bf16.gmra.mxu2 %v11060_v34  ;;  %v8594_v34 = vld [vmem:[#allocation7 + $0x68] sm:$0xff] }
 0x83e   :  { %5374 = vmatmul.bf16.gmra.mxu3 %v9803_v24  ;;  %5988 = vmatpush.bf16.msrb.mxu1 %v8594_v34  ;;  %v8601_v34 = vld [vmem:[#allocation7 + $0xa0] sm:$0xff] }
 0x83f   :  { %v10262_v1 = vpack.c.bf16 %v5523_v51, %v5519_v59  ;;  %6078 = vmatpush.bf16.msrb.mxu2 %v8601_v34 }
 0x840   :  { %v4970_v63 = vpop.f32.mrf.mxu2 }
 0x841   :  { %v5059_v42 = vpop.f32.mrf.mxu3  ;;  %v4971_v29 = vadd.f32 %v4970_v63, %v4882_v39  ;;  %v4794_v21 = vpop.f32.mrf.mxu0 }
 0x842   :  { %v4883_v9 = vpop.f32.mrf.mxu1  ;;  %v4795_v2 = vadd.f32 %v4794_v21, %v10175_v10 }
 0x843   :  { %v5060_v57 = vadd.f32 %v5059_v42, %v4971_v29 }
 0x844   :  { %v4884_v37 = vadd.f32 %v4883_v9, %v4795_v2 }
 0x845   :  { %v5527_v43 = vmax.f32 %v5060_v57, 0.0 }
 0x848   :  { %v4972_v24 = vpop.f32.mrf.mxu2 }
 0x849   :  { %v5061_v44 = vpop.f32.mrf.mxu3  ;;  %v4973_v35 = vadd.f32 %v4972_v24, %v4884_v37  ;;  %v4797_v27 = vpop.f32.mrf.mxu0  ;;  %v8585_v24 = vld [vmem:[#allocation7 + $0x20] sm:$0xff] }
 0x84a   :  { %v4886_v38 = vpop.f32.mrf.mxu1  ;;  %v4798_v11 = vadd.f32 %v4797_v27, %v10175_v10  ;;  %5900 = vmatpush.bf16.msrb.mxu0 %v8585_v24 }
 0x84b   :  { %v5062_v28 = vadd.f32 %v5061_v44, %v4973_v35  ;;  %v8609_v44 = vld [vmem:[#allocation7 + $0xe0] sm:$0xff] }
 0x84c   :  { %v4887_v14 = vadd.f32 %v4886_v38, %v4798_v11  ;;  %5112 = vmatmul.bf16.gmra.mxu0 %v11061_v36  ;;  %5201 = vmatmul.bf16.gmra.mxu1 %v11062_v25 }
 0x84d   :  { %v5531_v50 = vmax.f32 %v5062_v28, 0.0  ;;  %5290 = vmatmul.bf16.gmra.mxu2 %v11063_v0  ;;  %6167 = vmatpush.bf16.msrb.mxu3 %v8609_v44 }
 0x84e   :  { %5379 = vmatmul.bf16.gmra.mxu3 %v9811_v30 }
 0x84f   :  { %v10270_v33 = vpack.c.bf16 %v5531_v50, %v5527_v43 }
 0x850   :  { %v4975_v39 = vpop.f32.mrf.mxu2 }
 0x851   :  { %v5064_v59 = vpop.f32.mrf.mxu3  ;;  %v4976_v51 = vadd.f32 %v4975_v39, %v4887_v14  ;;  %v4799_v47 = vpop.f32.mrf.mxu0 }
 0x852   :  { %v4888_v7 = vpop.f32.mrf.mxu1  ;;  %v4800_v3 = vadd.f32 %v4799_v47, %v10175_v10 }
 0x853   :  { %v5065_v63 = vadd.f32 %v5064_v59, %v4976_v51 }
 0x854   :  { %v4889_v42 = vadd.f32 %v4888_v7, %v4800_v3 }
 0x855   :  { %v5535_v57 = vmax.f32 %v5065_v63, 0.0 }
 0x858   :  { %v4977_v36 = vpop.f32.mrf.mxu2 }
 0x859   :  { %v5066_v29 = vpop.f32.mrf.mxu3  ;;  %v4978_v25 = vadd.f32 %v4977_v36, %v4889_v42  ;;  %v4802_v21 = vpop.f32.mrf.mxu0 }
 0x85a   :  { %v4891_v9 = vpop.f32.mrf.mxu1  ;;  %v4803_v0 = vadd.f32 %v4802_v21, %v10175_v10 }
 0x85b   :  { %v5067_v2 = vadd.f32 %v5066_v29, %v4978_v25 }
 0x85c   :  { %v4892_v30 = vadd.f32 %v4891_v9, %v4803_v0  ;;  %5117 = vmatmul.bf16.gmra.mxu0 %v11065_v12  ;;  %5206 = vmatmul.bf16.gmra.mxu1 %v11066_v48 }
 0x85d   :  { %v5539_v37 = vmax.f32 %v5067_v2, 0.0  ;;  %5295 = vmatmul.bf16.gmra.mxu2 %v11067_v13  ;;  %v8593_v13 = vld [vmem:[#allocation7 + $0x60] sm:$0xff] }
 0x85e   :  { %5384 = vmatmul.bf16.gmra.mxu3 %v9819_v22  ;;  %5989 = vmatpush.bf16.msrb.mxu1 %v8593_v13  ;;  %v8608_v13 = vld [vmem:[#allocation7 + $0xd8] sm:$0xff] }
 0x85f   :  { %v10278_v35 = vpack.c.bf16 %v5539_v37, %v5535_v57  ;;  %6168 = vmatpush.bf16.msrb.mxu3 %v8608_v13 }
 0x860   :  { %v4980_v27 = vpop.f32.mrf.mxu2 }
 0x861   :  { %v5069_v38 = vpop.f32.mrf.mxu3  ;;  %v4981_v11 = vadd.f32 %v4980_v27, %v4892_v30  ;;  %v4804_v12 = vpop.f32.mrf.mxu0  ;;  %v11180_v27 = vld [vmem:[#allocation43_spill] sm:$0xff] }
 0x862   :  { %v4893_v28 = vpop.f32.mrf.mxu1  ;;  %v4805_v48 = vadd.f32 %v4804_v12, %v10175_v10 }
 0x863   :  { %v5070_v14 = vadd.f32 %v5069_v38, %v4981_v11  ;;  %v11181_v38 = vld [vmem:[#allocation58_spill] sm:$0xff] }
 0x864   :  { %v4894_v43 = vadd.f32 %v4893_v28, %v4805_v48  ;;  %v11182_v28 = vld [vmem:[#allocation75_spill] sm:$0xff]  ;;  %v11183_v48 = vld [vmem:[#allocation16_spill] sm:$0xff] }
 0x865   :  { %v5543_v63 = vmax.f32 %v5070_v14, 0.0  ;;  %v8600_v14 = vld [vmem:[#allocation7 + $0x98] sm:$0xff] }
 0x866   :  { %6079 = vmatpush.bf16.msrb.mxu2 %v8600_v14 }
 0x868   :  { %v4982_v22 = vpop.f32.mrf.mxu2 }
 0x869   :  { %v5071_v50 = vpop.f32.mrf.mxu3  ;;  %v4983_v39 = vadd.f32 %v4982_v22, %v4894_v43  ;;  %v4807_v59 = vpop.f32.mrf.mxu0  ;;  %v8584_v43 = vld [vmem:[#allocation7 + $0x18] sm:$0xff] }
 0x86a   :  { %v4896_v51 = vpop.f32.mrf.mxu1  ;;  %v4808_v47 = vadd.f32 %v4807_v59, %v10175_v10  ;;  %5901 = vmatpush.bf16.msrb.mxu0 %v8584_v43 }
 0x86b   :  { %v5072_v7 = vadd.f32 %v5071_v50, %v4983_v39 }
 0x86c   :  { %v4897_v3 = vadd.f32 %v4896_v51, %v4808_v47  ;;  %5122 = vmatmul.bf16.gmra.mxu0 %v11068_v23  ;;  %5211 = vmatmul.bf16.gmra.mxu1 %v11069_v45 }
 0x86d   :  { %v5547_v42 = vmax.f32 %v5072_v7, 0.0  ;;  %5300 = vmatmul.bf16.gmra.mxu2 %v11070_v40 }
 0x86e   :  { %5389 = vmatmul.bf16.gmra.mxu3 %v9827_v32 }
 0x86f   :  { %v10286_v36 = vpack.c.bf16 %v5547_v42, %v5543_v63  ;;  %v8592_v42 = vld [vmem:[#allocation7 + $0x58] sm:$0xff] }
 0x870   :  { %v4985_v29 = vpop.f32.mrf.mxu2  ;;  %5990 = vmatpush.bf16.msrb.mxu1 %v8592_v42  ;;  %v8583_v42 = vld [vmem:[#allocation7 + $0x10] sm:$0xff] }
 0x871   :  { %v5074_v25 = vpop.f32.mrf.mxu3  ;;  %v4986_v21 = vadd.f32 %v4985_v29, %v4897_v3  ;;  %v4809_v9 = vpop.f32.mrf.mxu0  ;;  %5902 = vmatpush.bf16.msrb.mxu0 %v8583_v42  ;;  %v11191_v42 = vld [vmem:[#allocation62_spill] sm:$0xff] }
 0x872   :  { %v4898_v0 = vpop.f32.mrf.mxu1  ;;  %v4810_v2 = vadd.f32 %v4809_v9, %v10175_v10 }
 0x873   :  { %v5075_v30 = vadd.f32 %v5074_v25, %v4986_v21 }
 0x874   :  { %v4899_v57 = vadd.f32 %v4898_v0, %v4810_v2 }
 0x875   :  { %v5551_v11 = vmax.f32 %v5075_v30, 0.0 }
 0x878   :  { %v4987_v23 = vpop.f32.mrf.mxu2 }
 0x879   :  { %v5076_v37 = vpop.f32.mrf.mxu3  ;;  %v4988_v45 = vadd.f32 %v4987_v23, %v4899_v57  ;;  %v4812_v34 = vpop.f32.mrf.mxu0 }
 0x87a   :  { %v4901_v24 = vpop.f32.mrf.mxu1  ;;  %v4813_v40 = vadd.f32 %v4812_v34, %v10175_v10 }
 0x87b   :  { %v5077_v44 = vadd.f32 %v5076_v37, %v4988_v45  ;;  %v11184_v45 = vld [vmem:[#allocation17_spill] sm:$0xff] }
 0x87c   :  { %v4902_v32 = vadd.f32 %v4901_v24, %v4813_v40  ;;  %5127 = vmatmul.bf16.gmra.mxu0 %v11180_v27  ;;  %5216 = vmatmul.bf16.gmra.mxu1 %v11181_v38 }
 0x87d   :  { %v5555_v12 = vmax.f32 %v5077_v44, 0.0  ;;  %5305 = vmatmul.bf16.gmra.mxu2 %v11182_v28 }
 0x87e   :  { %5394 = vmatmul.bf16.gmra.mxu3 %v11183_v48 }
 0x87f   :  { %v10294_v22 = vpack.c.bf16 %v5555_v12, %v5551_v11 }
 0x880   :  { %v4990_v50 = vpop.f32.mrf.mxu2 }
 0x881   :  { %v5079_v39 = vpop.f32.mrf.mxu3  ;;  %v4991_v59 = vadd.f32 %v4990_v50, %v4902_v32  ;;  %v4814_v51 = vpop.f32.mrf.mxu0 }
 0x882   :  { %v4903_v47 = vpop.f32.mrf.mxu1  ;;  %v4815_v7 = vadd.f32 %v4814_v51, %v10175_v10  ;;  %v11187_v51 = vld [vmem:[#allocation60_spill] sm:$0xff] }
 0x883   :  { %v5080_v3 = vadd.f32 %v5079_v39, %v4991_v59  ;;  %v11186_v59 = vld [vmem:[#allocation45_spill] sm:$0xff] }
 0x884   :  { %v4904_v63 = vadd.f32 %v4903_v47, %v4815_v7  ;;  %v11188_v7 = vld [vmem:[#allocation76_spill] sm:$0xff] }
 0x885   :  { %v5559_v23 = vmax.f32 %v5080_v3, 0.0  ;;  %v11189_v3 = vld [vmem:[#allocation18_spill] sm:$0xff] }
 0x888   :  { %v4992_v29 = vpop.f32.mrf.mxu2 }
 0x889   :  { %v5081_v25 = vpop.f32.mrf.mxu3  ;;  %v4993_v21 = vadd.f32 %v4992_v29, %v4904_v63  ;;  %v4817_v9 = vpop.f32.mrf.mxu0  ;;  %v8599_v63 = vld [vmem:[#allocation7 + $0x90] sm:$0xff] }
 0x88a   :  { %v4906_v0 = vpop.f32.mrf.mxu1  ;;  %v4818_v2 = vadd.f32 %v4817_v9, %v10175_v10  ;;  %v8607_v29 = vld [vmem:[#allocation7 + $0xd0] sm:$0xff]  ;;  %6080 = vmatpush.bf16.msrb.mxu2 %v8599_v63  ;;  %v11190_v63 = vld [vmem:[#allocation47_spill] sm:$0xff] }
 0x88b   :  { %v5082_v30 = vadd.f32 %v5081_v25, %v4993_v21  ;;  %6169 = vmatpush.bf16.msrb.mxu3 %v8607_v29 }
 0x88c   :  { %v4907_v57 = vadd.f32 %v4906_v0, %v4818_v2  ;;  %5132 = vmatmul.bf16.gmra.mxu0 %v11074_v54  ;;  %5221 = vmatmul.bf16.gmra.mxu1 %v11075_v6  ;;  %v11185_v54 = vld [vmem:[#allocation44_spill] sm:$0xff] }
 0x88d   :  { %v5563_v37 = vmax.f32 %v5082_v30, 0.0  ;;  %5310 = vmatmul.bf16.gmra.mxu2 %v9712_v26  ;;  %v10306_v28 = vperm.slane %v11185_v54, 3 }
 0x88e   :  { %5399 = vmatmul.bf16.gmra.mxu3 %v11184_v45  ;;  %v8591_v45 = vld [vmem:[#allocation7 + $0x50] sm:$0xff] }
 0x88f   :  { %v10302_v34 = vpack.c.bf16 %v5563_v37, %v5559_v23  ;;  %5991 = vmatpush.bf16.msrb.mxu1 %v8591_v45 }
 0x890   :  { %v4995_v24 = vpop.f32.mrf.mxu2 }
 0x891   :  { %v5084_v40 = vpop.f32.mrf.mxu3  ;;  %v4996_v44 = vadd.f32 %v4995_v24, %v4907_v57  ;;  %v4819_v32 = vpop.f32.mrf.mxu0 }
 0x892   :  { %v4908_v27 = vpop.f32.mrf.mxu1  ;;  %v4820_v38 = vadd.f32 %v4819_v32, %v10175_v10 }
 0x893   :  { %v5085_v11 = vadd.f32 %v5084_v40, %v4996_v44 }
 0x894   :  { %v4909_v12 = vadd.f32 %v4908_v27, %v4820_v38 }
 0x895   :  { %v5567_v47 = vmax.f32 %v5085_v11, 0.0 }
 0x898   :  { %v4997_v6 = vpop.f32.mrf.mxu2 }
 0x899   :  { %v5086_v48 = vpop.f32.mrf.mxu3  ;;  %v4998_v14 = vadd.f32 %v4997_v6, %v4909_v12  ;;  %v5098_v26 = vpop.f32.mrf.mxu0 }
 0x89a   :  { %v5187_v43 = vpop.f32.mrf.mxu1  ;;  %v5099_v13 = vadd.f32 %v5098_v26, %v10306_v28 }
 0x89b   :  { %v5087_v50 = vadd.f32 %v5086_v48, %v4998_v14 }
 0x89c   :  { %v5188_v39 = vadd.f32 %v5187_v43, %v5099_v13  ;;  %5137 = vmatmul.bf16.gmra.mxu0 %v11186_v59  ;;  %5226 = vmatmul.bf16.gmra.mxu1 %v11187_v51 }
 0x89d   :  { %v5571_v10 = vmax.f32 %v5087_v50, 0.0  ;;  %5315 = vmatmul.bf16.gmra.mxu2 %v11188_v7 }
 0x89e   :  { %5404 = vmatmul.bf16.gmra.mxu3 %v11189_v3 }
 0x89f   :  { %v10313_v25 = vpack.c.bf16 %v5571_v10, %v5567_v47 }
 0x8a0   :  { %v5276_v21 = vpop.f32.mrf.mxu2 }
 0x8a1   :  { %v5365_v9 = vpop.f32.mrf.mxu3  ;;  %v5277_v0 = vadd.f32 %v5276_v21, %v5188_v39  ;;  %v5100_v2 = vpop.f32.mrf.mxu0 }
 0x8a2   :  { %v5189_v30 = vpop.f32.mrf.mxu1  ;;  %v5101_v57 = vadd.f32 %v5100_v2, %v10306_v28  ;;  %v8598_v2 = vld [vmem:[#allocation7 + $0x88] sm:$0xff] }
 0x8a3   :  { %v5366_v23 = vadd.f32 %v5365_v9, %v5277_v0  ;;  %v11192_v9 = vld [vmem:[#allocation12_spill] sm:$0xff]  ;;  %v11193_v0 = vld [vmem:[#allocation19_spill] sm:$0xff]  ;;  %6081 = vmatpush.bf16.msrb.mxu2 %v8598_v2 }
 0x8a4   :  { %v5190_v37 = vadd.f32 %v5189_v30, %v5101_v57  ;;  %v8582_v30 = vld [vmem:[#allocation7 + $0x8] sm:$0xff] }
 0x8a5   :  { %v5448_v54 = vmax.f32 %v5366_v23, 0.0  ;;  %v8606_v57 = vld [vmem:[#allocation7 + $0xc8] sm:$0xff]  ;;  %5903 = vmatpush.bf16.msrb.mxu0 %v8582_v30 }
 0x8a6   :  { %6170 = vmatpush.bf16.msrb.mxu3 %v8606_v57  ;;  %v11196_v57 = vld [vmem:[#allocation13_spill] sm:$0xff] }
 0x8a8   :  { %v5278_v24 = vpop.f32.mrf.mxu2 }
 0x8a9   :  { %v5367_v40 = vpop.f32.mrf.mxu3  ;;  %v5279_v44 = vadd.f32 %v5278_v24, %v5190_v37  ;;  %v5103_v32 = vpop.f32.mrf.mxu0 }
 0x8aa   :  { %v5192_v27 = vpop.f32.mrf.mxu1  ;;  %v5104_v38 = vadd.f32 %v5103_v32, %v10306_v28 }
 0x8ab   :  { %v5368_v11 = vadd.f32 %v5367_v40, %v5279_v44 }
 0x8ac   :  { %v5193_v12 = vadd.f32 %v5192_v27, %v5104_v38  ;;  %5142 = vmatmul.bf16.gmra.mxu0 %v11080_v18  ;;  %5231 = vmatmul.bf16.gmra.mxu1 %v11081_v49 }
 0x8ad   :  { %v5452_v6 = vmax.f32 %v5368_v11, 0.0  ;;  %5320 = vmatmul.bf16.gmra.mxu2 %v9728_v20  ;;  %v8590_v11 = vld [vmem:[#allocation7 + $0x48] sm:$0xff] }
 0x8ae   :  { %5409 = vmatmul.bf16.gmra.mxu3 %v9859_v53  ;;  %5992 = vmatpush.bf16.msrb.mxu1 %v8590_v11 }
 0x8af   :  { %v10321_v48 = vpack.c.bf16 %v5452_v6, %v5448_v54 }
 0x8b0   :  { %v5281_v14 = vpop.f32.mrf.mxu2 }
 0x8b1   :  { %v5370_v26 = vpop.f32.mrf.mxu3  ;;  %v5282_v43 = vadd.f32 %v5281_v14, %v5193_v12  ;;  %v5105_v13 = vpop.f32.mrf.mxu0 }
 0x8b2   :  { %v5194_v50 = vpop.f32.mrf.mxu1  ;;  %v5106_v39 = vadd.f32 %v5105_v13, %v10306_v28 }
 0x8b3   :  { %v5371_v59 = vadd.f32 %v5370_v26, %v5282_v43 }
 0x8b4   :  { %v5195_v51 = vadd.f32 %v5194_v50, %v5106_v39 }
 0x8b5   :  { %v5456_v29 = vmax.f32 %v5371_v59, 0.0 }
 0x8b8   :  { %v5283_v18 = vpop.f32.mrf.mxu2 }
 0x8b9   :  { %v5372_v47 = vpop.f32.mrf.mxu3  ;;  %v5284_v49 = vadd.f32 %v5283_v18, %v5195_v51  ;;  %v5108_v10 = vpop.f32.mrf.mxu0 }
 0x8ba   :  { %v5197_v7 = vpop.f32.mrf.mxu1  ;;  %v5109_v20 = vadd.f32 %v5108_v10, %v10306_v28 }
 0x8bb   :  { %v5373_v3 = vadd.f32 %v5372_v47, %v5284_v49 }
 0x8bc   :  { %v5198_v53 = vadd.f32 %v5197_v7, %v5109_v20  ;;  %5147 = vmatmul.bf16.gmra.mxu0 %v11190_v63  ;;  %5236 = vmatmul.bf16.gmra.mxu1 %v11191_v42 }
 0x8bd   :  { %v5460_v21 = vmax.f32 %v5373_v3, 0.0  ;;  %5325 = vmatmul.bf16.gmra.mxu2 %v11192_v9  ;;  %v11194_v9 = vld [vmem:[#allocation49_spill] sm:$0xff] }
 0x8be   :  { %5414 = vmatmul.bf16.gmra.mxu3 %v11193_v0  ;;  %v11195_v0 = vld [vmem:[#allocation64_spill] sm:$0xff] }
 0x8bf   :  { %v10329_v23 = vpack.c.bf16 %v5460_v21, %v5456_v29 }
 0x8c0   :  { %v5286_v37 = vpop.f32.mrf.mxu2 }
 0x8c1   :  { %v5375_v45 = vpop.f32.mrf.mxu3  ;;  %v5287_v24 = vadd.f32 %v5286_v37, %v5198_v53  ;;  %v5110_v40 = vpop.f32.mrf.mxu0  ;;  %v11197_v37 = vld [vmem:[#allocation20_spill] sm:$0xff] }
 0x8c2   :  { %v5199_v44 = vpop.f32.mrf.mxu1  ;;  %v5111_v32 = vadd.f32 %v5110_v40, %v10306_v28  ;;  %v8605_v40 = vld [vmem:[#allocation7 + $0xc0] sm:$0xff] }
 0x8c3   :  { %v5376_v27 = vadd.f32 %v5375_v45, %v5287_v24  ;;  %v8597_v45 = vld [vmem:[#allocation7 + $0x80] sm:$0xff]  ;;  %6171 = vmatpush.bf16.msrb.mxu3 %v8605_v40 }
 0x8c4   :  { %v5200_v38 = vadd.f32 %v5199_v44, %v5111_v32  ;;  %v8581_v24 = vld [vmem:[#allocation7] sm:$0xff]  ;;  %6082 = vmatpush.bf16.msrb.mxu2 %v8597_v45 }
 0x8c5   :  { %v5464_v39 = vmax.f32 %v5376_v27, 0.0  ;;  %5904 = vmatpush.bf16.msrb.mxu0 %v8581_v24 }
 0x8c8   :  { %v5288_v12 = vpop.f32.mrf.mxu2 }
 0x8c9   :  { %v5377_v54 = vpop.f32.mrf.mxu3  ;;  %v5289_v6 = vadd.f32 %v5288_v12, %v5200_v38  ;;  %v5113_v14 = vpop.f32.mrf.mxu0 }
 0x8ca   :  { %v5202_v26 = vpop.f32.mrf.mxu1  ;;  %v5114_v43 = vadd.f32 %v5113_v14, %v10306_v28 }
 0x8cb   :  { %v5378_v13 = vadd.f32 %v5377_v54, %v5289_v6 }
 0x8cc   :  { %v5203_v50 = vadd.f32 %v5202_v26, %v5114_v43  ;;  %5152 = vmatmul.bf16.gmra.mxu0 %v11086_v41  ;;  %5241 = vmatmul.bf16.gmra.mxu1 %v11087_v46  ;;  %v8589_v26 = vld [vmem:[#allocation7 + $0x40] sm:$0xff] }
 0x8cd   :  { %v5468_v59 = vmax.f32 %v5378_v13, 0.0  ;;  %5330 = vmatmul.bf16.gmra.mxu2 %v9744_v58  ;;  %5993 = vmatpush.bf16.msrb.mxu1 %v8589_v26 }
 0x8ce   :  { %5419 = vmatmul.bf16.gmra.mxu3 %v9875_v60 }
 0x8cf   :  { %v10337_v51 = vpack.c.bf16 %v5468_v59, %v5464_v39 }
 0x8d0   :  { %v5291_v18 = vpop.f32.mrf.mxu2 }
 0x8d1   :  { %v5380_v47 = vpop.f32.mrf.mxu3  ;;  %v5292_v49 = vadd.f32 %v5291_v18, %v5203_v50  ;;  %v5115_v10 = vpop.f32.mrf.mxu0 }
 0x8d2   :  { %v5204_v7 = vpop.f32.mrf.mxu1  ;;  %v5116_v20 = vadd.f32 %v5115_v10, %v10306_v28 }
 0x8d3   :  { %v5381_v3 = vadd.f32 %v5380_v47, %v5292_v49 }
 0x8d4   :  { %v5205_v53 = vadd.f32 %v5204_v7, %v5116_v20 }
 0x8d5   :  { %v5472_v2 = vmax.f32 %v5381_v3, 0.0 }
 0x8d8   :  { %v5293_v41 = vpop.f32.mrf.mxu2 }
 0x8d9   :  { %v5382_v63 = vpop.f32.mrf.mxu3  ;;  %v5294_v46 = vadd.f32 %v5293_v41, %v5205_v53  ;;  %v5118_v42 = vpop.f32.mrf.mxu0 }
 0x8da   :  { %v5207_v29 = vpop.f32.mrf.mxu1  ;;  %v5119_v58 = vadd.f32 %v5118_v42, %v10306_v28 }
 0x8db   :  { %v5383_v21 = vadd.f32 %v5382_v63, %v5294_v46 }
 0x8dc   :  { %v5208_v60 = vadd.f32 %v5207_v29, %v5119_v58  ;;  %5157 = vmatmul.bf16.gmra.mxu0 %v11194_v9  ;;  %5246 = vmatmul.bf16.gmra.mxu1 %v11195_v0 }
 0x8dd   :  { %v5476_v30 = vmax.f32 %v5383_v21, 0.0  ;;  %5335 = vmatmul.bf16.gmra.mxu2 %v11196_v57  ;;  %v11198_v57 = vld [vmem:[#allocation14_spill] sm:$0xff] }
 0x8de   :  { %5424 = vmatmul.bf16.gmra.mxu3 %v11197_v37  ;;  %v11199_v37 = vld [vmem:[#allocation21_spill] sm:$0xff] }
 0x8df   :  { %v10345_v44 = vpack.c.bf16 %v5476_v30, %v5472_v2 }
 0x8e0   :  { %v5296_v32 = vpop.f32.mrf.mxu2 }
 0x8e1   :  { %v5385_v27 = vpop.f32.mrf.mxu3  ;;  %v5297_v38 = vadd.f32 %v5296_v32, %v5208_v60  ;;  %v5120_v11 = vpop.f32.mrf.mxu0 }
 0x8e2   :  { %v5209_v12 = vpop.f32.mrf.mxu1  ;;  %v5121_v54 = vadd.f32 %v5120_v11, %v10306_v28 }
 0x8e3   :  { %v5386_v6 = vadd.f32 %v5385_v27, %v5297_v38 }
 0x8e4   :  { %v5210_v14 = vadd.f32 %v5209_v12, %v5121_v54 }
 0x8e5   :  { %v5480_v10 = vmax.f32 %v5386_v6, 0.0 }
 0x8e8   :  { %v5298_v43 = vpop.f32.mrf.mxu2 }
 0x8e9   :  { %v5387_v13 = vpop.f32.mrf.mxu3  ;;  %v5299_v50 = vadd.f32 %v5298_v43, %v5210_v14  ;;  %v5123_v39 = vpop.f32.mrf.mxu0 }
 0x8ea   :  { %v5212_v59 = vpop.f32.mrf.mxu1  ;;  %v5124_v18 = vadd.f32 %v5123_v39, %v10306_v28 }
 0x8eb   :  { %v5388_v47 = vadd.f32 %v5387_v13, %v5299_v50 }
 0x8ec   :  { %v5213_v49 = vadd.f32 %v5212_v59, %v5124_v18  ;;  %5162 = vmatmul.bf16.gmra.mxu0 %v11092_v55  ;;  %5251 = vmatmul.bf16.gmra.mxu1 %v11093_v62 }
 0x8ed   :  { %v5484_v7 = vmax.f32 %v5388_v47, 0.0  ;;  %5340 = vmatmul.bf16.gmra.mxu2 %v9760_v61 }
 0x8ee   :  { %5429 = vmatmul.bf16.gmra.mxu3 %v9891_v5 }
 0x8ef   :  { %v10353_v20 = vpack.c.bf16 %v5484_v7, %v5480_v10 }
 0x8f0   :  { %v5301_v3 = vpop.f32.mrf.mxu2 }
 0x8f1   :  { %v5390_v53 = vpop.f32.mrf.mxu3  ;;  %v5302_v41 = vadd.f32 %v5301_v3, %v5213_v49  ;;  %v5125_v63 = vpop.f32.mrf.mxu0 }
 0x8f2   :  { %v5214_v46 = vpop.f32.mrf.mxu1  ;;  %v5126_v42 = vadd.f32 %v5125_v63, %v10306_v28 }
 0x8f3   :  { %v5391_v29 = vadd.f32 %v5390_v53, %v5302_v41 }
 0x8f4   :  { %v5215_v58 = vadd.f32 %v5214_v46, %v5126_v42 }
 0x8f5   :  { %v5488_v2 = vmax.f32 %v5391_v29, 0.0 }
 0x8f8   :  { %v5303_v55 = vpop.f32.mrf.mxu2 }
 0x8f9   :  { %v5392_v21 = vpop.f32.mrf.mxu3  ;;  %v5304_v62 = vadd.f32 %v5303_v55, %v5215_v58  ;;  %v5128_v60 = vpop.f32.mrf.mxu0  ;;  %v11200_v55 = vld [vmem:[#allocation23_spill] sm:$0xff] }
 0x8fa   :  { %v5217_v9 = vpop.f32.mrf.mxu1  ;;  %v5129_v61 = vadd.f32 %v5128_v60, %v10306_v28 }
 0x8fb   :  { %v5393_v0 = vadd.f32 %v5392_v21, %v5304_v62  ;;  %v11201_v21 = vld [vmem:[#allocation38_spill] sm:$0xff] }
 0x8fc   :  { %v5218_v5 = vadd.f32 %v5217_v9, %v5129_v61  ;;  %5167 = vmatmul.bf16.gmra.mxu0 %v11173_v19  ;;  %5256 = vmatmul.bf16.gmra.mxu1 %v11174_v15  ;;  %v11202_v9 = vld [vmem:[#allocation46_spill] sm:$0xff] }
 0x8fd   :  { %v5492_v30 = vmax.f32 %v5393_v0, 0.0  ;;  %5345 = vmatmul.bf16.gmra.mxu2 %v11198_v57 }
 0x8fe   :  { %5434 = vmatmul.bf16.gmra.mxu3 %v11199_v37 }
 0x8ff   :  { %v10361_v45 = vpack.c.bf16 %v5492_v30, %v5488_v2 }
 0x900   :  { %v5306_v24 = vpop.f32.mrf.mxu2 }
 0x901   :  { %v5395_v40 = vpop.f32.mrf.mxu3  ;;  %v5307_v32 = vadd.f32 %v5306_v24, %v5218_v5  ;;  %v5130_v27 = vpop.f32.mrf.mxu0 }
 0x902   :  { %v5219_v38 = vpop.f32.mrf.mxu1  ;;  %v5131_v11 = vadd.f32 %v5130_v27, %v10306_v28 }
 0x903   :  { %v5396_v12 = vadd.f32 %v5395_v40, %v5307_v32 }
 0x904   :  { %v5220_v54 = vadd.f32 %v5219_v38, %v5131_v11 }
 0x905   :  { %v5496_v39 = vmax.f32 %v5396_v12, 0.0 }
 0x908   :  { %v5308_v19 = vpop.f32.mrf.mxu2 }
 0x909   :  { %v5397_v6 = vpop.f32.mrf.mxu3  ;;  %v5309_v15 = vadd.f32 %v5308_v19, %v5220_v54  ;;  %v5133_v14 = vpop.f32.mrf.mxu0 }
 0x90a   :  { %v5222_v26 = vpop.f32.mrf.mxu1  ;;  %v5134_v43 = vadd.f32 %v5133_v14, %v10306_v28 }
 0x90b   :  { %v5398_v13 = vadd.f32 %v5397_v6, %v5309_v15  ;;  %v11203_v6 = vld [vmem:[#allocation24_spill] sm:$0xff]  ;;  %v11204_v15 = vld [vmem:[#allocation53_spill] sm:$0xff] }
 0x90c   :  { %v5223_v50 = vadd.f32 %v5222_v26, %v5134_v43  ;;  %5172 = vmatmul.bf16.gmra.mxu0 %v11098_v4  ;;  %5261 = vmatmul.bf16.gmra.mxu1 %v11099_v31  ;;  %v11205_v43 = vld [vmem:[#allocation61_spill] sm:$0xff] }
 0x90d   :  { %v5500_v59 = vmax.f32 %v5398_v13, 0.0  ;;  %5350 = vmatmul.bf16.gmra.mxu2 %v9779_v8 }
 0x90e   :  { %5439 = vmatmul.bf16.gmra.mxu3 %v9915_v16 }
 0x90f   :  { %v10369_v18 = vpack.c.bf16 %v5500_v59, %v5496_v39 }
 0x910   :  { %v5311_v47 = vpop.f32.mrf.mxu2 }
 0x911   :  { %v5400_v49 = vpop.f32.mrf.mxu3  ;;  %v5312_v10 = vadd.f32 %v5311_v47, %v5223_v50  ;;  %v5135_v7 = vpop.f32.mrf.mxu0 }
 0x912   :  { %v5224_v3 = vpop.f32.mrf.mxu1  ;;  %v5136_v53 = vadd.f32 %v5135_v7, %v10306_v28 }
 0x913   :  { %v5401_v41 = vadd.f32 %v5400_v49, %v5312_v10 }
 0x914   :  { %v5225_v63 = vadd.f32 %v5224_v3, %v5136_v53 }
 0x915   :  { %v5504_v62 = vmax.f32 %v5401_v41, 0.0 }
 0x918   :  { %v5313_v4 = vpop.f32.mrf.mxu2 }
 0x919   :  { %v5402_v46 = vpop.f32.mrf.mxu3  ;;  %v5314_v31 = vadd.f32 %v5313_v4, %v5225_v63  ;;  %v5138_v42 = vpop.f32.mrf.mxu0 }
 0x91a   :  { %v5227_v29 = vpop.f32.mrf.mxu1  ;;  %v5139_v8 = vadd.f32 %v5138_v42, %v10306_v28 }
 0x91b   :  { %v5403_v58 = vadd.f32 %v5402_v46, %v5314_v31 }
 0x91c   :  { %v5228_v16 = vadd.f32 %v5227_v29, %v5139_v8  ;;  %5905 = vmatmul.bf16.vlgmr.msrb.gmra.mxu0 %v11200_v55  ;;  %5994 = vmatmul.bf16.vlgmr.msrb.gmra.mxu1 %v11201_v21  ;;  %v11206_v29 = vld [vmem:[#allocation25_spill] sm:$0xff]  ;;  %v11207_v8 = vld [vmem:[#allocation70_spill] sm:$0xff]  ;;  %v11208_v55 = vld [vmem:[#allocation48_spill] sm:$0xff] }
 0x91d   :  { %v5508_v60 = vmax.f32 %v5403_v58, 0.0  ;;  %6083 = vmatmul.bf16.vlgmr.msrb.gmra.mxu2 %v11202_v9 }
 0x91e   :  { %6172 = vmatmul.bf16.vlgmr.msrb.gmra.mxu3 %v10321_v48 }
 0x91f   :  { %v10377_v61 = vpack.c.bf16 %v5508_v60, %v5504_v62 }
 0x920   :  { %v5316_v0 = vpop.f32.mrf.mxu2 }
 0x921   :  { %v5405_v5 = vpop.f32.mrf.mxu3  ;;  %v5317_v2 = vadd.f32 %v5316_v0, %v5228_v16  ;;  %v5140_v30 = vpop.f32.mrf.mxu0 }
 0x922   :  { %v5229_v57 = vpop.f32.mrf.mxu1  ;;  %v5141_v37 = vadd.f32 %v5140_v30, %v10306_v28 }
 0x923   :  { %v5406_v24 = vadd.f32 %v5405_v5, %v5317_v2 }
 0x924   :  { %v5230_v40 = vadd.f32 %v5229_v57, %v5141_v37 }
 0x925   :  { %v5512_v14 = vmax.f32 %v5406_v24, 0.0 }
 0x928   :  { %v5318_v32 = vpop.f32.mrf.mxu2 }
 0x929   :  { %v5407_v27 = vpop.f32.mrf.mxu3  ;;  %v5319_v38 = vadd.f32 %v5318_v32, %v5230_v40  ;;  %v5143_v11 = vpop.f32.mrf.mxu0 }
 0x92a   :  { %v5232_v12 = vpop.f32.mrf.mxu1  ;;  %v5144_v54 = vadd.f32 %v5143_v11, %v10306_v28 }
 0x92b   :  { %v5408_v19 = vadd.f32 %v5407_v27, %v5319_v38 }
 0x92c   :  { %v5233_v48 = vadd.f32 %v5232_v12, %v5144_v54  ;;  %5910 = vmatmul.bf16.gmra.mxu0 %v11203_v6  ;;  %5999 = vmatmul.bf16.gmra.mxu1 %v11204_v15  ;;  %v11209_v12 = vld [vmem:[#allocation26_spill] sm:$0xff]  ;;  %v11210_v54 = vld [vmem:[#allocation39_spill] sm:$0xff] }
 0x92d   :  { %v5516_v26 = vmax.f32 %v5408_v19, 0.0  ;;  %6088 = vmatmul.bf16.gmra.mxu2 %v11205_v43  ;;  %v11211_v6 = vld [vmem:[#allocation63_spill] sm:$0xff] }
 0x92e   :  { %6177 = vmatmul.bf16.gmra.mxu3 %v10329_v23 }
 0x92f   :  { %v10385_v13 = vpack.c.bf16 %v5516_v26, %v5512_v14 }
 0x930   :  { %v5321_v50 = vpop.f32.mrf.mxu2 }
 0x931   :  { %v5410_v39 = vpop.f32.mrf.mxu3  ;;  %v5322_v59 = vadd.f32 %v5321_v50, %v5233_v48  ;;  %v5145_v47 = vpop.f32.mrf.mxu0 }
 0x932   :  { %v5234_v49 = vpop.f32.mrf.mxu1  ;;  %v5146_v10 = vadd.f32 %v5145_v47, %v10306_v28 }
 0x933   :  { %v5411_v7 = vadd.f32 %v5410_v39, %v5322_v59 }
 0x934   :  { %v5235_v3 = vadd.f32 %v5234_v49, %v5146_v10 }
 0x935   :  { %v5520_v58 = vmax.f32 %v5411_v7, 0.0 }
 0x938   :  { %v5323_v53 = vpop.f32.mrf.mxu2 }
 0x939   :  { %v5412_v41 = vpop.f32.mrf.mxu3  ;;  %v5324_v63 = vadd.f32 %v5323_v53, %v5235_v3  ;;  %v5148_v4 = vpop.f32.mrf.mxu0 }
 0x93a   :  { %v5237_v46 = vpop.f32.mrf.mxu1  ;;  %v5149_v31 = vadd.f32 %v5148_v4, %v10306_v28 }
 0x93b   :  { %v5413_v42 = vadd.f32 %v5412_v41, %v5324_v63 }
 0x93c   :  { %v5238_v23 = vadd.f32 %v5237_v46, %v5149_v31  ;;  %5915 = vmatmul.bf16.gmra.mxu0 %v11206_v29  ;;  %6004 = vmatmul.bf16.gmra.mxu1 %v11207_v8  ;;  %v11212_v46 = vld [vmem:[#allocation27_spill] sm:$0xff]  ;;  %v11213_v31 = vld [vmem:[#allocation54_spill] sm:$0xff] }
 0x93d   :  { %v5524_v16 = vmax.f32 %v5413_v42, 0.0  ;;  %6093 = vmatmul.bf16.gmra.mxu2 %v11208_v55  ;;  %v11214_v29 = vld [vmem:[#allocation50_spill] sm:$0xff] }
 0x93e   :  { %6182 = vmatmul.bf16.gmra.mxu3 %v10337_v51 }
 0x93f   :  { %v10393_v21 = vpack.c.bf16 %v5524_v16, %v5520_v58 }
 0x940   :  { %v5326_v62 = vpop.f32.mrf.mxu2 }
 0x941   :  { %v5415_v60 = vpop.f32.mrf.mxu3  ;;  %v5327_v9 = vadd.f32 %v5326_v62, %v5238_v23  ;;  %v5150_v0 = vpop.f32.mrf.mxu0 }
 0x942   :  { %v5239_v5 = vpop.f32.mrf.mxu1  ;;  %v5151_v2 = vadd.f32 %v5150_v0, %v10306_v28 }
 0x943   :  { %v5416_v30 = vadd.f32 %v5415_v60, %v5327_v9 }
 0x944   :  { %v5240_v57 = vadd.f32 %v5239_v5, %v5151_v2 }
 0x945   :  { %v5528_v19 = vmax.f32 %v5416_v30, 0.0 }
 0x948   :  { %v5328_v37 = vpop.f32.mrf.mxu2 }
 0x949   :  { %v5417_v24 = vpop.f32.mrf.mxu3  ;;  %v5329_v40 = vadd.f32 %v5328_v37, %v5240_v57  ;;  %v5153_v32 = vpop.f32.mrf.mxu0 }
 0x94a   :  { %v5242_v27 = vpop.f32.mrf.mxu1  ;;  %v5154_v38 = vadd.f32 %v5153_v32, %v10306_v28 }
 0x94b   :  { %v5418_v11 = vadd.f32 %v5417_v24, %v5329_v40 }
 0x94c   :  { %v5243_v51 = vadd.f32 %v5242_v27, %v5154_v38  ;;  %5920 = vmatmul.bf16.gmra.mxu0 %v11209_v12  ;;  %6009 = vmatmul.bf16.gmra.mxu1 %v11210_v54  ;;  %v11215_v27 = vld [vmem:[#allocation28_spill] sm:$0xff]  ;;  %v11216_v38 = vld [vmem:[#allocation71_spill] sm:$0xff]  ;;  %v11217_v12 = vld [vmem:[#allocation65_spill] sm:$0xff] }
 0x94d   :  { %v5532_v48 = vmax.f32 %v5418_v11, 0.0  ;;  %6098 = vmatmul.bf16.gmra.mxu2 %v11211_v6 }
 0x94e   :  { %6187 = vmatmul.bf16.gmra.mxu3 %v10345_v44 }
 0x94f   :  { %v10401_v15 = vpack.c.bf16 %v5532_v48, %v5528_v19 }
 0x950   :  { %v5331_v14 = vpop.f32.mrf.mxu2 }
 0x951   :  { %v5420_v26 = vpop.f32.mrf.mxu3  ;;  %v5332_v43 = vadd.f32 %v5331_v14, %v5243_v51  ;;  %v5155_v50 = vpop.f32.mrf.mxu0 }
 0x952   :  { %v5244_v39 = vpop.f32.mrf.mxu1  ;;  %v5156_v59 = vadd.f32 %v5155_v50, %v10306_v28 }
 0x953   :  { %v5421_v47 = vadd.f32 %v5420_v26, %v5332_v43 }
 0x954   :  { %v5245_v49 = vadd.f32 %v5244_v39, %v5156_v59 }
 0x955   :  { %v5536_v42 = vmax.f32 %v5421_v47, 0.0 }
 0x958   :  { %v5333_v10 = vpop.f32.mrf.mxu2 }
 0x959   :  { %v5422_v7 = vpop.f32.mrf.mxu3  ;;  %v5334_v3 = vadd.f32 %v5333_v10, %v5245_v49  ;;  %v5158_v53 = vpop.f32.mrf.mxu0 }
 0x95a   :  { %v5247_v41 = vpop.f32.mrf.mxu1  ;;  %v5159_v63 = vadd.f32 %v5158_v53, %v10306_v28 }
 0x95b   :  { %v5423_v4 = vadd.f32 %v5422_v7, %v5334_v3 }
 0x95c   :  { %v5248_v44 = vadd.f32 %v5247_v41, %v5159_v63  ;;  %5925 = vmatmul.bf16.gmra.mxu0 %v11212_v46  ;;  %6014 = vmatmul.bf16.gmra.mxu1 %v11213_v31  ;;  %v11218_v41 = vld [vmem:[#allocation29_spill] sm:$0xff]  ;;  %v11219_v63 = vld [vmem:[#allocation40_spill] sm:$0xff] }
 0x95d   :  { %v5540_v23 = vmax.f32 %v5423_v4, 0.0  ;;  %6103 = vmatmul.bf16.gmra.mxu2 %v11214_v29 }
 0x95e   :  { %6192 = vmatmul.bf16.gmra.mxu3 %v10353_v20 }
 0x95f   :  { %v10409_v8 = vpack.c.bf16 %v5540_v23, %v5536_v42 }
 0x960   :  { %v5336_v58 = vpop.f32.mrf.mxu2 }
 0x961   :  { %v5425_v16 = vpop.f32.mrf.mxu3  ;;  %v5337_v55 = vadd.f32 %v5336_v58, %v5248_v44  ;;  %v5160_v62 = vpop.f32.mrf.mxu0 }
 0x962   :  { %v5249_v60 = vpop.f32.mrf.mxu1  ;;  %v5161_v9 = vadd.f32 %v5160_v62, %v10306_v28 }
 0x963   :  { %v5426_v0 = vadd.f32 %v5425_v16, %v5337_v55 }
 0x964   :  { %v5250_v5 = vadd.f32 %v5249_v60, %v5161_v9 }
 0x965   :  { %v5544_v11 = vmax.f32 %v5426_v0, 0.0 }
 0x968   :  { %v5338_v2 = vpop.f32.mrf.mxu2 }
 0x969   :  { %v5427_v30 = vpop.f32.mrf.mxu3  ;;  %v5339_v57 = vadd.f32 %v5338_v2, %v5250_v5  ;;  %v5163_v37 = vpop.f32.mrf.mxu0 }
 0x96a   :  { %v5252_v24 = vpop.f32.mrf.mxu1  ;;  %v5164_v40 = vadd.f32 %v5163_v37, %v10306_v28  ;;  %v11221_v37 = vld [vmem:[#allocation55_spill] sm:$0xff] }
 0x96b   :  { %v5428_v32 = vadd.f32 %v5427_v30, %v5339_v57  ;;  %v11220_v57 = vld [vmem:[#allocation30_spill] sm:$0xff] }
 0x96c   :  { %v5253_v20 = vadd.f32 %v5252_v24, %v5164_v40  ;;  %5930 = vmatmul.bf16.gmra.mxu0 %v11215_v27  ;;  %6019 = vmatmul.bf16.gmra.mxu1 %v11216_v38 }
 0x96d   :  { %v5548_v51 = vmax.f32 %v5428_v32, 0.0  ;;  %6108 = vmatmul.bf16.gmra.mxu2 %v11217_v12 }
 0x96e   :  { %6197 = vmatmul.bf16.gmra.mxu3 %v10361_v45 }
 0x96f   :  { %v10417_v54 = vpack.c.bf16 %v5548_v51, %v5544_v11 }
 0x970   :  { %v5341_v19 = vpop.f32.mrf.mxu2 }
 0x971   :  { %v5430_v48 = vpop.f32.mrf.mxu3  ;;  %v5342_v6 = vadd.f32 %v5341_v19, %v5253_v20  ;;  %v5165_v14 = vpop.f32.mrf.mxu0 }
 0x972   :  { %v5254_v26 = vpop.f32.mrf.mxu1  ;;  %v5166_v43 = vadd.f32 %v5165_v14, %v10306_v28 }
 0x973   :  { %v5431_v50 = vadd.f32 %v5430_v48, %v5342_v6  ;;  %v10439_v6 = vld [vmem:[%s10788_s8] ss:$0 sm:$0xff]  ;;  %s8863_s8 = smov [#allocation8]  }
 0x974   :  { %v5255_v39 = vadd.f32 %v5254_v26, %v5166_v43  ;;  %s6993_s14 = sshll.u32 %s8863_s8, 4  ;;  %s6994_s14 = int_to_ptr.vmem [resolvable:$true] %s6993_s14 }
 0x975   :  { %v5552_v4 = vmax.f32 %v5431_v50, 0.0 }
 0x978   :  { %v5343_v59 = vpop.f32.mrf.mxu2 }
 0x979   :  { %v5432_v47 = vpop.f32.mrf.mxu3  ;;  %v5344_v49 = vadd.f32 %v5343_v59, %v5255_v39  ;;  %v5168_v10 = vpop.f32.mrf.mxu0  ;;  %v11222_v59 = vld [vmem:[#allocation31_spill] sm:$0xff] }
 0x97a   :  { %v5257_v7 = vpop.f32.mrf.mxu1  ;;  %v5169_v3 = vadd.f32 %v5168_v10, %v10306_v28 }
 0x97b   :  { %v5433_v53 = vadd.f32 %v5432_v47, %v5344_v49  ;;  %v11223_v47 = vld [vmem:[#allocation72_spill] sm:$0xff] }
 0x97c   :  { %v5258_v45 = vadd.f32 %v5257_v7, %v5169_v3  ;;  %5935 = vmatmul.bf16.gmra.mxu0 %v11218_v41  ;;  %6024 = vmatmul.bf16.gmra.mxu1 %v11219_v63 }
 0x97d   :  { %v5556_v44 = vmax.f32 %v5433_v53, 0.0  ;;  %6113 = vmatmul.bf16.gmra.mxu2 %v10238_v56 }
 0x97e   :  { %6202 = vmatmul.bf16.gmra.mxu3 %v10369_v18 }
 0x97f   :  { %v10425_v46 = vpack.c.bf16 %v5556_v44, %v5552_v4 }
 0x980   :  { %v5346_v31 = vpop.f32.mrf.mxu2 }
 0x981   :  { %v5435_v42 = vpop.f32.mrf.mxu3  ;;  %v5347_v23 = vadd.f32 %v5346_v31, %v5258_v45  ;;  %v5170_v29 = vpop.f32.mrf.mxu0 }
 0x982   :  { %v5259_v58 = vpop.f32.mrf.mxu1  ;;  %v5171_v16 = vadd.f32 %v5170_v29, %v10306_v28 }
 0x983   :  { %v5436_v55 = vadd.f32 %v5435_v42, %v5347_v23 }
 0x984   :  { %v5260_v62 = vadd.f32 %v5259_v58, %v5171_v16 }
 0x985   :  { %v5560_v24 = vmax.f32 %v5436_v55, 0.0  ;;  %v11224_v55 = vld [vmem:[#allocation67_spill] sm:$0xff] }
 0x988   :  { %v5348_v60 = vpop.f32.mrf.mxu2 }
 0x989   :  { %v5437_v9 = vpop.f32.mrf.mxu3  ;;  %v5349_v0 = vadd.f32 %v5348_v60, %v5260_v62  ;;  %v5173_v5 = vpop.f32.mrf.mxu0  ;;  %v11225_v62 = vld [vmem:[#allocation41_spill] sm:$0xff] }
 0x98a   :  { %v5262_v2 = vpop.f32.mrf.mxu1  ;;  %v5174_v56 = vadd.f32 %v5173_v5, %v10306_v28 }
 0x98b   :  { %v5438_v30 = vadd.f32 %v5437_v9, %v5349_v0 }
 0x98c   :  { %v5263_v18 = vadd.f32 %v5262_v2, %v5174_v56  ;;  %5940 = vmatmul.bf16.gmra.mxu0 %v11220_v57  ;;  %6029 = vmatmul.bf16.gmra.mxu1 %v11221_v37 }
 0x98d   :  { %v5564_v40 = vmax.f32 %v5438_v30, 0.0  ;;  %6118 = vmatmul.bf16.gmra.mxu2 %v10246_v52 }
 0x98e   :  { %6207 = vmatmul.bf16.gmra.mxu3 %v10377_v61 }
 0x98f   :  { %v10433_v32 = vpack.c.bf16 %v5564_v40, %v5560_v24 }
 0x990   :  { %v5351_v20 = vpop.f32.mrf.mxu2 }
 0x991   :  { %v5440_v27 = vpop.f32.mrf.mxu3  ;;  %v5352_v38 = vadd.f32 %v5351_v20, %v5263_v18  ;;  %v5175_v11 = vpop.f32.mrf.mxu0 }
 0x992   :  { %v5264_v51 = vpop.f32.mrf.mxu1  ;;  %v5176_v12 = vadd.f32 %v5175_v11, %v10306_v28  ;;  %v11227_v11 = vld [vmem:[#allocation56_spill] sm:$0xff] }
 0x993   :  { %v5441_v19 = vadd.f32 %v5440_v27, %v5352_v38  ;;  %v11226_v38 = vld [vmem:[#allocation32_spill] sm:$0xff] }
 0x994   :  { %v5265_v48 = vadd.f32 %v5264_v51, %v5176_v12 }
 0x995   :  { %v5568_v28 = vmax.f32 %v5441_v19, 0.0 }
 0x998   :  { %v5353_v14 = vpop.f32.mrf.mxu2 }
 0x999   :  { %v5442_v52 = vpop.f32.mrf.mxu3  ;;  %v5354_v26 = vadd.f32 %v5353_v14, %v5265_v48  ;;  %v5906_v61 = vpop.f32.mrf.mxu0 }
 0x99a   :  { %v5995_v43 = vpop.f32.mrf.mxu1  ;;  %v5907_v39 = vadd.f32 %v10439_v6, %v5906_v61 }
 0x99b   :  { %v5443_v50 = vadd.f32 %v5442_v52, %v5354_v26 }
 0x99c   :  { %5945 = vmatmul.bf16.gmra.mxu0 %v11222_v59  ;;  %6034 = vmatmul.bf16.gmra.mxu1 %v11223_v47  ;;  %v5996_v10 = vadd.f32 %v5995_v43, %v5907_v39 }
 0x99d   :  { %v5572_v49 = vmax.f32 %v5443_v50, 0.0  ;;  %6123 = vmatmul.bf16.gmra.mxu2 %v10254_v17 }
 0x99e   :  { %6212 = vmatmul.bf16.gmra.mxu3 %v10385_v13 }
 0x99f   :  { %v10446_v7 = vpack.c.bf16 %v5572_v49, %v5568_v28  ;;  %v11228_v49 = vld [vmem:[#allocation33_spill] sm:$0xff] }
 0x9a0   :  { %v6084_v3 = vpop.f32.mrf.mxu2 }
 0x9a1   :  { %v6173_v53 = vpop.f32.mrf.mxu3  ;;  %v6085_v45 = vadd.f32 %v6084_v3, %v5996_v10  ;;  %v5908_v41 = vpop.f32.mrf.mxu0  ;;  %v11229_v10 = vld [vmem:[#allocation73_spill] sm:$0xff] }
 0x9a2   :  { %v5997_v63 = vpop.f32.mrf.mxu1  ;;  %v5909_v44 = vadd.f32 %v10439_v6, %v5908_v41 }
 0x9a3   :  { %v10448_v4 = vadd.f32 %v6173_v53, %v6085_v45 }
 0x9a4   :  { %v5998_v31 = vadd.f32 %v5997_v63, %v5909_v44 }
 0x9a5   :  { %6253 = vmax.xlane.f32.xlu0 %v10448_v4 }
 0x9a8   :  { %v6086_v42 = vpop.f32.mrf.mxu2 }
 0x9a9   :  { %v6175_v23 = vpop.f32.mrf.mxu3  ;;  %v6087_v17 = vadd.f32 %v6086_v42, %v5998_v31  ;;  %v5911_v29 = vpop.f32.mrf.mxu0 }
 0x9aa   :  { %v6000_v13 = vpop.f32.mrf.mxu1  ;;  %v5912_v58 = vadd.f32 %v10439_v6, %v5911_v29 }
 0x9ab   :  { %v10453_v16 = vadd.f32 %v6175_v23, %v6087_v17 }
 0x9ac   :  { %5950 = vmatmul.bf16.gmra.mxu0 %v11224_v55  ;;  %6039 = vmatmul.bf16.gmra.mxu1 %v11225_v62  ;;  %v6001_v60 = vadd.f32 %v6000_v13, %v5912_v58  ;;  %v11230_v62 = vld [vmem:[#allocation34_spill] sm:$0xff] }
 0x9ad   :  { %6128 = vmatmul.bf16.gmra.mxu2 %v10262_v1  ;;  %6255 = vmax.xlane.f32.xlu0 %v10453_v16 }
 0x9ae   :  { %6217 = vmatmul.bf16.gmra.mxu3 %v10393_v21 }
 0x9b0   :  { %v6089_v9 = vpop.f32.mrf.mxu2 }
 0x9b1   :  { %v6178_v0 = vpop.f32.mrf.mxu3  ;;  %v6090_v5 = vadd.f32 %v6089_v9, %v6001_v60  ;;  %v5913_v2 = vpop.f32.mrf.mxu0  ;;  %v11231_v60 = vld [vmem:[#allocation42_spill] sm:$0xff] }
 0x9b2   :  { %v6002_v56 = vpop.f32.mrf.mxu1  ;;  %v5914_v18 = vadd.f32 %v10439_v6, %v5913_v2 }
 0x9b3   :  { %v10460_v30 = vadd.f32 %v6178_v0, %v6090_v5 }
 0x9b4   :  { %v6003_v57 = vadd.f32 %v6002_v56, %v5914_v18 }
 0x9b5   :  { %6257 = vmax.xlane.f32.xlu1 %v10460_v30 }
 0x9b8   :  { %v6091_v37 = vpop.f32.mrf.mxu2 }
 0x9b9   :  { %v6180_v24 = vpop.f32.mrf.mxu3  ;;  %v6092_v1 = vadd.f32 %v6091_v37, %v6003_v57  ;;  %v5916_v40 = vpop.f32.mrf.mxu0 }
 0x9ba   :  { %v6005_v21 = vpop.f32.mrf.mxu1  ;;  %v5917_v20 = vadd.f32 %v10439_v6, %v5916_v40 }
 0x9bb   :  { %v10465_v27 = vadd.f32 %v6180_v24, %v6092_v1 }
 0x9bc   :  { %5955 = vmatmul.bf16.gmra.mxu0 %v11226_v38  ;;  %6044 = vmatmul.bf16.gmra.mxu1 %v11227_v11  ;;  %v6006_v51 = vadd.f32 %v6005_v21, %v5917_v20  ;;  %v11232_v11 = vld [vmem:[#allocation35_spill] sm:$0xff] }
 0x9bd   :  { %6133 = vmatmul.bf16.gmra.mxu2 %v10270_v33  ;;  %6259 = vmax.xlane.f32.xlu1 %v10465_v27 }
 0x9be   :  { %6222 = vmatmul.bf16.gmra.mxu3 %v10401_v15 }
 0x9c0   :  { %v6094_v12 = vpop.f32.mrf.mxu2 }
 0x9c1   :  { %v6183_v19 = vpop.f32.mrf.mxu3  ;;  %v6095_v48 = vadd.f32 %v6094_v12, %v6006_v51  ;;  %v5918_v14 = vpop.f32.mrf.mxu0  ;;  %v11233_v51 = vld [vmem:[#allocation57_spill] sm:$0xff] }
 0x9c2   :  { %v6007_v52 = vpop.f32.mrf.mxu1  ;;  %v5919_v61 = vadd.f32 %v10439_v6, %v5918_v14 }
 0x9c3   :  { %v10472_v26 = vadd.f32 %v6183_v19, %v6095_v48 }
 0x9c4   :  { %v6008_v43 = vadd.f32 %v6007_v52, %v5919_v61 }
 0x9c5   :  { %6261 = vmax.xlane.f32.xlu2 %v10472_v26 }
 0x9c8   :  { %v6096_v50 = vpop.f32.mrf.mxu2 }
 0x9c9   :  { %v6185_v39 = vpop.f32.mrf.mxu3  ;;  %v6097_v33 = vadd.f32 %v6096_v50, %v6008_v43  ;;  %v5921_v59 = vpop.f32.mrf.mxu0 }
 0x9ca   :  { %v6010_v15 = vpop.f32.mrf.mxu1  ;;  %v5922_v47 = vadd.f32 %v10439_v6, %v5921_v59 }
 0x9cb   :  { %v10477_v28 = vadd.f32 %v6185_v39, %v6097_v33 }
 0x9cc   :  { %5960 = vmatmul.bf16.gmra.mxu0 %v11228_v49  ;;  %6049 = vmatmul.bf16.gmra.mxu1 %v11229_v10  ;;  %v6011_v3 = vadd.f32 %v6010_v15, %v5922_v47  ;;  %v11234_v10 = vld [vmem:[#allocation37_spill] sm:$0xff] }
 0x9cd   :  { %6138 = vmatmul.bf16.gmra.mxu2 %v10278_v35  ;;  %6263 = vmax.xlane.f32.xlu2 %v10477_v28 }
 0x9ce   :  { %6227 = vmatmul.bf16.gmra.mxu3 %v10409_v8 }
 0x9d0   :  { %v6099_v53 = vpop.f32.mrf.mxu2 }
 0x9d1   :  { %v6188_v45 = vpop.f32.mrf.mxu3  ;;  %v6100_v41 = vadd.f32 %v6099_v53, %v6011_v3  ;;  %v5923_v63 = vpop.f32.mrf.mxu0  ;;  %v11235_v3 = vld [vmem:[#allocation74_spill] sm:$0xff] }
 0x9d2   :  { %v6012_v44 = vpop.f32.mrf.mxu1  ;;  %v5924_v42 = vadd.f32 %v10439_v6, %v5923_v63 }
 0x9d3   :  { %v10484_v31 = vadd.f32 %v6188_v45, %v6100_v41 }
 0x9d4   :  { %v6013_v23 = vadd.f32 %v6012_v44, %v5924_v42 }
 0x9d5   :  { %6265 = vmax.xlane.f32.xlu0 %v10484_v31 }
 0x9d8   :  { %v6101_v17 = vpop.f32.mrf.mxu2 }
 0x9d9   :  { %v6190_v29 = vpop.f32.mrf.mxu3  ;;  %v6102_v35 = vadd.f32 %v6101_v17, %v6013_v23  ;;  %v5926_v13 = vpop.f32.mrf.mxu0 }
 0x9da   :  { %v6015_v8 = vpop.f32.mrf.mxu1  ;;  %v5927_v58 = vadd.f32 %v10439_v6, %v5926_v13 }
 0x9db   :  { %v10489_v55 = vadd.f32 %v6190_v29, %v6102_v35 }
 0x9dc   :  { %5965 = vmatmul.bf16.gmra.mxu0 %v11230_v62  ;;  %6054 = vmatmul.bf16.gmra.mxu1 %v11231_v60  ;;  %v6016_v9 = vadd.f32 %v6015_v8, %v5927_v58  ;;  %v11236_v60 = vld [vmem:[#allocation52_spill] sm:$0xff] }
 0x9dd   :  { %6143 = vmatmul.bf16.gmra.mxu2 %v10286_v36  ;;  %6267 = vmax.xlane.f32.xlu1 %v10489_v55 }
 0x9de   :  { %6232 = vmatmul.bf16.gmra.mxu3 %v10417_v54 }
 0x9e0   :  { %v6104_v0 = vpop.f32.mrf.mxu2 }
 0x9e1   :  { %v6193_v5 = vpop.f32.mrf.mxu3  ;;  %v6105_v2 = vadd.f32 %v6104_v0, %v6016_v9  ;;  %v5928_v56 = vpop.f32.mrf.mxu0  ;;  %v11237_v9 = vld [vmem:[#allocation59_spill] sm:$0xff] }
 0x9e2   :  { %v6017_v18 = vpop.f32.mrf.mxu1  ;;  %v5929_v37 = vadd.f32 %v10439_v6, %v5928_v56 }
 0x9e3   :  { %v10496_v57 = vadd.f32 %v6193_v5, %v6105_v2 }
 0x9e4   :  { %v6018_v24 = vadd.f32 %v6017_v18, %v5929_v37 }
 0x9e5   :  { %6269 = vmax.xlane.f32.xlu2 %v10496_v57 }
 0x9e8   :  { %v6106_v1 = vpop.f32.mrf.mxu2 }
 0x9e9   :  { %v6195_v40 = vpop.f32.mrf.mxu3  ;;  %v6107_v36 = vadd.f32 %v6106_v1, %v6018_v24  ;;  %v5931_v21 = vpop.f32.mrf.mxu0 }
 0x9ea   :  { %v6020_v54 = vpop.f32.mrf.mxu1  ;;  %v5932_v38 = vadd.f32 %v10439_v6, %v5931_v21 }
 0x9eb   :  { %v10500_v20 = vadd.f32 %v6195_v40, %v6107_v36 }
 0x9ec   :  { %5970 = vmatmul.bf16.gmra.mxu0 %v11232_v11  ;;  %6059 = vmatmul.bf16.gmra.mxu1 %v11233_v51  ;;  %v6021_v12 = vadd.f32 %v6020_v54, %v5932_v38 }
 0x9ed   :  { %6148 = vmatmul.bf16.gmra.mxu2 %v10294_v22  ;;  %6271 = vmax.xlane.f32.xlu0 %v10500_v20 }
 0x9ee   :  { %6237 = vmatmul.bf16.gmra.mxu3 %v10425_v46 }
 0x9f0   :  { %v6109_v19 = vpop.f32.mrf.mxu2 }
 0x9f1   :  { %v6198_v48 = vpop.f32.mrf.mxu3  ;;  %v6110_v14 = vadd.f32 %v6109_v19, %v6021_v12  ;;  %v5933_v52 = vpop.f32.mrf.mxu0 }
 0x9f2   :  { %v6022_v61 = vpop.f32.mrf.mxu1  ;;  %v5934_v50 = vadd.f32 %v10439_v6, %v5933_v52 }
 0x9f3   :  { %v10508_v43 = vadd.f32 %v6198_v48, %v6110_v14 }
 0x9f4   :  { %v6023_v39 = vadd.f32 %v6022_v61, %v5934_v50 }
 0x9f5   :  { %6273 = vmax.xlane.f32.xlu1 %v10508_v43 }
 0x9f8   :  { %v6111_v33 = vpop.f32.mrf.mxu2 }
 0x9f9   :  { %v6200_v59 = vpop.f32.mrf.mxu3  ;;  %v6112_v22 = vadd.f32 %v6111_v33, %v6023_v39  ;;  %v5936_v15 = vpop.f32.mrf.mxu0 }
 0x9fa   :  { %v6025_v46 = vpop.f32.mrf.mxu1  ;;  %v5937_v49 = vadd.f32 %v10439_v6, %v5936_v15 }
 0x9fb   :  { %v10512_v47 = vadd.f32 %v6200_v59, %v6112_v22 }
 0x9fc   :  { %5975 = vmatmul.bf16.gmra.mxu0 %v11234_v10  ;;  %6064 = vmatmul.bf16.gmra.mxu1 %v11235_v3  ;;  %v6026_v53 = vadd.f32 %v6025_v46, %v5937_v49 }
 0x9fd   :  { %6153 = vmatmul.bf16.gmra.mxu2 %v10302_v34  ;;  %6275 = vmax.xlane.f32.xlu2 %v10512_v47 }
 0x9fe   :  { %6242 = vmatmul.bf16.gmra.mxu3 %v10433_v32 }
 0xa00   :  { %v6114_v45 = vpop.f32.mrf.mxu2 }
 0xa01   :  { %v6203_v41 = vpop.f32.mrf.mxu3  ;;  %v6115_v63 = vadd.f32 %v6114_v45, %v6026_v53  ;;  %v5938_v44 = vpop.f32.mrf.mxu0 }
 0xa02   :  { %v6027_v42 = vpop.f32.mrf.mxu1  ;;  %v5939_v17 = vadd.f32 %v10439_v6, %v5938_v44 }
 0xa03   :  { %v10520_v23 = vadd.f32 %v6203_v41, %v6115_v63 }
 0xa04   :  { %v6028_v29 = vadd.f32 %v6027_v42, %v5939_v17 }
 0xa05   :  { %6277 = vmax.xlane.f32.xlu0 %v10520_v23 }
 0xa08   :  { %v6116_v35 = vpop.f32.mrf.mxu2 }
 0xa09   :  { %v6205_v13 = vpop.f32.mrf.mxu3  ;;  %v6117_v34 = vadd.f32 %v6116_v35, %v6028_v29  ;;  %v5941_v8 = vpop.f32.mrf.mxu0 }
 0xa0a   :  { %v6030_v32 = vpop.f32.mrf.mxu1  ;;  %v5942_v62 = vadd.f32 %v10439_v6, %v5941_v8 }
 0xa0b   :  { %v10524_v58 = vadd.f32 %v6205_v13, %v6117_v34 }
 0xa0c   :  { %5980 = vmatmul.bf16.gmra.mxu0 %v11236_v60  ;;  %6069 = vmatmul.bf16.gmra.mxu1 %v11237_v9  ;;  %v6031_v0 = vadd.f32 %v6030_v32, %v5942_v62 }
 0xa0d   :  { %6158 = vmatmul.bf16.gmra.mxu2 %v10313_v25  ;;  %6279 = vmax.xlane.f32.xlu1 %v10524_v58 }
 0xa0e   :  { %6247 = vmatmul.bf16.gmra.mxu3 %v10446_v7 }
 0xa10   :  { %v6119_v5 = vpop.f32.mrf.mxu2 }
 0xa11   :  { %v6208_v2 = vpop.f32.mrf.mxu3  ;;  %v6120_v56 = vadd.f32 %v6119_v5, %v6031_v0  ;;  %v5943_v18 = vpop.f32.mrf.mxu0 }
 0xa12   :  { %v6032_v37 = vpop.f32.mrf.mxu1  ;;  %v5944_v1 = vadd.f32 %v10439_v6, %v5943_v18 }
 0xa13   :  { %v10532_v24 = vadd.f32 %v6208_v2, %v6120_v56 }
 0xa14   :  { %v6033_v40 = vadd.f32 %v6032_v37, %v5944_v1 }
 0xa15   :  { %6281 = vmax.xlane.f32.xlu2 %v10532_v24 }
 0xa18   :  { %v6121_v36 = vpop.f32.mrf.mxu2  ;;  %v6254_v54 = vpop.xlane.xlu0 %6253 }
 0xa19   :  { %v6210_v21 = vpop.f32.mrf.mxu3  ;;  %v6122_v25 = vadd.f32 %v6121_v36, %v6033_v40  ;;  %v5946_v7 = vpop.f32.mrf.mxu0  ;;  %v6317_v38 = vsub.f32 %v10448_v4, %v6254_v54 }
 0xa1a   :  { %v6035_v11 = vpop.f32.mrf.mxu1  ;;  %v5947_v12 = vadd.f32 %v10439_v6, %v5946_v7 }
 0xa1b   :  { %v10537_v51 = vadd.f32 %v6210_v21, %v6122_v25  ;;  %v6349_v19 = vmul.f32 1.442695, %v6317_v38 }
 0xa1c   :  { %v6036_v48 = vadd.f32 %v6035_v11, %v5947_v12 }
 0xa1d   :  { %6283 = vmax.xlane.f32.xlu0 %v10537_v51  ;;  %8624 = vpow2.f32 %v6349_v19 }
 0xa20   :  { %v6124_v14 = vpop.f32.mrf.mxu2  ;;  %v6256_v50 = vpop.xlane.xlu0 %6255 }
 0xa21   :  { %v6213_v52 = vpop.f32.mrf.mxu3  ;;  %v6125_v61 = vadd.f32 %v6124_v14, %v6036_v48  ;;  %v5948_v39 = vpop.f32.mrf.mxu0  ;;  %v6318_v33 = vsub.f32 %v10453_v16, %v6256_v50 }
 0xa22   :  { %v6037_v59 = vpop.f32.mrf.mxu1  ;;  %v5949_v4 = vadd.f32 %v10439_v6, %v5948_v39 }
 0xa23   :  { %v10542_v22 = vadd.f32 %v6213_v52, %v6125_v61  ;;  %v10545_v15 = vpop.eup %8624  ;;  %v6351_v46 = vmul.f32 1.442695, %v6318_v33 }
 0xa24   :  { %6413 = vadd.xlane.f32.xlu2 %v10545_v15  ;;  %v6038_v49 = vadd.f32 %v6037_v59, %v5949_v4 }
 0xa25   :  { %6285 = vmax.xlane.f32.xlu1 %v10542_v22  ;;  %8626 = vpow2.f32 %v6351_v46 }
 0xa28   :  { %v6126_v10 = vpop.f32.mrf.mxu2  ;;  %v6258_v45 = vpop.xlane.xlu1 %6257 }
 0xa29   :  { %v6215_v3 = vpop.f32.mrf.mxu3  ;;  %v6127_v53 = vadd.f32 %v6126_v10, %v6038_v49  ;;  %v5951_v41 = vpop.f32.mrf.mxu0  ;;  %v6319_v16 = vsub.f32 %v10460_v30, %v6258_v45 }
 0xa2a   :  { %v6040_v63 = vpop.f32.mrf.mxu1  ;;  %v5952_v42 = vadd.f32 %v10439_v6, %v5951_v41 }
 0xa2b   :  { %v10550_v44 = vadd.f32 %v6215_v3, %v6127_v53  ;;  %v10553_v17 = vpop.eup %8626  ;;  %v6353_v29 = vmul.f32 1.442695, %v6319_v16 }
 0xa2c   :  { %6415 = vadd.xlane.f32.xlu0 %v10553_v17  ;;  %v6041_v35 = vadd.f32 %v6040_v63, %v5952_v42 }
 0xa2d   :  { %6287 = vmax.xlane.f32.xlu2 %v10550_v44  ;;  %8628 = vpow2.f32 %v6353_v29 }
 0xa30   :  { %v6129_v13 = vpop.f32.mrf.mxu2  ;;  %v6260_v32 = vpop.xlane.xlu1 %6259 }
 0xa31   :  { %v6218_v34 = vpop.f32.mrf.mxu3  ;;  %v6130_v8 = vadd.f32 %v6129_v13, %v6041_v35  ;;  %v5953_v62 = vpop.f32.mrf.mxu0  ;;  %v6320_v30 = vsub.f32 %v10465_v27, %v6260_v32 }
 0xa32   :  { %v6042_v60 = vpop.f32.mrf.mxu1  ;;  %v5954_v0 = vadd.f32 %v10439_v6, %v5953_v62 }
 0xa33   :  { %v10558_v9 = vadd.f32 %v6218_v34, %v6130_v8  ;;  %v10561_v5 = vpop.eup %8628  ;;  %v6355_v2 = vmul.f32 1.442695, %v6320_v30 }
 0xa34   :  { %6417 = vadd.xlane.f32.xlu1 %v10561_v5  ;;  %v6043_v56 = vadd.f32 %v6042_v60, %v5954_v0 }
 0xa35   :  { %6289 = vmax.xlane.f32.xlu0 %v10558_v9  ;;  %8630 = vpow2.f32 %v6355_v2 }
 0xa38   :  { %v6131_v18 = vpop.f32.mrf.mxu2  ;;  %v6262_v40 = vpop.xlane.xlu2 %6261 }
 0xa39   :  { %v6220_v37 = vpop.f32.mrf.mxu3  ;;  %v6132_v1 = vadd.f32 %v6131_v18, %v6043_v56  ;;  %v5956_v36 = vpop.f32.mrf.mxu0  ;;  %v6321_v27 = vsub.f32 %v10472_v26, %v6262_v40 }
 0xa3a   :  { %v6045_v21 = vpop.f32.mrf.mxu1  ;;  %v5957_v54 = vadd.f32 %v10439_v6, %v5956_v36 }
 0xa3b   :  { %v10566_v25 = vadd.f32 %v6220_v37, %v6132_v1  ;;  %v10569_v7 = vpop.eup %8630  ;;  %v6357_v38 = vmul.f32 1.442695, %v6321_v27 }
 0xa3c   :  { %6419 = vadd.xlane.f32.xlu2 %v10569_v7  ;;  %v6046_v11 = vadd.f32 %v6045_v21, %v5957_v54 }
 0xa3d   :  { %6291 = vmax.xlane.f32.xlu1 %v10566_v25  ;;  %8632 = vpow2.f32 %v6357_v38 }
 0xa40   :  { %v6134_v12 = vpop.f32.mrf.mxu2  ;;  %v6264_v14 = vpop.xlane.xlu2 %6263 }
 0xa41   :  { %v6223_v19 = vpop.f32.mrf.mxu3  ;;  %v6135_v48 = vadd.f32 %v6134_v12, %v6046_v11  ;;  %v5958_v52 = vpop.f32.mrf.mxu0  ;;  %v6322_v26 = vsub.f32 %v10477_v28, %v6264_v14 }
 0xa42   :  { %v6047_v61 = vpop.f32.mrf.mxu1  ;;  %v5959_v39 = vadd.f32 %v10439_v6, %v5958_v52 }
 0xa43   :  { %v10574_v50 = vadd.f32 %v6223_v19, %v6135_v48  ;;  %v10577_v33 = vpop.eup %8632  ;;  %v6359_v59 = vmul.f32 1.442695, %v6322_v26 }
 0xa44   :  { %6421 = vadd.xlane.f32.xlu0 %v10577_v33  ;;  %v6048_v4 = vadd.f32 %v6047_v61, %v5959_v39 }
 0xa45   :  { %6293 = vmax.xlane.f32.xlu2 %v10574_v50  ;;  %8634 = vpow2.f32 %v6359_v59 }
 0xa48   :  { %v6136_v46 = vpop.f32.mrf.mxu2  ;;  %v6266_v3 = vpop.xlane.xlu0 %6265 }
 0xa49   :  { %v6225_v49 = vpop.f32.mrf.mxu3  ;;  %v6137_v10 = vadd.f32 %v6136_v46, %v6048_v4  ;;  %v5961_v53 = vpop.f32.mrf.mxu0  ;;  %v6323_v28 = vsub.f32 %v10484_v31, %v6266_v3 }
 0xa4a   :  { %v6050_v45 = vpop.f32.mrf.mxu1  ;;  %v5962_v16 = vadd.f32 %v10439_v6, %v5961_v53 }
 0xa4b   :  { %v10582_v41 = vadd.f32 %v6225_v49, %v6137_v10  ;;  %v10585_v63 = vpop.eup %8634  ;;  %v6361_v42 = vmul.f32 1.442695, %v6323_v28 }
 0xa4c   :  { %6423 = vadd.xlane.f32.xlu1 %v10585_v63  ;;  %v6051_v29 = vadd.f32 %v6050_v45, %v5962_v16 }
 0xa4d   :  { %6295 = vmax.xlane.f32.xlu0 %v10582_v41  ;;  %8636 = vpow2.f32 %v6361_v42 }
 0xa50   :  { %v6139_v35 = vpop.f32.mrf.mxu2  ;;  %v6268_v8 = vpop.xlane.xlu1 %6267 }
 0xa51   :  { %v6228_v13 = vpop.f32.mrf.mxu3  ;;  %v6140_v34 = vadd.f32 %v6139_v35, %v6051_v29  ;;  %v5963_v32 = vpop.f32.mrf.mxu0  ;;  %v6324_v31 = vsub.f32 %v10489_v55, %v6268_v8 }
 0xa52   :  { %v6052_v62 = vpop.f32.mrf.mxu1  ;;  %v5964_v60 = vadd.f32 %v10439_v6, %v5963_v32 }
 0xa53   :  { %v10590_v30 = vadd.f32 %v6228_v13, %v6140_v34  ;;  %v10593_v0 = vpop.eup %8636  ;;  %v6363_v2 = vmul.f32 1.442695, %v6324_v31 }
 0xa54   :  { %6425 = vadd.xlane.f32.xlu2 %v10593_v0  ;;  %v6053_v56 = vadd.f32 %v6052_v62, %v5964_v60 }
 0xa55   :  { %6297 = vmax.xlane.f32.xlu1 %v10590_v30  ;;  %8638 = vpow2.f32 %v6363_v2 }
 0xa58   :  { %v6141_v18 = vpop.f32.mrf.mxu2  ;;  %v6270_v40 = vpop.xlane.xlu2 %6269 }
 0xa59   :  { %v6230_v37 = vpop.f32.mrf.mxu3  ;;  %v6142_v1 = vadd.f32 %v6141_v18, %v6053_v56  ;;  %v5966_v36 = vpop.f32.mrf.mxu0  ;;  %v6325_v55 = vsub.f32 %v10496_v57, %v6270_v40 }
 0xa5a   :  { %v6055_v27 = vpop.f32.mrf.mxu1  ;;  %v5967_v54 = vadd.f32 %v10439_v6, %v5966_v36 }
 0xa5b   :  { %v10598_v21 = vadd.f32 %v6230_v37, %v6142_v1  ;;  %v10601_v38 = vpop.eup %8638  ;;  %v6365_v11 = vmul.f32 1.442695, %v6325_v55 }
 0xa5c   :  { %6427 = vadd.xlane.f32.xlu0 %v10601_v38  ;;  %v6056_v12 = vadd.f32 %v6055_v27, %v5967_v54 }
 0xa5d   :  { %6299 = vmax.xlane.f32.xlu2 %v10598_v21  ;;  %8640 = vpow2.f32 %v6365_v11 }
 0xa60   :  { %v6144_v19 = vpop.f32.mrf.mxu2  ;;  %v6272_v52 = vpop.xlane.xlu0 %6271 }
 0xa61   :  { %v6233_v48 = vpop.f32.mrf.mxu3  ;;  %v6145_v14 = vadd.f32 %v6144_v19, %v6056_v12  ;;  %v5968_v26 = vpop.f32.mrf.mxu0  ;;  %v6326_v57 = vsub.f32 %v10500_v20, %v6272_v52 }
 0xa62   :  { %v6057_v61 = vpop.f32.mrf.mxu1  ;;  %v5969_v59 = vadd.f32 %v10439_v6, %v5968_v26 }
 0xa63   :  { %v10606_v39 = vadd.f32 %v6233_v48, %v6145_v14  ;;  %v10609_v4 = vpop.eup %8640  ;;  %v6367_v46 = vmul.f32 1.442695, %v6326_v57 }
 0xa64   :  { %6429 = vadd.xlane.f32.xlu1 %v10609_v4  ;;  %v6058_v49 = vadd.f32 %v6057_v61, %v5969_v59 }
 0xa65   :  { %6301 = vmax.xlane.f32.xlu0 %v10606_v39  ;;  %8642 = vpow2.f32 %v6367_v46 }
 0xa68   :  { %v6146_v10 = vpop.f32.mrf.mxu2  ;;  %v6274_v28 = vpop.xlane.xlu1 %6273 }
 0xa69   :  { %v6235_v3 = vpop.f32.mrf.mxu3  ;;  %v6147_v53 = vadd.f32 %v6146_v10, %v6058_v49  ;;  %v5971_v45 = vpop.f32.mrf.mxu0  ;;  %v6327_v20 = vsub.f32 %v10508_v43, %v6274_v28 }
 0xa6a   :  { %v6060_v16 = vpop.f32.mrf.mxu1  ;;  %v5972_v29 = vadd.f32 %v10439_v6, %v5971_v45 }
 0xa6b   :  { %v10614_v42 = vadd.f32 %v6235_v3, %v6147_v53  ;;  %v10617_v35 = vpop.eup %8642  ;;  %v6369_v13 = vmul.f32 1.442695, %v6327_v20 }
 0xa6c   :  { %6431 = vadd.xlane.f32.xlu2 %v10617_v35  ;;  %v6061_v34 = vadd.f32 %v6060_v16, %v5972_v29 }
 0xa6d   :  { %6303 = vmax.xlane.f32.xlu1 %v10614_v42  ;;  %8644 = vpow2.f32 %v6369_v13 }
 0xa70   :  { %v6149_v8 = vpop.f32.mrf.mxu2  ;;  %v6276_v46 = vpop.xlane.xlu2 %6275 }
 0xa71   :  { %v6238_v32 = vpop.f32.mrf.mxu3  ;;  %v6150_v31 = vadd.f32 %v6149_v8, %v6061_v34  ;;  %v5973_v62 = vpop.f32.mrf.mxu0 }
 0xa72   :  { %v6062_v60 = vpop.f32.mrf.mxu1  ;;  %v5974_v2 = vadd.f32 %v10439_v6, %v5973_v62 }
 0xa73   :  { %v10621_v43 = vadd.f32 %v6238_v32, %v6150_v31  ;;  %v10624_v56 = vpop.eup %8644 }
 0xa74   :  { %6433 = vadd.xlane.f32.xlu0 %v10624_v56  ;;  %v6063_v18 = vadd.f32 %v6062_v60, %v5974_v2 }
 0xa75   :  { %6305 = vmax.xlane.f32.xlu2 %v10621_v43 }
 0xa78   :  { %v6151_v37 = vpop.f32.mrf.mxu2  ;;  %v6278_v52 = vpop.xlane.xlu0 %6277 }
 0xa79   :  { %v6240_v1 = vpop.f32.mrf.mxu3  ;;  %v6152_v40 = vadd.f32 %v6151_v37, %v6063_v18  ;;  %v5976_v36 = vpop.f32.mrf.mxu0  ;;  %v6329_v59 = vsub.f32 %v10520_v23, %v6278_v52 }
 0xa7a   :  { %v6065_v55 = vpop.f32.mrf.mxu1  ;;  %v5977_v54 = vadd.f32 %v10439_v6, %v5976_v36 }
 0xa7b   :  { %v10628_v27 = vadd.f32 %v6240_v1, %v6152_v40  ;;  %v6373_v45 = vmul.f32 1.442695, %v6329_v59 }
 0xa7c   :  { %v6066_v11 = vadd.f32 %v6065_v55, %v5977_v54  ;;  %v6328_v55 = vsub.f32 %v10512_v47, %v6276_v46 }
 0xa7d   :  { %6307 = vmax.xlane.f32.xlu0 %v10628_v27  ;;  %8646 = vpow2.f32 %v6373_v45 }
 0xa80   :  { %v6154_v12 = vpop.f32.mrf.mxu2  ;;  %v6280_v20 = vpop.xlane.xlu1 %6279 }
 0xa81   :  { %v6243_v19 = vpop.f32.mrf.mxu3  ;;  %v6155_v48 = vadd.f32 %v6154_v12, %v6066_v11  ;;  %v5978_v14 = vpop.f32.mrf.mxu0  ;;  %v6330_v13 = vsub.f32 %v10524_v58, %v6280_v20 }
 0xa82   :  { %v5979_v57 = vadd.f32 %v10439_v6, %v5978_v14  ;;  %v6067_v61 = vpop.f32.mrf.mxu1 }
 0xa83   :  { %v10632_v26 = vadd.f32 %v6243_v19, %v6155_v48  ;;  %v6375_v62 = vmul.f32 1.442695, %v6330_v13  ;;  %v10645_v40 = vpop.eup %8646 }
 0xa84   :  { %v6068_v49 = vadd.f32 %v6067_v61, %v5979_v57 }
 0xa85   :  { %6309 = vmax.xlane.f32.xlu1 %v10632_v26  ;;  %8648 = vpow2.f32 %v6375_v62 }
 0xa88   :  { %v6156_v10 = vpop.f32.mrf.mxu2  ;;  %v6282_v8 = vpop.xlane.xlu2 %6281 }
 0xa89   :  { %v6245_v3 = vpop.f32.mrf.mxu3  ;;  %v6157_v53 = vadd.f32 %v6156_v10, %v6068_v49  ;;  %v5981_v28 = vpop.f32.mrf.mxu0 }
 0xa8a   :  { %v5982_v29 = vadd.f32 %v10439_v6, %v5981_v28  ;;  %v6070_v34 = vpop.f32.mrf.mxu1 }
 0xa8b   :  { %v10637_v16 = vadd.f32 %v6245_v3, %v6157_v53  ;;  %v10652_v52 = vpop.eup %8648 }
 0xa8c   :  { %v6071_v23 = vadd.f32 %v6070_v34, %v5982_v29 }
 0xa8d   :  { %6311 = vmax.xlane.f32.xlu2 %v10637_v16 }
 0xa90   :  { %v6159_v32 = vpop.f32.mrf.mxu2  ;;  %v6284_v2 = vpop.xlane.xlu0 %6283 }
 0xa91   :  { %v6248_v31 = vpop.f32.mrf.mxu3  ;;  %v6160_v60 = vadd.f32 %v6159_v32, %v6071_v23  ;;  %v5983_v18 = vpop.f32.mrf.mxu0  ;;  %v6332_v37 = vsub.f32 %v10537_v51, %v6284_v2 }
 0xa92   :  { %v5984_v58 = vadd.f32 %v10439_v6, %v5983_v18  ;;  %v6072_v54 = vpop.f32.mrf.mxu1  ;;  %v6371_v6 = vmul.f32 1.442695, %v6328_v55 }
 0xa93   :  { %v10643_v1 = vadd.f32 %v6248_v31, %v6160_v60  ;;  %v6379_v36 = vmul.f32 1.442695, %v6332_v37 }
 0xa94   :  { %v6073_v11 = vadd.f32 %v6072_v54, %v5984_v58 }
 0xa95   :  { %6313 = vmax.xlane.f32.xlu0 %v10643_v1  ;;  %6437 = vadd.xlane.f32.xlu2 %v10645_v40  ;;  %8650 = vpow2.f32 %v6379_v36 }
 0xa97   :  { %v6414_v12 = vpop.xlane.xlu2 %6413 }
 0xa98   :  { %v6161_v19 = vpop.f32.mrf.mxu2  ;;  %8652 = vrcp.f32 %v6414_v12  ;;  %v6286_v51 = vpop.xlane.xlu1 %6285  ;;  %v6488_v28 = vand.u32 2147483648, %v6414_v12  ;;  %v6486_v29 = vand.u32 2147483647, %v6414_v12  ;;  %vm6482_vm3 = vweird.f32 %v6414_v12 }
 0xa99   :  { %v6162_v48 = vadd.f32 %v6161_v19, %v6073_v11  ;;  %v6333_v14 = vsub.f32 %v10542_v22, %v6286_v51  ;;  %v6250_v57 = vpop.f32.mrf.mxu3  ;;  %v6331_v22 = vsub.f32 %v10532_v24, %v6282_v8 }
 0xa9a   :  { %v6489_v8 = vor.u32 1.1754944e-38, %v6488_v28  ;;  %vm6487_vm5 = vcmp.eq.f32.partialorder %v6486_v29, 8.507059e+37 }
 0xa9b   :  { %v10654_v61 = vpop.eup %8650  ;;  %v10656_v59 = vadd.f32 %v6250_v57, %v6162_v48  ;;  %v6381_v49 = vmul.f32 1.442695, %v6333_v14  ;;  %v6377_v53 = vmul.f32 1.442695, %v6331_v22 }
 0xa9d   :  { %6439 = vadd.xlane.f32.xlu0 %v10652_v52  ;;  %6443 = vadd.xlane.f32.xlu2 %v10654_v61  ;;  %8654 = vpow2.f32 %v6381_v49 }
 0xa9e   :  { %6315 = vmax.xlane.f32.xlu1 %v10656_v59  ;;  %v8653_v47 = vpop.eup %8652  ;;  %8656 = vpow2.f32 %v6371_v6 }
 0xa9f   :  { %v6478_v46 = vmul.f32 %v8653_v47, %v6414_v12  ;;  %v6416_v10 = vpop.xlane.xlu0 %6415  ;;  %vm6483_vm2 = vweird.f32 %v8653_v47 }
 0xaa0   :  { %8658 = vrcp.f32 %v6416_v10  ;;  %v6288_v13 = vpop.xlane.xlu2 %6287  ;;  %vm6484_vm4 = vmor %vm6482_vm3, %vm6483_vm2  ;;  %v6503_v55 = vand.u32 2147483648, %v6416_v10  ;;  %v6501_v12 = vand.u32 2147483647, %v6416_v10  ;;  %vm6497_vm7 = vweird.f32 %v6416_v10 }
 0xaa1   :  { %v6479_v3 = vsub.f32 1.0, %v6478_v46  ;;  %8660 = vpow2.f32 %v6377_v53  ;;  %v6334_v32 = vsub.f32 %v10550_v44, %v6288_v13 }
 0xaa2   :  { %vm6502_vm9 = vcmp.eq.f32.partialorder %v6501_v12, 8.507059e+37 }
 0xaa3   :  { %v10662_v45 = vpop.eup %8654  ;;  %v6480_v20 = vmul.f32 %v8653_v47, %v6479_v3  ;;  %v6383_v54 = vmul.f32 1.442695, %v6334_v32 }
 0xaa4   :  { %v10664_v34 = vpop.eup %8656 }
 0xaa5   :  { %6445 = vadd.xlane.f32.xlu0 %v10662_v45  ;;  %v6481_v23 = vadd.f32 %v8653_v47, %v6480_v20 }
 0xaa6   :  { %6435 = vadd.xlane.f32.xlu1 %v10664_v34  ;;  %v8659_v24 = vpop.eup %8658 }
 0xaa7   :  { %v6485_v31 = vsel %vm6484_vm4, %v8653_v47, %v6481_v23  ;;  %v6493_v62 = vmul.f32 %v8659_v24, %v6416_v10  ;;  %v6418_v60 = vpop.xlane.xlu1 %6417  ;;  %vm6498_vm6 = vweird.f32 %v8659_v24  ;;  %v10671_v44 = vpop.eup %8660 }
 0xaa8   :  { %v6290_v2 = vpop.xlane.xlu0 %6289  ;;  %v6490_v18 = vsel %vm6487_vm5, %v6489_v8, %v6485_v31  ;;  %8662 = vrcp.f32 %v6418_v60  ;;  %vm6499_vm8 = vmor %vm6497_vm7, %vm6498_vm6  ;;  %v6518_v10 = vand.u32 2147483648, %v6418_v60  ;;  %v6516_v28 = vand.u32 2147483647, %v6418_v60 }
 0xaa9   :  { %v6491_v37 = vmul.f32 %v10545_v15, %v6490_v18  ;;  %v6494_v36 = vsub.f32 1.0, %v6493_v62  ;;  %v6335_v58 = vsub.f32 %v10558_v9, %v6290_v2  ;;  %v6504_v15 = vor.u32 1.1754944e-38, %v6503_v55 }
 0xaaa   :  { %vm6512_vm11 = vweird.f32 %v6418_v60  ;;  %vm6517_vm13 = vcmp.eq.f32.partialorder %v6516_v28, 8.507059e+37 }
 0xaab   :  { %6957 = vst [vmem:[#allocation8] sm:$0xff] %v6491_v37  ;;  %v6495_v11 = vmul.f32 %v8659_v24, %v6494_v36  ;;  %v6385_v19 = vmul.f32 1.442695, %v6335_v58 }
 0xaad   :  { %v6496_v51 = vadd.f32 %v8659_v24, %v6495_v11  ;;  %8664 = vpow2.f32 %v6385_v19 }
 0xaae   :  { %6441 = vadd.xlane.f32.xlu1 %v10671_v44  ;;  %v8663_v48 = vpop.eup %8662  ;;  %8666 = vpow2.f32 %v6383_v54 }
 0xaaf   :  { %v6500_v14 = vsel %vm6499_vm8, %v8659_v24, %v6496_v51  ;;  %v6508_v9 = vmul.f32 %v8663_v48, %v6418_v60  ;;  %v6420_v6 = vpop.xlane.xlu2 %6419  ;;  %vm6513_vm10 = vweird.f32 %v8663_v48 }
 0xab0   :  { %v6292_v57 = vpop.xlane.xlu1 %6291  ;;  %v6505_v49 = vsel %vm6502_vm9, %v6504_v15, %v6500_v14  ;;  %8668 = vrcp.f32 %v6420_v6  ;;  %vm6514_vm12 = vmor %vm6512_vm11, %vm6513_vm10  ;;  %v6533_v37 = vand.u32 2147483648, %v6420_v6  ;;  %v6531_v58 = vand.u32 2147483647, %v6420_v6 }
 0xab1   :  { %v6506_v47 = vmul.f32 %v10553_v17, %v6505_v49  ;;  %v6509_v22 = vsub.f32 1.0, %v6508_v9  ;;  %v6336_v46 = vsub.f32 %v10566_v25, %v6292_v57  ;;  %v6519_v25 = vor.u32 1.1754944e-38, %v6518_v10 }
 0xab2   :  { %vm6527_vm15 = vweird.f32 %v6420_v6  ;;  %v6534_v12 = vor.u32 1.1754944e-38, %v6533_v37  ;;  %vm6532_vm1 = vcmp.eq.f32.partialorder %v6531_v58, 8.507059e+37 }
 0xab3   :  { %v10676_v3 = vpop.eup %8664  ;;  %6958 = vst [vmem:[#allocation8 + $0x8] sm:$0xff] %v6506_v47  ;;  %v6510_v53 = vmul.f32 %v8663_v48, %v6509_v22  ;;  %v6387_v20 = vmul.f32 1.442695, %v6336_v46 }
 0xab4   :  { %v10678_v29 = vpop.eup %8666  ;;  %6449 = vadd.xlane.f32.xlu2 %v10676_v3 }
 0xab5   :  { %v6511_v13 = vadd.f32 %v8663_v48, %v6510_v53  ;;  %8670 = vpow2.f32 %v6387_v20 }
 0xab6   :  { %6447 = vadd.xlane.f32.xlu1 %v10678_v29  ;;  %v8669_v17 = vpop.eup %8668 }
 0xab7   :  { %v6515_v23 = vsel %vm6514_vm12, %v8663_v48, %v6511_v13  ;;  %v6523_v24 = vmul.f32 %v8669_v17, %v6420_v6  ;;  %v6422_v8 = vpop.xlane.xlu0 %6421  ;;  %vm6528_vm14 = vweird.f32 %v8669_v17 }
 0xab8   :  { %v6294_v32 = vpop.xlane.xlu2 %6293  ;;  %v6520_v31 = vsel %vm6517_vm13, %v6519_v25, %v6515_v23  ;;  %8672 = vrcp.f32 %v6422_v8  ;;  %vm6529_vm0 = vmor %vm6527_vm15, %vm6528_vm14  ;;  %v6548_v57 = vand.u32 2147483648, %v6422_v8  ;;  %v6546_v47 = vand.u32 2147483647, %v6422_v8 }
 0xab9   :  { %v6521_v62 = vmul.f32 %v10561_v5, %v6520_v31  ;;  %v6524_v2 = vsub.f32 1.0, %v6523_v24  ;;  %v6337_v18 = vsub.f32 %v10574_v50, %v6294_v32  ;;  %vm6542_vm3 = vweird.f32 %v6422_v8 }
 0xaba   :  { %v6549_v53 = vor.u32 1.1754944e-38, %v6548_v57  ;;  %vm6547_vm5 = vcmp.eq.f32.partialorder %v6546_v47, 8.507059e+37 }
 0xabb   :  { %v10684_v60 = vpop.eup %8670  ;;  %6959 = vst [vmem:[#allocation8 + $0x10] sm:$0xff] %v6521_v62  ;;  %v6525_v36 = vmul.f32 %v8669_v17, %v6524_v2  ;;  %v6389_v55 = vmul.f32 1.442695, %v6337_v18 }
 0xabc   :  { %6451 = vadd.xlane.f32.xlu0 %v10684_v60 }
 0xabd   :  { %v6526_v54 = vadd.f32 %v8669_v17, %v6525_v36  ;;  %8674 = vpow2.f32 %v6389_v55 }
 0xabe   :  { %v8673_v11 = vpop.eup %8672 }
 0xabf   :  { %v6530_v5 = vsel %vm6529_vm0, %v8669_v17, %v6526_v54  ;;  %v6538_v19 = vmul.f32 %v8673_v11, %v6422_v8  ;;  %v6424_v50 = vpop.xlane.xlu1 %6423  ;;  %vm6543_vm2 = vweird.f32 %v8673_v11 }
 0xac0   :  { %v6296_v51 = vpop.xlane.xlu0 %6295  ;;  %v6535_v48 = vsel %vm6532_vm1, %v6534_v12, %v6530_v5  ;;  %8676 = vrcp.f32 %v6424_v50  ;;  %vm6544_vm4 = vmor %vm6542_vm3, %vm6543_vm2  ;;  %v6563_v24 = vand.u32 2147483648, %v6424_v50  ;;  %v6561_v31 = vand.u32 2147483647, %v6424_v50 }
 0xac1   :  { %v6536_v15 = vmul.f32 %v10569_v7, %v6535_v48  ;;  %v6539_v14 = vsub.f32 1.0, %v6538_v19  ;;  %v6338_v9 = vsub.f32 %v10582_v41, %v6296_v51  ;;  %vm6557_vm7 = vweird.f32 %v6424_v50 }
 0xac2   :  { %v6564_v37 = vor.u32 1.1754944e-38, %v6563_v24  ;;  %vm6562_vm9 = vcmp.eq.f32.partialorder %v6561_v31, 8.507059e+37 }
 0xac3   :  { %v10689_v49 = vpop.eup %8674  ;;  %6960 = vst [vmem:[#allocation8 + $0x18] sm:$0xff] %v6536_v15  ;;  %v6540_v6 = vmul.f32 %v8673_v11, %v6539_v14  ;;  %v6391_v22 = vmul.f32 1.442695, %v6338_v9 }
 0xac4   :  { %6453 = vadd.xlane.f32.xlu1 %v10689_v49 }
 0xac5   :  { %v6541_v46 = vadd.f32 %v8673_v11, %v6540_v6  ;;  %8678 = vpow2.f32 %v6391_v22 }
 0xac6   :  { %v8677_v10 = vpop.eup %8676 }
 0xac7   :  { %v6545_v7 = vsel %vm6544_vm4, %v8673_v11, %v6541_v46  ;;  %v6553_v28 = vmul.f32 %v8677_v10, %v6424_v50  ;;  %v6426_v41 = vpop.xlane.xlu2 %6425  ;;  %vm6558_vm6 = vweird.f32 %v8677_v10 }
 0xac8   :  { %v6298_v20 = vpop.xlane.xlu1 %6297  ;;  %v6550_v13 = vsel %vm6547_vm5, %v6549_v53, %v6545_v7  ;;  %8680 = vrcp.f32 %v6426_v41  ;;  %vm6559_vm8 = vmor %vm6557_vm7, %vm6558_vm6  ;;  %v6578_v5 = vand.u32 2147483648, %v6426_v41  ;;  %v6576_v51 = vand.u32 2147483647, %v6426_v41 }
 0xac9   :  { %v6551_v17 = vmul.f32 %v10577_v33, %v6550_v13  ;;  %v6554_v25 = vsub.f32 1.0, %v6553_v28  ;;  %v6339_v23 = vsub.f32 %v10590_v30, %v6298_v20  ;;  %vm6572_vm11 = vweird.f32 %v6426_v41 }
 0xaca   :  { %v6579_v9 = vor.u32 1.1754944e-38, %v6578_v5  ;;  %vm6577_vm13 = vcmp.eq.f32.partialorder %v6576_v51, 8.507059e+37 }
 0xacb   :  { %v10694_v32 = vpop.eup %8678  ;;  %6961 = vst [vmem:[#allocation8 + $0x20] sm:$0xff] %v6551_v17  ;;  %v6555_v8 = vmul.f32 %v8677_v10, %v6554_v25  ;;  %v6393_v62 = vmul.f32 1.442695, %v6339_v23 }
 0xacc   :  { %6455 = vadd.xlane.f32.xlu2 %v10694_v32 }
 0xacd   :  { %v6556_v2 = vadd.f32 %v8677_v10, %v6555_v8  ;;  %8682 = vpow2.f32 %v6393_v62 }
 0xace   :  { %v8681_v18 = vpop.eup %8680 }
 0xacf   :  { %v6560_v33 = vsel %vm6559_vm8, %v8677_v10, %v6556_v2  ;;  %v6568_v36 = vmul.f32 %v8681_v18, %v6426_v41  ;;  %v6428_v30 = vpop.xlane.xlu0 %6427  ;;  %vm6573_vm10 = vweird.f32 %v8681_v18 }
 0xad0   :  { %v6300_v58 = vpop.xlane.xlu2 %6299  ;;  %v6565_v55 = vsel %vm6562_vm9, %v6564_v37, %v6560_v33  ;;  %8684 = vrcp.f32 %v6428_v30  ;;  %vm6574_vm12 = vmor %vm6572_vm11, %vm6573_vm10  ;;  %v6593_v53 = vand.u32 2147483648, %v6428_v30  ;;  %v6591_v41 = vand.u32 2147483647, %v6428_v30 }
 0xad1   :  { %v6566_v54 = vmul.f32 %v10585_v63, %v6565_v55  ;;  %v6569_v11 = vsub.f32 1.0, %v6568_v36  ;;  %v6340_v12 = vsub.f32 %v10598_v21, %v6300_v58  ;;  %vm6587_vm15 = vweird.f32 %v6428_v30 }
 0xad2   :  { %v6594_v25 = vor.u32 1.1754944e-38, %v6593_v53  ;;  %vm6592_vm1 = vcmp.eq.f32.partialorder %v6591_v41, 8.507059e+37 }
 0xad3   :  { %v10699_v19 = vpop.eup %8682  ;;  %6962 = vst [vmem:[#allocation8 + $0x28] sm:$0xff] %v6566_v54  ;;  %v6570_v50 = vmul.f32 %v8681_v18, %v6569_v11  ;;  %v6395_v48 = vmul.f32 1.442695, %v6340_v12 }
 0xad4   :  { %6457 = vadd.xlane.f32.xlu0 %v10699_v19 }
 0xad5   :  { %v6571_v15 = vadd.f32 %v8681_v18, %v6570_v50  ;;  %8686 = vpow2.f32 %v6395_v48 }
 0xad6   :  { %v8685_v14 = vpop.eup %8684 }
 0xad7   :  { %v6575_v63 = vsel %vm6574_vm12, %v8681_v18, %v6571_v15  ;;  %v6583_v57 = vmul.f32 %v8685_v14, %v6428_v30  ;;  %v6430_v21 = vpop.xlane.xlu1 %6429  ;;  %vm6588_vm14 = vweird.f32 %v8685_v14 }
 0xad8   :  { %v6302_v6 = vpop.xlane.xlu0 %6301  ;;  %v6580_v47 = vsel %vm6577_vm13, %v6579_v9, %v6575_v63  ;;  %8688 = vrcp.f32 %v6430_v21  ;;  %vm6589_vm0 = vmor %vm6587_vm15, %vm6588_vm14  ;;  %v6608_v18 = vand.u32 2147483648, %v6430_v21  ;;  %v6606_v36 = vand.u32 2147483647, %v6430_v21 }
 0xad9   :  { %v6581_v22 = vmul.f32 %v10593_v0, %v6580_v47  ;;  %v6584_v46 = vsub.f32 1.0, %v6583_v57  ;;  %v6341_v10 = vsub.f32 %v10606_v39, %v6302_v6  ;;  %vm6602_vm3 = vweird.f32 %v6430_v21 }
 0xada   :  { %v6609_v54 = vor.u32 1.1754944e-38, %v6608_v18  ;;  %vm6607_vm5 = vcmp.eq.f32.partialorder %v6606_v36, 8.507059e+37 }
 0xadb   :  { %v10704_v7 = vpop.eup %8686  ;;  %6963 = vst [vmem:[#allocation8 + $0x30] sm:$0xff] %v6581_v22  ;;  %v6585_v28 = vmul.f32 %v8685_v14, %v6584_v46  ;;  %v6397_v20 = vmul.f32 1.442695, %v6341_v10 }
 0xadc   :  { %6459 = vadd.xlane.f32.xlu1 %v10704_v7 }
 0xadd   :  { %v6586_v13 = vadd.f32 %v8685_v14, %v6585_v28  ;;  %8690 = vpow2.f32 %v6397_v20 }
 0xade   :  { %v8689_v17 = vpop.eup %8688 }
 0xadf   :  { %v6590_v0 = vsel %vm6589_vm0, %v8685_v14, %v6586_v13  ;;  %v6598_v23 = vmul.f32 %v8689_v17, %v6430_v21  ;;  %v6432_v39 = vpop.xlane.xlu2 %6431  ;;  %vm6603_vm2 = vweird.f32 %v8689_v17 }
 0xae0   :  { %v6304_v24 = vpop.xlane.xlu1 %6303  ;;  %v6595_v8 = vsel %vm6592_vm1, %v6594_v25, %v6590_v0  ;;  %8692 = vrcp.f32 %v6432_v39  ;;  %vm6604_vm4 = vmor %vm6602_vm3, %vm6603_vm2  ;;  %v6623_v15 = vand.u32 2147483648, %v6432_v39  ;;  %v6621_v63 = vand.u32 2147483647, %v6432_v39 }
 0xae1   :  { %v6596_v31 = vmul.f32 %v10601_v38, %v6595_v8  ;;  %v6599_v62 = vsub.f32 1.0, %v6598_v23  ;;  %v6342_v2 = vsub.f32 %v10614_v42, %v6304_v24  ;;  %vm6617_vm7 = vweird.f32 %v6432_v39 }
 0xae2   :  { %v6624_v47 = vor.u32 1.1754944e-38, %v6623_v15  ;;  %vm6622_vm9 = vcmp.eq.f32.partialorder %v6621_v63, 8.507059e+37 }
 0xae3   :  { %v10709_v37 = vpop.eup %8690  ;;  %6964 = vst [vmem:[#allocation8 + $0x38] sm:$0xff] %v6596_v31  ;;  %v6600_v33 = vmul.f32 %v8689_v17, %v6599_v62  ;;  %v6399_v30 = vmul.f32 1.442695, %v6342_v2 }
 0xae4   :  { %6461 = vadd.xlane.f32.xlu2 %v10709_v37 }
 0xae5   :  { %v6601_v58 = vadd.f32 %v8689_v17, %v6600_v33  ;;  %8694 = vpow2.f32 %v6399_v30 }
 0xae6   :  { %v8693_v55 = vpop.eup %8692 }
 0xae7   :  { %v6605_v38 = vsel %vm6604_vm4, %v8689_v17, %v6601_v58  ;;  %v6613_v11 = vmul.f32 %v8693_v55, %v6432_v39  ;;  %v6434_v42 = vpop.xlane.xlu0 %6433  ;;  %vm6618_vm6 = vweird.f32 %v8693_v55 }
 0xae8   :  { %v6306_v12 = vpop.xlane.xlu2 %6305  ;;  %v6610_v5 = vsel %vm6607_vm5, %v6609_v54, %v6605_v38  ;;  %8696 = vrcp.f32 %v6434_v42  ;;  %vm6619_vm8 = vmor %vm6617_vm7, %vm6618_vm6  ;;  %v6638_v41 = vand.u32 2147483648, %v6434_v42  ;;  %v6636_v25 = vand.u32 2147483647, %v6434_v42 }
 0xae9   :  { %v6611_v50 = vmul.f32 %v10609_v4, %v6610_v5  ;;  %v6614_v51 = vsub.f32 1.0, %v6613_v11  ;;  %v6343_v48 = vsub.f32 %v10621_v43, %v6306_v12  ;;  %vm6632_vm11 = vweird.f32 %v6434_v42 }
 0xaea   :  { %v6639_v23 = vor.u32 1.1754944e-38, %v6638_v41  ;;  %vm6637_vm13 = vcmp.eq.f32.partialorder %v6636_v25, 8.507059e+37 }
 0xaeb   :  { %v10714_v14 = vpop.eup %8694  ;;  %6965 = vst [vmem:[#allocation8 + $0x40] sm:$0xff] %v6611_v50  ;;  %v6615_v9 = vmul.f32 %v8693_v55, %v6614_v51  ;;  %v6401_v57 = vmul.f32 1.442695, %v6343_v48 }
 0xaec   :  { %6463 = vadd.xlane.f32.xlu0 %v10714_v14 }
 0xaed   :  { %v6616_v21 = vadd.f32 %v8693_v55, %v6615_v9  ;;  %8698 = vpow2.f32 %v6401_v57 }
 0xaee   :  { %v8697_v6 = vpop.eup %8696 }
 0xaef   :  { %v6620_v4 = vsel %vm6619_vm8, %v8693_v55, %v6616_v21  ;;  %v6628_v22 = vmul.f32 %v8697_v6, %v6434_v42  ;;  %vm6633_vm10 = vweird.f32 %v8697_v6 }
 0xaf0   :  { %v6308_v43 = vpop.xlane.xlu0 %6307  ;;  %v6625_v46 = vsel %vm6622_vm9, %v6624_v47, %v6620_v4  ;;  %vm6634_vm12 = vmor %vm6632_vm11, %vm6633_vm10 }
 0xaf1   :  { %v6344_v10 = vsub.f32 %v10628_v27, %v6308_v43  ;;  %v6626_v53 = vmul.f32 %v10617_v35, %v6625_v46  ;;  %v6629_v28 = vsub.f32 1.0, %v6628_v22 }
 0xaf3   :  { %v6403_v20 = vmul.f32 1.442695, %v6344_v10  ;;  %v10719_v13 = vpop.eup %8698  ;;  %6966 = vst [vmem:[#allocation8 + $0x48] sm:$0xff] %v6626_v53  ;;  %v6630_v17 = vmul.f32 %v8697_v6, %v6629_v28 }
 0xaf4   :  { %6465 = vadd.xlane.f32.xlu1 %v10719_v13 }
 0xaf5   :  { %8700 = vpow2.f32 %v6403_v20  ;;  %v6631_v0 = vadd.f32 %v8697_v6, %v6630_v17 }
 0xaf7   :  { %v6635_v39 = vsel %vm6634_vm12, %v8697_v6, %v6631_v0 }
 0xaf8   :  { %v6310_v27 = vpop.xlane.xlu1 %6309  ;;  %v6640_v35 = vsel %vm6637_vm13, %v6639_v23, %v6635_v39 }
 0xaf9   :  { %v6345_v24 = vsub.f32 %v10632_v26, %v6310_v27  ;;  %v6641_v8 = vmul.f32 %v10624_v56, %v6640_v35 }
 0xafb   :  { %v10724_v31 = vpop.eup %8700  ;;  %v6405_v62 = vmul.f32 1.442695, %v6345_v24  ;;  %6967 = vst [vmem:[#allocation8 + $0x50] sm:$0xff] %v6641_v8 }
 0xafc   :  { %6467 = vadd.xlane.f32.xlu2 %v10724_v31 }
 0xafd   :  { %8702 = vpow2.f32 %v6405_v62 }
 0xb00   :  { %v6312_v2 = vpop.xlane.xlu2 %6311 }
 0xb01   :  { %v6346_v18 = vsub.f32 %v10637_v16, %v6312_v2 }
 0xb03   :  { %v10728_v33 = vpop.eup %8702  ;;  %v6407_v36 = vmul.f32 1.442695, %v6346_v18 }
 0xb04   :  { %6469 = vadd.xlane.f32.xlu0 %v10728_v33 }
 0xb05   :  { %8704 = vpow2.f32 %v6407_v36 }
 0xb08   :  { %v6438_v30 = vpop.xlane.xlu2 %6437  ;;  %v6314_v26 = vpop.xlane.xlu0 %6313 }
 0xb09   :  { %8706 = vrcp.f32 %v6438_v30  ;;  %v6347_v56 = vsub.f32 %v10643_v1, %v6314_v26  ;;  %v6668_v50 = vand.u32 2147483648, %v6438_v30  ;;  %v6666_v48 = vand.u32 2147483647, %v6438_v30 }
 0xb0a   :  { %vm6662_vm15 = vweird.f32 %v6438_v30 }
 0xb0b   :  { %v10732_v58 = vpop.eup %8704  ;;  %v6409_v55 = vmul.f32 1.442695, %v6347_v56  ;;  %v6669_v57 = vor.u32 1.1754944e-38, %v6668_v50  ;;  %vm6667_vm1 = vcmp.eq.f32.partialorder %v6666_v48, 8.507059e+37 }
 0xb0c   :  { %6471 = vadd.xlane.f32.xlu1 %v10732_v58 }
 0xb0d   :  { %8708 = vpow2.f32 %v6409_v55 }
 0xb0f   :  { %v8707_v54 = vpop.eup %8706 }
 0xb10   :  { %v6658_v38 = vmul.f32 %v8707_v54, %v6438_v30  ;;  %v6444_v16 = vpop.xlane.xlu2 %6443  ;;  %v6440_v11 = vpop.xlane.xlu0 %6439  ;;  %vm6663_vm14 = vweird.f32 %v8707_v54 }
 0xb11   :  { %v6316_v42 = vpop.xlane.xlu1 %6315  ;;  %8710 = vrcp.f32 %v6444_v16  ;;  %vm6664_vm0 = vmor %vm6662_vm15, %vm6663_vm14  ;;  %v6713_v53 = vand.u32 2147483648, %v6444_v16  ;;  %v6711_v17 = vand.u32 2147483647, %v6444_v16  ;;  %v6683_v25 = vand.u32 2147483648, %v6440_v11 }
 0xb12   :  { %v6659_v12 = vsub.f32 1.0, %v6658_v38  ;;  %v6348_v5 = vsub.f32 %v10656_v59, %v6316_v42  ;;  %8712 = vrcp.f32 %v6440_v11  ;;  %v6681_v23 = vand.u32 2147483647, %v6440_v11 }
 0xb13   :  { %v10736_v51 = vpop.eup %8708  ;;  %vm6707_vm4 = vweird.f32 %v6444_v16  ;;  %v6714_v27 = vor.u32 1.1754944e-38, %v6713_v53  ;;  %vm6677_vm6 = vweird.f32 %v6440_v11  ;;  %vm6712_vm7 = vcmp.eq.f32.partialorder %v6711_v17, 8.507059e+37 }
 0xb14   :  { %v6660_v1 = vmul.f32 %v8707_v54, %v6659_v12  ;;  %v6411_v15 = vmul.f32 1.442695, %v6348_v5  ;;  %6473 = vadd.xlane.f32.xlu2 %v10736_v51  ;;  %v6684_v62 = vor.u32 1.1754944e-38, %v6683_v25  ;;  %vm6682_vm9 = vcmp.eq.f32.partialorder %v6681_v23, 8.507059e+37 }
 0xb16   :  { %v6661_v9 = vadd.f32 %v8707_v54, %v6660_v1  ;;  %8714 = vpow2.f32 %v6411_v15 }
 0xb17   :  { %v8711_v63 = vpop.eup %8710 }
 0xb18   :  { %v8713_v21 = vpop.eup %8712  ;;  %v6665_v6 = vsel %vm6664_vm0, %v8707_v54, %v6661_v9  ;;  %v6703_v59 = vmul.f32 %v8711_v63, %v6444_v16  ;;  %v10739_v47 = vpop.xlane.xlu0 %6445  ;;  %vm6708_vm2 = vweird.f32 %v8711_v63 }
 0xb19   :  { %v6670_v4 = vsel %vm6667_vm1, %v6669_v57, %v6665_v6  ;;  %v6673_v22 = vmul.f32 %v8713_v21, %v6440_v11  ;;  %v10741_v43 = vpop.xlane.xlu1 %6435  ;;  %8716 = vrcp.f32 %v10739_v47  ;;  %vm6678_vm3 = vweird.f32 %v8713_v21  ;;  %vm6709_vm5 = vmor %vm6707_vm4, %vm6708_vm2 }
 0xb1a   :  { %v6671_v46 = vmul.f32 %v10645_v40, %v6670_v4  ;;  %v6704_v10 = vsub.f32 1.0, %v6703_v59  ;;  %8718 = vrcp.f32 %v10741_v43  ;;  %vm6679_vm8 = vmor %vm6677_vm6, %vm6678_vm3  ;;  %v6728_v11 = vand.u32 2147483648, %v10739_v47 }
 0xb1b   :  { %v6674_v28 = vsub.f32 1.0, %v6673_v22  ;;  %v6653_v42 = vand.u32 2147483648, %v10741_v43  ;;  %v6726_v5 = vand.u32 2147483647, %v10739_v47  ;;  %vm6722_vm12 = vweird.f32 %v10739_v47 }
 0xb1c   :  { %v10746_v41 = vpop.eup %8714  ;;  %6969 = vst [vmem:[#allocation8 + $0x60] sm:$0xff] %v6671_v46  ;;  %v6705_v20 = vmul.f32 %v8711_v63, %v6704_v10  ;;  %vm6647_vm13 = vweird.f32 %v10741_v43 }
 0xb1d   :  { %v6675_v0 = vmul.f32 %v8713_v21, %v6674_v28  ;;  %6475 = vadd.xlane.f32.xlu0 %v10746_v41  ;;  %v6654_v9 = vor.u32 1.1754944e-38, %v6653_v42  ;;  %vm6727_vm0 = vcmp.eq.f32.partialorder %v6726_v5, 8.507059e+37 }
 0xb1e   :  { %v6706_v39 = vadd.f32 %v8711_v63, %v6705_v20 }
 0xb1f   :  { %v8717_v40 = vpop.eup %8716  ;;  %v6676_v35 = vadd.f32 %v8713_v21, %v6675_v0 }
 0xb20   :  { %v8719_v24 = vpop.eup %8718  ;;  %v6710_v8 = vsel %vm6709_vm5, %v8711_v63, %v6706_v39  ;;  %v6718_v2 = vmul.f32 %v8717_v40, %v10739_v47  ;;  %vm6723_vm10 = vweird.f32 %v8717_v40 }
 0xb21   :  { %v6715_v18 = vsel %vm6712_vm7, %v6714_v27, %v6710_v8  ;;  %v6680_v36 = vsel %vm6679_vm8, %v8713_v21, %v6676_v35  ;;  %v6643_v30 = vmul.f32 %v8719_v24, %v10741_v43  ;;  %v6442_v26 = vpop.xlane.xlu1 %6441  ;;  %vm6648_vm11 = vweird.f32 %v8719_v24  ;;  %vm6724_vm14 = vmor %vm6722_vm12, %vm6723_vm10 }
 0xb22   :  { %v6716_v56 = vmul.f32 %v10654_v61, %v6715_v18  ;;  %v6685_v55 = vsel %vm6682_vm9, %v6684_v62, %v6680_v36  ;;  %v6719_v54 = vsub.f32 1.0, %v6718_v2  ;;  %8720 = vrcp.f32 %v6442_v26  ;;  %vm6649_vm15 = vmor %vm6647_vm13, %vm6648_vm11 }
 0xb23   :  { %v6686_v38 = vmul.f32 %v10652_v52, %v6685_v55  ;;  %v6644_v16 = vsub.f32 1.0, %v6643_v30  ;;  %v6651_v61 = vand.u32 2147483647, %v10741_v43  ;;  %v6729_v52 = vor.u32 1.1754944e-38, %v6728_v11 }
 0xb24   :  { %6972 = vst [vmem:[#allocation8 + $0x78] sm:$0xff] %v6716_v56  ;;  %v6720_v12 = vmul.f32 %v8717_v40, %v6719_v54  ;;  %v6698_v10 = vand.u32 2147483648, %v6442_v26  ;;  %v6696_v28 = vand.u32 2147483647, %v6442_v26  ;;  %vm6692_vm3 = vweird.f32 %v6442_v26 }
 0xb25   :  { %6970 = vst [vmem:[#allocation8 + $0x68] sm:$0xff] %v6686_v38  ;;  %v6645_v50 = vmul.f32 %v8719_v24, %v6644_v16  ;;  %vm6652_vm1 = vcmp.eq.f32.partialorder %v6651_v61, 8.507059e+37 }
 0xb26   :  { %v6721_v1 = vadd.f32 %v8717_v40, %v6720_v12  ;;  %v6699_v25 = vor.u32 1.1754944e-38, %v6698_v10  ;;  %vm6697_vm5 = vcmp.eq.f32.partialorder %v6696_v28, 8.507059e+37 }
 0xb27   :  { %v6646_v48 = vadd.f32 %v8719_v24, %v6645_v50  ;;  %v6450_v57 = vpop.xlane.xlu2 %6449 }
 0xb28   :  { %v8721_v15 = vpop.eup %8720  ;;  %v6725_v63 = vsel %vm6724_vm14, %v8717_v40, %v6721_v1  ;;  %8722 = vrcp.f32 %v6450_v57  ;;  %v6756_v62 = vand.u32 2147483647, %v6450_v57  ;;  %vm6752_vm7 = vweird.f32 %v6450_v57 }
 0xb29   :  { %v6650_v21 = vsel %vm6649_vm15, %v8719_v24, %v6646_v48  ;;  %v6730_v6 = vsel %vm6727_vm0, %v6729_v52, %v6725_v63  ;;  %v6688_v59 = vmul.f32 %v8721_v15, %v6442_v26  ;;  %v6448_v4 = vpop.xlane.xlu1 %6447  ;;  %vm6693_vm2 = vweird.f32 %v8721_v15 }
 0xb2a   :  { %v6655_v22 = vsel %vm6652_vm1, %v6654_v9, %v6650_v21  ;;  %v6731_v46 = vmul.f32 %v10662_v45, %v6730_v6  ;;  %8724 = vrcp.f32 %v6448_v4  ;;  %vm6694_vm4 = vmor %vm6692_vm3, %vm6693_vm2  ;;  %v6758_v24 = vand.u32 2147483648, %v6450_v57 }
 0xb2b   :  { %v6656_v47 = vmul.f32 %v10664_v34, %v6655_v22  ;;  %v6689_v43 = vsub.f32 1.0, %v6688_v59  ;;  %v6743_v18 = vand.u32 2147483648, %v6448_v4  ;;  %v6741_v56 = vand.u32 2147483647, %v6448_v4 }
 0xb2c   :  { %6973 = vst [vmem:[#allocation8 + $0x80] sm:$0xff] %v6731_v46  ;;  %v6759_v55 = vor.u32 1.1754944e-38, %v6758_v24  ;;  %vm6737_vm10 = vweird.f32 %v6448_v4  ;;  %vm6757_vm11 = vcmp.eq.f32.partialorder %v6756_v62, 8.507059e+37 }
 0xb2d   :  { %6968 = vst [vmem:[#allocation8 + $0x58] sm:$0xff] %v6656_v47  ;;  %v6690_v53 = vmul.f32 %v8721_v15, %v6689_v43  ;;  %v6744_v42 = vor.u32 1.1754944e-38, %v6743_v18  ;;  %vm6742_vm13 = vcmp.eq.f32.partialorder %v6741_v56, 8.507059e+37 }
 0xb2e   :  { %v8723_v17 = vpop.eup %8722 }
 0xb2f   :  { %v6691_v20 = vadd.f32 %v8721_v15, %v6690_v53  ;;  %v6452_v0 = vpop.xlane.xlu0 %6451  ;;  %v6748_v45 = vmul.f32 %v8723_v17, %v6450_v57  ;;  %vm6753_vm6 = vweird.f32 %v8723_v17 }
 0xb30   :  { %8726 = vrcp.f32 %v6452_v0  ;;  %v8725_v39 = vpop.eup %8724  ;;  %vm6754_vm9 = vmor %vm6752_vm7, %vm6753_vm6  ;;  %v6773_v61 = vand.u32 2147483648, %v6452_v0  ;;  %v6771_v52 = vand.u32 2147483647, %v6452_v0  ;;  %vm6767_vm15 = vweird.f32 %v6452_v0 }
 0xb31   :  { %v6695_v23 = vsel %vm6694_vm4, %v8721_v15, %v6691_v20  ;;  %v6749_v27 = vsub.f32 1.0, %v6748_v45  ;;  %v6733_v35 = vmul.f32 %v8725_v39, %v6448_v4  ;;  %vm6738_vm8 = vweird.f32 %v8725_v39 }
 0xb32   :  { %v6700_v34 = vsel %vm6697_vm5, %v6699_v25, %v6695_v23  ;;  %vm6739_vm12 = vmor %vm6737_vm10, %vm6738_vm8  ;;  %v6774_v57 = vor.u32 1.1754944e-38, %v6773_v61  ;;  %vm6772_vm1 = vcmp.eq.f32.partialorder %v6771_v52, 8.507059e+37 }
 0xb33   :  { %v6701_v40 = vmul.f32 %v10671_v44, %v6700_v34  ;;  %v6750_v8 = vmul.f32 %v8723_v17, %v6749_v27  ;;  %v6734_v2 = vsub.f32 1.0, %v6733_v35 }
 0xb35   :  { %6971 = vst [vmem:[#allocation8 + $0x70] sm:$0xff] %v6701_v40  ;;  %v6751_v30 = vadd.f32 %v8723_v17, %v6750_v8  ;;  %v6735_v26 = vmul.f32 %v8725_v39, %v6734_v2 }
 0xb36   :  { %v8727_v36 = vpop.eup %8726 }
 0xb37   :  { %v6763_v54 = vmul.f32 %v8727_v36, %v6452_v0  ;;  %v6454_v44 = vpop.xlane.xlu1 %6453  ;;  %v6755_v38 = vsel %vm6754_vm9, %v8723_v17, %v6751_v30  ;;  %v6736_v16 = vadd.f32 %v8725_v39, %v6735_v26  ;;  %vm6768_vm14 = vweird.f32 %v8727_v36 }
 0xb38   :  { %8728 = vrcp.f32 %v6454_v44  ;;  %v6760_v11 = vsel %vm6757_vm11, %v6759_v55, %v6755_v38  ;;  %vm6769_vm0 = vmor %vm6767_vm15, %vm6768_vm14  ;;  %v6788_v46 = vand.u32 2147483648, %v6454_v44  ;;  %vm6782_vm3 = vweird.f32 %v6454_v44 }
 0xb39   :  { %v6764_v12 = vsub.f32 1.0, %v6763_v54  ;;  %v6761_v5 = vmul.f32 %v10676_v3, %v6760_v11  ;;  %v6740_v50 = vsel %vm6739_vm12, %v8725_v39, %v6736_v16 }
 0xb3a   :  { %v6745_v1 = vsel %vm6742_vm13, %v6744_v42, %v6740_v50  ;;  %v6789_v53 = vor.u32 1.1754944e-38, %v6788_v46 }
 0xb3b   :  { %v6765_v48 = vmul.f32 %v8727_v36, %v6764_v12  ;;  %6975 = vst [vmem:[#allocation8 + $0x90] sm:$0xff] %v6761_v5  ;;  %v6746_v15 = vmul.f32 %v10678_v29, %v6745_v1  ;;  %v6786_v29 = vand.u32 2147483647, %v6454_v44 }
 0xb3d   :  { %v6766_v9 = vadd.f32 %v8727_v36, %v6765_v48  ;;  %6974 = vst [vmem:[#allocation8 + $0x88] sm:$0xff] %v6746_v15  ;;  %vm6787_vm5 = vcmp.eq.f32.partialorder %v6786_v29, 8.507059e+37 }
 0xb3e   :  { %v8729_v63 = vpop.eup %8728 }
 0xb3f   :  { %v6770_v21 = vsel %vm6769_vm0, %v8727_v36, %v6766_v9  ;;  %v6778_v6 = vmul.f32 %v8729_v63, %v6454_v44  ;;  %v6456_v3 = vpop.xlane.xlu2 %6455  ;;  %vm6783_vm2 = vweird.f32 %v8729_v63 }
 0xb40   :  { %v6775_v59 = vsel %vm6772_vm1, %v6774_v57, %v6770_v21  ;;  %8730 = vrcp.f32 %v6456_v3  ;;  %vm6784_vm4 = vmor %vm6782_vm3, %vm6783_vm2  ;;  %v6803_v23 = vand.u32 2147483648, %v6456_v3  ;;  %v6801_v39 = vand.u32 2147483647, %v6456_v3 }
 0xb41   :  { %v6776_v4 = vmul.f32 %v10684_v60, %v6775_v59  ;;  %v6779_v22 = vsub.f32 1.0, %v6778_v6  ;;  %vm6797_vm7 = vweird.f32 %v6456_v3 }
 0xb42   :  { %v6804_v27 = vor.u32 1.1754944e-38, %v6803_v23  ;;  %vm6802_vm9 = vcmp.eq.f32.partialorder %v6801_v39, 8.507059e+37 }
 0xb43   :  { %6976 = vst [vmem:[#allocation8 + $0x98] sm:$0xff] %v6776_v4  ;;  %v6780_v47 = vmul.f32 %v8729_v63, %v6779_v22 }
 0xb45   :  { %v6781_v43 = vadd.f32 %v8729_v63, %v6780_v47 }
 0xb46   :  { %v8731_v10 = vpop.eup %8730 }
 0xb47   :  { %v6785_v28 = vsel %vm6784_vm4, %v8729_v63, %v6781_v43  ;;  %v6793_v20 = vmul.f32 %v8731_v10, %v6456_v3  ;;  %v6458_v17 = vpop.xlane.xlu0 %6457  ;;  %vm6798_vm6 = vweird.f32 %v8731_v10 }
 0xb48   :  { %v6790_v25 = vsel %vm6787_vm5, %v6789_v53, %v6785_v28  ;;  %8732 = vrcp.f32 %v6458_v17  ;;  %vm6799_vm8 = vmor %vm6797_vm7, %vm6798_vm6  ;;  %v6818_v18 = vand.u32 2147483648, %v6458_v17  ;;  %v6816_v30 = vand.u32 2147483647, %v6458_v17 }
 0xb49   :  { %v6791_v0 = vmul.f32 %v10689_v49, %v6790_v25  ;;  %v6794_v60 = vsub.f32 1.0, %v6793_v20  ;;  %vm6812_vm11 = vweird.f32 %v6458_v17 }
 0xb4a   :  { %v6819_v55 = vor.u32 1.1754944e-38, %v6818_v18  ;;  %vm6817_vm13 = vcmp.eq.f32.partialorder %v6816_v30, 8.507059e+37 }
 0xb4b   :  { %6977 = vst [vmem:[#allocation8 + $0xa0] sm:$0xff] %v6791_v0  ;;  %v6795_v45 = vmul.f32 %v8731_v10, %v6794_v60 }
 0xb4d   :  { %v6796_v34 = vadd.f32 %v8731_v10, %v6795_v45 }
 0xb4e   :  { %v8733_v40 = vpop.eup %8732 }
 0xb4f   :  { %v6800_v35 = vsel %vm6799_vm8, %v8731_v10, %v6796_v34  ;;  %v6808_v24 = vmul.f32 %v8733_v40, %v6458_v17  ;;  %v6460_v8 = vpop.xlane.xlu1 %6459  ;;  %vm6813_vm10 = vweird.f32 %v8733_v40 }
 0xb50   :  { %v6805_v62 = vsel %vm6802_vm9, %v6804_v27, %v6800_v35  ;;  %8734 = vrcp.f32 %v6460_v8  ;;  %vm6814_vm12 = vmor %vm6812_vm11, %vm6813_vm10  ;;  %v6833_v42 = vand.u32 2147483648, %v6460_v8  ;;  %v6831_v5 = vand.u32 2147483647, %v6460_v8 }
 0xb51   :  { %v6806_v2 = vmul.f32 %v10694_v32, %v6805_v62  ;;  %v6809_v49 = vsub.f32 1.0, %v6808_v24  ;;  %vm6827_vm15 = vweird.f32 %v6460_v8 }
 0xb52   :  { %v6834_v1 = vor.u32 1.1754944e-38, %v6833_v42  ;;  %vm6832_vm1 = vcmp.eq.f32.partialorder %v6831_v5, 8.507059e+37 }
 0xb53   :  { %6978 = vst [vmem:[#allocation8 + $0xa8] sm:$0xff] %v6806_v2  ;;  %v6810_v36 = vmul.f32 %v8733_v40, %v6809_v49 }
 0xb55   :  { %v6811_v26 = vadd.f32 %v8733_v40, %v6810_v36 }
 0xb56   :  { %v8735_v56 = vpop.eup %8734 }
 0xb57   :  { %v6815_v54 = vsel %vm6814_vm12, %v8733_v40, %v6811_v26  ;;  %v6823_v44 = vmul.f32 %v8735_v56, %v6460_v8  ;;  %v6462_v38 = vpop.xlane.xlu2 %6461  ;;  %vm6828_vm14 = vweird.f32 %v8735_v56 }
 0xb58   :  { %v6820_v16 = vsel %vm6817_vm13, %v6819_v55, %v6815_v54  ;;  %8736 = vrcp.f32 %v6462_v38  ;;  %vm6829_vm0 = vmor %vm6827_vm15, %vm6828_vm14  ;;  %v6848_v57 = vand.u32 2147483648, %v6462_v38  ;;  %v6846_v6 = vand.u32 2147483647, %v6462_v38 }
 0xb59   :  { %v6821_v11 = vmul.f32 %v10699_v19, %v6820_v16  ;;  %v6824_v32 = vsub.f32 1.0, %v6823_v44  ;;  %vm6842_vm3 = vweird.f32 %v6462_v38 }
 0xb5a   :  { %v6849_v4 = vor.u32 1.1754944e-38, %v6848_v57  ;;  %vm6847_vm5 = vcmp.eq.f32.partialorder %v6846_v6, 8.507059e+37 }
 0xb5b   :  { %6979 = vst [vmem:[#allocation8 + $0xb0] sm:$0xff] %v6821_v11  ;;  %v6825_v12 = vmul.f32 %v8735_v56, %v6824_v32 }
 0xb5d   :  { %v6826_v50 = vadd.f32 %v8735_v56, %v6825_v12 }
 0xb5e   :  { %v8737_v61 = vpop.eup %8736 }
 0xb5f   :  { %v6830_v48 = vsel %vm6829_vm0, %v8735_v56, %v6826_v50  ;;  %v6838_v52 = vmul.f32 %v8737_v61, %v6462_v38  ;;  %v6464_v15 = vpop.xlane.xlu0 %6463  ;;  %vm6843_vm2 = vweird.f32 %v8737_v61 }
 0xb60   :  { %v6835_v9 = vsel %vm6832_vm1, %v6834_v1, %v6830_v48  ;;  %8738 = vrcp.f32 %v6464_v15  ;;  %vm6844_vm4 = vmor %vm6842_vm3, %vm6843_vm2  ;;  %v6863_v10 = vand.u32 2147483648, %v6464_v15  ;;  %v6861_v28 = vand.u32 2147483647, %v6464_v15 }
 0xb61   :  { %v6836_v63 = vmul.f32 %v10704_v7, %v6835_v9  ;;  %v6839_v19 = vsub.f32 1.0, %v6838_v52  ;;  %vm6857_vm7 = vweird.f32 %v6464_v15 }
 0xb62   :  { %v6864_v25 = vor.u32 1.1754944e-38, %v6863_v10  ;;  %vm6862_vm9 = vcmp.eq.f32.partialorder %v6861_v28, 8.507059e+37 }
 0xb63   :  { %6980 = vst [vmem:[#allocation8 + $0xb8] sm:$0xff] %v6836_v63  ;;  %v6840_v21 = vmul.f32 %v8737_v61, %v6839_v19 }
 0xb65   :  { %v6841_v3 = vadd.f32 %v8737_v61, %v6840_v21 }
 0xb66   :  { %v8739_v59 = vpop.eup %8738 }
 0xb67   :  { %v6845_v22 = vsel %vm6844_vm4, %v8737_v61, %v6841_v3  ;;  %v6853_v46 = vmul.f32 %v8739_v59, %v6464_v15  ;;  %v6466_v47 = vpop.xlane.xlu1 %6465  ;;  %vm6858_vm6 = vweird.f32 %v8739_v59 }
 0xb68   :  { %v6850_v29 = vsel %vm6847_vm5, %v6849_v4, %v6845_v22  ;;  %8740 = vrcp.f32 %v6466_v47  ;;  %vm6859_vm8 = vmor %vm6857_vm7, %vm6858_vm6  ;;  %v6878_v34 = vand.u32 2147483648, %v6466_v47  ;;  %v6876_v27 = vand.u32 2147483647, %v6466_v47 }
 0xb69   :  { %v6851_v43 = vmul.f32 %v10709_v37, %v6850_v29  ;;  %v6854_v7 = vsub.f32 1.0, %v6853_v46  ;;  %vm6872_vm11 = vweird.f32 %v6466_v47 }
 0xb6a   :  { %v6879_v8 = vor.u32 1.1754944e-38, %v6878_v34  ;;  %vm6877_vm13 = vcmp.eq.f32.partialorder %v6876_v27, 8.507059e+37 }
 0xb6b   :  { %6981 = vst [vmem:[#allocation8 + $0xc0] sm:$0xff] %v6851_v43  ;;  %v6855_v53 = vmul.f32 %v8739_v59, %v6854_v7 }
 0xb6d   :  { %v6856_v20 = vadd.f32 %v8739_v59, %v6855_v53 }
 0xb6e   :  { %v8741_v17 = vpop.eup %8740 }
 0xb6f   :  { %v6468_v0 = vpop.xlane.xlu2 %6467  ;;  %v6860_v60 = vsel %vm6859_vm8, %v8739_v59, %v6856_v20  ;;  %v6868_v23 = vmul.f32 %v8741_v17, %v6466_v47  ;;  %vm6873_vm10 = vweird.f32 %v8741_v17 }
 0xb70   :  { %8742 = vrcp.f32 %v6468_v0  ;;  %v6865_v45 = vsel %vm6862_vm9, %v6864_v25, %v6860_v60  ;;  %vm6874_vm12 = vmor %vm6872_vm11, %vm6873_vm10  ;;  %v6893_v30 = vand.u32 2147483648, %v6468_v0  ;;  %v6891_v56 = vand.u32 2147483647, %v6468_v0 }
 0xb71   :  { %v6866_v39 = vmul.f32 %v10714_v14, %v6865_v45  ;;  %v6869_v37 = vsub.f32 1.0, %v6868_v23  ;;  %vm6887_vm15 = vweird.f32 %v6468_v0 }
 0xb72   :  { %v6894_v44 = vor.u32 1.1754944e-38, %v6893_v30  ;;  %vm6892_vm1 = vcmp.eq.f32.partialorder %v6891_v56, 8.507059e+37 }
 0xb73   :  { %6982 = vst [vmem:[#allocation8 + $0xc8] sm:$0xff] %v6866_v39  ;;  %v6870_v40 = vmul.f32 %v8741_v17, %v6869_v37 }
 0xb75   :  { %v6871_v24 = vadd.f32 %v8741_v17, %v6870_v40 }
 0xb76   :  { %v8743_v35 = vpop.eup %8742 }
 0xb77   :  { %v6883_v62 = vmul.f32 %v8743_v35, %v6468_v0  ;;  %v6470_v2 = vpop.xlane.xlu0 %6469  ;;  %v6875_v49 = vsel %vm6874_vm12, %v8741_v17, %v6871_v24  ;;  %vm6888_vm14 = vweird.f32 %v8743_v35 }
 0xb78   :  { %8744 = vrcp.f32 %v6470_v2  ;;  %v6880_v18 = vsel %vm6877_vm13, %v6879_v8, %v6875_v49  ;;  %vm6889_vm0 = vmor %vm6887_vm15, %vm6888_vm14  ;;  %v6906_v50 = vand.u32 2147483647, %v6470_v2  ;;  %vm6902_vm3 = vweird.f32 %v6470_v2 }
 0xb79   :  { %v6884_v36 = vsub.f32 1.0, %v6883_v62  ;;  %v6881_v14 = vmul.f32 %v10719_v13, %v6880_v18  ;;  %v6908_v13 = vand.u32 2147483648, %v6470_v2 }
 0xb7a   :  { %vm6907_vm5 = vcmp.eq.f32.partialorder %v6906_v50, 8.507059e+37 }
 0xb7b   :  { %v6885_v26 = vmul.f32 %v8743_v35, %v6884_v36  ;;  %6983 = vst [vmem:[#allocation8 + $0xd0] sm:$0xff] %v6881_v14  ;;  %v6909_v48 = vor.u32 1.1754944e-38, %v6908_v13 }
 0xb7d   :  { %v6886_v55 = vadd.f32 %v8743_v35, %v6885_v26 }
 0xb7e   :  { %v8745_v54 = vpop.eup %8744 }
 0xb7f   :  { %v6890_v38 = vsel %vm6889_vm0, %v8743_v35, %v6886_v55  ;;  %v6898_v16 = vmul.f32 %v8745_v54, %v6470_v2  ;;  %v6472_v11 = vpop.xlane.xlu1 %6471  ;;  %vm6903_vm2 = vweird.f32 %v8745_v54 }
 0xb80   :  { %v6895_v32 = vsel %vm6892_vm1, %v6894_v44, %v6890_v38  ;;  %8746 = vrcp.f32 %v6472_v11  ;;  %vm6904_vm4 = vmor %vm6902_vm3, %vm6903_vm2  ;;  %v6921_v6 = vand.u32 2147483647, %v6472_v11  ;;  %vm6917_vm7 = vweird.f32 %v6472_v11 }
 0xb81   :  { %v6896_v42 = vmul.f32 %v10724_v31, %v6895_v32  ;;  %v6899_v12 = vsub.f32 1.0, %v6898_v16  ;;  %v6923_v31 = vand.u32 2147483648, %v6472_v11 }
 0xb82   :  { %vm6922_vm9 = vcmp.eq.f32.partialorder %v6921_v6, 8.507059e+37 }
 0xb83   :  { %6984 = vst [vmem:[#allocation8 + $0xd8] sm:$0xff] %v6896_v42  ;;  %v6900_v5 = vmul.f32 %v8745_v54, %v6899_v12  ;;  %v6924_v59 = vor.u32 1.1754944e-38, %v6923_v31 }
 0xb85   :  { %v6901_v61 = vadd.f32 %v8745_v54, %v6900_v5 }
 0xb86   :  { %v8747_v1 = vpop.eup %8746 }
 0xb87   :  { %v6905_v52 = vsel %vm6904_vm4, %v8745_v54, %v6901_v61  ;;  %v6913_v15 = vmul.f32 %v8747_v1, %v6472_v11  ;;  %v6474_v63 = vpop.xlane.xlu2 %6473  ;;  %vm6918_vm6 = vweird.f32 %v8747_v1 }
 0xb88   :  { %v6910_v9 = vsel %vm6907_vm5, %v6909_v48, %v6905_v52  ;;  %8748 = vrcp.f32 %v6474_v63  ;;  %vm6919_vm8 = vmor %vm6917_vm7, %vm6918_vm6  ;;  %v6938_v7 = vand.u32 2147483648, %v6474_v63  ;;  %v6936_v53 = vand.u32 2147483647, %v6474_v63 }
 0xb89   :  { %v6911_v19 = vmul.f32 %v10728_v33, %v6910_v9  ;;  %v6914_v57 = vsub.f32 1.0, %v6913_v15  ;;  %vm6932_vm11 = vweird.f32 %v6474_v63 }
 0xb8a   :  { %v6939_v17 = vor.u32 1.1754944e-38, %v6938_v7  ;;  %vm6937_vm13 = vcmp.eq.f32.partialorder %v6936_v53, 8.507059e+37 }
 0xb8b   :  { %6985 = vst [vmem:[#allocation8 + $0xe0] sm:$0xff] %v6911_v19  ;;  %v6915_v21 = vmul.f32 %v8747_v1, %v6914_v57 }
 0xb8d   :  { %v6916_v3 = vadd.f32 %v8747_v1, %v6915_v21 }
 0xb8e   :  { %v8749_v4 = vpop.eup %8748 }
 0xb8f   :  { %v6920_v22 = vsel %vm6919_vm8, %v8747_v1, %v6916_v3  ;;  %v6928_v47 = vmul.f32 %v8749_v4, %v6474_v63  ;;  %vm6933_vm10 = vweird.f32 %v8749_v4 }
 0xb90   :  { %v6925_v46 = vsel %vm6922_vm9, %v6924_v59, %v6920_v22  ;;  %v6476_v29 = vpop.xlane.xlu0 %6475  ;;  %vm6934_vm12 = vmor %vm6932_vm11, %vm6933_vm10 }
 0xb91   :  { %v6926_v43 = vmul.f32 %v10732_v58, %v6925_v46  ;;  %8750 = vrcp.f32 %v6476_v29  ;;  %v6929_v33 = vsub.f32 1.0, %v6928_v47  ;;  %v6953_v58 = vand.u32 2147483648, %v6476_v29 }
 0xb92   :  { %v6951_v37 = vand.u32 2147483647, %v6476_v29  ;;  %vm6947_vm15 = vweird.f32 %v6476_v29 }
 0xb93   :  { %6986 = vst [vmem:[#allocation8 + $0xe8] sm:$0xff] %v6926_v43  ;;  %v6930_v10 = vmul.f32 %v8749_v4, %v6929_v33  ;;  %v6954_v40 = vor.u32 1.1754944e-38, %v6953_v58 }
 0xb94   :  { %vm6952_vm1 = vcmp.eq.f32.partialorder %v6951_v37, 8.507059e+37 }
 0xb95   :  { %v6931_v28 = vadd.f32 %v8749_v4, %v6930_v10 }
 0xb97   :  { %v8751_v20 = vpop.eup %8750  ;;  %v6935_v25 = vsel %vm6934_vm12, %v8749_v4, %v6931_v28 }
 0xb98   :  { %v6943_v0 = vmul.f32 %v8751_v20, %v6476_v29  ;;  %v6940_v60 = vsel %vm6937_vm13, %v6939_v17, %v6935_v25  ;;  %vm6948_vm14 = vweird.f32 %v8751_v20 }
 0xb99   :  { %v6941_v23 = vmul.f32 %v10736_v51, %v6940_v60  ;;  %vm6949_vm0 = vmor %vm6947_vm15, %vm6948_vm14 }
 0xb9a   :  { %v6944_v45 = vsub.f32 1.0, %v6943_v0 }
 0xb9b   :  { %6987 = vst [vmem:[#allocation8 + $0xf0] sm:$0xff] %v6941_v23 }
 0xb9c   :  { %v6945_v39 = vmul.f32 %v8751_v20, %v6944_v45 }
 0xb9e   :  { %v6946_v34 = vadd.f32 %v8751_v20, %v6945_v39 }
 0xba0   :  { %v6950_v27 = vsel %vm6949_vm0, %v8751_v20, %v6946_v34 }
 0xba1   :  { %v6955_v35 = vsel %vm6952_vm1, %v6954_v40, %v6950_v27 }
 0xba2   :  { %v6956_v51 = vmul.f32 %v10746_v41, %v6955_v35 }
 0xba4   :  { %6988 = vst [vmem:[#allocation8 + $0xf8] sm:$0xff] %v6956_v51 }
 0xba5   :  { %7001 = dma.vmem_to_hbm [thread:$0]  %s6994_s14, 4096, %s6996_s17, [#allocation4], %s8864_s18, %s8864_s18, %s8865_s2  }
 0xba6   :  { %8854 = dma.done.wait [#allocation4], 4096  }
 0xba7   :  { %8855 = vsyncadd [#allocation4], 4294963200 }
 0xba8   :  { %7006 = vsyncpa [#allocation3], 1 }
 0xba9   :  { %7007 = vsyncpa [#allocation6], 1 }
 0xbaa   :  { %7008 = vsyncpa [#allocation4], 1 }

</bundles_post_ra>
